<compile_context>
chip_gen: v7x
topology: tpu7x:2x2x1
jax: 0.10.0
libtpu: 0.0.40
codegen_flags: <defaults>
</compile_context>

<pallas_src>
import jax
import jax.numpy as jnp
from jax.experimental import pallas as pl
from jax.experimental.pallas import tpu as pltpu

BN_EPS = 1e-5


# --------------------------------------------------------------------------
# Geometry / glue: pool-phase-major im2col, weight packing, BN folding
# --------------------------------------------------------------------------
def pool_geometry(H, W, kh, kw):
    PH = (H - kh + 1) // 3          # MaxPool2d(3), floor mode
    PW = (W - kw + 1) // 3
    P = PH * PW
    NPAD = -(-P // 256) * 256       # lane-pad to a multiple of 256 (MXU pass)
    return PH, PW, P, NPAD


def build_im2col(x, kh, kw, npad):
    """x: (B, C, H, W) -> (B, kh*kw*C, 9*npad) bf16.

    Lane block j = 3*l + k holds, at lane g*PW + w', the im2col column of the
    conv output at position (3g+l, 3w'+k) — i.e. the member of pool cell
    (g, w') with pool phase (l, k).  Rows are tap-major / channel-minor:
    row = (di*kw + dj)*C + c.  The 3x3 maxpool is then a max over the 9 lane
    blocks, done inside the kernel.
    """
    B, C, H, W = x.shape
    PH, PW, P, _ = pool_geometry(H, W, kh, kw)
    xb = x.astype(jnp.bfloat16)
    blocks = []
    for l in range(3):
        for k in range(3):
            taps = [
                xb[:, :, l + di: l + di + 3 * PH - 2: 3,
                       k + dj: k + dj + 3 * PW - 2: 3]
                for di in range(kh) for dj in range(kw)
            ]
            blk = jnp.stack(taps, axis=1).reshape(B, kh * kw * C, P)
            blocks.append(jnp.pad(blk, ((0, 0), (0, 0), (0, npad - P))))
    return jnp.concatenate(blocks, axis=2)


def pack_weight(w, c_out_pad, c_in_pad):
    """(C_out, C_in, kh, kw) -> (c_out_pad, kh*kw*c_in_pad) bf16, tap-major rows."""
    C_out, C_in, kh, kw = w.shape
    w = jnp.pad(w, ((0, c_out_pad - C_out), (0, c_in_pad - C_in), (0, 0), (0, 0)))
    wp = w.transpose(0, 2, 3, 1).reshape(c_out_pad, kh * kw * c_in_pad)
    return wp.astype(jnp.bfloat16)


def fold_bn(gamma, beta, mean, var, conv_bias, c_out_pad, eps=BN_EPS):
    """BN(maxpool(conv + b)) == s * maxpool(conv) + (beta + s*(b - mean))."""
    s = gamma / jnp.sqrt(var + eps)
    t = beta + s * (conv_bias - mean)
    pad = c_out_pad - s.shape[0]
    s = jnp.pad(s, (0, pad))
    t = jnp.pad(t, (0, pad))
    return (s.reshape(-1, 1).astype(jnp.float32),
            t.reshape(-1, 1).astype(jnp.float32))


# --------------------------------------------------------------------------
# Kernels
# --------------------------------------------------------------------------
def _pool_group_max(x_ref, w_ref, group, npad):
    """Running max over `group` pool-phase blocks: group dots of N = npad."""
    w = w_ref[...]
    m = jnp.dot(w, x_ref[0, :, 0:npad], preferred_element_type=jnp.float32)
    for t in range(1, group):
        r = jnp.dot(w, x_ref[0, :, t * npad:(t + 1) * npad],
                    preferred_element_type=jnp.float32)
        m = jnp.maximum(m, r)
    return m


def _make_conv_pool_kernel(group, npad):
    """Conv2d -> MaxPool2d(3) -> folded BN(eval) -> ReLU, lane-dense bf16 slab out."""

    def kernel(x_ref, w_ref, s_ref, t_ref, o_ref, acc_ref):
        j = pl.program_id(1)
        m = _pool_group_max(x_ref, w_ref, group, npad)

        @pl.when(j == 0)
        def _():
            acc_ref[...] = m

        @pl.when(j != 0)
        def _():
            acc_ref[...] = jnp.maximum(acc_ref[...], m)

        @pl.when(j == pl.num_programs(1) - 1)
        def _():
            y = jnp.maximum(acc_ref[...] * s_ref[...] + t_ref[...], 0.0)
            o_ref[0] = y.astype(o_ref.dtype)          # one (C_out, NPAD) slab

    return kernel


def _make_conv_pool_attn_kernel(group, npad):
    """Layer-2 kernel with the attention head fused into the epilogue."""

    def kernel(x_ref, w_ref, s_ref, t_ref, wc_ref, cb_ref, wl_ref, lb_ref,
               bns_ref, bnt_ref, o_ref, acc_ref):
        j = pl.program_id(1)
        m = _pool_group_max(x_ref, w_ref, group, npad)

        @pl.when(j == 0)
        def _():
            acc_ref[...] = m

        @pl.when(j != 0)
        def _():
            acc_ref[...] = jnp.maximum(acc_ref[...], m)

        @pl.when(j == pl.num_programs(1) - 1)
        def _():
            # f: (C_out, NPAD) feature map, channels x flattened 21x21 spatial
            f = jnp.maximum(acc_ref[...] * s_ref[...] + t_ref[...], 0.0)
            # Conv1d(441, 1, 1): att[c] = sum_p wc[p] * f[c, p] + cb
            att = jnp.sum(f * wc_ref[...], axis=1, keepdims=True) + cb_ref[...]
            # Softmax over the C_out channels
            att = att - jnp.max(att, axis=0, keepdims=True)
            e = jnp.exp(att)
            a = e / jnp.sum(e, axis=0, keepdims=True)              # (C_out, 1)
            # bmm + Linear, reassociated:  y = sum_c a[c] * (f @ wl)[c, :]
            g = jnp.dot(f, wl_ref[...], preferred_element_type=jnp.float32)
            y = jnp.sum(g * a, axis=0, keepdims=True) + lb_ref[...]
            # BatchNorm1d(eval)
            o_ref[0] = y * bns_ref[...] + bnt_ref[...]

    return kernel


# --------------------------------------------------------------------------
# pallas_call wrappers
# --------------------------------------------------------------------------
def conv_pool_bn_relu(rhs, w, s, t, *, npad, group, c_out):
    B, K, _ = rhs.shape
    n_steps = 9 // group
    ce = pl.CostEstimate(
        flops=2 * B * 9 * c_out * K * npad,
        transcendentals=0,
        bytes_accessed=B * K * 9 * npad * 2 + B * c_out * npad * 2 + c_out * K * 2,
    )
    return pl.pallas_call(
        _make_conv_pool_kernel(group, npad),
        out_shape=jax.ShapeDtypeStruct((B, c_out, npad), jnp.bfloat16),
        grid=(B, n_steps),
        in_specs=[
            pl.BlockSpec((1, K, group * npad), lambda b, j: (b, 0, j)),
            pl.BlockSpec((c_out, K), lambda b, j: (0, 0)),
            pl.BlockSpec((c_out, 1), lambda b, j: (0, 0)),
            pl.BlockSpec((c_out, 1), lambda b, j: (0, 0)),
        ],
        out_specs=pl.BlockSpec((1, c_out, npad), lambda b, j: (b, 0, 0)),
        scratch_shapes=[pltpu.VMEM((c_out, npad), jnp.float32)],
        compiler_params=pltpu.CompilerParams(
            dimension_semantics=("parallel", "arbitrary")),
        cost_estimate=ce,
    )(rhs, w, s, t)


def conv_pool_bn_relu_attn(rhs, w, s, t, wc, cb, wl, lb, bns, bnt, *,
                           npad, group, c_out):
    B, K, _ = rhs.shape
    NC = wl.shape[1]
    n_steps = 9 // group
    ce = pl.CostEstimate(
        flops=2 * B * 9 * c_out * K * npad + 2 * B * c_out * npad * NC,
        transcendentals=B * c_out,
        bytes_accessed=(B * K * 9 * npad * 2 + B * NC * 4
                        + c_out * K * 2 + npad * (NC + 1) * 4),
    )
    return pl.pallas_call(
        _make_conv_pool_attn_kernel(group, npad),
        out_shape=jax.ShapeDtypeStruct((B, 1, NC), jnp.float32),
        grid=(B, n_steps),
        in_specs=[
            pl.BlockSpec((1, K, group * npad), lambda b, j: (b, 0, j)),
            pl.BlockSpec((c_out, K), lambda b, j: (0, 0)),
            pl.BlockSpec((c_out, 1), lambda b, j: (0, 0)),
            pl.BlockSpec((c_out, 1), lambda b, j: (0, 0)),
            pl.BlockSpec((1, npad), lambda b, j: (0, 0)),
            pl.BlockSpec((1, 1), lambda b, j: (0, 0)),
            pl.BlockSpec((npad, NC), lambda b, j: (0, 0)),
            pl.BlockSpec((1, NC), lambda b, j: (0, 0)),
            pl.BlockSpec((1, NC), lambda b, j: (0, 0)),
            pl.BlockSpec((1, NC), lambda b, j: (0, 0)),
        ],
        out_specs=pl.BlockSpec((1, 1, NC), lambda b, j: (b, 0, 0)),
        scratch_shapes=[pltpu.VMEM((c_out, npad), jnp.float32)],
        compiler_params=pltpu.CompilerParams(
            dimension_semantics=("parallel", "arbitrary")),
        cost_estimate=ce,
    )(rhs, w, s, t, wc, cb, wl, lb, bns, bnt)


# --------------------------------------------------------------------------
# Full forward pass
# --------------------------------------------------------------------------
def imgnet_forward(x, p):
    B, C_in, H, W = x.shape
    C1P = 24                         # layer-1 C_out (20) padded to sublane x8
    C2 = 40

    # l1: Conv2d(3,20,5) -> MaxPool2d(3) -> BatchNorm2d(eval) -> ReLU (Dropout=id)
    PH1, PW1, P1, NPAD1 = pool_geometry(H, W, 5, 5)        # 65, 65, 4225, 4352
    rhs1 = build_im2col(x, 5, 5, NPAD1)                     # (B, 75, 9*4352) bf16
    w1 = pack_weight(p["conv1_w"], C1P, C_in)
    s1, t1 = fold_bn(p["bn1_g"], p["bn1_b"], p["bn1_m"], p["bn1_v"],
                     p["conv1_b"], C1P)
    z1 = conv_pool_bn_relu(rhs1, w1, s1, t1, npad=NPAD1, group=3, c_out=C1P)

    # l2 + attention head, fused
    z1_sp = z1[:, :, :P1].reshape(B, C1P, PH1, PW1)         # (B, 24, 65, 65) bf16
    PH2, PW2, P2, NPAD2 = pool_geometry(PH1, PW1, 3, 3)     # 21, 21, 441, 512
    rhs2 = build_im2col(z1_sp, 3, 3, NPAD2)                 # (B, 216, 9*512) bf16
    w2 = pack_weight(p["conv2_w"], C2, C1P)
    s2, t2 = fold_bn(p["bn2_g"], p["bn2_b"], p["bn2_m"], p["bn2_v"],
                     p["conv2_b"], C2)

    wc = jnp.pad(p["att_w"].reshape(1, P2),
                 ((0, 0), (0, NPAD2 - P2))).astype(jnp.float32)      # (1, 512)
    cb = p["att_b"].reshape(1, 1).astype(jnp.float32)
    wl = jnp.pad(p["lin_w"].T,
                 ((0, NPAD2 - P2), (0, 0))).astype(jnp.float32)      # (512, NC)
    lb = p["lin_b"].reshape(1, -1).astype(jnp.float32)
    bns = (p["bnf_g"] / jnp.sqrt(p["bnf_v"] + BN_EPS)).reshape(1, -1)
    bnt = (p["bnf_b"].reshape(1, -1) - p["bnf_m"].reshape(1, -1) * bns)

    out = conv_pool_bn_relu_attn(rhs2, w2, s2, t2, wc, cb, wl, lb,
                                 bns.astype(jnp.float32), bnt.astype(jnp.float32),
                                 npad=NPAD2, group=9, c_out=C2)
    return out.reshape(B, -1)


# --------------------------------------------------------------------------
# Deterministic parameter init (shapes from ImgNet.__init__) + pure-JAX reference
# --------------------------------------------------------------------------
def init_params(key, num_classes):
    ks = jax.random.split(key, 20)
    n = lambda k, shape, s=0.05: (s * jax.random.normal(k, shape)).astype(jnp.float32)
    u = lambda k, shape: jax.random.uniform(k, shape, jnp.float32, 0.5, 1.5)
    g = lambda k, shape: (1.0 + 0.1 * jax.random.normal(k, shape)).astype(jnp.float32)
    return {
        "conv1_w": n(ks[0], (20, 3, 5, 5)), "conv1_b": n(ks[1], (20,)),
        "bn1_g": g(ks[2], (20,)), "bn1_b": n(ks[3], (20,)),
        "bn1_m": n(ks[4], (20,)), "bn1_v": u(ks[5], (20,)),
        "conv2_w": n(ks[6], (40, 20, 3, 3)), "conv2_b": n(ks[7], (40,)),
        "bn2_g": g(ks[8], (40,)), "bn2_b": n(ks[9], (40,)),
        "bn2_m": n(ks[10], (40,)), "bn2_v": u(ks[11], (40,)),
        "att_w": n(ks[12], (1, 441, 1)), "att_b": n(ks[13], (1,)),
        "lin_w": n(ks[14], (num_classes, 441)), "lin_b": n(ks[15], (num_classes,)),
        "bnf_g": g(ks[16], (num_classes,)), "bnf_b": n(ks[17], (num_classes,)),
        "bnf_m": n(ks[18], (num_classes,)), "bnf_v": u(ks[19], (num_classes,)),
    }


def reference_forward(x, p):
    dn = ("NCHW", "OIHW", "NCHW")
    hp = jax.lax.Precision.HIGHEST

    def bn4(v, g, b, m, var):
        r = lambda a: a.reshape(1, -1, 1, 1)
        return (v - r(m)) / jnp.sqrt(r(var) + BN_EPS) * r(g) + r(b)

    def maxpool3(v):
        return jax.lax.reduce_window(
            v, -jnp.inf, jax.lax.max, (1, 1, 3, 3), (1, 1, 3, 3), "VALID"
        )

    v = jax.lax.conv_general_dilated(x, p["conv1_w"], (1, 1), "VALID",
                                     dimension_numbers=dn, precision=hp)
    v = v + p["conv1_b"].reshape(1, -1, 1, 1)
    v = jax.nn.relu(bn4(maxpool3(v), p["bn1_g"], p["bn1_b"], p["bn1_m"], p["bn1_v"]))
    v = jax.lax.conv_general_dilated(v, p["conv2_w"], (1, 1), "VALID",
                                     dimension_numbers=dn, precision=hp)
    v = v + p["conv2_b"].reshape(1, -1, 1, 1)
    v = jax.nn.relu(bn4(maxpool3(v), p["bn2_g"], p["bn2_b"], p["bn2_m"], p["bn2_v"]))

    B = x.shape[0]
    flat = v.reshape(B, 40, 441)
    att = jnp.einsum("bcp,p->bc", flat, p["att_w"].reshape(441), precision=hp)
    att = jax.nn.softmax(att + p["att_b"][0], axis=-1)
    pooled = jnp.einsum("bc,bcp->bp", att, flat, precision=hp)
    y = jnp.matmul(pooled, p["lin_w"].T, precision=hp) + p["lin_b"]
    return (y - p["bnf_m"]) / jnp.sqrt(p["bnf_v"] + BN_EPS) * p["bnf_g"] + p["bnf_b"]


# --------------------------------------------------------------------------
if __name__ == "__main__":
    num_classes = 10
    key = jax.random.PRNGKey(0)
    k_x, k_p = jax.random.split(key)

    # Spatial size 199 is forced by BIND_SIZE=441 (final map must be 21x21).
    x = jax.random.normal(k_x, (2, 3, 199, 199), jnp.float32)
    params = init_params(k_p, num_classes)

    fwd = jax.jit(imgnet_forward)
    out = jax.block_until_ready(fwd(x, params))

    assert out.shape == (2, num_classes)
    assert bool(jnp.all(jnp.isfinite(out)))

    ref = jax.block_until_ready(jax.jit(reference_forward)(x, params))
    err = float(jnp.max(jnp.abs(out - ref)))
    tol = 1e-2 * max(1.0, float(jnp.max(jnp.abs(ref))))
    assert err <= tol, f"mismatch vs reference: max_abs_err={err}"

    print("KERNEL_OK")
</pallas_src>

<mosaic_0001>
module attributes {stable_mosaic.version = 11 : i64} {
  func.func @kernel(%arg0: i32, %arg1: i32, %arg2: memref<1x75x13056xbf16, #tpu.memory_space<vmem>>, %arg3: memref<24x75xbf16, #tpu.memory_space<vmem>>, %arg4: memref<24x1xf32, #tpu.memory_space<vmem>>, %arg5: memref<24x1xf32, #tpu.memory_space<vmem>>, %arg6: memref<1x24x4352xbf16, #tpu.memory_space<vmem>>, %arg7: memref<24x4352xf32, #tpu.memory_space<vmem>>) attributes {dimension_semantics = [#tpu.dimension_semantics<parallel>, #tpu.dimension_semantics<arbitrary>], iteration_bounds = array<i64: 2, 3>, scalar_prefetch = 0 : i64, scratch_operands = 1 : i64, tpu.core_type = #tpu.core_type<tc>, window_params = [{transform_indices = @transform_0, window_bounds = array<i64: 1, 75, 13056>}, {pipeline_mode = #tpu.pipeline_mode<synchronous>, transform_indices = @transform_1, window_bounds = array<i64: 24, 75>}, {pipeline_mode = #tpu.pipeline_mode<synchronous>, transform_indices = @transform_2, window_bounds = array<i64: 24, 1>}, {pipeline_mode = #tpu.pipeline_mode<synchronous>, transform_indices = @transform_3, window_bounds = array<i64: 24, 1>}, {transform_indices = @transform_4, window_bounds = array<i64: 1, 24, 4352>}]} {
    %c0 = arith.constant 0 : index
    %c0_0 = arith.constant 0 : index
    %0 = vector.load %arg3[%c0, %c0_0] : memref<24x75xbf16, #tpu.memory_space<vmem>>, vector<24x75xbf16>
    %c0_1 = arith.constant 0 : index
    %c0_2 = arith.constant 0 : index
    %c0_3 = arith.constant 0 : index
    %1 = vector.load %arg2[%c0_1, %c0_2, %c0_3] : memref<1x75x13056xbf16, #tpu.memory_space<vmem>>, vector<1x75x4352xbf16>
    %2 = vector.shape_cast %1 : vector<1x75x4352xbf16> to vector<75x4352xbf16>
    %cst = arith.constant dense<0.000000e+00> : vector<24x4352xf32>
    %3 = tpu.matmul %0, %2, %cst {dimension_numbers = #tpu.dot_dimension_numbers<[1], [0], [0], [1], [0, 0, 1, 1], [], []>} : vector<24x75xbf16>, vector<75x4352xbf16>, vector<24x4352xf32> -> vector<24x4352xf32>
    %c0_4 = arith.constant 0 : index
    %c0_5 = arith.constant 0 : index
    %c4352 = arith.constant 4352 : index
    %4 = vector.load %arg2[%c0_4, %c0_5, %c4352] : memref<1x75x13056xbf16, #tpu.memory_space<vmem>>, vector<1x75x4352xbf16>
    %5 = vector.shape_cast %4 : vector<1x75x4352xbf16> to vector<75x4352xbf16>
    %cst_6 = arith.constant dense<0.000000e+00> : vector<24x4352xf32>
    %6 = tpu.matmul %0, %5, %cst_6 {dimension_numbers = #tpu.dot_dimension_numbers<[1], [0], [0], [1], [0, 0, 1, 1], [], []>} : vector<24x75xbf16>, vector<75x4352xbf16>, vector<24x4352xf32> -> vector<24x4352xf32>
    %7 = arith.maximumf %3, %6 : vector<24x4352xf32>
    %c0_7 = arith.constant 0 : index
    %c0_8 = arith.constant 0 : index
    %c8704 = arith.constant 8704 : index
    %8 = vector.load %arg2[%c0_7, %c0_8, %c8704] : memref<1x75x13056xbf16, #tpu.memory_space<vmem>>, vector<1x75x4352xbf16>
    %9 = vector.shape_cast %8 : vector<1x75x4352xbf16> to vector<75x4352xbf16>
    %cst_9 = arith.constant dense<0.000000e+00> : vector<24x4352xf32>
    %10 = tpu.matmul %0, %9, %cst_9 {dimension_numbers = #tpu.dot_dimension_numbers<[1], [0], [0], [1], [0, 0, 1, 1], [], []>} : vector<24x75xbf16>, vector<75x4352xbf16>, vector<24x4352xf32> -> vector<24x4352xf32>
    %11 = arith.maximumf %7, %10 : vector<24x4352xf32>
    %c0_i32 = arith.constant 0 : i32
    %12 = arith.cmpi eq, %arg1, %c0_i32 : i32
    %13 = arith.extui %12 : i1 to i32
    %c0_i32_10 = arith.constant 0 : i32
    %14 = arith.cmpi ne, %13, %c0_i32_10 : i32
    scf.if %14 {
      %c0_14 = arith.constant 0 : index
      %c0_15 = arith.constant 0 : index
      %21 = vector.load %arg7[%c0_14, %c0_15] : memref<24x4352xf32, #tpu.memory_space<vmem>>, vector<24x4352xf32>
      tpu.vector_store %arg7[%c0_14, %c0_15], %11 {strides = array<i32>} : memref<24x4352xf32, #tpu.memory_space<vmem>>, vector<24x4352xf32>,
    } else {
    }
    %c0_i32_11 = arith.constant 0 : i32
    %15 = arith.cmpi ne, %arg1, %c0_i32_11 : i32
    %16 = arith.extui %15 : i1 to i32
    %c0_i32_12 = arith.constant 0 : i32
    %17 = arith.cmpi ne, %16, %c0_i32_12 : i32
    scf.if %17 {
      %c0_14 = arith.constant 0 : index
      %c0_15 = arith.constant 0 : index
      %21 = vector.load %arg7[%c0_14, %c0_15] : memref<24x4352xf32, #tpu.memory_space<vmem>>, vector<24x4352xf32>
      %22 = arith.maximumf %21, %11 : vector<24x4352xf32>
      %c0_16 = arith.constant 0 : index
      %c0_17 = arith.constant 0 : index
      %23 = vector.load %arg7[%c0_16, %c0_17] : memref<24x4352xf32, #tpu.memory_space<vmem>>, vector<24x4352xf32>
      tpu.vector_store %arg7[%c0_16, %c0_17], %22 {strides = array<i32>} : memref<24x4352xf32, #tpu.memory_space<vmem>>, vector<24x4352xf32>,
    } else {
    }
    %c2_i32 = arith.constant 2 : i32
    %18 = arith.cmpi eq, %arg1, %c2_i32 : i32
    %19 = arith.extui %18 : i1 to i32
    %c0_i32_13 = arith.constant 0 : i32
    %20 = arith.cmpi ne, %19, %c0_i32_13 : i32
    scf.if %20 {
      %c0_14 = arith.constant 0 : index
      %c0_15 = arith.constant 0 : index
      %21 = vector.load %arg7[%c0_14, %c0_15] : memref<24x4352xf32, #tpu.memory_space<vmem>>, vector<24x4352xf32>
      %c0_16 = arith.constant 0 : index
      %c0_17 = arith.constant 0 : index
      %22 = vector.load %arg4[%c0_16, %c0_17] : memref<24x1xf32, #tpu.memory_space<vmem>>, vector<24x1xf32>
      %23 = vector.broadcast %22 : vector<24x1xf32> to vector<24x4352xf32>
      %24 = arith.mulf %21, %23 : vector<24x4352xf32>
      %c0_18 = arith.constant 0 : index
      %c0_19 = arith.constant 0 : index
      %25 = vector.load %arg5[%c0_18, %c0_19] : memref<24x1xf32, #tpu.memory_space<vmem>>, vector<24x1xf32>
      %26 = vector.broadcast %25 : vector<24x1xf32> to vector<24x4352xf32>
      %27 = arith.addf %24, %26 : vector<24x4352xf32>
      %cst_20 = arith.constant 0.000000e+00 : f32
      %28 = vector.broadcast %cst_20 : f32 to vector<24x4352xf32>
      %29 = arith.maximumf %27, %28 : vector<24x4352xf32>
      %30 = arith.truncf %29 : vector<24x4352xf32> to vector<24x4352xbf16>
      %c0_21 = arith.constant 0 : index
      %c0_22 = arith.constant 0 : index
      %c0_23 = arith.constant 0 : index
      %31 = vector.load %arg6[%c0_21, %c0_22, %c0_23] : memref<1x24x4352xbf16, #tpu.memory_space<vmem>>, vector<1x24x4352xbf16>
      %32 = vector.shape_cast %31 : vector<1x24x4352xbf16> to vector<24x4352xbf16>
      %33 = vector.shape_cast %30 : vector<24x4352xbf16> to vector<1x24x4352xbf16>
      tpu.vector_store %arg6[%c0_21, %c0_22, %c0_23], %33 {strides = array<i32>} : memref<1x24x4352xbf16, #tpu.memory_space<vmem>>, vector<1x24x4352xbf16>,
    } else {
    }
    return
  }
  func.func @transform_0(%arg0: i32, %arg1: i32) -> (i32, i32, i32) {
    %c0_i32 = arith.constant 0 : i32
    %c0_i32_0 = arith.constant 0 : i32
    return %arg0, %c0_i32, %arg1 : i32, i32, i32
  }
  func.func @transform_1(%arg0: i32, %arg1: i32) -> (i32, i32) {
    %c0_i32 = arith.constant 0 : i32
    %c0_i32_0 = arith.constant 0 : i32
    %c0_i32_1 = arith.constant 0 : i32
    return %c0_i32, %c0_i32_0 : i32, i32
  }
  func.func @transform_2(%arg0: i32, %arg1: i32) -> (i32, i32) {
    %c0_i32 = arith.constant 0 : i32
    %c0_i32_0 = arith.constant 0 : i32
    %c0_i32_1 = arith.constant 0 : i32
    return %c0_i32, %c0_i32_0 : i32, i32
  }
  func.func @transform_3(%arg0: i32, %arg1: i32) -> (i32, i32) {
    %c0_i32 = arith.constant 0 : i32
    %c0_i32_0 = arith.constant 0 : i32
    %c0_i32_1 = arith.constant 0 : i32
    return %c0_i32, %c0_i32_0 : i32, i32
  }
  func.func @transform_4(%arg0: i32, %arg1: i32) -> (i32, i32, i32) {
    %c0_i32 = arith.constant 0 : i32
    %c0_i32_0 = arith.constant 0 : i32
    %c0_i32_1 = arith.constant 0 : i32
    return %arg0, %c0_i32, %c0_i32_0 : i32, i32, i32
  }
}

module attributes {stable_mosaic.version = 11 : i64} {
  func.func @kernel(%arg0: i32, %arg1: i32, %arg2: memref<1x216x4608xbf16, #tpu.memory_space<vmem>>, %arg3: memref<40x216xbf16, #tpu.memory_space<vmem>>, %arg4: memref<40x1xf32, #tpu.memory_space<vmem>>, %arg5: memref<40x1xf32, #tpu.memory_space<vmem>>, %arg6: memref<1x512xf32, #tpu.memory_space<vmem>>, %arg7: memref<1x1xf32, #tpu.memory_space<vmem>>, %arg8: memref<512x10xf32, #tpu.memory_space<vmem>>, %arg9: memref<1x10xf32, #tpu.memory_space<vmem>>, %arg10: memref<1x10xf32, #tpu.memory_space<vmem>>, %arg11: memref<1x10xf32, #tpu.memory_space<vmem>>, %arg12: memref<1x1x10xf32, #tpu.memory_space<vmem>>, %arg13: memref<40x512xf32, #tpu.memory_space<vmem>>) attributes {dimension_semantics = [#tpu.dimension_semantics<parallel>, #tpu.dimension_semantics<arbitrary>], iteration_bounds = array<i64: 2, 1>, scalar_prefetch = 0 : i64, scratch_operands = 1 : i64, tpu.core_type = #tpu.core_type<tc>, window_params = [{transform_indices = @transform_0, window_bounds = array<i64: 1, 216, 4608>}, {pipeline_mode = #tpu.pipeline_mode<synchronous>, transform_indices = @transform_1, window_bounds = array<i64: 40, 216>}, {pipeline_mode = #tpu.pipeline_mode<synchronous>, transform_indices = @transform_2, window_bounds = array<i64: 40, 1>}, {pipeline_mode = #tpu.pipeline_mode<synchronous>, transform_indices = @transform_3, window_bounds = array<i64: 40, 1>}, {pipeline_mode = #tpu.pipeline_mode<synchronous>, transform_indices = @transform_4, window_bounds = array<i64: 1, 512>}, {pipeline_mode = #tpu.pipeline_mode<synchronous>, transform_indices = @transform_5, window_bounds = array<i64: 1, 1>}, {pipeline_mode = #tpu.pipeline_mode<synchronous>, transform_indices = @transform_6, window_bounds = array<i64: 512, 10>}, {pipeline_mode = #tpu.pipeline_mode<synchronous>, transform_indices = @transform_7, window_bounds = array<i64: 1, 10>}, {pipeline_mode = #tpu.pipeline_mode<synchronous>, transform_indices = @transform_8, window_bounds = array<i64: 1, 10>}, {pipeline_mode = #tpu.pipeline_mode<synchronous>, transform_indices = @transform_9, window_bounds = array<i64: 1, 10>}, {transform_indices = @transform_10, window_bounds = array<i64: 1, 1, 10>}]} {
    %c0 = arith.constant 0 : index
    %c0_0 = arith.constant 0 : index
    %0 = vector.load %arg3[%c0, %c0_0] : memref<40x216xbf16, #tpu.memory_space<vmem>>, vector<40x216xbf16>
    %c0_1 = arith.constant 0 : index
    %c0_2 = arith.constant 0 : index
    %c0_3 = arith.constant 0 : index
    %1 = vector.load %arg2[%c0_1, %c0_2, %c0_3] : memref<1x216x4608xbf16, #tpu.memory_space<vmem>>, vector<1x216x512xbf16>
    %2 = vector.shape_cast %1 : vector<1x216x512xbf16> to vector<216x512xbf16>
    %cst = arith.constant dense<0.000000e+00> : vector<40x512xf32>
    %3 = tpu.matmul %0, %2, %cst {dimension_numbers = #tpu.dot_dimension_numbers<[1], [0], [0], [1], [0, 0, 1, 1], [], []>} : vector<40x216xbf16>, vector<216x512xbf16>, vector<40x512xf32> -> vector<40x512xf32>
    %c0_4 = arith.constant 0 : index
    %c0_5 = arith.constant 0 : index
    %c512 = arith.constant 512 : index
    %4 = vector.load %arg2[%c0_4, %c0_5, %c512] : memref<1x216x4608xbf16, #tpu.memory_space<vmem>>, vector<1x216x512xbf16>
    %5 = vector.shape_cast %4 : vector<1x216x512xbf16> to vector<216x512xbf16>
    %cst_6 = arith.constant dense<0.000000e+00> : vector<40x512xf32>
    %6 = tpu.matmul %0, %5, %cst_6 {dimension_numbers = #tpu.dot_dimension_numbers<[1], [0], [0], [1], [0, 0, 1, 1], [], []>} : vector<40x216xbf16>, vector<216x512xbf16>, vector<40x512xf32> -> vector<40x512xf32>
    %7 = arith.maximumf %3, %6 : vector<40x512xf32>
    %c0_7 = arith.constant 0 : index
    %c0_8 = arith.constant 0 : index
    %c1024 = arith.constant 1024 : index
    %8 = vector.load %arg2[%c0_7, %c0_8, %c1024] : memref<1x216x4608xbf16, #tpu.memory_space<vmem>>, vector<1x216x512xbf16>
    %9 = vector.shape_cast %8 : vector<1x216x512xbf16> to vector<216x512xbf16>
    %cst_9 = arith.constant dense<0.000000e+00> : vector<40x512xf32>
    %10 = tpu.matmul %0, %9, %cst_9 {dimension_numbers = #tpu.dot_dimension_numbers<[1], [0], [0], [1], [0, 0, 1, 1], [], []>} : vector<40x216xbf16>, vector<216x512xbf16>, vector<40x512xf32> -> vector<40x512xf32>
    %11 = arith.maximumf %7, %10 : vector<40x512xf32>
    %c0_10 = arith.constant 0 : index
    %c0_11 = arith.constant 0 : index
    %c1536 = arith.constant 1536 : index
    %12 = vector.load %arg2[%c0_10, %c0_11, %c1536] : memref<1x216x4608xbf16, #tpu.memory_space<vmem>>, vector<1x216x512xbf16>
    %13 = vector.shape_cast %12 : vector<1x216x512xbf16> to vector<216x512xbf16>
    %cst_12 = arith.constant dense<0.000000e+00> : vector<40x512xf32>
    %14 = tpu.matmul %0, %13, %cst_12 {dimension_numbers = #tpu.dot_dimension_numbers<[1], [0], [0], [1], [0, 0, 1, 1], [], []>} : vector<40x216xbf16>, vector<216x512xbf16>, vector<40x512xf32> -> vector<40x512xf32>
    %15 = arith.maximumf %11, %14 : vector<40x512xf32>
    %c0_13 = arith.constant 0 : index
    %c0_14 = arith.constant 0 : index
    %c2048 = arith.constant 2048 : index
    %16 = vector.load %arg2[%c0_13, %c0_14, %c2048] : memref<1x216x4608xbf16, #tpu.memory_space<vmem>>, vector<1x216x512xbf16>
    %17 = vector.shape_cast %16 : vector<1x216x512xbf16> to vector<216x512xbf16>
    %cst_15 = arith.constant dense<0.000000e+00> : vector<40x512xf32>
    %18 = tpu.matmul %0, %17, %cst_15 {dimension_numbers = #tpu.dot_dimension_numbers<[1], [0], [0], [1], [0, 0, 1, 1], [], []>} : vector<40x216xbf16>, vector<216x512xbf16>, vector<40x512xf32> -> vector<40x512xf32>
    %19 = arith.maximumf %15, %18 : vector<40x512xf32>
    %c0_16 = arith.constant 0 : index
    %c0_17 = arith.constant 0 : index
    %c2560 = arith.constant 2560 : index
    %20 = vector.load %arg2[%c0_16, %c0_17, %c2560] : memref<1x216x4608xbf16, #tpu.memory_space<vmem>>, vector<1x216x512xbf16>
    %21 = vector.shape_cast %20 : vector<1x216x512xbf16> to vector<216x512xbf16>
    %cst_18 = arith.constant dense<0.000000e+00> : vector<40x512xf32>
    %22 = tpu.matmul %0, %21, %cst_18 {dimension_numbers = #tpu.dot_dimension_numbers<[1], [0], [0], [1], [0, 0, 1, 1], [], []>} : vector<40x216xbf16>, vector<216x512xbf16>, vector<40x512xf32> -> vector<40x512xf32>
    %23 = arith.maximumf %19, %22 : vector<40x512xf32>
    %c0_19 = arith.constant 0 : index
    %c0_20 = arith.constant 0 : index
    %c3072 = arith.constant 3072 : index
    %24 = vector.load %arg2[%c0_19, %c0_20, %c3072] : memref<1x216x4608xbf16, #tpu.memory_space<vmem>>, vector<1x216x512xbf16>
    %25 = vector.shape_cast %24 : vector<1x216x512xbf16> to vector<216x512xbf16>
    %cst_21 = arith.constant dense<0.000000e+00> : vector<40x512xf32>
    %26 = tpu.matmul %0, %25, %cst_21 {dimension_numbers = #tpu.dot_dimension_numbers<[1], [0], [0], [1], [0, 0, 1, 1], [], []>} : vector<40x216xbf16>, vector<216x512xbf16>, vector<40x512xf32> -> vector<40x512xf32>
    %27 = arith.maximumf %23, %26 : vector<40x512xf32>
    %c0_22 = arith.constant 0 : index
    %c0_23 = arith.constant 0 : index
    %c3584 = arith.constant 3584 : index
    %28 = vector.load %arg2[%c0_22, %c0_23, %c3584] : memref<1x216x4608xbf16, #tpu.memory_space<vmem>>, vector<1x216x512xbf16>
    %29 = vector.shape_cast %28 : vector<1x216x512xbf16> to vector<216x512xbf16>
    %cst_24 = arith.constant dense<0.000000e+00> : vector<40x512xf32>
    %30 = tpu.matmul %0, %29, %cst_24 {dimension_numbers = #tpu.dot_dimension_numbers<[1], [0], [0], [1], [0, 0, 1, 1], [], []>} : vector<40x216xbf16>, vector<216x512xbf16>, vector<40x512xf32> -> vector<40x512xf32>
    %31 = arith.maximumf %27, %30 : vector<40x512xf32>
    %c0_25 = arith.constant 0 : index
    %c0_26 = arith.constant 0 : index
    %c4096 = arith.constant 4096 : index
    %32 = vector.load %arg2[%c0_25, %c0_26, %c4096] : memref<1x216x4608xbf16, #tpu.memory_space<vmem>>, vector<1x216x512xbf16>
    %33 = vector.shape_cast %32 : vector<1x216x512xbf16> to vector<216x512xbf16>
    %cst_27 = arith.constant dense<0.000000e+00> : vector<40x512xf32>
    %34 = tpu.matmul %0, %33, %cst_27 {dimension_numbers = #tpu.dot_dimension_numbers<[1], [0], [0], [1], [0, 0, 1, 1], [], []>} : vector<40x216xbf16>, vector<216x512xbf16>, vector<40x512xf32> -> vector<40x512xf32>
    %35 = arith.maximumf %31, %34 : vector<40x512xf32>
    %c0_i32 = arith.constant 0 : i32
    %36 = arith.cmpi eq, %arg1, %c0_i32 : i32
    %37 = arith.extui %36 : i1 to i32
    %c0_i32_28 = arith.constant 0 : i32
    %38 = arith.cmpi ne, %37, %c0_i32_28 : i32
    scf.if %38 {
      %c0_33 = arith.constant 0 : index
      %c0_34 = arith.constant 0 : index
      %45 = vector.load %arg13[%c0_33, %c0_34] : memref<40x512xf32, #tpu.memory_space<vmem>>, vector<40x512xf32>
      tpu.vector_store %arg13[%c0_33, %c0_34], %35 {strides = array<i32>} : memref<40x512xf32, #tpu.memory_space<vmem>>, vector<40x512xf32>,
    } else {
    }
    %c0_i32_29 = arith.constant 0 : i32
    %39 = arith.cmpi ne, %arg1, %c0_i32_29 : i32
    %40 = arith.extui %39 : i1 to i32
    %c0_i32_30 = arith.constant 0 : i32
    %41 = arith.cmpi ne, %40, %c0_i32_30 : i32
    scf.if %41 {
      %c0_33 = arith.constant 0 : index
      %c0_34 = arith.constant 0 : index
      %45 = vector.load %arg13[%c0_33, %c0_34] : memref<40x512xf32, #tpu.memory_space<vmem>>, vector<40x512xf32>
      %46 = arith.maximumf %45, %35 : vector<40x512xf32>
      %c0_35 = arith.constant 0 : index
      %c0_36 = arith.constant 0 : index
      %47 = vector.load %arg13[%c0_35, %c0_36] : memref<40x512xf32, #tpu.memory_space<vmem>>, vector<40x512xf32>
      tpu.vector_store %arg13[%c0_35, %c0_36], %46 {strides = array<i32>} : memref<40x512xf32, #tpu.memory_space<vmem>>, vector<40x512xf32>,
    } else {
    }
    %c0_i32_31 = arith.constant 0 : i32
    %42 = arith.cmpi eq, %arg1, %c0_i32_31 : i32
    %43 = arith.extui %42 : i1 to i32
    %c0_i32_32 = arith.constant 0 : i32
    %44 = arith.cmpi ne, %43, %c0_i32_32 : i32
    scf.if %44 {
      %c0_33 = arith.constant 0 : index
      %c0_34 = arith.constant 0 : index
      %45 = vector.load %arg13[%c0_33, %c0_34] : memref<40x512xf32, #tpu.memory_space<vmem>>, vector<40x512xf32>
      %c0_35 = arith.constant 0 : index
      %c0_36 = arith.constant 0 : index
      %46 = vector.load %arg4[%c0_35, %c0_36] : memref<40x1xf32, #tpu.memory_space<vmem>>, vector<40x1xf32>
      %47 = vector.broadcast %46 : vector<40x1xf32> to vector<40x512xf32>
      %48 = arith.mulf %45, %47 : vector<40x512xf32>
      %c0_37 = arith.constant 0 : index
      %c0_38 = arith.constant 0 : index
      %49 = vector.load %arg5[%c0_37, %c0_38] : memref<40x1xf32, #tpu.memory_space<vmem>>, vector<40x1xf32>
      %50 = vector.broadcast %49 : vector<40x1xf32> to vector<40x512xf32>
      %51 = arith.addf %48, %50 : vector<40x512xf32>
      %cst_39 = arith.constant 0.000000e+00 : f32
      %52 = vector.broadcast %cst_39 : f32 to vector<40x512xf32>
      %53 = arith.maximumf %51, %52 : vector<40x512xf32>
      %c0_40 = arith.constant 0 : index
      %c0_41 = arith.constant 0 : index
      %54 = vector.load %arg6[%c0_40, %c0_41] : memref<1x512xf32, #tpu.memory_space<vmem>>, vector<1x512xf32>
      %55 = vector.broadcast %54 : vector<1x512xf32> to vector<40x512xf32>
      %56 = arith.mulf %53, %55 : vector<40x512xf32>
      %cst_42 = arith.constant dense<0.000000e+00> : vector<40xf32>
      %57 = vector.multi_reduction <add>, %56, %cst_42 [1] : vector<40x512xf32> to vector<40xf32>
      %58 = vector.shape_cast %57 : vector<40xf32> to vector<40x1xf32>
      %c0_43 = arith.constant 0 : index
      %c0_44 = arith.constant 0 : index
      %59 = vector.load %arg7[%c0_43, %c0_44] : memref<1x1xf32, #tpu.memory_space<vmem>>, vector<1x1xf32>
      %60 = vector.broadcast %59 : vector<1x1xf32> to vector<40x1xf32>
      %61 = arith.addf %58, %60 : vector<40x1xf32>
      %cst_45 = arith.constant dense<0xFF800000> : vector<1xf32>
      %62 = vector.multi_reduction <maximumf>, %61, %cst_45 [0] : vector<40x1xf32> to vector<1xf32>
      %63 = vector.shape_cast %62 : vector<1xf32> to vector<1x1xf32>
      %64 = vector.broadcast %63 : vector<1x1xf32> to vector<40x1xf32>
      %65 = arith.subf %61, %64 : vector<40x1xf32>
      %66 = math.exp %65 : vector<40x1xf32>
      %cst_46 = arith.constant dense<0.000000e+00> : vector<1xf32>
      %67 = vector.multi_reduction <add>, %66, %cst_46 [0] : vector<40x1xf32> to vector<1xf32>
      %68 = vector.shape_cast %67 : vector<1xf32> to vector<1x1xf32>
      %69 = vector.broadcast %68 : vector<1x1xf32> to vector<40x1xf32>
      %70 = arith.divf %66, %69 : vector<40x1xf32>
      %c0_47 = arith.constant 0 : index
      %c0_48 = arith.constant 0 : index
      %71 = vector.load %arg8[%c0_47, %c0_48] : memref<512x10xf32, #tpu.memory_space<vmem>>, vector<512x10xf32>
      %cst_49 = arith.constant dense<0.000000e+00> : vector<40x10xf32>
      %72 = tpu.matmul %53, %71, %cst_49 {dimension_numbers = #tpu.dot_dimension_numbers<[1], [0], [0], [1], [0, 0, 1, 1], [], []>} : vector<40x512xf32>, vector<512x10xf32>, vector<40x10xf32> -> vector<40x10xf32>
      %73 = vector.broadcast %70 : vector<40x1xf32> to vector<40x10xf32>
      %74 = arith.mulf %72, %73 : vector<40x10xf32>
      %cst_50 = arith.constant dense<0.000000e+00> : vector<10xf32>
      %75 = vector.multi_reduction <add>, %74, %cst_50 [0] : vector<40x10xf32> to vector<10xf32>
      %76 = vector.shape_cast %75 : vector<10xf32> to vector<1x10xf32>
      %c0_51 = arith.constant 0 : index
      %c0_52 = arith.constant 0 : index
      %77 = vector.load %arg9[%c0_51, %c0_52] : memref<1x10xf32, #tpu.memory_space<vmem>>, vector<1x10xf32>
      %78 = arith.addf %76, %77 : vector<1x10xf32>
      %c0_53 = arith.constant 0 : index
      %c0_54 = arith.constant 0 : index
      %79 = vector.load %arg10[%c0_53, %c0_54] : memref<1x10xf32, #tpu.memory_space<vmem>>, vector<1x10xf32>
      %80 = arith.mulf %78, %79 : vector<1x10xf32>
      %c0_55 = arith.constant 0 : index
      %c0_56 = arith.constant 0 : index
      %81 = vector.load %arg11[%c0_55, %c0_56] : memref<1x10xf32, #tpu.memory_space<vmem>>, vector<1x10xf32>
      %82 = arith.addf %80, %81 : vector<1x10xf32>
      %c0_57 = arith.constant 0 : index
      %c0_58 = arith.constant 0 : index
      %c0_59 = arith.constant 0 : index
      %83 = vector.load %arg12[%c0_57, %c0_58, %c0_59] : memref<1x1x10xf32, #tpu.memory_space<vmem>>, vector<1x1x10xf32>
      %84 = vector.shape_cast %83 : vector<1x1x10xf32> to vector<1x10xf32>
      %85 = vector.shape_cast %82 : vector<1x10xf32> to vector<1x1x10xf32>
      tpu.vector_store %arg12[%c0_57, %c0_58, %c0_59], %85 {strides = array<i32>} : memref<1x1x10xf32, #tpu.memory_space<vmem>>, vector<1x1x10xf32>,
    } else {
    }
    return
  }
  func.func @transform_0(%arg0: i32, %arg1: i32) -> (i32, i32, i32) {
    %c0_i32 = arith.constant 0 : i32
    %c0_i32_0 = arith.constant 0 : i32
    return %arg0, %c0_i32, %arg1 : i32, i32, i32
  }
  func.func @transform_1(%arg0: i32, %arg1: i32) -> (i32, i32) {
    %c0_i32 = arith.constant 0 : i32
    %c0_i32_0 = arith.constant 0 : i32
    %c0_i32_1 = arith.constant 0 : i32
    return %c0_i32, %c0_i32_0 : i32, i32
  }
  func.func @transform_2(%arg0: i32, %arg1: i32) -> (i32, i32) {
    %c0_i32 = arith.constant 0 : i32
    %c0_i32_0 = arith.constant 0 : i32
    %c0_i32_1 = arith.constant 0 : i32
    return %c0_i32, %c0_i32_0 : i32, i32
  }
  func.func @transform_3(%arg0: i32, %arg1: i32) -> (i32, i32) {
    %c0_i32 = arith.constant 0 : i32
    %c0_i32_0 = arith.constant 0 : i32
    %c0_i32_1 = arith.constant 0 : i32
    return %c0_i32, %c0_i32_0 : i32, i32
  }
  func.func @transform_4(%arg0: i32, %arg1: i32) -> (i32, i32) {
    %c0_i32 = arith.constant 0 : i32
    %c0_i32_0 = arith.constant 0 : i32
    %c0_i32_1 = arith.constant 0 : i32
    return %c0_i32, %c0_i32_0 : i32, i32
  }
  func.func @transform_5(%arg0: i32, %arg1: i32) -> (i32, i32) {
    %c0_i32 = arith.constant 0 : i32
    %c0_i32_0 = arith.constant 0 : i32
    %c0_i32_1 = arith.constant 0 : i32
    return %c0_i32, %c0_i32_0 : i32, i32
  }
  func.func @transform_6(%arg0: i32, %arg1: i32) -> (i32, i32) {
    %c0_i32 = arith.constant 0 : i32
    %c0_i32_0 = arith.constant 0 : i32
    %c0_i32_1 = arith.constant 0 : i32
    return %c0_i32, %c0_i32_0 : i32, i32
  }
  func.func @transform_7(%arg0: i32, %arg1: i32) -> (i32, i32) {
    %c0_i32 = arith.constant 0 : i32
    %c0_i32_0 = arith.constant 0 : i32
    %c0_i32_1 = arith.constant 0 : i32
    return %c0_i32, %c0_i32_0 : i32, i32
  }
  func.func @transform_8(%arg0: i32, %arg1: i32) -> (i32, i32) {
    %c0_i32 = arith.constant 0 : i32
    %c0_i32_0 = arith.constant 0 : i32
    %c0_i32_1 = arith.constant 0 : i32
    return %c0_i32, %c0_i32_0 : i32, i32
  }
  func.func @transform_9(%arg0: i32, %arg1: i32) -> (i32, i32) {
    %c0_i32 = arith.constant 0 : i32
    %c0_i32_0 = arith.constant 0 : i32
    %c0_i32_1 = arith.constant 0 : i32
    return %c0_i32, %c0_i32_0 : i32, i32
  }
  func.func @transform_10(%arg0: i32, %arg1: i32) -> (i32, i32, i32) {
    %c0_i32 = arith.constant 0 : i32
    %c0_i32_0 = arith.constant 0 : i32
    %c0_i32_1 = arith.constant 0 : i32
    return %arg0, %c0_i32, %c0_i32_0 : i32, i32, i32
  }
}

</mosaic_0001>

<bundles_post_ra>
// kernel: imgnet_forward.2
= control target key start
LH: loop header
LB: loop body
LE: loop exit
PB: predicated region body
PF: predicated region fallthrough
CT: control target
= control target key end

     0   :  { %s10335_s15 = smov 0   ;;  %s10337_s16 = smov 0   ;;  %s14125_s0 = inlined_call_operand.vmem [shape: bf16[2,75,39168], index: 0, kind: input, shape index: {}]   ;;  %s14126_s1 = inlined_call_operand.vmem [shape: bf16[24,75], index: 1, kind: input, shape index: {}]   ;;  %s14127_s2 = inlined_call_operand.vmem [shape: f32[24,1], index: 2, kind: input, shape index: {}]   ;;  %s14128_s3 = inlined_call_operand.vmem [shape: f32[24,1], index: 3, kind: input, shape index: {}]   ;;  %s14129_s4 = inlined_call_operand.vmem [shape: bf16[2,24,4352], index: 4, kind: output, shape index: {}]  }
   0x1   :  { %s10339_s17 = smov 0   ;;  %s10341_s18 = smov 0  }
   0x2   :  { %s10343_s19 = smov 0   ;;  %s10345_s20 = smov 0  }
   0x3   :  { %s10347_s21 = smov 0  }
   0x4 LB: > { %s23_s22 = sadd.s32 1, %s10297_s19  ;;  %s26_s23 = sadd.s32 1, %s10301_s20  ;;  %s10305_s21 = sphi %s10347_s21, %s14_s21   ;;  %s10301_s20 = sphi %s10345_s20, %s14940_s20   ;;  %s10297_s19 = sphi %s10343_s19, %s14939_s19   ;;  %s10293_s18 = sphi %s10341_s18, %s14938_s18   ;;  %s10289_s17 = sphi %s10339_s17, %s14937_s17   ;;  %s10285_s16 = sphi %s10337_s16, %s14936_s16   ;;  %s10281_s15 = sphi %s10335_s15, %s14935_s15  }
   0x5   : > { %p24_p0 = scmp.ge.s32.totalorder %s23_s22, 3  ;;  %p42_p1 = scmp.ne.s32.totalorder %s10285_s16, %s10281_s15 }
   0x6   : > { %p43_p2 = scmp.eq.s32.totalorder %s10305_s21, 0  ;;  %s35_s27 = sadd.s32 1, %s10285_s16 }
   0x7   : > { %s14942_s22 = smov (%p24_p0, %s23_s22), 0  ;;  %s14944_s23 = smov (!%p24_p0, %s26_s23), %s10301_s20 }
   0x8   : > { %p44_p3 = por %p43_p2, %p42_p1  ;;  %p28_p4 = scmp.ge.s32.totalorder %s14944_s23, 2 }
   0x9   : > { %s31_s24 = ssub.s32 %s10297_s19, %s14942_s22  ;;  %p8678_p6 = scmp.ge.s32.totalorder %s10305_s21, 6 }
   0xa   : > { %s14946_s23 = smov (%p28_p4, %s14944_s23), 0 }
   0xb   : > { %s30_s25 = ssub.s32 %s10301_s20, %s14946_s23  ;;  %166 = sbr.rel (%p8678_p6) target bundleno = 282 (0x11a), region = 28 }
   0xc   : > { %s32_s26 = sor.u32 %s31_s24, %s30_s25 }
   0xd   : > { %p33_p5 = scmp.eq.s32.totalorder %s32_s26, 0 }
   0xf   : > { %s10386_s28 = scalar_select %p33_p5, %s10285_s16, %s35_s27  }
  0x12   : > { %169 = sbr.rel (!%p44_p3) target bundleno = 282 (0x11a), region = 32  ;;  %s171_s29 = sand.u32 (%p44_p3), 1, %s10285_s16  }
  0x13   : > { %s174_s30 = smul.u32 (%p44_p3), 102, %s10297_s19 }
  0x14   : > { %s9413_s5 = smul.u32 (%p44_p3), 4080, %s171_s29 }
  0x15   : > { %s9414_s6 = smul.u32 (%p44_p3), 3060, %s10301_s20 }
  0x16   : > { %s10400_s12 = scalar_lea.vmem (%p44_p3), [#allocation3], %s9413_s5 }
  0x17   : > { %s176_s7 = sadd.s32 (%p44_p3), %s9414_s6, %s174_s30 }
  0x18   : > { %s8679_s8 = sshll.u32 (%p44_p3), %s176_s7, 2 }
  0x19   : > { %s10395_s11 = scalar_lea.vmem %s14125_s0, %s8679_s8 }
  0x1a   : > { %v191_v0 = vld [vmem:[%s10395_s11] sm:$0xff]  ;;  %v193_v1 = vld [vmem:[%s10395_s11 + $0x8] sm:$0xff]  ;;  %v195_v2 = vld [vmem:[%s10395_s11 + $0x10] sm:$0xff] }
  0x1b   : > { %192 = vst [vmem:[%s10400_s12] sm:$0xff] %v191_v0  ;;  %194 = vst [vmem:[%s10400_s12 + $0x8] sm:$0xff] %v193_v1  ;;  %v197_v3 = vld [vmem:[%s10395_s11 + $0x18] sm:$0xff]  ;;  %v199_v4 = vld [vmem:[%s10395_s11 + $0x20] sm:$0xff] }
  0x1c   : > { %196 = vst [vmem:[%s10400_s12 + $0x10] sm:$0xff] %v195_v2  ;;  %v201_v5 = vld [vmem:[%s10395_s11 + $0x28] sm:$0xff]  ;;  %198 = vst [vmem:[%s10400_s12 + $0x18] sm:$0xff] %v197_v3  ;;  %v203_v6 = vld [vmem:[%s10395_s11 + $0x30] sm:$0xff] }
  0x1d   : > { %200 = vst [vmem:[%s10400_s12 + $0x20] sm:$0xff] %v199_v4  ;;  %202 = vst [vmem:[%s10400_s12 + $0x28] sm:$0xff] %v201_v5  ;;  %v205_v7 = vld [vmem:[%s10395_s11 + $0x38] sm:$0xff]  ;;  %v207_v8 = vld [vmem:[%s10395_s11 + $0x40] sm:$0xff] }
  0x1e   : > { %204 = vst [vmem:[%s10400_s12 + $0x30] sm:$0xff] %v203_v6  ;;  %206 = vst [vmem:[%s10400_s12 + $0x38] sm:$0xff] %v205_v7  ;;  %v209_v9 = vld [vmem:[%s10395_s11 + $0x48] sm:$0xff]  ;;  %v211_v10 = vld [vmem:[%s10395_s11 + $0x50] sm:$0xff] }
  0x1f   : > { %208 = vst [vmem:[%s10400_s12 + $0x40] sm:$0xff] %v207_v8  ;;  %v213_v11 = vld [vmem:[%s10395_s11 + $0x58] sm:$0xff]  ;;  %210 = vst [vmem:[%s10400_s12 + $0x48] sm:$0xff] %v209_v9  ;;  %v215_v12 = vld [vmem:[%s10395_s11 + $0x60] sm:$0xff] }
  0x20   : > { %212 = vst [vmem:[%s10400_s12 + $0x50] sm:$0xff] %v211_v10  ;;  %214 = vst [vmem:[%s10400_s12 + $0x58] sm:$0xff] %v213_v11  ;;  %v217_v13 = vld [vmem:[%s10395_s11 + $0x68] sm:$0xff]  ;;  %v219_v14 = vld [vmem:[%s10395_s11 + $0x70] sm:$0xff] }
  0x21   : > { %216 = vst [vmem:[%s10400_s12 + $0x60] sm:$0xff] %v215_v12  ;;  %218 = vst [vmem:[%s10400_s12 + $0x68] sm:$0xff] %v217_v13  ;;  %v221_v15 = vld [vmem:[%s10395_s11 + $0x78] sm:$0xff]  ;;  %v223_v16 = vld [vmem:[%s10395_s11 + $0x80] sm:$0xff] }
  0x22   : > { %220 = vst [vmem:[%s10400_s12 + $0x70] sm:$0xff] %v219_v14  ;;  %v225_v17 = vld [vmem:[%s10395_s11 + $0x88] sm:$0xff]  ;;  %222 = vst [vmem:[%s10400_s12 + $0x78] sm:$0xff] %v221_v15  ;;  %v227_v18 = vld [vmem:[%s10395_s11 + $0x90] sm:$0xff] }
  0x23   : > { %224 = vst [vmem:[%s10400_s12 + $0x80] sm:$0xff] %v223_v16  ;;  %226 = vst [vmem:[%s10400_s12 + $0x88] sm:$0xff] %v225_v17  ;;  %v229_v19 = vld [vmem:[%s10395_s11 + $0x98] sm:$0xff]  ;;  %v231_v20 = vld [vmem:[%s10395_s11 + $0xa0] sm:$0xff] }
  0x24   : > { %228 = vst [vmem:[%s10400_s12 + $0x90] sm:$0xff] %v227_v18  ;;  %230 = vst [vmem:[%s10400_s12 + $0x98] sm:$0xff] %v229_v19  ;;  %v233_v21 = vld [vmem:[%s10395_s11 + $0xa8] sm:$0xff]  ;;  %v235_v22 = vld [vmem:[%s10395_s11 + $0xb0] sm:$0xff] }
  0x25   : > { %232 = vst [vmem:[%s10400_s12 + $0xa0] sm:$0xff] %v231_v20  ;;  %v237_v23 = vld [vmem:[%s10395_s11 + $0xb8] sm:$0xff]  ;;  %234 = vst [vmem:[%s10400_s12 + $0xa8] sm:$0xff] %v233_v21  ;;  %v239_v24 = vld [vmem:[%s10395_s11 + $0xc0] sm:$0xff] }
  0x26   : > { %236 = vst [vmem:[%s10400_s12 + $0xb0] sm:$0xff] %v235_v22  ;;  %238 = vst [vmem:[%s10400_s12 + $0xb8] sm:$0xff] %v237_v23  ;;  %v241_v25 = vld [vmem:[%s10395_s11 + $0xc8] sm:$0xff]  ;;  %v243_v26 = vld [vmem:[%s10395_s11 + $0xd0] sm:$0xff] }
  0x27   : > { %240 = vst [vmem:[%s10400_s12 + $0xc0] sm:$0xff] %v239_v24  ;;  %242 = vst [vmem:[%s10400_s12 + $0xc8] sm:$0xff] %v241_v25  ;;  %v245_v27 = vld [vmem:[%s10395_s11 + $0xd8] sm:$0xff]  ;;  %v247_v28 = vld [vmem:[%s10395_s11 + $0xe0] sm:$0xff] }
  0x28   : > { %244 = vst [vmem:[%s10400_s12 + $0xd0] sm:$0xff] %v243_v26  ;;  %v249_v29 = vld [vmem:[%s10395_s11 + $0xe8] sm:$0xff]  ;;  %246 = vst [vmem:[%s10400_s12 + $0xd8] sm:$0xff] %v245_v27  ;;  %v251_v30 = vld [vmem:[%s10395_s11 + $0xf0] sm:$0xff] }
  0x29   : > { %248 = vst [vmem:[%s10400_s12 + $0xe0] sm:$0xff] %v247_v28  ;;  %250 = vst [vmem:[%s10400_s12 + $0xe8] sm:$0xff] %v249_v29  ;;  %v253_v31 = vld [vmem:[%s10395_s11 + $0xf8] sm:$0xff]  ;;  %v255_v32 = vld [vmem:[%s10395_s11 + $0x100] sm:$0xff] }
  0x2a   : > { %252 = vst [vmem:[%s10400_s12 + $0xf0] sm:$0xff] %v251_v30  ;;  %254 = vst [vmem:[%s10400_s12 + $0xf8] sm:$0xff] %v253_v31  ;;  %v257_v33 = vld [vmem:[%s10395_s11 + $0x108] sm:$0xff]  ;;  %v259_v34 = vld [vmem:[%s10395_s11 + $0x110] sm:$0xff] }
  0x2b   : > { %256 = vst [vmem:[%s10400_s12 + $0x100] sm:$0xff] %v255_v32  ;;  %v261_v35 = vld [vmem:[%s10395_s11 + $0x118] sm:$0xff]  ;;  %258 = vst [vmem:[%s10400_s12 + $0x108] sm:$0xff] %v257_v33  ;;  %v263_v36 = vld [vmem:[%s10395_s11 + $0x120] sm:$0xff] }
  0x2c   : > { %260 = vst [vmem:[%s10400_s12 + $0x110] sm:$0xff] %v259_v34  ;;  %262 = vst [vmem:[%s10400_s12 + $0x118] sm:$0xff] %v261_v35  ;;  %v265_v37 = vld [vmem:[%s10395_s11 + $0x128] sm:$0xff]  ;;  %v267_v38 = vld [vmem:[%s10395_s11 + $0x130] sm:$0xff] }
  0x2d   : > { %264 = vst [vmem:[%s10400_s12 + $0x120] sm:$0xff] %v263_v36  ;;  %266 = vst [vmem:[%s10400_s12 + $0x128] sm:$0xff] %v265_v37  ;;  %v269_v39 = vld [vmem:[%s10395_s11 + $0x138] sm:$0xff]  ;;  %v271_v40 = vld [vmem:[%s10395_s11 + $0x140] sm:$0xff] }
  0x2e   : > { %268 = vst [vmem:[%s10400_s12 + $0x130] sm:$0xff] %v267_v38  ;;  %v273_v41 = vld [vmem:[%s10395_s11 + $0x148] sm:$0xff]  ;;  %270 = vst [vmem:[%s10400_s12 + $0x138] sm:$0xff] %v269_v39  ;;  %v275_v42 = vld [vmem:[%s10395_s11 + $0x150] sm:$0xff] }
  0x2f   : > { %272 = vst [vmem:[%s10400_s12 + $0x140] sm:$0xff] %v271_v40  ;;  %274 = vst [vmem:[%s10400_s12 + $0x148] sm:$0xff] %v273_v41  ;;  %v277_v43 = vld [vmem:[%s10395_s11 + $0x158] sm:$0xff]  ;;  %v279_v44 = vld [vmem:[%s10395_s11 + $0x160] sm:$0xff] }
  0x30   : > { %276 = vst [vmem:[%s10400_s12 + $0x150] sm:$0xff] %v275_v42  ;;  %278 = vst [vmem:[%s10400_s12 + $0x158] sm:$0xff] %v277_v43  ;;  %v281_v45 = vld [vmem:[%s10395_s11 + $0x168] sm:$0xff]  ;;  %v283_v46 = vld [vmem:[%s10395_s11 + $0x170] sm:$0xff] }
  0x31   : > { %280 = vst [vmem:[%s10400_s12 + $0x160] sm:$0xff] %v279_v44  ;;  %v285_v47 = vld [vmem:[%s10395_s11 + $0x178] sm:$0xff]  ;;  %282 = vst [vmem:[%s10400_s12 + $0x168] sm:$0xff] %v281_v45  ;;  %v287_v48 = vld [vmem:[%s10395_s11 + $0x180] sm:$0xff] }
  0x32   : > { %284 = vst [vmem:[%s10400_s12 + $0x170] sm:$0xff] %v283_v46  ;;  %286 = vst [vmem:[%s10400_s12 + $0x178] sm:$0xff] %v285_v47  ;;  %v289_v49 = vld [vmem:[%s10395_s11 + $0x188] sm:$0xff]  ;;  %v291_v50 = vld [vmem:[%s10395_s11 + $0x190] sm:$0xff] }
  0x33   : > { %288 = vst [vmem:[%s10400_s12 + $0x180] sm:$0xff] %v287_v48  ;;  %290 = vst [vmem:[%s10400_s12 + $0x188] sm:$0xff] %v289_v49  ;;  %v293_v51 = vld [vmem:[%s10395_s11 + $0x4c8] sm:$0xff]  ;;  %v295_v52 = vld [vmem:[%s10395_s11 + $0x4d0] sm:$0xff] }
  0x34   : > { %292 = vst [vmem:[%s10400_s12 + $0x190] sm:$0xff] %v291_v50  ;;  %v297_v53 = vld [vmem:[%s10395_s11 + $0x4d8] sm:$0xff]  ;;  %294 = vst [vmem:[%s10400_s12 + $0x198] sm:$0xff] %v293_v51  ;;  %v299_v54 = vld [vmem:[%s10395_s11 + $0x4e0] sm:$0xff] }
  0x35   : > { %296 = vst [vmem:[%s10400_s12 + $0x1a0] sm:$0xff] %v295_v52  ;;  %298 = vst [vmem:[%s10400_s12 + $0x1a8] sm:$0xff] %v297_v53  ;;  %v301_v55 = vld [vmem:[%s10395_s11 + $0x4e8] sm:$0xff]  ;;  %v303_v56 = vld [vmem:[%s10395_s11 + $0x4f0] sm:$0xff] }
  0x36   : > { %300 = vst [vmem:[%s10400_s12 + $0x1b0] sm:$0xff] %v299_v54  ;;  %302 = vst [vmem:[%s10400_s12 + $0x1b8] sm:$0xff] %v301_v55  ;;  %v305_v57 = vld [vmem:[%s10395_s11 + $0x4f8] sm:$0xff]  ;;  %v307_v58 = vld [vmem:[%s10395_s11 + $0x500] sm:$0xff] }
  0x37   : > { %304 = vst [vmem:[%s10400_s12 + $0x1c0] sm:$0xff] %v303_v56  ;;  %v309_v59 = vld [vmem:[%s10395_s11 + $0x508] sm:$0xff]  ;;  %306 = vst [vmem:[%s10400_s12 + $0x1c8] sm:$0xff] %v305_v57  ;;  %v311_v60 = vld [vmem:[%s10395_s11 + $0x510] sm:$0xff] }
  0x38   : > { %308 = vst [vmem:[%s10400_s12 + $0x1d0] sm:$0xff] %v307_v58  ;;  %310 = vst [vmem:[%s10400_s12 + $0x1d8] sm:$0xff] %v309_v59  ;;  %v313_v61 = vld [vmem:[%s10395_s11 + $0x518] sm:$0xff]  ;;  %v315_v62 = vld [vmem:[%s10395_s11 + $0x520] sm:$0xff] }
  0x39   : > { %312 = vst [vmem:[%s10400_s12 + $0x1e0] sm:$0xff] %v311_v60  ;;  %314 = vst [vmem:[%s10400_s12 + $0x1e8] sm:$0xff] %v313_v61  ;;  %v317_v63 = vld [vmem:[%s10395_s11 + $0x528] sm:$0xff]  ;;  %v319_v0 = vld [vmem:[%s10395_s11 + $0x530] sm:$0xff] }
  0x3a   : > { %316 = vst [vmem:[%s10400_s12 + $0x1f0] sm:$0xff] %v315_v62  ;;  %v321_v1 = vld [vmem:[%s10395_s11 + $0x538] sm:$0xff]  ;;  %318 = vst [vmem:[%s10400_s12 + $0x1f8] sm:$0xff] %v317_v63  ;;  %v323_v2 = vld [vmem:[%s10395_s11 + $0x540] sm:$0xff] }
  0x3b   : > { %320 = vst [vmem:[%s10400_s12 + $0x200] sm:$0xff] %v319_v0  ;;  %322 = vst [vmem:[%s10400_s12 + $0x208] sm:$0xff] %v321_v1  ;;  %v325_v3 = vld [vmem:[%s10395_s11 + $0x548] sm:$0xff]  ;;  %v327_v4 = vld [vmem:[%s10395_s11 + $0x550] sm:$0xff] }
  0x3c   : > { %324 = vst [vmem:[%s10400_s12 + $0x210] sm:$0xff] %v323_v2  ;;  %326 = vst [vmem:[%s10400_s12 + $0x218] sm:$0xff] %v325_v3  ;;  %v329_v5 = vld [vmem:[%s10395_s11 + $0x558] sm:$0xff]  ;;  %v331_v6 = vld [vmem:[%s10395_s11 + $0x560] sm:$0xff] }
  0x3d   : > { %328 = vst [vmem:[%s10400_s12 + $0x220] sm:$0xff] %v327_v4  ;;  %v333_v7 = vld [vmem:[%s10395_s11 + $0x568] sm:$0xff]  ;;  %330 = vst [vmem:[%s10400_s12 + $0x228] sm:$0xff] %v329_v5  ;;  %v335_v8 = vld [vmem:[%s10395_s11 + $0x570] sm:$0xff] }
  0x3e   : > { %332 = vst [vmem:[%s10400_s12 + $0x230] sm:$0xff] %v331_v6  ;;  %334 = vst [vmem:[%s10400_s12 + $0x238] sm:$0xff] %v333_v7  ;;  %v337_v9 = vld [vmem:[%s10395_s11 + $0x578] sm:$0xff]  ;;  %v339_v10 = vld [vmem:[%s10395_s11 + $0x580] sm:$0xff] }
  0x3f   : > { %336 = vst [vmem:[%s10400_s12 + $0x240] sm:$0xff] %v335_v8  ;;  %338 = vst [vmem:[%s10400_s12 + $0x248] sm:$0xff] %v337_v9  ;;  %v341_v11 = vld [vmem:[%s10395_s11 + $0x588] sm:$0xff]  ;;  %v343_v12 = vld [vmem:[%s10395_s11 + $0x590] sm:$0xff] }
  0x40   : > { %340 = vst [vmem:[%s10400_s12 + $0x250] sm:$0xff] %v339_v10  ;;  %v345_v13 = vld [vmem:[%s10395_s11 + $0x598] sm:$0xff]  ;;  %342 = vst [vmem:[%s10400_s12 + $0x258] sm:$0xff] %v341_v11  ;;  %v347_v14 = vld [vmem:[%s10395_s11 + $0x5a0] sm:$0xff] }
  0x41   : > { %344 = vst [vmem:[%s10400_s12 + $0x260] sm:$0xff] %v343_v12  ;;  %346 = vst [vmem:[%s10400_s12 + $0x268] sm:$0xff] %v345_v13  ;;  %v349_v15 = vld [vmem:[%s10395_s11 + $0x5a8] sm:$0xff]  ;;  %v351_v16 = vld [vmem:[%s10395_s11 + $0x5b0] sm:$0xff] }
  0x42   : > { %348 = vst [vmem:[%s10400_s12 + $0x270] sm:$0xff] %v347_v14  ;;  %350 = vst [vmem:[%s10400_s12 + $0x278] sm:$0xff] %v349_v15  ;;  %v353_v17 = vld [vmem:[%s10395_s11 + $0x5b8] sm:$0xff]  ;;  %v355_v18 = vld [vmem:[%s10395_s11 + $0x5c0] sm:$0xff] }
  0x43   : > { %352 = vst [vmem:[%s10400_s12 + $0x280] sm:$0xff] %v351_v16  ;;  %v357_v19 = vld [vmem:[%s10395_s11 + $0x5c8] sm:$0xff]  ;;  %354 = vst [vmem:[%s10400_s12 + $0x288] sm:$0xff] %v353_v17  ;;  %v359_v20 = vld [vmem:[%s10395_s11 + $0x5d0] sm:$0xff] }
  0x44   : > { %356 = vst [vmem:[%s10400_s12 + $0x290] sm:$0xff] %v355_v18  ;;  %358 = vst [vmem:[%s10400_s12 + $0x298] sm:$0xff] %v357_v19  ;;  %v361_v21 = vld [vmem:[%s10395_s11 + $0x5d8] sm:$0xff]  ;;  %v363_v22 = vld [vmem:[%s10395_s11 + $0x5e0] sm:$0xff] }
  0x45   : > { %360 = vst [vmem:[%s10400_s12 + $0x2a0] sm:$0xff] %v359_v20  ;;  %362 = vst [vmem:[%s10400_s12 + $0x2a8] sm:$0xff] %v361_v21  ;;  %v365_v23 = vld [vmem:[%s10395_s11 + $0x5e8] sm:$0xff]  ;;  %v367_v24 = vld [vmem:[%s10395_s11 + $0x5f0] sm:$0xff] }
  0x46   : > { %364 = vst [vmem:[%s10400_s12 + $0x2b0] sm:$0xff] %v363_v22  ;;  %v369_v25 = vld [vmem:[%s10395_s11 + $0x5f8] sm:$0xff]  ;;  %366 = vst [vmem:[%s10400_s12 + $0x2b8] sm:$0xff] %v365_v23  ;;  %v371_v26 = vld [vmem:[%s10395_s11 + $0x600] sm:$0xff] }
  0x47   : > { %368 = vst [vmem:[%s10400_s12 + $0x2c0] sm:$0xff] %v367_v24  ;;  %370 = vst [vmem:[%s10400_s12 + $0x2c8] sm:$0xff] %v369_v25  ;;  %v373_v27 = vld [vmem:[%s10395_s11 + $0x608] sm:$0xff]  ;;  %v375_v28 = vld [vmem:[%s10395_s11 + $0x610] sm:$0xff] }
  0x48   : > { %372 = vst [vmem:[%s10400_s12 + $0x2d0] sm:$0xff] %v371_v26  ;;  %374 = vst [vmem:[%s10400_s12 + $0x2d8] sm:$0xff] %v373_v27  ;;  %v377_v29 = vld [vmem:[%s10395_s11 + $0x618] sm:$0xff]  ;;  %v379_v30 = vld [vmem:[%s10395_s11 + $0x620] sm:$0xff] }
  0x49   : > { %376 = vst [vmem:[%s10400_s12 + $0x2e0] sm:$0xff] %v375_v28  ;;  %v381_v31 = vld [vmem:[%s10395_s11 + $0x628] sm:$0xff]  ;;  %378 = vst [vmem:[%s10400_s12 + $0x2e8] sm:$0xff] %v377_v29  ;;  %v383_v32 = vld [vmem:[%s10395_s11 + $0x630] sm:$0xff] }
  0x4a   : > { %380 = vst [vmem:[%s10400_s12 + $0x2f0] sm:$0xff] %v379_v30  ;;  %382 = vst [vmem:[%s10400_s12 + $0x2f8] sm:$0xff] %v381_v31  ;;  %v385_v33 = vld [vmem:[%s10395_s11 + $0x638] sm:$0xff]  ;;  %v387_v34 = vld [vmem:[%s10395_s11 + $0x640] sm:$0xff] }
  0x4b   : > { %384 = vst [vmem:[%s10400_s12 + $0x300] sm:$0xff] %v383_v32  ;;  %386 = vst [vmem:[%s10400_s12 + $0x308] sm:$0xff] %v385_v33  ;;  %v389_v35 = vld [vmem:[%s10395_s11 + $0x648] sm:$0xff]  ;;  %v391_v36 = vld [vmem:[%s10395_s11 + $0x650] sm:$0xff] }
  0x4c   : > { %388 = vst [vmem:[%s10400_s12 + $0x310] sm:$0xff] %v387_v34  ;;  %v393_v37 = vld [vmem:[%s10395_s11 + $0x658] sm:$0xff]  ;;  %390 = vst [vmem:[%s10400_s12 + $0x318] sm:$0xff] %v389_v35  ;;  %v395_v38 = vld [vmem:[%s10395_s11 + $0x990] sm:$0xff] }
  0x4d   : > { %392 = vst [vmem:[%s10400_s12 + $0x320] sm:$0xff] %v391_v36  ;;  %394 = vst [vmem:[%s10400_s12 + $0x328] sm:$0xff] %v393_v37  ;;  %v397_v39 = vld [vmem:[%s10395_s11 + $0x998] sm:$0xff]  ;;  %v399_v40 = vld [vmem:[%s10395_s11 + $0x9a0] sm:$0xff] }
  0x4e   : > { %396 = vst [vmem:[%s10400_s12 + $0x330] sm:$0xff] %v395_v38  ;;  %398 = vst [vmem:[%s10400_s12 + $0x338] sm:$0xff] %v397_v39  ;;  %v401_v41 = vld [vmem:[%s10395_s11 + $0x9a8] sm:$0xff]  ;;  %v403_v42 = vld [vmem:[%s10395_s11 + $0x9b0] sm:$0xff] }
  0x4f   : > { %400 = vst [vmem:[%s10400_s12 + $0x340] sm:$0xff] %v399_v40  ;;  %v405_v43 = vld [vmem:[%s10395_s11 + $0x9b8] sm:$0xff]  ;;  %402 = vst [vmem:[%s10400_s12 + $0x348] sm:$0xff] %v401_v41  ;;  %v407_v44 = vld [vmem:[%s10395_s11 + $0x9c0] sm:$0xff] }
  0x50   : > { %404 = vst [vmem:[%s10400_s12 + $0x350] sm:$0xff] %v403_v42  ;;  %406 = vst [vmem:[%s10400_s12 + $0x358] sm:$0xff] %v405_v43  ;;  %v409_v45 = vld [vmem:[%s10395_s11 + $0x9c8] sm:$0xff]  ;;  %v411_v46 = vld [vmem:[%s10395_s11 + $0x9d0] sm:$0xff] }
  0x51   : > { %408 = vst [vmem:[%s10400_s12 + $0x360] sm:$0xff] %v407_v44  ;;  %410 = vst [vmem:[%s10400_s12 + $0x368] sm:$0xff] %v409_v45  ;;  %v413_v47 = vld [vmem:[%s10395_s11 + $0x9d8] sm:$0xff]  ;;  %v415_v48 = vld [vmem:[%s10395_s11 + $0x9e0] sm:$0xff] }
  0x52   : > { %412 = vst [vmem:[%s10400_s12 + $0x370] sm:$0xff] %v411_v46  ;;  %v417_v49 = vld [vmem:[%s10395_s11 + $0x9e8] sm:$0xff]  ;;  %414 = vst [vmem:[%s10400_s12 + $0x378] sm:$0xff] %v413_v47  ;;  %v419_v50 = vld [vmem:[%s10395_s11 + $0x9f0] sm:$0xff] }
  0x53   : > { %416 = vst [vmem:[%s10400_s12 + $0x380] sm:$0xff] %v415_v48  ;;  %418 = vst [vmem:[%s10400_s12 + $0x388] sm:$0xff] %v417_v49  ;;  %v421_v51 = vld [vmem:[%s10395_s11 + $0x9f8] sm:$0xff]  ;;  %v423_v52 = vld [vmem:[%s10395_s11 + $0xa00] sm:$0xff] }
  0x54   : > { %420 = vst [vmem:[%s10400_s12 + $0x390] sm:$0xff] %v419_v50  ;;  %422 = vst [vmem:[%s10400_s12 + $0x398] sm:$0xff] %v421_v51  ;;  %v425_v53 = vld [vmem:[%s10395_s11 + $0xa08] sm:$0xff]  ;;  %v427_v54 = vld [vmem:[%s10395_s11 + $0xa10] sm:$0xff] }
  0x55   : > { %424 = vst [vmem:[%s10400_s12 + $0x3a0] sm:$0xff] %v423_v52  ;;  %v429_v55 = vld [vmem:[%s10395_s11 + $0xa18] sm:$0xff]  ;;  %426 = vst [vmem:[%s10400_s12 + $0x3a8] sm:$0xff] %v425_v53  ;;  %v431_v56 = vld [vmem:[%s10395_s11 + $0xa20] sm:$0xff] }
  0x56   : > { %428 = vst [vmem:[%s10400_s12 + $0x3b0] sm:$0xff] %v427_v54  ;;  %430 = vst [vmem:[%s10400_s12 + $0x3b8] sm:$0xff] %v429_v55  ;;  %v433_v57 = vld [vmem:[%s10395_s11 + $0xa28] sm:$0xff]  ;;  %v435_v58 = vld [vmem:[%s10395_s11 + $0xa30] sm:$0xff] }
  0x57   : > { %432 = vst [vmem:[%s10400_s12 + $0x3c0] sm:$0xff] %v431_v56  ;;  %434 = vst [vmem:[%s10400_s12 + $0x3c8] sm:$0xff] %v433_v57  ;;  %v437_v59 = vld [vmem:[%s10395_s11 + $0xa38] sm:$0xff]  ;;  %v439_v60 = vld [vmem:[%s10395_s11 + $0xa40] sm:$0xff] }
  0x58   : > { %436 = vst [vmem:[%s10400_s12 + $0x3d0] sm:$0xff] %v435_v58  ;;  %v441_v61 = vld [vmem:[%s10395_s11 + $0xa48] sm:$0xff]  ;;  %438 = vst [vmem:[%s10400_s12 + $0x3d8] sm:$0xff] %v437_v59  ;;  %v443_v62 = vld [vmem:[%s10395_s11 + $0xa50] sm:$0xff] }
  0x59   : > { %440 = vst [vmem:[%s10400_s12 + $0x3e0] sm:$0xff] %v439_v60  ;;  %442 = vst [vmem:[%s10400_s12 + $0x3e8] sm:$0xff] %v441_v61  ;;  %v445_v63 = vld [vmem:[%s10395_s11 + $0xa58] sm:$0xff]  ;;  %v447_v0 = vld [vmem:[%s10395_s11 + $0xa60] sm:$0xff] }
  0x5a   : > { %444 = vst [vmem:[%s10400_s12 + $0x3f0] sm:$0xff] %v443_v62  ;;  %446 = vst [vmem:[%s10400_s12 + $0x3f8] sm:$0xff] %v445_v63  ;;  %v449_v1 = vld [vmem:[%s10395_s11 + $0xa68] sm:$0xff]  ;;  %v451_v2 = vld [vmem:[%s10395_s11 + $0xa70] sm:$0xff] }
  0x5b   : > { %448 = vst [vmem:[%s10400_s12 + $0x400] sm:$0xff] %v447_v0  ;;  %v453_v3 = vld [vmem:[%s10395_s11 + $0xa78] sm:$0xff]  ;;  %450 = vst [vmem:[%s10400_s12 + $0x408] sm:$0xff] %v449_v1  ;;  %v455_v4 = vld [vmem:[%s10395_s11 + $0xa80] sm:$0xff] }
  0x5c   : > { %452 = vst [vmem:[%s10400_s12 + $0x410] sm:$0xff] %v451_v2  ;;  %454 = vst [vmem:[%s10400_s12 + $0x418] sm:$0xff] %v453_v3  ;;  %v457_v5 = vld [vmem:[%s10395_s11 + $0xa88] sm:$0xff]  ;;  %v459_v6 = vld [vmem:[%s10395_s11 + $0xa90] sm:$0xff] }
  0x5d   : > { %456 = vst [vmem:[%s10400_s12 + $0x420] sm:$0xff] %v455_v4  ;;  %458 = vst [vmem:[%s10400_s12 + $0x428] sm:$0xff] %v457_v5  ;;  %v461_v7 = vld [vmem:[%s10395_s11 + $0xa98] sm:$0xff]  ;;  %v463_v8 = vld [vmem:[%s10395_s11 + $0xaa0] sm:$0xff] }
  0x5e   : > { %460 = vst [vmem:[%s10400_s12 + $0x430] sm:$0xff] %v459_v6  ;;  %v465_v9 = vld [vmem:[%s10395_s11 + $0xaa8] sm:$0xff]  ;;  %462 = vst [vmem:[%s10400_s12 + $0x438] sm:$0xff] %v461_v7  ;;  %v467_v10 = vld [vmem:[%s10395_s11 + $0xab0] sm:$0xff] }
  0x5f   : > { %464 = vst [vmem:[%s10400_s12 + $0x440] sm:$0xff] %v463_v8  ;;  %466 = vst [vmem:[%s10400_s12 + $0x448] sm:$0xff] %v465_v9  ;;  %v469_v11 = vld [vmem:[%s10395_s11 + $0xab8] sm:$0xff]  ;;  %v471_v12 = vld [vmem:[%s10395_s11 + $0xac0] sm:$0xff] }
  0x60   : > { %468 = vst [vmem:[%s10400_s12 + $0x450] sm:$0xff] %v467_v10  ;;  %470 = vst [vmem:[%s10400_s12 + $0x458] sm:$0xff] %v469_v11  ;;  %v473_v13 = vld [vmem:[%s10395_s11 + $0xac8] sm:$0xff]  ;;  %v475_v14 = vld [vmem:[%s10395_s11 + $0xad0] sm:$0xff] }
  0x61   : > { %472 = vst [vmem:[%s10400_s12 + $0x460] sm:$0xff] %v471_v12  ;;  %v477_v15 = vld [vmem:[%s10395_s11 + $0xad8] sm:$0xff]  ;;  %474 = vst [vmem:[%s10400_s12 + $0x468] sm:$0xff] %v473_v13  ;;  %v479_v16 = vld [vmem:[%s10395_s11 + $0xae0] sm:$0xff] }
  0x62   : > { %476 = vst [vmem:[%s10400_s12 + $0x470] sm:$0xff] %v475_v14  ;;  %478 = vst [vmem:[%s10400_s12 + $0x478] sm:$0xff] %v477_v15  ;;  %v481_v17 = vld [vmem:[%s10395_s11 + $0xae8] sm:$0xff]  ;;  %v483_v18 = vld [vmem:[%s10395_s11 + $0xaf0] sm:$0xff] }
  0x63   : > { %480 = vst [vmem:[%s10400_s12 + $0x480] sm:$0xff] %v479_v16  ;;  %482 = vst [vmem:[%s10400_s12 + $0x488] sm:$0xff] %v481_v17  ;;  %v485_v19 = vld [vmem:[%s10395_s11 + $0xaf8] sm:$0xff]  ;;  %v487_v20 = vld [vmem:[%s10395_s11 + $0xb00] sm:$0xff] }
  0x64   : > { %484 = vst [vmem:[%s10400_s12 + $0x490] sm:$0xff] %v483_v18  ;;  %v489_v21 = vld [vmem:[%s10395_s11 + $0xb08] sm:$0xff]  ;;  %486 = vst [vmem:[%s10400_s12 + $0x498] sm:$0xff] %v485_v19  ;;  %v491_v22 = vld [vmem:[%s10395_s11 + $0xb10] sm:$0xff] }
  0x65   : > { %488 = vst [vmem:[%s10400_s12 + $0x4a0] sm:$0xff] %v487_v20  ;;  %490 = vst [vmem:[%s10400_s12 + $0x4a8] sm:$0xff] %v489_v21  ;;  %v493_v23 = vld [vmem:[%s10395_s11 + $0xb18] sm:$0xff]  ;;  %v495_v24 = vld [vmem:[%s10395_s11 + $0xb20] sm:$0xff] }
  0x66   : > { %492 = vst [vmem:[%s10400_s12 + $0x4b0] sm:$0xff] %v491_v22  ;;  %494 = vst [vmem:[%s10400_s12 + $0x4b8] sm:$0xff] %v493_v23  ;;  %v497_v25 = vld [vmem:[%s10395_s11 + $0xe58] sm:$0xff]  ;;  %v499_v26 = vld [vmem:[%s10395_s11 + $0xe60] sm:$0xff] }
  0x67   : > { %496 = vst [vmem:[%s10400_s12 + $0x4c0] sm:$0xff] %v495_v24  ;;  %v501_v27 = vld [vmem:[%s10395_s11 + $0xe68] sm:$0xff]  ;;  %498 = vst [vmem:[%s10400_s12 + $0x4c8] sm:$0xff] %v497_v25  ;;  %v503_v28 = vld [vmem:[%s10395_s11 + $0xe70] sm:$0xff] }
  0x68   : > { %500 = vst [vmem:[%s10400_s12 + $0x4d0] sm:$0xff] %v499_v26  ;;  %502 = vst [vmem:[%s10400_s12 + $0x4d8] sm:$0xff] %v501_v27  ;;  %v505_v29 = vld [vmem:[%s10395_s11 + $0xe78] sm:$0xff]  ;;  %v507_v30 = vld [vmem:[%s10395_s11 + $0xe80] sm:$0xff] }
  0x69   : > { %504 = vst [vmem:[%s10400_s12 + $0x4e0] sm:$0xff] %v503_v28  ;;  %506 = vst [vmem:[%s10400_s12 + $0x4e8] sm:$0xff] %v505_v29  ;;  %v509_v31 = vld [vmem:[%s10395_s11 + $0xe88] sm:$0xff]  ;;  %v511_v32 = vld [vmem:[%s10395_s11 + $0xe90] sm:$0xff] }
  0x6a   : > { %508 = vst [vmem:[%s10400_s12 + $0x4f0] sm:$0xff] %v507_v30  ;;  %v513_v33 = vld [vmem:[%s10395_s11 + $0xe98] sm:$0xff]  ;;  %510 = vst [vmem:[%s10400_s12 + $0x4f8] sm:$0xff] %v509_v31  ;;  %v515_v34 = vld [vmem:[%s10395_s11 + $0xea0] sm:$0xff] }
  0x6b   : > { %512 = vst [vmem:[%s10400_s12 + $0x500] sm:$0xff] %v511_v32  ;;  %514 = vst [vmem:[%s10400_s12 + $0x508] sm:$0xff] %v513_v33  ;;  %v517_v35 = vld [vmem:[%s10395_s11 + $0xea8] sm:$0xff]  ;;  %v519_v36 = vld [vmem:[%s10395_s11 + $0xeb0] sm:$0xff] }
  0x6c   : > { %516 = vst [vmem:[%s10400_s12 + $0x510] sm:$0xff] %v515_v34  ;;  %518 = vst [vmem:[%s10400_s12 + $0x518] sm:$0xff] %v517_v35  ;;  %v521_v37 = vld [vmem:[%s10395_s11 + $0xeb8] sm:$0xff]  ;;  %v523_v38 = vld [vmem:[%s10395_s11 + $0xec0] sm:$0xff] }
  0x6d   : > { %520 = vst [vmem:[%s10400_s12 + $0x520] sm:$0xff] %v519_v36  ;;  %v525_v39 = vld [vmem:[%s10395_s11 + $0xec8] sm:$0xff]  ;;  %522 = vst [vmem:[%s10400_s12 + $0x528] sm:$0xff] %v521_v37  ;;  %v527_v40 = vld [vmem:[%s10395_s11 + $0xed0] sm:$0xff] }
  0x6e   : > { %524 = vst [vmem:[%s10400_s12 + $0x530] sm:$0xff] %v523_v38  ;;  %526 = vst [vmem:[%s10400_s12 + $0x538] sm:$0xff] %v525_v39  ;;  %v529_v41 = vld [vmem:[%s10395_s11 + $0xed8] sm:$0xff]  ;;  %v531_v42 = vld [vmem:[%s10395_s11 + $0xee0] sm:$0xff] }
  0x6f   : > { %528 = vst [vmem:[%s10400_s12 + $0x540] sm:$0xff] %v527_v40  ;;  %530 = vst [vmem:[%s10400_s12 + $0x548] sm:$0xff] %v529_v41  ;;  %v533_v43 = vld [vmem:[%s10395_s11 + $0xee8] sm:$0xff]  ;;  %v535_v44 = vld [vmem:[%s10395_s11 + $0xef0] sm:$0xff] }
  0x70   : > { %532 = vst [vmem:[%s10400_s12 + $0x550] sm:$0xff] %v531_v42  ;;  %v537_v45 = vld [vmem:[%s10395_s11 + $0xef8] sm:$0xff]  ;;  %534 = vst [vmem:[%s10400_s12 + $0x558] sm:$0xff] %v533_v43  ;;  %v539_v46 = vld [vmem:[%s10395_s11 + $0xf00] sm:$0xff] }
  0x71   : > { %536 = vst [vmem:[%s10400_s12 + $0x560] sm:$0xff] %v535_v44  ;;  %538 = vst [vmem:[%s10400_s12 + $0x568] sm:$0xff] %v537_v45  ;;  %v541_v47 = vld [vmem:[%s10395_s11 + $0xf08] sm:$0xff]  ;;  %v543_v48 = vld [vmem:[%s10395_s11 + $0xf10] sm:$0xff] }
  0x72   : > { %540 = vst [vmem:[%s10400_s12 + $0x570] sm:$0xff] %v539_v46  ;;  %542 = vst [vmem:[%s10400_s12 + $0x578] sm:$0xff] %v541_v47  ;;  %v545_v49 = vld [vmem:[%s10395_s11 + $0xf18] sm:$0xff]  ;;  %v547_v50 = vld [vmem:[%s10395_s11 + $0xf20] sm:$0xff] }
  0x73   : > { %544 = vst [vmem:[%s10400_s12 + $0x580] sm:$0xff] %v543_v48  ;;  %v549_v51 = vld [vmem:[%s10395_s11 + $0xf28] sm:$0xff]  ;;  %546 = vst [vmem:[%s10400_s12 + $0x588] sm:$0xff] %v545_v49  ;;  %v551_v52 = vld [vmem:[%s10395_s11 + $0xf30] sm:$0xff] }
  0x74   : > { %548 = vst [vmem:[%s10400_s12 + $0x590] sm:$0xff] %v547_v50  ;;  %550 = vst [vmem:[%s10400_s12 + $0x598] sm:$0xff] %v549_v51  ;;  %v553_v53 = vld [vmem:[%s10395_s11 + $0xf38] sm:$0xff]  ;;  %v555_v54 = vld [vmem:[%s10395_s11 + $0xf40] sm:$0xff] }
  0x75   : > { %552 = vst [vmem:[%s10400_s12 + $0x5a0] sm:$0xff] %v551_v52  ;;  %554 = vst [vmem:[%s10400_s12 + $0x5a8] sm:$0xff] %v553_v53  ;;  %v557_v55 = vld [vmem:[%s10395_s11 + $0xf48] sm:$0xff]  ;;  %v559_v56 = vld [vmem:[%s10395_s11 + $0xf50] sm:$0xff] }
  0x76   : > { %556 = vst [vmem:[%s10400_s12 + $0x5b0] sm:$0xff] %v555_v54  ;;  %v561_v57 = vld [vmem:[%s10395_s11 + $0xf58] sm:$0xff]  ;;  %558 = vst [vmem:[%s10400_s12 + $0x5b8] sm:$0xff] %v557_v55  ;;  %v563_v58 = vld [vmem:[%s10395_s11 + $0xf60] sm:$0xff] }
  0x77   : > { %560 = vst [vmem:[%s10400_s12 + $0x5c0] sm:$0xff] %v559_v56  ;;  %562 = vst [vmem:[%s10400_s12 + $0x5c8] sm:$0xff] %v561_v57  ;;  %v565_v59 = vld [vmem:[%s10395_s11 + $0xf68] sm:$0xff]  ;;  %v567_v60 = vld [vmem:[%s10395_s11 + $0xf70] sm:$0xff] }
  0x78   : > { %564 = vst [vmem:[%s10400_s12 + $0x5d0] sm:$0xff] %v563_v58  ;;  %566 = vst [vmem:[%s10400_s12 + $0x5d8] sm:$0xff] %v565_v59  ;;  %v569_v61 = vld [vmem:[%s10395_s11 + $0xf78] sm:$0xff]  ;;  %v571_v62 = vld [vmem:[%s10395_s11 + $0xf80] sm:$0xff] }
  0x79   : > { %568 = vst [vmem:[%s10400_s12 + $0x5e0] sm:$0xff] %v567_v60  ;;  %v573_v63 = vld [vmem:[%s10395_s11 + $0xf88] sm:$0xff]  ;;  %570 = vst [vmem:[%s10400_s12 + $0x5e8] sm:$0xff] %v569_v61  ;;  %v575_v0 = vld [vmem:[%s10395_s11 + $0xf90] sm:$0xff] }
  0x7a   : > { %572 = vst [vmem:[%s10400_s12 + $0x5f0] sm:$0xff] %v571_v62  ;;  %574 = vst [vmem:[%s10400_s12 + $0x5f8] sm:$0xff] %v573_v63  ;;  %v577_v1 = vld [vmem:[%s10395_s11 + $0xf98] sm:$0xff]  ;;  %v579_v2 = vld [vmem:[%s10395_s11 + $0xfa0] sm:$0xff] }
  0x7b   : > { %576 = vst [vmem:[%s10400_s12 + $0x600] sm:$0xff] %v575_v0  ;;  %578 = vst [vmem:[%s10400_s12 + $0x608] sm:$0xff] %v577_v1  ;;  %v581_v3 = vld [vmem:[%s10395_s11 + $0xfa8] sm:$0xff]  ;;  %v583_v4 = vld [vmem:[%s10395_s11 + $0xfb0] sm:$0xff] }
  0x7c   : > { %580 = vst [vmem:[%s10400_s12 + $0x610] sm:$0xff] %v579_v2  ;;  %v585_v5 = vld [vmem:[%s10395_s11 + $0xfb8] sm:$0xff]  ;;  %582 = vst [vmem:[%s10400_s12 + $0x618] sm:$0xff] %v581_v3  ;;  %v587_v6 = vld [vmem:[%s10395_s11 + $0xfc0] sm:$0xff] }
  0x7d   : > { %584 = vst [vmem:[%s10400_s12 + $0x620] sm:$0xff] %v583_v4  ;;  %586 = vst [vmem:[%s10400_s12 + $0x628] sm:$0xff] %v585_v5  ;;  %v589_v7 = vld [vmem:[%s10395_s11 + $0xfc8] sm:$0xff]  ;;  %v591_v8 = vld [vmem:[%s10395_s11 + $0xfd0] sm:$0xff] }
  0x7e   : > { %588 = vst [vmem:[%s10400_s12 + $0x630] sm:$0xff] %v587_v6  ;;  %590 = vst [vmem:[%s10400_s12 + $0x638] sm:$0xff] %v589_v7  ;;  %v593_v9 = vld [vmem:[%s10395_s11 + $0xfd8] sm:$0xff]  ;;  %v595_v10 = vld [vmem:[%s10395_s11 + $0xfe0] sm:$0xff] }
  0x7f   : > { %592 = vst [vmem:[%s10400_s12 + $0x640] sm:$0xff] %v591_v8  ;;  %v597_v11 = vld [vmem:[%s10395_s11 + $0xfe8] sm:$0xff]  ;;  %594 = vst [vmem:[%s10400_s12 + $0x648] sm:$0xff] %v593_v9  ;;  %v599_v12 = vld [vmem:[%s10395_s11 + $0x1320] sm:$0xff] }
  0x80   : > { %596 = vst [vmem:[%s10400_s12 + $0x650] sm:$0xff] %v595_v10  ;;  %598 = vst [vmem:[%s10400_s12 + $0x658] sm:$0xff] %v597_v11  ;;  %v601_v13 = vld [vmem:[%s10395_s11 + $0x1328] sm:$0xff]  ;;  %v603_v14 = vld [vmem:[%s10395_s11 + $0x1330] sm:$0xff] }
  0x81   : > { %600 = vst [vmem:[%s10400_s12 + $0x660] sm:$0xff] %v599_v12  ;;  %602 = vst [vmem:[%s10400_s12 + $0x668] sm:$0xff] %v601_v13  ;;  %v605_v15 = vld [vmem:[%s10395_s11 + $0x1338] sm:$0xff]  ;;  %v607_v16 = vld [vmem:[%s10395_s11 + $0x1340] sm:$0xff] }
  0x82   : > { %604 = vst [vmem:[%s10400_s12 + $0x670] sm:$0xff] %v603_v14  ;;  %v609_v17 = vld [vmem:[%s10395_s11 + $0x1348] sm:$0xff]  ;;  %606 = vst [vmem:[%s10400_s12 + $0x678] sm:$0xff] %v605_v15  ;;  %v611_v18 = vld [vmem:[%s10395_s11 + $0x1350] sm:$0xff] }
  0x83   : > { %608 = vst [vmem:[%s10400_s12 + $0x680] sm:$0xff] %v607_v16  ;;  %610 = vst [vmem:[%s10400_s12 + $0x688] sm:$0xff] %v609_v17  ;;  %v613_v19 = vld [vmem:[%s10395_s11 + $0x1358] sm:$0xff]  ;;  %v615_v20 = vld [vmem:[%s10395_s11 + $0x1360] sm:$0xff] }
  0x84   : > { %612 = vst [vmem:[%s10400_s12 + $0x690] sm:$0xff] %v611_v18  ;;  %614 = vst [vmem:[%s10400_s12 + $0x698] sm:$0xff] %v613_v19  ;;  %v617_v21 = vld [vmem:[%s10395_s11 + $0x1368] sm:$0xff]  ;;  %v619_v22 = vld [vmem:[%s10395_s11 + $0x1370] sm:$0xff] }
  0x85   : > { %616 = vst [vmem:[%s10400_s12 + $0x6a0] sm:$0xff] %v615_v20  ;;  %v621_v23 = vld [vmem:[%s10395_s11 + $0x1378] sm:$0xff]  ;;  %618 = vst [vmem:[%s10400_s12 + $0x6a8] sm:$0xff] %v617_v21  ;;  %v623_v24 = vld [vmem:[%s10395_s11 + $0x1380] sm:$0xff] }
  0x86   : > { %620 = vst [vmem:[%s10400_s12 + $0x6b0] sm:$0xff] %v619_v22  ;;  %622 = vst [vmem:[%s10400_s12 + $0x6b8] sm:$0xff] %v621_v23  ;;  %v625_v25 = vld [vmem:[%s10395_s11 + $0x1388] sm:$0xff]  ;;  %v627_v26 = vld [vmem:[%s10395_s11 + $0x1390] sm:$0xff] }
  0x87   : > { %624 = vst [vmem:[%s10400_s12 + $0x6c0] sm:$0xff] %v623_v24  ;;  %626 = vst [vmem:[%s10400_s12 + $0x6c8] sm:$0xff] %v625_v25  ;;  %v629_v27 = vld [vmem:[%s10395_s11 + $0x1398] sm:$0xff]  ;;  %v631_v28 = vld [vmem:[%s10395_s11 + $0x13a0] sm:$0xff] }
  0x88   : > { %628 = vst [vmem:[%s10400_s12 + $0x6d0] sm:$0xff] %v627_v26  ;;  %v633_v29 = vld [vmem:[%s10395_s11 + $0x13a8] sm:$0xff]  ;;  %630 = vst [vmem:[%s10400_s12 + $0x6d8] sm:$0xff] %v629_v27  ;;  %v635_v30 = vld [vmem:[%s10395_s11 + $0x13b0] sm:$0xff] }
  0x89   : > { %632 = vst [vmem:[%s10400_s12 + $0x6e0] sm:$0xff] %v631_v28  ;;  %634 = vst [vmem:[%s10400_s12 + $0x6e8] sm:$0xff] %v633_v29  ;;  %v637_v31 = vld [vmem:[%s10395_s11 + $0x13b8] sm:$0xff]  ;;  %v639_v32 = vld [vmem:[%s10395_s11 + $0x13c0] sm:$0xff] }
  0x8a   : > { %636 = vst [vmem:[%s10400_s12 + $0x6f0] sm:$0xff] %v635_v30  ;;  %638 = vst [vmem:[%s10400_s12 + $0x6f8] sm:$0xff] %v637_v31  ;;  %v641_v33 = vld [vmem:[%s10395_s11 + $0x13c8] sm:$0xff]  ;;  %v643_v34 = vld [vmem:[%s10395_s11 + $0x13d0] sm:$0xff] }
  0x8b   : > { %640 = vst [vmem:[%s10400_s12 + $0x700] sm:$0xff] %v639_v32  ;;  %v645_v35 = vld [vmem:[%s10395_s11 + $0x13d8] sm:$0xff]  ;;  %642 = vst [vmem:[%s10400_s12 + $0x708] sm:$0xff] %v641_v33  ;;  %v647_v36 = vld [vmem:[%s10395_s11 + $0x13e0] sm:$0xff] }
  0x8c   : > { %644 = vst [vmem:[%s10400_s12 + $0x710] sm:$0xff] %v643_v34  ;;  %646 = vst [vmem:[%s10400_s12 + $0x718] sm:$0xff] %v645_v35  ;;  %v649_v37 = vld [vmem:[%s10395_s11 + $0x13e8] sm:$0xff]  ;;  %v651_v38 = vld [vmem:[%s10395_s11 + $0x13f0] sm:$0xff] }
  0x8d   : > { %648 = vst [vmem:[%s10400_s12 + $0x720] sm:$0xff] %v647_v36  ;;  %650 = vst [vmem:[%s10400_s12 + $0x728] sm:$0xff] %v649_v37  ;;  %v653_v39 = vld [vmem:[%s10395_s11 + $0x13f8] sm:$0xff]  ;;  %v655_v40 = vld [vmem:[%s10395_s11 + $0x1400] sm:$0xff] }
  0x8e   : > { %652 = vst [vmem:[%s10400_s12 + $0x730] sm:$0xff] %v651_v38  ;;  %v657_v41 = vld [vmem:[%s10395_s11 + $0x1408] sm:$0xff]  ;;  %654 = vst [vmem:[%s10400_s12 + $0x738] sm:$0xff] %v653_v39  ;;  %v659_v42 = vld [vmem:[%s10395_s11 + $0x1410] sm:$0xff] }
  0x8f   : > { %656 = vst [vmem:[%s10400_s12 + $0x740] sm:$0xff] %v655_v40  ;;  %658 = vst [vmem:[%s10400_s12 + $0x748] sm:$0xff] %v657_v41  ;;  %v661_v43 = vld [vmem:[%s10395_s11 + $0x1418] sm:$0xff]  ;;  %v663_v44 = vld [vmem:[%s10395_s11 + $0x1420] sm:$0xff] }
  0x90   : > { %660 = vst [vmem:[%s10400_s12 + $0x750] sm:$0xff] %v659_v42  ;;  %662 = vst [vmem:[%s10400_s12 + $0x758] sm:$0xff] %v661_v43  ;;  %v665_v45 = vld [vmem:[%s10395_s11 + $0x1428] sm:$0xff]  ;;  %v667_v46 = vld [vmem:[%s10395_s11 + $0x1430] sm:$0xff] }
  0x91   : > { %664 = vst [vmem:[%s10400_s12 + $0x760] sm:$0xff] %v663_v44  ;;  %v669_v47 = vld [vmem:[%s10395_s11 + $0x1438] sm:$0xff]  ;;  %666 = vst [vmem:[%s10400_s12 + $0x768] sm:$0xff] %v665_v45  ;;  %v671_v48 = vld [vmem:[%s10395_s11 + $0x1440] sm:$0xff] }
  0x92   : > { %668 = vst [vmem:[%s10400_s12 + $0x770] sm:$0xff] %v667_v46  ;;  %670 = vst [vmem:[%s10400_s12 + $0x778] sm:$0xff] %v669_v47  ;;  %v673_v49 = vld [vmem:[%s10395_s11 + $0x1448] sm:$0xff]  ;;  %v675_v50 = vld [vmem:[%s10395_s11 + $0x1450] sm:$0xff] }
  0x93   : > { %672 = vst [vmem:[%s10400_s12 + $0x780] sm:$0xff] %v671_v48  ;;  %674 = vst [vmem:[%s10400_s12 + $0x788] sm:$0xff] %v673_v49  ;;  %v677_v51 = vld [vmem:[%s10395_s11 + $0x1458] sm:$0xff]  ;;  %v679_v52 = vld [vmem:[%s10395_s11 + $0x1460] sm:$0xff] }
  0x94   : > { %676 = vst [vmem:[%s10400_s12 + $0x790] sm:$0xff] %v675_v50  ;;  %v681_v53 = vld [vmem:[%s10395_s11 + $0x1468] sm:$0xff]  ;;  %678 = vst [vmem:[%s10400_s12 + $0x798] sm:$0xff] %v677_v51  ;;  %v683_v54 = vld [vmem:[%s10395_s11 + $0x1470] sm:$0xff] }
  0x95   : > { %680 = vst [vmem:[%s10400_s12 + $0x7a0] sm:$0xff] %v679_v52  ;;  %682 = vst [vmem:[%s10400_s12 + $0x7a8] sm:$0xff] %v681_v53  ;;  %v685_v55 = vld [vmem:[%s10395_s11 + $0x1478] sm:$0xff]  ;;  %v687_v56 = vld [vmem:[%s10395_s11 + $0x1480] sm:$0xff] }
  0x96   : > { %684 = vst [vmem:[%s10400_s12 + $0x7b0] sm:$0xff] %v683_v54  ;;  %686 = vst [vmem:[%s10400_s12 + $0x7b8] sm:$0xff] %v685_v55  ;;  %v689_v57 = vld [vmem:[%s10395_s11 + $0x1488] sm:$0xff]  ;;  %v691_v58 = vld [vmem:[%s10395_s11 + $0x1490] sm:$0xff] }
  0x97   : > { %688 = vst [vmem:[%s10400_s12 + $0x7c0] sm:$0xff] %v687_v56  ;;  %v693_v59 = vld [vmem:[%s10395_s11 + $0x1498] sm:$0xff]  ;;  %690 = vst [vmem:[%s10400_s12 + $0x7c8] sm:$0xff] %v689_v57  ;;  %v695_v60 = vld [vmem:[%s10395_s11 + $0x14a0] sm:$0xff] }
  0x98   : > { %692 = vst [vmem:[%s10400_s12 + $0x7d0] sm:$0xff] %v691_v58  ;;  %694 = vst [vmem:[%s10400_s12 + $0x7d8] sm:$0xff] %v693_v59  ;;  %v697_v61 = vld [vmem:[%s10395_s11 + $0x14a8] sm:$0xff]  ;;  %v699_v62 = vld [vmem:[%s10395_s11 + $0x14b0] sm:$0xff] }
  0x99   : > { %696 = vst [vmem:[%s10400_s12 + $0x7e0] sm:$0xff] %v695_v60  ;;  %698 = vst [vmem:[%s10400_s12 + $0x7e8] sm:$0xff] %v697_v61  ;;  %v701_v63 = vld [vmem:[%s10395_s11 + $0x17e8] sm:$0xff]  ;;  %v703_v0 = vld [vmem:[%s10395_s11 + $0x17f0] sm:$0xff] }
  0x9a   : > { %700 = vst [vmem:[%s10400_s12 + $0x7f0] sm:$0xff] %v699_v62  ;;  %v705_v1 = vld [vmem:[%s10395_s11 + $0x17f8] sm:$0xff]  ;;  %702 = vst [vmem:[%s10400_s12 + $0x7f8] sm:$0xff] %v701_v63  ;;  %v707_v2 = vld [vmem:[%s10395_s11 + $0x1800] sm:$0xff] }
  0x9b   : > { %704 = vst [vmem:[%s10400_s12 + $0x800] sm:$0xff] %v703_v0  ;;  %706 = vst [vmem:[%s10400_s12 + $0x808] sm:$0xff] %v705_v1  ;;  %v709_v3 = vld [vmem:[%s10395_s11 + $0x1808] sm:$0xff]  ;;  %v711_v4 = vld [vmem:[%s10395_s11 + $0x1810] sm:$0xff] }
  0x9c   : > { %708 = vst [vmem:[%s10400_s12 + $0x810] sm:$0xff] %v707_v2  ;;  %710 = vst [vmem:[%s10400_s12 + $0x818] sm:$0xff] %v709_v3  ;;  %v713_v5 = vld [vmem:[%s10395_s11 + $0x1818] sm:$0xff]  ;;  %v715_v6 = vld [vmem:[%s10395_s11 + $0x1820] sm:$0xff] }
  0x9d   : > { %712 = vst [vmem:[%s10400_s12 + $0x820] sm:$0xff] %v711_v4  ;;  %v717_v7 = vld [vmem:[%s10395_s11 + $0x1828] sm:$0xff]  ;;  %714 = vst [vmem:[%s10400_s12 + $0x828] sm:$0xff] %v713_v5  ;;  %v719_v8 = vld [vmem:[%s10395_s11 + $0x1830] sm:$0xff] }
  0x9e   : > { %716 = vst [vmem:[%s10400_s12 + $0x830] sm:$0xff] %v715_v6  ;;  %718 = vst [vmem:[%s10400_s12 + $0x838] sm:$0xff] %v717_v7  ;;  %v721_v9 = vld [vmem:[%s10395_s11 + $0x1838] sm:$0xff]  ;;  %v723_v10 = vld [vmem:[%s10395_s11 + $0x1840] sm:$0xff] }
  0x9f   : > { %720 = vst [vmem:[%s10400_s12 + $0x840] sm:$0xff] %v719_v8  ;;  %722 = vst [vmem:[%s10400_s12 + $0x848] sm:$0xff] %v721_v9  ;;  %v725_v11 = vld [vmem:[%s10395_s11 + $0x1848] sm:$0xff]  ;;  %v727_v12 = vld [vmem:[%s10395_s11 + $0x1850] sm:$0xff] }
  0xa0   : > { %724 = vst [vmem:[%s10400_s12 + $0x850] sm:$0xff] %v723_v10  ;;  %v729_v13 = vld [vmem:[%s10395_s11 + $0x1858] sm:$0xff]  ;;  %726 = vst [vmem:[%s10400_s12 + $0x858] sm:$0xff] %v725_v11  ;;  %v731_v14 = vld [vmem:[%s10395_s11 + $0x1860] sm:$0xff] }
  0xa1   : > { %728 = vst [vmem:[%s10400_s12 + $0x860] sm:$0xff] %v727_v12  ;;  %730 = vst [vmem:[%s10400_s12 + $0x868] sm:$0xff] %v729_v13  ;;  %v733_v15 = vld [vmem:[%s10395_s11 + $0x1868] sm:$0xff]  ;;  %v735_v16 = vld [vmem:[%s10395_s11 + $0x1870] sm:$0xff] }
  0xa2   : > { %732 = vst [vmem:[%s10400_s12 + $0x870] sm:$0xff] %v731_v14  ;;  %734 = vst [vmem:[%s10400_s12 + $0x878] sm:$0xff] %v733_v15  ;;  %v737_v17 = vld [vmem:[%s10395_s11 + $0x1878] sm:$0xff]  ;;  %v739_v18 = vld [vmem:[%s10395_s11 + $0x1880] sm:$0xff] }
  0xa3   : > { %736 = vst [vmem:[%s10400_s12 + $0x880] sm:$0xff] %v735_v16  ;;  %v741_v19 = vld [vmem:[%s10395_s11 + $0x1888] sm:$0xff]  ;;  %738 = vst [vmem:[%s10400_s12 + $0x888] sm:$0xff] %v737_v17  ;;  %v743_v20 = vld [vmem:[%s10395_s11 + $0x1890] sm:$0xff] }
  0xa4   : > { %740 = vst [vmem:[%s10400_s12 + $0x890] sm:$0xff] %v739_v18  ;;  %742 = vst [vmem:[%s10400_s12 + $0x898] sm:$0xff] %v741_v19  ;;  %v745_v21 = vld [vmem:[%s10395_s11 + $0x1898] sm:$0xff]  ;;  %v747_v22 = vld [vmem:[%s10395_s11 + $0x18a0] sm:$0xff] }
  0xa5   : > { %744 = vst [vmem:[%s10400_s12 + $0x8a0] sm:$0xff] %v743_v20  ;;  %746 = vst [vmem:[%s10400_s12 + $0x8a8] sm:$0xff] %v745_v21  ;;  %v749_v23 = vld [vmem:[%s10395_s11 + $0x18a8] sm:$0xff]  ;;  %v751_v24 = vld [vmem:[%s10395_s11 + $0x18b0] sm:$0xff] }
  0xa6   : > { %748 = vst [vmem:[%s10400_s12 + $0x8b0] sm:$0xff] %v747_v22  ;;  %v753_v25 = vld [vmem:[%s10395_s11 + $0x18b8] sm:$0xff]  ;;  %750 = vst [vmem:[%s10400_s12 + $0x8b8] sm:$0xff] %v749_v23  ;;  %v755_v26 = vld [vmem:[%s10395_s11 + $0x18c0] sm:$0xff] }
  0xa7   : > { %752 = vst [vmem:[%s10400_s12 + $0x8c0] sm:$0xff] %v751_v24  ;;  %754 = vst [vmem:[%s10400_s12 + $0x8c8] sm:$0xff] %v753_v25  ;;  %v757_v27 = vld [vmem:[%s10395_s11 + $0x18c8] sm:$0xff]  ;;  %v759_v28 = vld [vmem:[%s10395_s11 + $0x18d0] sm:$0xff] }
  0xa8   : > { %756 = vst [vmem:[%s10400_s12 + $0x8d0] sm:$0xff] %v755_v26  ;;  %758 = vst [vmem:[%s10400_s12 + $0x8d8] sm:$0xff] %v757_v27  ;;  %v761_v29 = vld [vmem:[%s10395_s11 + $0x18d8] sm:$0xff]  ;;  %v763_v30 = vld [vmem:[%s10395_s11 + $0x18e0] sm:$0xff] }
  0xa9   : > { %760 = vst [vmem:[%s10400_s12 + $0x8e0] sm:$0xff] %v759_v28  ;;  %v765_v31 = vld [vmem:[%s10395_s11 + $0x18e8] sm:$0xff]  ;;  %762 = vst [vmem:[%s10400_s12 + $0x8e8] sm:$0xff] %v761_v29  ;;  %v767_v32 = vld [vmem:[%s10395_s11 + $0x18f0] sm:$0xff] }
  0xaa   : > { %764 = vst [vmem:[%s10400_s12 + $0x8f0] sm:$0xff] %v763_v30  ;;  %766 = vst [vmem:[%s10400_s12 + $0x8f8] sm:$0xff] %v765_v31  ;;  %v769_v33 = vld [vmem:[%s10395_s11 + $0x18f8] sm:$0xff]  ;;  %v771_v34 = vld [vmem:[%s10395_s11 + $0x1900] sm:$0xff] }
  0xab   : > { %768 = vst [vmem:[%s10400_s12 + $0x900] sm:$0xff] %v767_v32  ;;  %770 = vst [vmem:[%s10400_s12 + $0x908] sm:$0xff] %v769_v33  ;;  %v773_v35 = vld [vmem:[%s10395_s11 + $0x1908] sm:$0xff]  ;;  %v775_v36 = vld [vmem:[%s10395_s11 + $0x1910] sm:$0xff] }
  0xac   : > { %772 = vst [vmem:[%s10400_s12 + $0x910] sm:$0xff] %v771_v34  ;;  %v777_v37 = vld [vmem:[%s10395_s11 + $0x1918] sm:$0xff]  ;;  %774 = vst [vmem:[%s10400_s12 + $0x918] sm:$0xff] %v773_v35  ;;  %v779_v38 = vld [vmem:[%s10395_s11 + $0x1920] sm:$0xff] }
  0xad   : > { %776 = vst [vmem:[%s10400_s12 + $0x920] sm:$0xff] %v775_v36  ;;  %778 = vst [vmem:[%s10400_s12 + $0x928] sm:$0xff] %v777_v37  ;;  %v781_v39 = vld [vmem:[%s10395_s11 + $0x1928] sm:$0xff]  ;;  %v783_v40 = vld [vmem:[%s10395_s11 + $0x1930] sm:$0xff] }
  0xae   : > { %780 = vst [vmem:[%s10400_s12 + $0x930] sm:$0xff] %v779_v38  ;;  %782 = vst [vmem:[%s10400_s12 + $0x938] sm:$0xff] %v781_v39  ;;  %v785_v41 = vld [vmem:[%s10395_s11 + $0x1938] sm:$0xff]  ;;  %v787_v42 = vld [vmem:[%s10395_s11 + $0x1940] sm:$0xff] }
  0xaf   : > { %784 = vst [vmem:[%s10400_s12 + $0x940] sm:$0xff] %v783_v40  ;;  %v789_v43 = vld [vmem:[%s10395_s11 + $0x1948] sm:$0xff]  ;;  %786 = vst [vmem:[%s10400_s12 + $0x948] sm:$0xff] %v785_v41  ;;  %v791_v44 = vld [vmem:[%s10395_s11 + $0x1950] sm:$0xff] }
  0xb0   : > { %788 = vst [vmem:[%s10400_s12 + $0x950] sm:$0xff] %v787_v42  ;;  %790 = vst [vmem:[%s10400_s12 + $0x958] sm:$0xff] %v789_v43  ;;  %v793_v45 = vld [vmem:[%s10395_s11 + $0x1958] sm:$0xff]  ;;  %v795_v46 = vld [vmem:[%s10395_s11 + $0x1960] sm:$0xff] }
  0xb1   : > { %792 = vst [vmem:[%s10400_s12 + $0x960] sm:$0xff] %v791_v44  ;;  %794 = vst [vmem:[%s10400_s12 + $0x968] sm:$0xff] %v793_v45  ;;  %v797_v47 = vld [vmem:[%s10395_s11 + $0x1968] sm:$0xff]  ;;  %v799_v48 = vld [vmem:[%s10395_s11 + $0x1970] sm:$0xff] }
  0xb2   : > { %796 = vst [vmem:[%s10400_s12 + $0x970] sm:$0xff] %v795_v46  ;;  %v801_v49 = vld [vmem:[%s10395_s11 + $0x1978] sm:$0xff]  ;;  %798 = vst [vmem:[%s10400_s12 + $0x978] sm:$0xff] %v797_v47  ;;  %v803_v50 = vld [vmem:[%s10395_s11 + $0x1cb0] sm:$0xff] }
  0xb3   : > { %800 = vst [vmem:[%s10400_s12 + $0x980] sm:$0xff] %v799_v48  ;;  %802 = vst [vmem:[%s10400_s12 + $0x988] sm:$0xff] %v801_v49  ;;  %v805_v51 = vld [vmem:[%s10395_s11 + $0x1cb8] sm:$0xff]  ;;  %v807_v52 = vld [vmem:[%s10395_s11 + $0x1cc0] sm:$0xff] }
  0xb4   : > { %804 = vst [vmem:[%s10400_s12 + $0x990] sm:$0xff] %v803_v50  ;;  %806 = vst [vmem:[%s10400_s12 + $0x998] sm:$0xff] %v805_v51  ;;  %v809_v53 = vld [vmem:[%s10395_s11 + $0x1cc8] sm:$0xff]  ;;  %v811_v54 = vld [vmem:[%s10395_s11 + $0x1cd0] sm:$0xff] }
  0xb5   : > { %808 = vst [vmem:[%s10400_s12 + $0x9a0] sm:$0xff] %v807_v52  ;;  %v813_v55 = vld [vmem:[%s10395_s11 + $0x1cd8] sm:$0xff]  ;;  %810 = vst [vmem:[%s10400_s12 + $0x9a8] sm:$0xff] %v809_v53  ;;  %v815_v56 = vld [vmem:[%s10395_s11 + $0x1ce0] sm:$0xff] }
  0xb6   : > { %812 = vst [vmem:[%s10400_s12 + $0x9b0] sm:$0xff] %v811_v54  ;;  %814 = vst [vmem:[%s10400_s12 + $0x9b8] sm:$0xff] %v813_v55  ;;  %v817_v57 = vld [vmem:[%s10395_s11 + $0x1ce8] sm:$0xff]  ;;  %v819_v58 = vld [vmem:[%s10395_s11 + $0x1cf0] sm:$0xff] }
  0xb7   : > { %816 = vst [vmem:[%s10400_s12 + $0x9c0] sm:$0xff] %v815_v56  ;;  %818 = vst [vmem:[%s10400_s12 + $0x9c8] sm:$0xff] %v817_v57  ;;  %v821_v59 = vld [vmem:[%s10395_s11 + $0x1cf8] sm:$0xff]  ;;  %v823_v60 = vld [vmem:[%s10395_s11 + $0x1d00] sm:$0xff] }
  0xb8   : > { %820 = vst [vmem:[%s10400_s12 + $0x9d0] sm:$0xff] %v819_v58  ;;  %v825_v61 = vld [vmem:[%s10395_s11 + $0x1d08] sm:$0xff]  ;;  %822 = vst [vmem:[%s10400_s12 + $0x9d8] sm:$0xff] %v821_v59  ;;  %v827_v62 = vld [vmem:[%s10395_s11 + $0x1d10] sm:$0xff] }
  0xb9   : > { %824 = vst [vmem:[%s10400_s12 + $0x9e0] sm:$0xff] %v823_v60  ;;  %826 = vst [vmem:[%s10400_s12 + $0x9e8] sm:$0xff] %v825_v61  ;;  %v829_v63 = vld [vmem:[%s10395_s11 + $0x1d18] sm:$0xff]  ;;  %v831_v0 = vld [vmem:[%s10395_s11 + $0x1d20] sm:$0xff] }
  0xba   : > { %828 = vst [vmem:[%s10400_s12 + $0x9f0] sm:$0xff] %v827_v62  ;;  %830 = vst [vmem:[%s10400_s12 + $0x9f8] sm:$0xff] %v829_v63  ;;  %v833_v1 = vld [vmem:[%s10395_s11 + $0x1d28] sm:$0xff]  ;;  %v835_v2 = vld [vmem:[%s10395_s11 + $0x1d30] sm:$0xff] }
  0xbb   : > { %832 = vst [vmem:[%s10400_s12 + $0xa00] sm:$0xff] %v831_v0  ;;  %v837_v3 = vld [vmem:[%s10395_s11 + $0x1d38] sm:$0xff]  ;;  %834 = vst [vmem:[%s10400_s12 + $0xa08] sm:$0xff] %v833_v1  ;;  %v839_v4 = vld [vmem:[%s10395_s11 + $0x1d40] sm:$0xff] }
  0xbc   : > { %836 = vst [vmem:[%s10400_s12 + $0xa10] sm:$0xff] %v835_v2  ;;  %838 = vst [vmem:[%s10400_s12 + $0xa18] sm:$0xff] %v837_v3  ;;  %v841_v5 = vld [vmem:[%s10395_s11 + $0x1d48] sm:$0xff]  ;;  %v843_v6 = vld [vmem:[%s10395_s11 + $0x1d50] sm:$0xff] }
  0xbd   : > { %840 = vst [vmem:[%s10400_s12 + $0xa20] sm:$0xff] %v839_v4  ;;  %842 = vst [vmem:[%s10400_s12 + $0xa28] sm:$0xff] %v841_v5  ;;  %v845_v7 = vld [vmem:[%s10395_s11 + $0x1d58] sm:$0xff]  ;;  %v847_v8 = vld [vmem:[%s10395_s11 + $0x1d60] sm:$0xff] }
  0xbe   : > { %844 = vst [vmem:[%s10400_s12 + $0xa30] sm:$0xff] %v843_v6  ;;  %v849_v9 = vld [vmem:[%s10395_s11 + $0x1d68] sm:$0xff]  ;;  %846 = vst [vmem:[%s10400_s12 + $0xa38] sm:$0xff] %v845_v7  ;;  %v851_v10 = vld [vmem:[%s10395_s11 + $0x1d70] sm:$0xff] }
  0xbf   : > { %848 = vst [vmem:[%s10400_s12 + $0xa40] sm:$0xff] %v847_v8  ;;  %850 = vst [vmem:[%s10400_s12 + $0xa48] sm:$0xff] %v849_v9  ;;  %v853_v11 = vld [vmem:[%s10395_s11 + $0x1d78] sm:$0xff]  ;;  %v855_v12 = vld [vmem:[%s10395_s11 + $0x1d80] sm:$0xff] }
  0xc0   : > { %852 = vst [vmem:[%s10400_s12 + $0xa50] sm:$0xff] %v851_v10  ;;  %854 = vst [vmem:[%s10400_s12 + $0xa58] sm:$0xff] %v853_v11  ;;  %v857_v13 = vld [vmem:[%s10395_s11 + $0x1d88] sm:$0xff]  ;;  %v859_v14 = vld [vmem:[%s10395_s11 + $0x1d90] sm:$0xff] }
  0xc1   : > { %856 = vst [vmem:[%s10400_s12 + $0xa60] sm:$0xff] %v855_v12  ;;  %v861_v15 = vld [vmem:[%s10395_s11 + $0x1d98] sm:$0xff]  ;;  %858 = vst [vmem:[%s10400_s12 + $0xa68] sm:$0xff] %v857_v13  ;;  %v863_v16 = vld [vmem:[%s10395_s11 + $0x1da0] sm:$0xff] }
  0xc2   : > { %860 = vst [vmem:[%s10400_s12 + $0xa70] sm:$0xff] %v859_v14  ;;  %862 = vst [vmem:[%s10400_s12 + $0xa78] sm:$0xff] %v861_v15  ;;  %v865_v17 = vld [vmem:[%s10395_s11 + $0x1da8] sm:$0xff]  ;;  %v867_v18 = vld [vmem:[%s10395_s11 + $0x1db0] sm:$0xff] }
  0xc3   : > { %864 = vst [vmem:[%s10400_s12 + $0xa80] sm:$0xff] %v863_v16  ;;  %866 = vst [vmem:[%s10400_s12 + $0xa88] sm:$0xff] %v865_v17  ;;  %v869_v19 = vld [vmem:[%s10395_s11 + $0x1db8] sm:$0xff]  ;;  %v871_v20 = vld [vmem:[%s10395_s11 + $0x1dc0] sm:$0xff] }
  0xc4   : > { %868 = vst [vmem:[%s10400_s12 + $0xa90] sm:$0xff] %v867_v18  ;;  %v873_v21 = vld [vmem:[%s10395_s11 + $0x1dc8] sm:$0xff]  ;;  %870 = vst [vmem:[%s10400_s12 + $0xa98] sm:$0xff] %v869_v19  ;;  %v875_v22 = vld [vmem:[%s10395_s11 + $0x1dd0] sm:$0xff] }
  0xc5   : > { %872 = vst [vmem:[%s10400_s12 + $0xaa0] sm:$0xff] %v871_v20  ;;  %874 = vst [vmem:[%s10400_s12 + $0xaa8] sm:$0xff] %v873_v21  ;;  %v877_v23 = vld [vmem:[%s10395_s11 + $0x1dd8] sm:$0xff]  ;;  %v879_v24 = vld [vmem:[%s10395_s11 + $0x1de0] sm:$0xff] }
  0xc6   : > { %876 = vst [vmem:[%s10400_s12 + $0xab0] sm:$0xff] %v875_v22  ;;  %878 = vst [vmem:[%s10400_s12 + $0xab8] sm:$0xff] %v877_v23  ;;  %v881_v25 = vld [vmem:[%s10395_s11 + $0x1de8] sm:$0xff]  ;;  %v883_v26 = vld [vmem:[%s10395_s11 + $0x1df0] sm:$0xff] }
  0xc7   : > { %880 = vst [vmem:[%s10400_s12 + $0xac0] sm:$0xff] %v879_v24  ;;  %v885_v27 = vld [vmem:[%s10395_s11 + $0x1df8] sm:$0xff]  ;;  %882 = vst [vmem:[%s10400_s12 + $0xac8] sm:$0xff] %v881_v25  ;;  %v887_v28 = vld [vmem:[%s10395_s11 + $0x1e00] sm:$0xff] }
  0xc8   : > { %884 = vst [vmem:[%s10400_s12 + $0xad0] sm:$0xff] %v883_v26  ;;  %886 = vst [vmem:[%s10400_s12 + $0xad8] sm:$0xff] %v885_v27  ;;  %v889_v29 = vld [vmem:[%s10395_s11 + $0x1e08] sm:$0xff]  ;;  %v891_v30 = vld [vmem:[%s10395_s11 + $0x1e10] sm:$0xff] }
  0xc9   : > { %888 = vst [vmem:[%s10400_s12 + $0xae0] sm:$0xff] %v887_v28  ;;  %890 = vst [vmem:[%s10400_s12 + $0xae8] sm:$0xff] %v889_v29  ;;  %v893_v31 = vld [vmem:[%s10395_s11 + $0x1e18] sm:$0xff]  ;;  %v895_v32 = vld [vmem:[%s10395_s11 + $0x1e20] sm:$0xff] }
  0xca   : > { %892 = vst [vmem:[%s10400_s12 + $0xaf0] sm:$0xff] %v891_v30  ;;  %v897_v33 = vld [vmem:[%s10395_s11 + $0x1e28] sm:$0xff]  ;;  %894 = vst [vmem:[%s10400_s12 + $0xaf8] sm:$0xff] %v893_v31  ;;  %v899_v34 = vld [vmem:[%s10395_s11 + $0x1e30] sm:$0xff] }
  0xcb   : > { %896 = vst [vmem:[%s10400_s12 + $0xb00] sm:$0xff] %v895_v32  ;;  %898 = vst [vmem:[%s10400_s12 + $0xb08] sm:$0xff] %v897_v33  ;;  %v901_v35 = vld [vmem:[%s10395_s11 + $0x1e38] sm:$0xff]  ;;  %v903_v36 = vld [vmem:[%s10395_s11 + $0x1e40] sm:$0xff] }
  0xcc   : > { %900 = vst [vmem:[%s10400_s12 + $0xb10] sm:$0xff] %v899_v34  ;;  %902 = vst [vmem:[%s10400_s12 + $0xb18] sm:$0xff] %v901_v35  ;;  %v905_v37 = vld [vmem:[%s10395_s11 + $0x2178] sm:$0xff]  ;;  %v907_v38 = vld [vmem:[%s10395_s11 + $0x2180] sm:$0xff] }
  0xcd   : > { %904 = vst [vmem:[%s10400_s12 + $0xb20] sm:$0xff] %v903_v36  ;;  %v909_v39 = vld [vmem:[%s10395_s11 + $0x2188] sm:$0xff]  ;;  %906 = vst [vmem:[%s10400_s12 + $0xb28] sm:$0xff] %v905_v37  ;;  %v911_v40 = vld [vmem:[%s10395_s11 + $0x2190] sm:$0xff] }
  0xce   : > { %908 = vst [vmem:[%s10400_s12 + $0xb30] sm:$0xff] %v907_v38  ;;  %910 = vst [vmem:[%s10400_s12 + $0xb38] sm:$0xff] %v909_v39  ;;  %v913_v41 = vld [vmem:[%s10395_s11 + $0x2198] sm:$0xff]  ;;  %v915_v42 = vld [vmem:[%s10395_s11 + $0x21a0] sm:$0xff] }
  0xcf   : > { %912 = vst [vmem:[%s10400_s12 + $0xb40] sm:$0xff] %v911_v40  ;;  %914 = vst [vmem:[%s10400_s12 + $0xb48] sm:$0xff] %v913_v41  ;;  %v917_v43 = vld [vmem:[%s10395_s11 + $0x21a8] sm:$0xff]  ;;  %v919_v44 = vld [vmem:[%s10395_s11 + $0x21b0] sm:$0xff] }
  0xd0   : > { %916 = vst [vmem:[%s10400_s12 + $0xb50] sm:$0xff] %v915_v42  ;;  %v921_v45 = vld [vmem:[%s10395_s11 + $0x21b8] sm:$0xff]  ;;  %918 = vst [vmem:[%s10400_s12 + $0xb58] sm:$0xff] %v917_v43  ;;  %v923_v46 = vld [vmem:[%s10395_s11 + $0x21c0] sm:$0xff] }
  0xd1   : > { %920 = vst [vmem:[%s10400_s12 + $0xb60] sm:$0xff] %v919_v44  ;;  %922 = vst [vmem:[%s10400_s12 + $0xb68] sm:$0xff] %v921_v45  ;;  %v925_v47 = vld [vmem:[%s10395_s11 + $0x21c8] sm:$0xff]  ;;  %v927_v48 = vld [vmem:[%s10395_s11 + $0x21d0] sm:$0xff] }
  0xd2   : > { %924 = vst [vmem:[%s10400_s12 + $0xb70] sm:$0xff] %v923_v46  ;;  %926 = vst [vmem:[%s10400_s12 + $0xb78] sm:$0xff] %v925_v47  ;;  %v929_v49 = vld [vmem:[%s10395_s11 + $0x21d8] sm:$0xff]  ;;  %v931_v50 = vld [vmem:[%s10395_s11 + $0x21e0] sm:$0xff] }
  0xd3   : > { %928 = vst [vmem:[%s10400_s12 + $0xb80] sm:$0xff] %v927_v48  ;;  %v933_v51 = vld [vmem:[%s10395_s11 + $0x21e8] sm:$0xff]  ;;  %930 = vst [vmem:[%s10400_s12 + $0xb88] sm:$0xff] %v929_v49  ;;  %v935_v52 = vld [vmem:[%s10395_s11 + $0x21f0] sm:$0xff] }
  0xd4   : > { %932 = vst [vmem:[%s10400_s12 + $0xb90] sm:$0xff] %v931_v50  ;;  %934 = vst [vmem:[%s10400_s12 + $0xb98] sm:$0xff] %v933_v51  ;;  %v937_v53 = vld [vmem:[%s10395_s11 + $0x21f8] sm:$0xff]  ;;  %v939_v54 = vld [vmem:[%s10395_s11 + $0x2200] sm:$0xff] }
  0xd5   : > { %936 = vst [vmem:[%s10400_s12 + $0xba0] sm:$0xff] %v935_v52  ;;  %938 = vst [vmem:[%s10400_s12 + $0xba8] sm:$0xff] %v937_v53  ;;  %v941_v55 = vld [vmem:[%s10395_s11 + $0x2208] sm:$0xff]  ;;  %v943_v56 = vld [vmem:[%s10395_s11 + $0x2210] sm:$0xff] }
  0xd6   : > { %940 = vst [vmem:[%s10400_s12 + $0xbb0] sm:$0xff] %v939_v54  ;;  %v945_v57 = vld [vmem:[%s10395_s11 + $0x2218] sm:$0xff]  ;;  %942 = vst [vmem:[%s10400_s12 + $0xbb8] sm:$0xff] %v941_v55  ;;  %v947_v58 = vld [vmem:[%s10395_s11 + $0x2220] sm:$0xff] }
  0xd7   : > { %944 = vst [vmem:[%s10400_s12 + $0xbc0] sm:$0xff] %v943_v56  ;;  %946 = vst [vmem:[%s10400_s12 + $0xbc8] sm:$0xff] %v945_v57  ;;  %v949_v59 = vld [vmem:[%s10395_s11 + $0x2228] sm:$0xff]  ;;  %v951_v60 = vld [vmem:[%s10395_s11 + $0x2230] sm:$0xff] }
  0xd8   : > { %948 = vst [vmem:[%s10400_s12 + $0xbd0] sm:$0xff] %v947_v58  ;;  %950 = vst [vmem:[%s10400_s12 + $0xbd8] sm:$0xff] %v949_v59  ;;  %v953_v61 = vld [vmem:[%s10395_s11 + $0x2238] sm:$0xff]  ;;  %v955_v62 = vld [vmem:[%s10395_s11 + $0x2240] sm:$0xff] }
  0xd9   : > { %952 = vst [vmem:[%s10400_s12 + $0xbe0] sm:$0xff] %v951_v60  ;;  %v957_v63 = vld [vmem:[%s10395_s11 + $0x2248] sm:$0xff]  ;;  %954 = vst [vmem:[%s10400_s12 + $0xbe8] sm:$0xff] %v953_v61  ;;  %v959_v0 = vld [vmem:[%s10395_s11 + $0x2250] sm:$0xff] }
  0xda   : > { %956 = vst [vmem:[%s10400_s12 + $0xbf0] sm:$0xff] %v955_v62  ;;  %958 = vst [vmem:[%s10400_s12 + $0xbf8] sm:$0xff] %v957_v63  ;;  %v961_v1 = vld [vmem:[%s10395_s11 + $0x2258] sm:$0xff]  ;;  %v963_v2 = vld [vmem:[%s10395_s11 + $0x2260] sm:$0xff] }
  0xdb   : > { %960 = vst [vmem:[%s10400_s12 + $0xc00] sm:$0xff] %v959_v0  ;;  %962 = vst [vmem:[%s10400_s12 + $0xc08] sm:$0xff] %v961_v1  ;;  %v965_v3 = vld [vmem:[%s10395_s11 + $0x2268] sm:$0xff]  ;;  %v967_v4 = vld [vmem:[%s10395_s11 + $0x2270] sm:$0xff] }
  0xdc   : > { %964 = vst [vmem:[%s10400_s12 + $0xc10] sm:$0xff] %v963_v2  ;;  %v969_v5 = vld [vmem:[%s10395_s11 + $0x2278] sm:$0xff]  ;;  %966 = vst [vmem:[%s10400_s12 + $0xc18] sm:$0xff] %v965_v3  ;;  %v971_v6 = vld [vmem:[%s10395_s11 + $0x2280] sm:$0xff] }
  0xdd   : > { %968 = vst [vmem:[%s10400_s12 + $0xc20] sm:$0xff] %v967_v4  ;;  %970 = vst [vmem:[%s10400_s12 + $0xc28] sm:$0xff] %v969_v5  ;;  %v973_v7 = vld [vmem:[%s10395_s11 + $0x2288] sm:$0xff]  ;;  %v975_v8 = vld [vmem:[%s10395_s11 + $0x2290] sm:$0xff] }
  0xde   : > { %972 = vst [vmem:[%s10400_s12 + $0xc30] sm:$0xff] %v971_v6  ;;  %974 = vst [vmem:[%s10400_s12 + $0xc38] sm:$0xff] %v973_v7  ;;  %v977_v9 = vld [vmem:[%s10395_s11 + $0x2298] sm:$0xff]  ;;  %v979_v10 = vld [vmem:[%s10395_s11 + $0x22a0] sm:$0xff] }
  0xdf   : > { %976 = vst [vmem:[%s10400_s12 + $0xc40] sm:$0xff] %v975_v8  ;;  %v981_v11 = vld [vmem:[%s10395_s11 + $0x22a8] sm:$0xff]  ;;  %978 = vst [vmem:[%s10400_s12 + $0xc48] sm:$0xff] %v977_v9  ;;  %v983_v12 = vld [vmem:[%s10395_s11 + $0x22b0] sm:$0xff] }
  0xe0   : > { %980 = vst [vmem:[%s10400_s12 + $0xc50] sm:$0xff] %v979_v10  ;;  %982 = vst [vmem:[%s10400_s12 + $0xc58] sm:$0xff] %v981_v11  ;;  %v985_v13 = vld [vmem:[%s10395_s11 + $0x22b8] sm:$0xff]  ;;  %v987_v14 = vld [vmem:[%s10395_s11 + $0x22c0] sm:$0xff] }
  0xe1   : > { %984 = vst [vmem:[%s10400_s12 + $0xc60] sm:$0xff] %v983_v12  ;;  %986 = vst [vmem:[%s10400_s12 + $0xc68] sm:$0xff] %v985_v13  ;;  %v989_v15 = vld [vmem:[%s10395_s11 + $0x22c8] sm:$0xff]  ;;  %v991_v16 = vld [vmem:[%s10395_s11 + $0x22d0] sm:$0xff] }
  0xe2   : > { %988 = vst [vmem:[%s10400_s12 + $0xc70] sm:$0xff] %v987_v14  ;;  %v993_v17 = vld [vmem:[%s10395_s11 + $0x22d8] sm:$0xff]  ;;  %990 = vst [vmem:[%s10400_s12 + $0xc78] sm:$0xff] %v989_v15  ;;  %v995_v18 = vld [vmem:[%s10395_s11 + $0x22e0] sm:$0xff] }
  0xe3   : > { %992 = vst [vmem:[%s10400_s12 + $0xc80] sm:$0xff] %v991_v16  ;;  %994 = vst [vmem:[%s10400_s12 + $0xc88] sm:$0xff] %v993_v17  ;;  %v997_v19 = vld [vmem:[%s10395_s11 + $0x22e8] sm:$0xff]  ;;  %v999_v20 = vld [vmem:[%s10395_s11 + $0x22f0] sm:$0xff] }
  0xe4   : > { %996 = vst [vmem:[%s10400_s12 + $0xc90] sm:$0xff] %v995_v18  ;;  %998 = vst [vmem:[%s10400_s12 + $0xc98] sm:$0xff] %v997_v19  ;;  %v1001_v21 = vld [vmem:[%s10395_s11 + $0x22f8] sm:$0xff]  ;;  %v1003_v22 = vld [vmem:[%s10395_s11 + $0x2300] sm:$0xff] }
  0xe5   : > { %1000 = vst [vmem:[%s10400_s12 + $0xca0] sm:$0xff] %v999_v20  ;;  %v1005_v23 = vld [vmem:[%s10395_s11 + $0x2308] sm:$0xff]  ;;  %1002 = vst [vmem:[%s10400_s12 + $0xca8] sm:$0xff] %v1001_v21  ;;  %v1007_v24 = vld [vmem:[%s10395_s11 + $0x2640] sm:$0xff] }
  0xe6   : > { %1004 = vst [vmem:[%s10400_s12 + $0xcb0] sm:$0xff] %v1003_v22  ;;  %1006 = vst [vmem:[%s10400_s12 + $0xcb8] sm:$0xff] %v1005_v23  ;;  %v1009_v25 = vld [vmem:[%s10395_s11 + $0x2648] sm:$0xff]  ;;  %v1011_v26 = vld [vmem:[%s10395_s11 + $0x2650] sm:$0xff] }
  0xe7   : > { %1008 = vst [vmem:[%s10400_s12 + $0xcc0] sm:$0xff] %v1007_v24  ;;  %1010 = vst [vmem:[%s10400_s12 + $0xcc8] sm:$0xff] %v1009_v25  ;;  %v1013_v27 = vld [vmem:[%s10395_s11 + $0x2658] sm:$0xff]  ;;  %v1015_v28 = vld [vmem:[%s10395_s11 + $0x2660] sm:$0xff] }
  0xe8   : > { %1012 = vst [vmem:[%s10400_s12 + $0xcd0] sm:$0xff] %v1011_v26  ;;  %v1017_v29 = vld [vmem:[%s10395_s11 + $0x2668] sm:$0xff]  ;;  %1014 = vst [vmem:[%s10400_s12 + $0xcd8] sm:$0xff] %v1013_v27  ;;  %v1019_v30 = vld [vmem:[%s10395_s11 + $0x2670] sm:$0xff] }
  0xe9   : > { %1016 = vst [vmem:[%s10400_s12 + $0xce0] sm:$0xff] %v1015_v28  ;;  %1018 = vst [vmem:[%s10400_s12 + $0xce8] sm:$0xff] %v1017_v29  ;;  %v1021_v31 = vld [vmem:[%s10395_s11 + $0x2678] sm:$0xff]  ;;  %v1023_v32 = vld [vmem:[%s10395_s11 + $0x2680] sm:$0xff] }
  0xea   : > { %1020 = vst [vmem:[%s10400_s12 + $0xcf0] sm:$0xff] %v1019_v30  ;;  %1022 = vst [vmem:[%s10400_s12 + $0xcf8] sm:$0xff] %v1021_v31  ;;  %v1025_v33 = vld [vmem:[%s10395_s11 + $0x2688] sm:$0xff]  ;;  %v1027_v34 = vld [vmem:[%s10395_s11 + $0x2690] sm:$0xff] }
  0xeb   : > { %1024 = vst [vmem:[%s10400_s12 + $0xd00] sm:$0xff] %v1023_v32  ;;  %v1029_v35 = vld [vmem:[%s10395_s11 + $0x2698] sm:$0xff]  ;;  %1026 = vst [vmem:[%s10400_s12 + $0xd08] sm:$0xff] %v1025_v33  ;;  %v1031_v36 = vld [vmem:[%s10395_s11 + $0x26a0] sm:$0xff] }
  0xec   : > { %1028 = vst [vmem:[%s10400_s12 + $0xd10] sm:$0xff] %v1027_v34  ;;  %1030 = vst [vmem:[%s10400_s12 + $0xd18] sm:$0xff] %v1029_v35  ;;  %v1033_v37 = vld [vmem:[%s10395_s11 + $0x26a8] sm:$0xff]  ;;  %v1035_v38 = vld [vmem:[%s10395_s11 + $0x26b0] sm:$0xff] }
  0xed   : > { %1032 = vst [vmem:[%s10400_s12 + $0xd20] sm:$0xff] %v1031_v36  ;;  %1034 = vst [vmem:[%s10400_s12 + $0xd28] sm:$0xff] %v1033_v37  ;;  %v1037_v39 = vld [vmem:[%s10395_s11 + $0x26b8] sm:$0xff]  ;;  %v1039_v40 = vld [vmem:[%s10395_s11 + $0x26c0] sm:$0xff] }
  0xee   : > { %1036 = vst [vmem:[%s10400_s12 + $0xd30] sm:$0xff] %v1035_v38  ;;  %v1041_v41 = vld [vmem:[%s10395_s11 + $0x26c8] sm:$0xff]  ;;  %1038 = vst [vmem:[%s10400_s12 + $0xd38] sm:$0xff] %v1037_v39  ;;  %v1043_v42 = vld [vmem:[%s10395_s11 + $0x26d0] sm:$0xff] }
  0xef   : > { %1040 = vst [vmem:[%s10400_s12 + $0xd40] sm:$0xff] %v1039_v40  ;;  %1042 = vst [vmem:[%s10400_s12 + $0xd48] sm:$0xff] %v1041_v41  ;;  %v1045_v43 = vld [vmem:[%s10395_s11 + $0x26d8] sm:$0xff]  ;;  %v1047_v44 = vld [vmem:[%s10395_s11 + $0x26e0] sm:$0xff] }
  0xf0   : > { %1044 = vst [vmem:[%s10400_s12 + $0xd50] sm:$0xff] %v1043_v42  ;;  %1046 = vst [vmem:[%s10400_s12 + $0xd58] sm:$0xff] %v1045_v43  ;;  %v1049_v45 = vld [vmem:[%s10395_s11 + $0x26e8] sm:$0xff]  ;;  %v1051_v46 = vld [vmem:[%s10395_s11 + $0x26f0] sm:$0xff] }
  0xf1   : > { %1048 = vst [vmem:[%s10400_s12 + $0xd60] sm:$0xff] %v1047_v44  ;;  %v1053_v47 = vld [vmem:[%s10395_s11 + $0x26f8] sm:$0xff]  ;;  %1050 = vst [vmem:[%s10400_s12 + $0xd68] sm:$0xff] %v1049_v45  ;;  %v1055_v48 = vld [vmem:[%s10395_s11 + $0x2700] sm:$0xff] }
  0xf2   : > { %1052 = vst [vmem:[%s10400_s12 + $0xd70] sm:$0xff] %v1051_v46  ;;  %1054 = vst [vmem:[%s10400_s12 + $0xd78] sm:$0xff] %v1053_v47  ;;  %v1057_v49 = vld [vmem:[%s10395_s11 + $0x2708] sm:$0xff]  ;;  %v1059_v50 = vld [vmem:[%s10395_s11 + $0x2710] sm:$0xff] }
  0xf3   : > { %1056 = vst [vmem:[%s10400_s12 + $0xd80] sm:$0xff] %v1055_v48  ;;  %1058 = vst [vmem:[%s10400_s12 + $0xd88] sm:$0xff] %v1057_v49  ;;  %v1061_v51 = vld [vmem:[%s10395_s11 + $0x2718] sm:$0xff]  ;;  %v1063_v52 = vld [vmem:[%s10395_s11 + $0x2720] sm:$0xff] }
  0xf4   : > { %1060 = vst [vmem:[%s10400_s12 + $0xd90] sm:$0xff] %v1059_v50  ;;  %v1065_v53 = vld [vmem:[%s10395_s11 + $0x2728] sm:$0xff]  ;;  %1062 = vst [vmem:[%s10400_s12 + $0xd98] sm:$0xff] %v1061_v51  ;;  %v1067_v54 = vld [vmem:[%s10395_s11 + $0x2730] sm:$0xff] }
  0xf5   : > { %1064 = vst [vmem:[%s10400_s12 + $0xda0] sm:$0xff] %v1063_v52  ;;  %1066 = vst [vmem:[%s10400_s12 + $0xda8] sm:$0xff] %v1065_v53  ;;  %v1069_v55 = vld [vmem:[%s10395_s11 + $0x2738] sm:$0xff]  ;;  %v1071_v56 = vld [vmem:[%s10395_s11 + $0x2740] sm:$0xff] }
  0xf6   : > { %1068 = vst [vmem:[%s10400_s12 + $0xdb0] sm:$0xff] %v1067_v54  ;;  %1070 = vst [vmem:[%s10400_s12 + $0xdb8] sm:$0xff] %v1069_v55  ;;  %v1073_v57 = vld [vmem:[%s10395_s11 + $0x2748] sm:$0xff]  ;;  %v1075_v58 = vld [vmem:[%s10395_s11 + $0x2750] sm:$0xff] }
  0xf7   : > { %1072 = vst [vmem:[%s10400_s12 + $0xdc0] sm:$0xff] %v1071_v56  ;;  %v1077_v59 = vld [vmem:[%s10395_s11 + $0x2758] sm:$0xff]  ;;  %1074 = vst [vmem:[%s10400_s12 + $0xdc8] sm:$0xff] %v1073_v57  ;;  %v1079_v60 = vld [vmem:[%s10395_s11 + $0x2760] sm:$0xff] }
  0xf8   : > { %1076 = vst [vmem:[%s10400_s12 + $0xdd0] sm:$0xff] %v1075_v58  ;;  %1078 = vst [vmem:[%s10400_s12 + $0xdd8] sm:$0xff] %v1077_v59  ;;  %v1081_v61 = vld [vmem:[%s10395_s11 + $0x2768] sm:$0xff]  ;;  %v1083_v62 = vld [vmem:[%s10395_s11 + $0x2770] sm:$0xff] }
  0xf9   : > { %1080 = vst [vmem:[%s10400_s12 + $0xde0] sm:$0xff] %v1079_v60  ;;  %1082 = vst [vmem:[%s10400_s12 + $0xde8] sm:$0xff] %v1081_v61  ;;  %v1085_v63 = vld [vmem:[%s10395_s11 + $0x2778] sm:$0xff]  ;;  %v1087_v0 = vld [vmem:[%s10395_s11 + $0x2780] sm:$0xff] }
  0xfa   : > { %1084 = vst [vmem:[%s10400_s12 + $0xdf0] sm:$0xff] %v1083_v62  ;;  %v1089_v1 = vld [vmem:[%s10395_s11 + $0x2788] sm:$0xff]  ;;  %1086 = vst [vmem:[%s10400_s12 + $0xdf8] sm:$0xff] %v1085_v63  ;;  %v1091_v2 = vld [vmem:[%s10395_s11 + $0x2790] sm:$0xff] }
  0xfb   : > { %1088 = vst [vmem:[%s10400_s12 + $0xe00] sm:$0xff] %v1087_v0  ;;  %1090 = vst [vmem:[%s10400_s12 + $0xe08] sm:$0xff] %v1089_v1  ;;  %v1093_v3 = vld [vmem:[%s10395_s11 + $0x2798] sm:$0xff]  ;;  %v1095_v4 = vld [vmem:[%s10395_s11 + $0x27a0] sm:$0xff] }
  0xfc   : > { %1092 = vst [vmem:[%s10400_s12 + $0xe10] sm:$0xff] %v1091_v2  ;;  %1094 = vst [vmem:[%s10400_s12 + $0xe18] sm:$0xff] %v1093_v3  ;;  %v1097_v5 = vld [vmem:[%s10395_s11 + $0x27a8] sm:$0xff]  ;;  %v1099_v6 = vld [vmem:[%s10395_s11 + $0x27b0] sm:$0xff] }
  0xfd   : > { %1096 = vst [vmem:[%s10400_s12 + $0xe20] sm:$0xff] %v1095_v4  ;;  %v1101_v7 = vld [vmem:[%s10395_s11 + $0x27b8] sm:$0xff]  ;;  %1098 = vst [vmem:[%s10400_s12 + $0xe28] sm:$0xff] %v1097_v5  ;;  %v1103_v8 = vld [vmem:[%s10395_s11 + $0x27c0] sm:$0xff] }
  0xfe   : > { %1100 = vst [vmem:[%s10400_s12 + $0xe30] sm:$0xff] %v1099_v6  ;;  %1102 = vst [vmem:[%s10400_s12 + $0xe38] sm:$0xff] %v1101_v7  ;;  %v1105_v9 = vld [vmem:[%s10395_s11 + $0x27c8] sm:$0xff]  ;;  %v1107_v10 = vld [vmem:[%s10395_s11 + $0x27d0] sm:$0xff] }
  0xff   : > { %1104 = vst [vmem:[%s10400_s12 + $0xe40] sm:$0xff] %v1103_v8  ;;  %1106 = vst [vmem:[%s10400_s12 + $0xe48] sm:$0xff] %v1105_v9  ;;  %v1109_v11 = vld [vmem:[%s10395_s11 + $0x2b08] sm:$0xff]  ;;  %v1111_v12 = vld [vmem:[%s10395_s11 + $0x2b10] sm:$0xff] }
 0x100   : > { %1108 = vst [vmem:[%s10400_s12 + $0xe50] sm:$0xff] %v1107_v10  ;;  %v1113_v13 = vld [vmem:[%s10395_s11 + $0x2b18] sm:$0xff]  ;;  %1110 = vst [vmem:[%s10400_s12 + $0xe58] sm:$0xff] %v1109_v11  ;;  %v1115_v14 = vld [vmem:[%s10395_s11 + $0x2b20] sm:$0xff] }
 0x101   : > { %1112 = vst [vmem:[%s10400_s12 + $0xe60] sm:$0xff] %v1111_v12  ;;  %1114 = vst [vmem:[%s10400_s12 + $0xe68] sm:$0xff] %v1113_v13  ;;  %v1117_v15 = vld [vmem:[%s10395_s11 + $0x2b28] sm:$0xff]  ;;  %v1119_v16 = vld [vmem:[%s10395_s11 + $0x2b30] sm:$0xff] }
 0x102   : > { %1116 = vst [vmem:[%s10400_s12 + $0xe70] sm:$0xff] %v1115_v14  ;;  %1118 = vst [vmem:[%s10400_s12 + $0xe78] sm:$0xff] %v1117_v15  ;;  %v1121_v17 = vld [vmem:[%s10395_s11 + $0x2b38] sm:$0xff]  ;;  %v1123_v18 = vld [vmem:[%s10395_s11 + $0x2b40] sm:$0xff] }
 0x103   : > { %1120 = vst [vmem:[%s10400_s12 + $0xe80] sm:$0xff] %v1119_v16  ;;  %v1125_v19 = vld [vmem:[%s10395_s11 + $0x2b48] sm:$0xff]  ;;  %1122 = vst [vmem:[%s10400_s12 + $0xe88] sm:$0xff] %v1121_v17  ;;  %v1127_v20 = vld [vmem:[%s10395_s11 + $0x2b50] sm:$0xff] }
 0x104   : > { %1124 = vst [vmem:[%s10400_s12 + $0xe90] sm:$0xff] %v1123_v18  ;;  %1126 = vst [vmem:[%s10400_s12 + $0xe98] sm:$0xff] %v1125_v19  ;;  %v1129_v21 = vld [vmem:[%s10395_s11 + $0x2b58] sm:$0xff]  ;;  %v1131_v22 = vld [vmem:[%s10395_s11 + $0x2b60] sm:$0xff] }
 0x105   : > { %1128 = vst [vmem:[%s10400_s12 + $0xea0] sm:$0xff] %v1127_v20  ;;  %1130 = vst [vmem:[%s10400_s12 + $0xea8] sm:$0xff] %v1129_v21  ;;  %v1133_v23 = vld [vmem:[%s10395_s11 + $0x2b68] sm:$0xff]  ;;  %v1135_v24 = vld [vmem:[%s10395_s11 + $0x2b70] sm:$0xff] }
 0x106   : > { %1132 = vst [vmem:[%s10400_s12 + $0xeb0] sm:$0xff] %v1131_v22  ;;  %v1137_v25 = vld [vmem:[%s10395_s11 + $0x2b78] sm:$0xff]  ;;  %1134 = vst [vmem:[%s10400_s12 + $0xeb8] sm:$0xff] %v1133_v23  ;;  %v1139_v26 = vld [vmem:[%s10395_s11 + $0x2b80] sm:$0xff] }
 0x107   : > { %1136 = vst [vmem:[%s10400_s12 + $0xec0] sm:$0xff] %v1135_v24  ;;  %1138 = vst [vmem:[%s10400_s12 + $0xec8] sm:$0xff] %v1137_v25  ;;  %v1141_v27 = vld [vmem:[%s10395_s11 + $0x2b88] sm:$0xff]  ;;  %v1143_v28 = vld [vmem:[%s10395_s11 + $0x2b90] sm:$0xff] }
 0x108   : > { %1140 = vst [vmem:[%s10400_s12 + $0xed0] sm:$0xff] %v1139_v26  ;;  %1142 = vst [vmem:[%s10400_s12 + $0xed8] sm:$0xff] %v1141_v27  ;;  %v1145_v29 = vld [vmem:[%s10395_s11 + $0x2b98] sm:$0xff]  ;;  %v1147_v30 = vld [vmem:[%s10395_s11 + $0x2ba0] sm:$0xff] }
 0x109   : > { %1144 = vst [vmem:[%s10400_s12 + $0xee0] sm:$0xff] %v1143_v28  ;;  %v1149_v31 = vld [vmem:[%s10395_s11 + $0x2ba8] sm:$0xff]  ;;  %1146 = vst [vmem:[%s10400_s12 + $0xee8] sm:$0xff] %v1145_v29  ;;  %v1151_v32 = vld [vmem:[%s10395_s11 + $0x2bb0] sm:$0xff] }
 0x10a   : > { %1148 = vst [vmem:[%s10400_s12 + $0xef0] sm:$0xff] %v1147_v30  ;;  %1150 = vst [vmem:[%s10400_s12 + $0xef8] sm:$0xff] %v1149_v31  ;;  %v1153_v33 = vld [vmem:[%s10395_s11 + $0x2bb8] sm:$0xff]  ;;  %v1155_v34 = vld [vmem:[%s10395_s11 + $0x2bc0] sm:$0xff] }
 0x10b   : > { %1152 = vst [vmem:[%s10400_s12 + $0xf00] sm:$0xff] %v1151_v32  ;;  %1154 = vst [vmem:[%s10400_s12 + $0xf08] sm:$0xff] %v1153_v33  ;;  %v1157_v35 = vld [vmem:[%s10395_s11 + $0x2bc8] sm:$0xff]  ;;  %v1159_v36 = vld [vmem:[%s10395_s11 + $0x2bd0] sm:$0xff] }
 0x10c   : > { %1156 = vst [vmem:[%s10400_s12 + $0xf10] sm:$0xff] %v1155_v34  ;;  %v1161_v37 = vld [vmem:[%s10395_s11 + $0x2bd8] sm:$0xff]  ;;  %1158 = vst [vmem:[%s10400_s12 + $0xf18] sm:$0xff] %v1157_v35  ;;  %v1163_v38 = vld [vmem:[%s10395_s11 + $0x2be0] sm:$0xff] }
 0x10d   : > { %1160 = vst [vmem:[%s10400_s12 + $0xf20] sm:$0xff] %v1159_v36  ;;  %1162 = vst [vmem:[%s10400_s12 + $0xf28] sm:$0xff] %v1161_v37  ;;  %v1165_v39 = vld [vmem:[%s10395_s11 + $0x2be8] sm:$0xff]  ;;  %v1167_v40 = vld [vmem:[%s10395_s11 + $0x2bf0] sm:$0xff] }
 0x10e   : > { %1164 = vst [vmem:[%s10400_s12 + $0xf30] sm:$0xff] %v1163_v38  ;;  %1166 = vst [vmem:[%s10400_s12 + $0xf38] sm:$0xff] %v1165_v39  ;;  %v1169_v41 = vld [vmem:[%s10395_s11 + $0x2bf8] sm:$0xff]  ;;  %v1171_v42 = vld [vmem:[%s10395_s11 + $0x2c00] sm:$0xff] }
 0x10f   : > { %1168 = vst [vmem:[%s10400_s12 + $0xf40] sm:$0xff] %v1167_v40  ;;  %v1173_v43 = vld [vmem:[%s10395_s11 + $0x2c08] sm:$0xff]  ;;  %1170 = vst [vmem:[%s10400_s12 + $0xf48] sm:$0xff] %v1169_v41  ;;  %v1175_v44 = vld [vmem:[%s10395_s11 + $0x2c10] sm:$0xff] }
 0x110   : > { %1172 = vst [vmem:[%s10400_s12 + $0xf50] sm:$0xff] %v1171_v42  ;;  %1174 = vst [vmem:[%s10400_s12 + $0xf58] sm:$0xff] %v1173_v43  ;;  %v1177_v45 = vld [vmem:[%s10395_s11 + $0x2c18] sm:$0xff]  ;;  %v1179_v46 = vld [vmem:[%s10395_s11 + $0x2c20] sm:$0xff] }
 0x111   : > { %1176 = vst [vmem:[%s10400_s12 + $0xf60] sm:$0xff] %v1175_v44  ;;  %1178 = vst [vmem:[%s10400_s12 + $0xf68] sm:$0xff] %v1177_v45  ;;  %v1181_v47 = vld [vmem:[%s10395_s11 + $0x2c28] sm:$0xff]  ;;  %v1183_v48 = vld [vmem:[%s10395_s11 + $0x2c30] sm:$0xff] }
 0x112   : > { %1180 = vst [vmem:[%s10400_s12 + $0xf70] sm:$0xff] %v1179_v46  ;;  %v1185_v49 = vld [vmem:[%s10395_s11 + $0x2c38] sm:$0xff]  ;;  %1182 = vst [vmem:[%s10400_s12 + $0xf78] sm:$0xff] %v1181_v47  ;;  %v1187_v50 = vld [vmem:[%s10395_s11 + $0x2c40] sm:$0xff] }
 0x113   : > { %1184 = vst [vmem:[%s10400_s12 + $0xf80] sm:$0xff] %v1183_v48  ;;  %1186 = vst [vmem:[%s10400_s12 + $0xf88] sm:$0xff] %v1185_v49  ;;  %v1189_v51 = vld [vmem:[%s10395_s11 + $0x2c48] sm:$0xff]  ;;  %v1191_v52 = vld [vmem:[%s10395_s11 + $0x2c50] sm:$0xff] }
 0x114   : > { %1188 = vst [vmem:[%s10400_s12 + $0xf90] sm:$0xff] %v1187_v50  ;;  %1190 = vst [vmem:[%s10400_s12 + $0xf98] sm:$0xff] %v1189_v51  ;;  %v1193_v53 = vld [vmem:[%s10395_s11 + $0x2c58] sm:$0xff]  ;;  %v1195_v54 = vld [vmem:[%s10395_s11 + $0x2c60] sm:$0xff] }
 0x115   : > { %1192 = vst [vmem:[%s10400_s12 + $0xfa0] sm:$0xff] %v1191_v52  ;;  %v1197_v55 = vld [vmem:[%s10395_s11 + $0x2c68] sm:$0xff]  ;;  %1194 = vst [vmem:[%s10400_s12 + $0xfa8] sm:$0xff] %v1193_v53  ;;  %v1199_v56 = vld [vmem:[%s10395_s11 + $0x2c70] sm:$0xff] }
 0x116   : > { %1196 = vst [vmem:[%s10400_s12 + $0xfb0] sm:$0xff] %v1195_v54  ;;  %1198 = vst [vmem:[%s10400_s12 + $0xfb8] sm:$0xff] %v1197_v55  ;;  %v1201_v57 = vld [vmem:[%s10395_s11 + $0x2c78] sm:$0xff]  ;;  %v1203_v58 = vld [vmem:[%s10395_s11 + $0x2c80] sm:$0xff] }
 0x117   : > { %1200 = vst [vmem:[%s10400_s12 + $0xfc0] sm:$0xff] %v1199_v56  ;;  %1202 = vst [vmem:[%s10400_s12 + $0xfc8] sm:$0xff] %v1201_v57  ;;  %v1205_v59 = vld [vmem:[%s10395_s11 + $0x2c88] sm:$0xff]  ;;  %v1207_v60 = vld [vmem:[%s10395_s11 + $0x2c90] sm:$0xff] }
 0x118   : > { %1204 = vst [vmem:[%s10400_s12 + $0xfd0] sm:$0xff] %v1203_v58  ;;  %v1209_v61 = vld [vmem:[%s10395_s11 + $0x2c98] sm:$0xff]  ;;  %1206 = vst [vmem:[%s10400_s12 + $0xfd8] sm:$0xff] %v1205_v59 }
 0x119   : > { %1208 = vst [vmem:[%s10400_s12 + $0xfe0] sm:$0xff] %v1207_v60  ;;  %1210 = vst [vmem:[%s10400_s12 + $0xfe8] sm:$0xff] %v1209_v61 }
 0x11a PF: > { %p8680_p7 = scmp.ge.s32.totalorder %s10305_s21, 1  ;;  %p1215_p8 = scmp.lt.s32.totalorder %s10305_s21, 7 }
 0x11c   : > { %p1216_p9 = pnand %p8680_p7, %p1215_p8 }
 0x11e   : > { %1219 = sbr.rel (%p1216_p9) target bundleno = 1357 (0x54d), region = 55 }
 0x125   : > { %s1222_s13 = sand.u32 1, %s10281_s15   ;;  %p1248_p10 = scmp.lt.s32.totalorder %s10293_s18, 1  ;;  %v14133_v62 = vmov 0   ;;  %vm2258_vm0 = vcmask 1044480   ;;  %vm2259_vm1 = vcmask 1045504   ;;  %v10308_v8 = vmov 65535  }
 0x126   : > { %s9415_s14 = smul.u32 4080, %s1222_s13  ;;  %2396 = vmatprep.mubr.bf16.mxu0 %v14133_v62  ;;  %2447 = vmatprep.mubr.bf16.mxu1 %v14133_v62  ;;  %v2260_v9 = vsel %vm2258_vm0, 4294967295, %v10308_v8  ;;  %v11464_v28 = vld [vmem:[%s14126_s1] sm:$0xff]   ;;  %vm2251_vm2 = vcmask 613376   ;;  %v11481_v37 = vld [vmem:[%s14126_s1 + $0x8] ss:$0 sps:$4 sm:$0xff]  }
 0x127   : > { %s14948_s18 = smov (!%p1248_p10, %s10293_s18), 1  ;;  %v11449_v17 = vsel %vm2259_vm1, %v2260_v9, 0  ;;  %p9296_p11 = scmp.ne.s32.totalorder %s10289_s17, 0 }
 0x128   : > { %s9416_s24 = smul.u32 408, %s14948_s18  ;;  %s11426_s25 = scalar_lea.vmem [#allocation3], %s9415_s14 }
 0x129   : > { %v9476_v63 = vld [vmem:[%s11426_s25 + $0x4] ss:$408 sps:$4 sm:$0xff]   ;;  %v9480_v1 = vld [vmem:[%s11426_s25] ss:$408 sps:$4 sm:$0xff]   ;;  %v9482_v3 = vld [vmem:[%s11426_s25 + $0x334] ss:$408 sps:$4 sm:$0xff]  }
 0x12a   : > { %v9478_v0 = vld [vmem:[%s11426_s25 + $0xc] ss:$408 sps:$4 sm:$0xff]   ;;  %s11433_s27 = scalar_lea.vmem %s14129_s4, %s9416_s24  ;;  %2364 = vmatprep.subr.bf16.mxu0 %v9476_v63  ;;  %v9481_v2 = vld [vmem:[%s11426_s25 + $0x8] ss:$408 sps:$4 sm:$0xff]   ;;  %v9484_v4 = vld [vmem:[%s11426_s25 + $0x33c] ss:$408 sps:$4 sm:$0xff]  }
 0x12b   : > { %2415 = vmatprep.subr.bf16.mxu1 %v9478_v0  ;;  %2365 = vmatpush1.bf16.msra.mxu0 %v9480_v1  ;;  %v9486_v5 = vld [vmem:[%s11426_s25 + $0x330] ss:$408 sps:$4 sm:$0xff]   ;;  %v9488_v7 = vld [vmem:[%s11426_s25 + $0x664] ss:$408 sps:$4 sm:$0xff]   ;;  %v9492_v11 = vld [vmem:[%s11426_s25 + $0x660] ss:$408 sps:$4 sm:$0xff]  }
 0x12c   : > { %2416 = vmatpush1.bf16.msra.mxu1 %v9481_v2  ;;  %2366 = vmatprep.subr.bf16.mxu0 %v9482_v3  ;;  %v9487_v6 = vld [vmem:[%s11426_s25 + $0x338] ss:$408 sps:$4 sm:$0xff]   ;;  %v9490_v10 = vld [vmem:[%s11426_s25 + $0x66c] ss:$408 sps:$4 sm:$0xff]   ;;  %v9493_v12 = vld [vmem:[%s11426_s25 + $0x668] ss:$408 sps:$4 sm:$0xff]  }
 0x12d   : > { %2417 = vmatprep.subr.bf16.mxu1 %v9484_v4  ;;  %v9494_v13 = vld [vmem:[%s11426_s25 + $0x994] ss:$408 sps:$4 sm:$0xff]   ;;  %v9498_v15 = vld [vmem:[%s11426_s25 + $0x990] ss:$408 sps:$4 sm:$0xff]   ;;  %v9515_v31 = vld [vmem:[%s11426_s25 + $0x344] ss:$408 sps:$4 sm:$0xff]  }
 0x12e   : > { %v9496_v14 = vld [vmem:[%s11426_s25 + $0x99c] ss:$408 sps:$4 sm:$0xff]   ;;  %v9499_v16 = vld [vmem:[%s11426_s25 + $0x998] ss:$408 sps:$4 sm:$0xff]   ;;  %v9518_v32 = vld [vmem:[%s11426_s25 + $0x34c] ss:$408 sps:$4 sm:$0xff]  }
 0x12f   : > { %2367 = vmatpush1.bf16.msra.mxu0 %v9486_v5  ;;  %v9500_v18 = vld [vmem:[%s11426_s25 + $0xcc4] ss:$408 sps:$4 sm:$0x3f]   ;;  %v9504_v21 = vld [vmem:[%s11426_s25 + $0xcc0] ss:$408 sps:$4 sm:$0x3f]  }
 0x130   : > { %2418 = vmatpush1.bf16.msra.mxu1 %v9487_v6  ;;  %2368 = vmatprep.subr.bf16.mxu0 %v9488_v7  ;;  %v9502_v19 = vld [vmem:[%s11426_s25 + $0xccc] ss:$408 sps:$4 sm:$0x3f]   ;;  %v2266_v20 = vand.u32 %v9500_v18, %v11449_v17  ;;  %v9505_v22 = vld [vmem:[%s11426_s25 + $0xcc8] ss:$408 sps:$4 sm:$0x3f]   ;;  %v2263_v24 = vand.u32 %v9504_v21, %v11449_v17 }
 0x131   : > { %2419 = vmatprep.subr.bf16.mxu1 %v9490_v10  ;;  %v2272_v23 = vand.u32 %v9502_v19, %v11449_v17  ;;  %v2269_v25 = vand.u32 %v9505_v22, %v11449_v17  ;;  %v9509_v26 = vld [vmem:[%s11426_s25 + $0x14] ss:$408 sps:$4 sm:$0xff]   ;;  %v9507_v29 = vld [vmem:[%s11426_s25 + $0x10] ss:$408 sps:$4 sm:$0xff]   ;;  %v9513_v33 = vld [vmem:[%s11426_s25 + $0x340] ss:$408 sps:$4 sm:$0xff]  }
 0x132   : > { %v9512_v27 = vld [vmem:[%s11426_s25 + $0x1c] ss:$408 sps:$4 sm:$0xff]   ;;  %v9510_v30 = vld [vmem:[%s11426_s25 + $0x18] ss:$408 sps:$4 sm:$0xff]   ;;  %v9516_v34 = vld [vmem:[%s11426_s25 + $0x348] ss:$408 sps:$4 sm:$0xff]  }
 0x133   : > { %2369 = vmatpush1.bf16.msra.mxu0 %v9492_v11  ;;  %v9521_v35 = vld [vmem:[%s11426_s25 + $0x674] ss:$408 sps:$4 sm:$0xff]   ;;  %v9519_v38 = vld [vmem:[%s11426_s25 + $0x670] ss:$408 sps:$4 sm:$0xff]   ;;  %v9528_v40 = vld [vmem:[%s11426_s25 + $0x9a4] ss:$408 sps:$4 sm:$0xff]  }
 0x134   : > { %2420 = vmatpush1.bf16.msra.mxu1 %v9493_v12  ;;  %2370 = vmatprep.subr.bf16.mxu0 %v9494_v13  ;;  %v9524_v36 = vld [vmem:[%s11426_s25 + $0x67c] ss:$408 sps:$4 sm:$0xff]   ;;  %v9522_v39 = vld [vmem:[%s11426_s25 + $0x678] ss:$408 sps:$4 sm:$0xff]   ;;  %v9531_v42 = vld [vmem:[%s11426_s25 + $0x9ac] ss:$408 sps:$4 sm:$0xff]  }
 0x135   : > { %2421 = vmatprep.subr.bf16.mxu1 %v9496_v14  ;;  %v9534_v41 = vld [vmem:[%s11426_s25 + $0xcd4] ss:$408 sps:$4 sm:$0x3f]   ;;  %v9526_v44 = vld [vmem:[%s11426_s25 + $0x9a0] ss:$408 sps:$4 sm:$0xff]  }
 0x136   : > { %v9537_v43 = vld [vmem:[%s11426_s25 + $0xcdc] ss:$408 sps:$4 sm:$0x3f]   ;;  %v9532_v45 = vld [vmem:[%s11426_s25 + $0xcd0] ss:$408 sps:$4 sm:$0x3f]   ;;  %v2278_v48 = vand.u32 %v9534_v41, %v11449_v17 }
 0x137   : > { %2371 = vmatpush1.bf16.msra.mxu0 %v9498_v15  ;;  %v9529_v46 = vld [vmem:[%s11426_s25 + $0x9a8] ss:$408 sps:$4 sm:$0xff]   ;;  %v9535_v47 = vld [vmem:[%s11426_s25 + $0xcd8] ss:$408 sps:$4 sm:$0x3f]   ;;  %v2284_v49 = vand.u32 %v9537_v43, %v11449_v17  ;;  %v2275_v50 = vand.u32 %v9532_v45, %v11449_v17 }
 0x138   : > { %2422 = vmatpush1.bf16.msra.mxu1 %v9499_v16  ;;  %2372 = vmatprep.subr.bf16.mxu0 %v2266_v20  ;;  %v2281_v51 = vand.u32 %v9535_v47, %v11449_v17  ;;  %v9540_v52 = vld [vmem:[%s11426_s25 + $0x24] ss:$408 sps:$4 sm:$0xff]   ;;  %v9538_v54 = vld [vmem:[%s11426_s25 + $0x20] ss:$408 sps:$4 sm:$0xff]   ;;  %v9546_v56 = vld [vmem:[%s11426_s25 + $0x354] ss:$408 sps:$4 sm:$0xff]  }
 0x139   : > { %2423 = vmatprep.subr.bf16.mxu1 %v2272_v23  ;;  %v9543_v53 = vld [vmem:[%s11426_s25 + $0x2c] ss:$408 sps:$4 sm:$0xff]   ;;  %v9541_v55 = vld [vmem:[%s11426_s25 + $0x28] ss:$408 sps:$4 sm:$0xff]   ;;  %v9549_v57 = vld [vmem:[%s11426_s25 + $0x35c] ss:$408 sps:$4 sm:$0xff]  }
 0x13a   : > { %v9544_v58 = vld [vmem:[%s11426_s25 + $0x350] ss:$408 sps:$4 sm:$0xff]   ;;  %v9552_v60 = vld [vmem:[%s11426_s25 + $0x684] ss:$408 sps:$4 sm:$0xff]   ;;  %v9550_v63 = vld [vmem:[%s11426_s25 + $0x680] ss:$408 sps:$4 sm:$0xff]  }
 0x13b   : > { %2373 = vmatpush1.bf16.msra.mxu0 %v2263_v24  ;;  %v9547_v59 = vld [vmem:[%s11426_s25 + $0x358] ss:$408 sps:$4 sm:$0xff]   ;;  %v9555_v61 = vld [vmem:[%s11426_s25 + $0x68c] ss:$408 sps:$4 sm:$0xff]   ;;  %v9553_v0 = vld [vmem:[%s11426_s25 + $0x688] ss:$408 sps:$4 sm:$0xff]  }
 0x13c   : > { %2424 = vmatpush1.bf16.msra.mxu1 %v2269_v25  ;;  %2466 = vmatprep.subr.bf16.mxu0 %v9509_v26  ;;  %v9558_v1 = vld [vmem:[%s11426_s25 + $0x9b4] ss:$408 sps:$4 sm:$0xff]   ;;  %v9564_v3 = vld [vmem:[%s11426_s25 + $0xce4] ss:$408 sps:$4 sm:$0x3f]  }
 0x13d   : > { %2517 = vmatprep.subr.bf16.mxu1 %v9512_v27  ;;  %v9561_v2 = vld [vmem:[%s11426_s25 + $0x9bc] ss:$408 sps:$4 sm:$0xff]   ;;  %v9567_v4 = vld [vmem:[%s11426_s25 + $0xcec] ss:$408 sps:$4 sm:$0x3f]   ;;  %v2290_v9 = vand.u32 %v9564_v3, %v11449_v17 }
 0x13e   : > { %8854 = vmatmul.mubr.msk.bf16.vlgmr.msra.gmra.mrb[0].mxu0 %vm2251_vm2, %v11464_v28  ;;  %v9556_v5 = vld [vmem:[%s11426_s25 + $0x9b0] ss:$408 sps:$4 sm:$0xff]   ;;  %v9562_v7 = vld [vmem:[%s11426_s25 + $0xce0] ss:$408 sps:$4 sm:$0x3f]   ;;  %v2296_v10 = vand.u32 %v9567_v4, %v11449_v17 }
 0x13f   : > { %8856 = vmatmul.mubr.msk.bf16.vlgmr.msra.gmra.mrb[0].mxu1 %vm2251_vm2, %v11464_v28  ;;  %2467 = vmatpush1.bf16.msra.mxu0 %v9507_v29  ;;  %v9559_v6 = vld [vmem:[%s11426_s25 + $0x9b8] ss:$408 sps:$4 sm:$0xff]   ;;  %v9565_v8 = vld [vmem:[%s11426_s25 + $0xce8] ss:$408 sps:$4 sm:$0x3f]   ;;  %v2287_v11 = vand.u32 %v9562_v7, %v11449_v17 }
 0x140   : > { %2518 = vmatpush1.bf16.msra.mxu1 %v9510_v30  ;;  %2468 = vmatprep.subr.bf16.mxu0 %v9515_v31  ;;  %v2293_v12 = vand.u32 %v9565_v8, %v11449_v17  ;;  %v9570_v13 = vld [vmem:[%s11426_s25 + $0x34] ss:$408 sps:$4 sm:$0xff]   ;;  %v9568_v15 = vld [vmem:[%s11426_s25 + $0x30] ss:$408 sps:$4 sm:$0xff]   ;;  %v9576_v18 = vld [vmem:[%s11426_s25 + $0x364] ss:$408 sps:$4 sm:$0xff]  }
 0x141   : > { %2519 = vmatprep.subr.bf16.mxu1 %v9518_v32  ;;  %2406 = vmatprep.mubr.bf16.mxu0 %v14133_v62  ;;  %v9573_v14 = vld [vmem:[%s11426_s25 + $0x3c] ss:$408 sps:$4 sm:$0xff]   ;;  %v9571_v16 = vld [vmem:[%s11426_s25 + $0x38] ss:$408 sps:$4 sm:$0xff]   ;;  %v9579_v19 = vld [vmem:[%s11426_s25 + $0x36c] ss:$408 sps:$4 sm:$0xff]  }
 0x142   : > { %2457 = vmatprep.mubr.bf16.mxu1 %v14133_v62  ;;  %v9574_v20 = vld [vmem:[%s11426_s25 + $0x360] ss:$408 sps:$4 sm:$0xff]   ;;  %v9582_v22 = vld [vmem:[%s11426_s25 + $0x694] ss:$408 sps:$4 sm:$0xff]   ;;  %v9580_v24 = vld [vmem:[%s11426_s25 + $0x690] ss:$408 sps:$4 sm:$0xff]  }
 0x143   : > { %2469 = vmatpush1.bf16.msra.mxu0 %v9513_v33  ;;  %v9577_v21 = vld [vmem:[%s11426_s25 + $0x368] ss:$408 sps:$4 sm:$0xff]   ;;  %v9585_v23 = vld [vmem:[%s11426_s25 + $0x69c] ss:$408 sps:$4 sm:$0xff]   ;;  %v9583_v25 = vld [vmem:[%s11426_s25 + $0x698] ss:$408 sps:$4 sm:$0xff]  }
 0x144   : > { %2520 = vmatpush1.bf16.msra.mxu1 %v9516_v34  ;;  %2470 = vmatprep.subr.bf16.mxu0 %v9521_v35  ;;  %v9588_v26 = vld [vmem:[%s11426_s25 + $0x9c4] ss:$408 sps:$4 sm:$0xff]   ;;  %v9594_v27 = vld [vmem:[%s11426_s25 + $0xcf4] ss:$408 sps:$4 sm:$0x3f]  }
 0x145   : > { %2521 = vmatprep.subr.bf16.mxu1 %v9524_v36  ;;  %v9591_v29 = vld [vmem:[%s11426_s25 + $0x9cc] ss:$408 sps:$4 sm:$0xff]   ;;  %v9597_v30 = vld [vmem:[%s11426_s25 + $0xcfc] ss:$408 sps:$4 sm:$0x3f]   ;;  %v2302_v35 = vand.u32 %v9594_v27, %v11449_v17 }
 0x146   : > { %8855 = vmatmul.mubr.msk.bf16.gmra.mrb[4].mxu0 %vm2251_vm2, %v11481_v37  ;;  %v9586_v31 = vld [vmem:[%s11426_s25 + $0x9c0] ss:$408 sps:$4 sm:$0xff]   ;;  %v9592_v33 = vld [vmem:[%s11426_s25 + $0xcf0] ss:$408 sps:$4 sm:$0x3f]   ;;  %v2308_v36 = vand.u32 %v9597_v30, %v11449_v17 }
 0x147   : > { %8857 = vmatmul.mubr.msk.bf16.gmra.mrb[4].mxu1 %vm2251_vm2, %v11481_v37  ;;  %2471 = vmatpush1.bf16.msra.mxu0 %v9519_v38  ;;  %v9589_v32 = vld [vmem:[%s11426_s25 + $0x9c8] ss:$408 sps:$4 sm:$0xff]   ;;  %v9595_v34 = vld [vmem:[%s11426_s25 + $0xcf8] ss:$408 sps:$4 sm:$0x3f]   ;;  %v2299_v38 = vand.u32 %v9592_v33, %v11449_v17 }
 0x148   : > { %2522 = vmatpush1.bf16.msra.mxu1 %v9522_v39  ;;  %2472 = vmatprep.subr.bf16.mxu0 %v9528_v40  ;;  %v2305_v39 = vand.u32 %v9595_v34, %v11449_v17  ;;  %v9600_v40 = vld [vmem:[%s11426_s25 + $0x44] ss:$408 sps:$4 sm:$0xff]   ;;  %v9601_v43 = vld [vmem:[%s11426_s25 + $0x48] ss:$408 sps:$4 sm:$0xff]   ;;  %v9607_v47 = vld [vmem:[%s11426_s25 + $0x378] ss:$408 sps:$4 sm:$0xff]  }
 0x149   : > { %2523 = vmatprep.subr.bf16.mxu1 %v9531_v42  ;;  %2498 = vmatprep.mubr.bf16.mxu0 %v14133_v62  ;;  %v9603_v41 = vld [vmem:[%s11426_s25 + $0x4c] ss:$408 sps:$4 sm:$0xff]   ;;  %v9598_v42 = vld [vmem:[%s11426_s25 + $0x40] ss:$408 sps:$4 sm:$0xff]   ;;  %v9609_v45 = vld [vmem:[%s11426_s25 + $0x37c] ss:$408 sps:$4 sm:$0xff]  }
 0x14a   : > { %2549 = vmatprep.mubr.bf16.mxu1 %v14133_v62  ;;  %v9628_v3 = vld [vmem:[%s11426_s25 + $0x50] ss:$408 sps:$4 sm:$0xff]   ;;  %v9634_v7 = vld [vmem:[%s11426_s25 + $0x380] ss:$408 sps:$4 sm:$0xff]   ;;  %v9663_v27 = vld [vmem:[%s11426_s25 + $0x6c] ss:$408 sps:$4 sm:$0xff]  }
 0x14b   : > { %2473 = vmatpush1.bf16.msra.mxu0 %v9526_v44  ;;  %v9606_v44 = vld [vmem:[%s11426_s25 + $0x374] ss:$408 sps:$4 sm:$0xff]   ;;  %v9631_v4 = vld [vmem:[%s11426_s25 + $0x58] ss:$408 sps:$4 sm:$0xff]   ;;  %v9637_v8 = vld [vmem:[%s11426_s25 + $0x388] ss:$408 sps:$4 sm:$0xff]  }
 0x14c   : > { %2524 = vmatpush1.bf16.msra.mxu1 %v9529_v46  ;;  %2474 = vmatprep.subr.bf16.mxu0 %v2278_v48  ;;  %v9604_v46 = vld [vmem:[%s11426_s25 + $0x370] ss:$408 sps:$4 sm:$0xff]   ;;  %v9612_v48 = vld [vmem:[%s11426_s25 + $0x6a4] ss:$408 sps:$4 sm:$0xff]  }
 0x14d   : > { %2525 = vmatprep.subr.bf16.mxu1 %v2284_v49  ;;  %v9615_v49 = vld [vmem:[%s11426_s25 + $0x6ac] ss:$408 sps:$4 sm:$0xff]   ;;  %v9661_v30 = vld [vmem:[%s11426_s25 + $0x68] ss:$408 sps:$4 sm:$0xff]   ;;  %v9667_v34 = vld [vmem:[%s11426_s25 + $0x398] ss:$408 sps:$4 sm:$0xff]  }
 0x14e   : > { %v9664_v33 = vld [vmem:[%s11426_s25 + $0x390] ss:$408 sps:$4 sm:$0xff]  }
 0x14f   : > { %2475 = vmatpush1.bf16.msra.mxu0 %v2275_v50  ;;  %v9610_v50 = vld [vmem:[%s11426_s25 + $0x6a0] ss:$408 sps:$4 sm:$0xff]  }
 0x150   : > { %2526 = vmatpush1.bf16.msra.mxu1 %v2281_v51  ;;  %2568 = vmatprep.subr.bf16.mxu0 %v9540_v52  ;;  %v9613_v51 = vld [vmem:[%s11426_s25 + $0x6a8] ss:$408 sps:$4 sm:$0xff]   ;;  %v9618_v52 = vld [vmem:[%s11426_s25 + $0x9d4] ss:$408 sps:$4 sm:$0xff]  }
 0x151   : > { %2619 = vmatprep.subr.bf16.mxu1 %v9543_v53  ;;  %v9624_v53 = vld [vmem:[%s11426_s25 + $0xd04] ss:$408 sps:$4 sm:$0x3f]  }
 0x152   : > { %8858 = vmatmul.mubr.msk.bf16.vlgmr.msra.gmra.mrb[8].mxu0 %vm2251_vm2, %v11464_v28 }
 0x153   : > { %8860 = vmatmul.mubr.msk.bf16.vlgmr.msra.gmra.mrb[8].mxu1 %vm2251_vm2, %v11464_v28  ;;  %2569 = vmatpush1.bf16.msra.mxu0 %v9538_v54  ;;  %v9621_v54 = vld [vmem:[%s11426_s25 + $0x9dc] ss:$408 sps:$4 sm:$0xff]  }
 0x154   : > { %2620 = vmatpush1.bf16.msra.mxu1 %v9541_v55  ;;  %2570 = vmatprep.subr.bf16.mxu0 %v9546_v56  ;;  %v9627_v55 = vld [vmem:[%s11426_s25 + $0xd0c] ss:$408 sps:$4 sm:$0x3f]   ;;  %v9616_v56 = vld [vmem:[%s11426_s25 + $0x9d0] ss:$408 sps:$4 sm:$0xff]  }
 0x155   : > { %2621 = vmatprep.subr.bf16.mxu1 %v9549_v57  ;;  %2508 = vmatprep.mubr.bf16.mxu0 %v14133_v62  ;;  %v9622_v57 = vld [vmem:[%s11426_s25 + $0xd00] ss:$408 sps:$4 sm:$0x3f]  }
 0x156   : > { %2559 = vmatprep.mubr.bf16.mxu1 %v14133_v62 }
 0x157   : > { %2571 = vmatpush1.bf16.msra.mxu0 %v9544_v58  ;;  %v9619_v58 = vld [vmem:[%s11426_s25 + $0x9d8] ss:$408 sps:$4 sm:$0xff]  }
 0x158   : > { %2622 = vmatpush1.bf16.msra.mxu1 %v9547_v59  ;;  %2572 = vmatprep.subr.bf16.mxu0 %v9552_v60  ;;  %v9625_v59 = vld [vmem:[%s11426_s25 + $0xd08] ss:$408 sps:$4 sm:$0x3f]   ;;  %v2314_v60 = vand.u32 %v9624_v53, %v11449_v17  ;;  %v9693_v53 = vld [vmem:[%s11426_s25 + $0x7c] ss:$408 sps:$4 sm:$0xff]  }
 0x159   : > { %2623 = vmatprep.subr.bf16.mxu1 %v9555_v61  ;;  %v2320_v61 = vand.u32 %v9627_v55, %v11449_v17  ;;  %v9691_v55 = vld [vmem:[%s11426_s25 + $0x78] ss:$408 sps:$4 sm:$0xff]  }
 0x15a   : > { %8859 = vmatmul.mubr.msk.bf16.gmra.mrb[12].mxu0 %vm2251_vm2, %v11481_v37 }
 0x15b   : > { %8861 = vmatmul.mubr.msk.bf16.gmra.mrb[12].mxu1 %vm2251_vm2, %v11481_v37  ;;  %2573 = vmatpush1.bf16.msra.mxu0 %v9550_v63  ;;  %v2311_v63 = vand.u32 %v9622_v57, %v11449_v17  ;;  %v9699_v57 = vld [vmem:[%s11426_s25 + $0x3ac] ss:$408 sps:$4 sm:$0xff]  }
 0x15c   : > { %2624 = vmatpush1.bf16.msra.mxu1 %v9553_v0  ;;  %2574 = vmatprep.subr.bf16.mxu0 %v9558_v1  ;;  %v2317_v0 = vand.u32 %v9625_v59, %v11449_v17  ;;  %v9630_v1 = vld [vmem:[%s11426_s25 + $0x54] ss:$408 sps:$4 sm:$0xff]   ;;  %v9697_v59 = vld [vmem:[%s11426_s25 + $0x3a8] ss:$408 sps:$4 sm:$0xff]  }
 0x15d   : > { %2625 = vmatprep.subr.bf16.mxu1 %v9561_v2  ;;  %2600 = vmatprep.mubr.bf16.mxu0 %v14133_v62  ;;  %v9633_v2 = vld [vmem:[%s11426_s25 + $0x5c] ss:$408 sps:$4 sm:$0xff]  }
 0x15e   : > { %2651 = vmatprep.mubr.bf16.mxu1 %v14133_v62 }
 0x15f   : > { %2575 = vmatpush1.bf16.msra.mxu0 %v9556_v5  ;;  %v9636_v5 = vld [vmem:[%s11426_s25 + $0x384] ss:$408 sps:$4 sm:$0xff]  }
 0x160   : > { %2626 = vmatpush1.bf16.msra.mxu1 %v9559_v6  ;;  %2576 = vmatprep.subr.bf16.mxu0 %v2290_v9  ;;  %v9639_v6 = vld [vmem:[%s11426_s25 + $0x38c] ss:$408 sps:$4 sm:$0xff]  }
 0x161   : > { %2627 = vmatprep.subr.bf16.mxu1 %v2296_v10  ;;  %v9642_v9 = vld [vmem:[%s11426_s25 + $0x6b4] ss:$408 sps:$4 sm:$0xff]  }
 0x162   : > { %v9645_v10 = vld [vmem:[%s11426_s25 + $0x6bc] ss:$408 sps:$4 sm:$0xff]  }
 0x163   : > { %2577 = vmatpush1.bf16.msra.mxu0 %v2287_v11  ;;  %v9640_v11 = vld [vmem:[%s11426_s25 + $0x6b0] ss:$408 sps:$4 sm:$0xff]  }
 0x164   : > { %2628 = vmatpush1.bf16.msra.mxu1 %v2293_v12  ;;  %2670 = vmatprep.subr.bf16.mxu0 %v9570_v13  ;;  %v9643_v12 = vld [vmem:[%s11426_s25 + $0x6b8] ss:$408 sps:$4 sm:$0xff]   ;;  %v9648_v13 = vld [vmem:[%s11426_s25 + $0x9e4] ss:$408 sps:$4 sm:$0xff]  }
 0x165   : > { %2721 = vmatprep.subr.bf16.mxu1 %v9573_v14  ;;  %v9651_v14 = vld [vmem:[%s11426_s25 + $0x9ec] ss:$408 sps:$4 sm:$0xff]  }
 0x166   : > { %8862 = vmatmul.mubr.msk.bf16.vlgmr.msra.gmra.mrb[16].mxu0 %vm2251_vm2, %v11464_v28 }
 0x167   : > { %8864 = vmatmul.mubr.msk.bf16.vlgmr.msra.gmra.mrb[16].mxu1 %vm2251_vm2, %v11464_v28  ;;  %2671 = vmatpush1.bf16.msra.mxu0 %v9568_v15  ;;  %v9654_v15 = vld [vmem:[%s11426_s25 + $0xd14] ss:$408 sps:$4 sm:$0x3f]  }
 0x168   : > { %2722 = vmatpush1.bf16.msra.mxu1 %v9571_v16  ;;  %2672 = vmatprep.subr.bf16.mxu0 %v9576_v18  ;;  %v9657_v16 = vld [vmem:[%s11426_s25 + $0xd1c] ss:$408 sps:$4 sm:$0x3f]   ;;  %v9646_v18 = vld [vmem:[%s11426_s25 + $0x9e0] ss:$408 sps:$4 sm:$0xff]  }
 0x169   : > { %2723 = vmatprep.subr.bf16.mxu1 %v9579_v19  ;;  %2610 = vmatprep.mubr.bf16.mxu0 %v14133_v62  ;;  %v9649_v19 = vld [vmem:[%s11426_s25 + $0x9e8] ss:$408 sps:$4 sm:$0xff]  }
 0x16a   : > { %2661 = vmatprep.mubr.bf16.mxu1 %v14133_v62 }
 0x16b   : > { %2673 = vmatpush1.bf16.msra.mxu0 %v9574_v20  ;;  %v9652_v20 = vld [vmem:[%s11426_s25 + $0xd10] ss:$408 sps:$4 sm:$0x3f]  }
 0x16c   : > { %2724 = vmatpush1.bf16.msra.mxu1 %v9577_v21  ;;  %2674 = vmatprep.subr.bf16.mxu0 %v9582_v22  ;;  %v9655_v21 = vld [vmem:[%s11426_s25 + $0xd18] ss:$408 sps:$4 sm:$0x3f]   ;;  %v2326_v22 = vand.u32 %v9654_v15, %v11449_v17  ;;  %v9726_v15 = vld [vmem:[%s11426_s25 + $0x3b4] ss:$408 sps:$4 sm:$0xff]  }
 0x16d   : > { %2725 = vmatprep.subr.bf16.mxu1 %v9585_v23  ;;  %v2332_v23 = vand.u32 %v9657_v16, %v11449_v17  ;;  %v9729_v16 = vld [vmem:[%s11426_s25 + $0x3bc] ss:$408 sps:$4 sm:$0xff]  }
 0x16e   : > { %8863 = vmatmul.mubr.msk.bf16.gmra.mrb[20].mxu0 %vm2251_vm2, %v11481_v37 }
 0x16f   : > { %8865 = vmatmul.mubr.msk.bf16.gmra.mrb[20].mxu1 %vm2251_vm2, %v11481_v37  ;;  %2675 = vmatpush1.bf16.msra.mxu0 %v9580_v24  ;;  %v2323_v24 = vand.u32 %v9652_v20, %v11449_v17  ;;  %v9727_v20 = vld [vmem:[%s11426_s25 + $0x3b8] ss:$408 sps:$4 sm:$0xff]  }
 0x170   : > { %2726 = vmatpush1.bf16.msra.mxu1 %v9583_v25  ;;  %2676 = vmatprep.subr.bf16.mxu0 %v9588_v26  ;;  %v2329_v25 = vand.u32 %v9655_v21, %v11449_v17  ;;  %v9660_v26 = vld [vmem:[%s11426_s25 + $0x64] ss:$408 sps:$4 sm:$0xff]  }
 0x171   : > { %2727 = vmatprep.subr.bf16.mxu1 %v9591_v29  ;;  %2702 = vmatprep.mubr.bf16.mxu0 %v14133_v62  ;;  %v9658_v29 = vld [vmem:[%s11426_s25 + $0x60] ss:$408 sps:$4 sm:$0xff]   ;;  %v9732_v21 = vld [vmem:[%s11426_s25 + $0x6e4] ss:$408 sps:$4 sm:$0xff]  }
 0x172   : > { %2753 = vmatprep.mubr.bf16.mxu1 %v14133_v62 }
 0x173   : > { %2677 = vmatpush1.bf16.msra.mxu0 %v9586_v31  ;;  %v9666_v31 = vld [vmem:[%s11426_s25 + $0x394] ss:$408 sps:$4 sm:$0xff]  }
 0x174   : > { %2728 = vmatpush1.bf16.msra.mxu1 %v9589_v32  ;;  %2678 = vmatprep.subr.bf16.mxu0 %v2302_v35  ;;  %v9669_v32 = vld [vmem:[%s11426_s25 + $0x39c] ss:$408 sps:$4 sm:$0xff]  }
 0x175   : > { %2729 = vmatprep.subr.bf16.mxu1 %v2308_v36  ;;  %v9672_v35 = vld [vmem:[%s11426_s25 + $0x6c4] ss:$408 sps:$4 sm:$0xff]  }
 0x176   : > { %v9675_v36 = vld [vmem:[%s11426_s25 + $0x6cc] ss:$408 sps:$4 sm:$0xff]  }
 0x177   : > { %2679 = vmatpush1.bf16.msra.mxu0 %v2299_v38  ;;  %v9670_v38 = vld [vmem:[%s11426_s25 + $0x6c0] ss:$408 sps:$4 sm:$0xff]  }
 0x178   : > { %2730 = vmatpush1.bf16.msra.mxu1 %v2305_v39  ;;  %2772 = vmatprep.subr.bf16.mxu0 %v9600_v40  ;;  %v9673_v39 = vld [vmem:[%s11426_s25 + $0x6c8] ss:$408 sps:$4 sm:$0xff]   ;;  %v9678_v40 = vld [vmem:[%s11426_s25 + $0x9f4] ss:$408 sps:$4 sm:$0xff]  }
 0x179   : > { %2823 = vmatprep.subr.bf16.mxu1 %v9603_v41  ;;  %v9684_v41 = vld [vmem:[%s11426_s25 + $0xd24] ss:$408 sps:$4 sm:$0x3f]  }
 0x17a   : > { %8866 = vmatmul.mubr.msk.bf16.vlgmr.msra.gmra.mrb[24].mxu0 %vm2251_vm2, %v11464_v28 }
 0x17b   : > { %8868 = vmatmul.mubr.msk.bf16.vlgmr.msra.gmra.mrb[24].mxu1 %vm2251_vm2, %v11464_v28  ;;  %2773 = vmatpush1.bf16.msra.mxu0 %v9598_v42  ;;  %v9681_v42 = vld [vmem:[%s11426_s25 + $0x9fc] ss:$408 sps:$4 sm:$0xff]  }
 0x17c   : > { %2824 = vmatpush1.bf16.msra.mxu1 %v9601_v43  ;;  %2774 = vmatprep.subr.bf16.mxu0 %v9606_v44  ;;  %v9687_v43 = vld [vmem:[%s11426_s25 + $0xd2c] ss:$408 sps:$4 sm:$0x3f]   ;;  %v9676_v44 = vld [vmem:[%s11426_s25 + $0x9f0] ss:$408 sps:$4 sm:$0xff]  }
 0x17d   : > { %2825 = vmatprep.subr.bf16.mxu1 %v9609_v45  ;;  %2712 = vmatprep.mubr.bf16.mxu0 %v14133_v62  ;;  %v9679_v45 = vld [vmem:[%s11426_s25 + $0x9f8] ss:$408 sps:$4 sm:$0xff]  }
 0x17e   : > { %2763 = vmatprep.mubr.bf16.mxu1 %v14133_v62 }
 0x17f   : > { %2775 = vmatpush1.bf16.msra.mxu0 %v9604_v46  ;;  %v9682_v46 = vld [vmem:[%s11426_s25 + $0xd20] ss:$408 sps:$4 sm:$0x3f]  }
 0x180   : > { %2826 = vmatpush1.bf16.msra.mxu1 %v9607_v47  ;;  %2776 = vmatprep.subr.bf16.mxu0 %v9612_v48  ;;  %v9685_v47 = vld [vmem:[%s11426_s25 + $0xd28] ss:$408 sps:$4 sm:$0x3f]   ;;  %v2338_v48 = vand.u32 %v9684_v41, %v11449_v17  ;;  %v9753_v41 = vld [vmem:[%s11426_s25 + $0x9c] ss:$408 sps:$4 sm:$0xff]  }
 0x181   : > { %2827 = vmatprep.subr.bf16.mxu1 %v9615_v49  ;;  %v2344_v49 = vand.u32 %v9687_v43, %v11449_v17  ;;  %v9751_v43 = vld [vmem:[%s11426_s25 + $0x98] ss:$408 sps:$4 sm:$0xff]  }
 0x182   : > { %8867 = vmatmul.mubr.msk.bf16.gmra.mrb[28].mxu0 %vm2251_vm2, %v11481_v37 }
 0x183   : > { %8869 = vmatmul.mubr.msk.bf16.gmra.mrb[28].mxu1 %vm2251_vm2, %v11481_v37  ;;  %2777 = vmatpush1.bf16.msra.mxu0 %v9610_v50  ;;  %v2335_v50 = vand.u32 %v9682_v46, %v11449_v17  ;;  %v9754_v46 = vld [vmem:[%s11426_s25 + $0x3c0] ss:$408 sps:$4 sm:$0xff]  }
 0x184   : > { %2828 = vmatpush1.bf16.msra.mxu1 %v9613_v51  ;;  %2778 = vmatprep.subr.bf16.mxu0 %v9618_v52  ;;  %v2341_v51 = vand.u32 %v9685_v47, %v11449_v17  ;;  %v9690_v52 = vld [vmem:[%s11426_s25 + $0x74] ss:$408 sps:$4 sm:$0xff]   ;;  %v9757_v47 = vld [vmem:[%s11426_s25 + $0x3c8] ss:$408 sps:$4 sm:$0xff]  }
 0x185   : > { %2829 = vmatprep.subr.bf16.mxu1 %v9621_v54  ;;  %2804 = vmatprep.mubr.bf16.mxu0 %v14133_v62  ;;  %v9688_v54 = vld [vmem:[%s11426_s25 + $0x70] ss:$408 sps:$4 sm:$0xff]  }
 0x186   : > { %2855 = vmatprep.mubr.bf16.mxu1 %v14133_v62 }
 0x187   : > { %2779 = vmatpush1.bf16.msra.mxu0 %v9616_v56  ;;  %v9696_v56 = vld [vmem:[%s11426_s25 + $0x3a4] ss:$408 sps:$4 sm:$0xff]  }
 0x188   : > { %2830 = vmatpush1.bf16.msra.mxu1 %v9619_v58  ;;  %2780 = vmatprep.subr.bf16.mxu0 %v2314_v60  ;;  %v9694_v58 = vld [vmem:[%s11426_s25 + $0x3a0] ss:$408 sps:$4 sm:$0xff]   ;;  %v9702_v60 = vld [vmem:[%s11426_s25 + $0x6d4] ss:$408 sps:$4 sm:$0xff]  }
 0x189   : > { %2831 = vmatprep.subr.bf16.mxu1 %v2320_v61  ;;  %v9705_v61 = vld [vmem:[%s11426_s25 + $0x6dc] ss:$408 sps:$4 sm:$0xff]  }
 0x18b   : > { %2781 = vmatpush1.bf16.msra.mxu0 %v2311_v63  ;;  %v9700_v63 = vld [vmem:[%s11426_s25 + $0x6d0] ss:$408 sps:$4 sm:$0xff]  }
 0x18c   : > { %2832 = vmatpush1.bf16.msra.mxu1 %v2317_v0  ;;  %2874 = vmatprep.subr.bf16.mxu0 %v9630_v1  ;;  %v9703_v0 = vld [vmem:[%s11426_s25 + $0x6d8] ss:$408 sps:$4 sm:$0xff]   ;;  %v9711_v1 = vld [vmem:[%s11426_s25 + $0xa0c] ss:$408 sps:$4 sm:$0xff]  }
 0x18d   : > { %2925 = vmatprep.subr.bf16.mxu1 %v9633_v2  ;;  %v9714_v2 = vld [vmem:[%s11426_s25 + $0xd34] ss:$408 sps:$4 sm:$0x3f]  }
 0x18e   : > { %8870 = vmatmul.mubr.msk.bf16.vlgmr.msra.gmra.mrb[32].mxu0 %vm2251_vm2, %v11464_v28 }
 0x18f   : > { %8872 = vmatmul.mubr.msk.bf16.vlgmr.msra.gmra.mrb[32].mxu1 %vm2251_vm2, %v11464_v28  ;;  %2875 = vmatpush1.bf16.msra.mxu0 %v9628_v3  ;;  %v9717_v3 = vld [vmem:[%s11426_s25 + $0xd3c] ss:$408 sps:$4 sm:$0x3f]  }
 0x190   : > { %2926 = vmatpush1.bf16.msra.mxu1 %v9631_v4  ;;  %2876 = vmatprep.subr.bf16.mxu0 %v9636_v5  ;;  %v9706_v4 = vld [vmem:[%s11426_s25 + $0xa00] ss:$408 sps:$4 sm:$0xff]   ;;  %v9712_v5 = vld [vmem:[%s11426_s25 + $0xd30] ss:$408 sps:$4 sm:$0x3f]  }
 0x191   : > { %2927 = vmatprep.subr.bf16.mxu1 %v9639_v6  ;;  %2814 = vmatprep.mubr.bf16.mxu0 %v14133_v62  ;;  %v9709_v6 = vld [vmem:[%s11426_s25 + $0xa08] ss:$408 sps:$4 sm:$0xff]  }
 0x192   : > { %2865 = vmatprep.mubr.bf16.mxu1 %v14133_v62 }
 0x193   : > { %2877 = vmatpush1.bf16.msra.mxu0 %v9634_v7  ;;  %v9715_v7 = vld [vmem:[%s11426_s25 + $0xd38] ss:$408 sps:$4 sm:$0x3f]  }
 0x194   : > { %2928 = vmatpush1.bf16.msra.mxu1 %v9637_v8  ;;  %2878 = vmatprep.subr.bf16.mxu0 %v9642_v9  ;;  %v2350_v8 = vand.u32 %v9714_v2, %v11449_v17  ;;  %v2356_v9 = vand.u32 %v9717_v3, %v11449_v17  ;;  %v9778_v2 = vld [vmem:[%s11426_s25 + $0xa0] ss:$408 sps:$4 sm:$0xff]  }
 0x195   : > { %2929 = vmatprep.subr.bf16.mxu1 %v9645_v10  ;;  %v2353_v10 = vand.u32 %v9715_v7, %v11449_v17  ;;  %v9781_v3 = vld [vmem:[%s11426_s25 + $0xa8] ss:$408 sps:$4 sm:$0xff]   ;;  %v9787_v7 = vld [vmem:[%s11426_s25 + $0x3d8] ss:$408 sps:$4 sm:$0xff]  }
 0x196   : > { %8871 = vmatmul.mubr.msk.bf16.gmra.mrb[36].mxu0 %vm2251_vm2, %v11481_v37 }
 0x197   : > { %8873 = vmatmul.mubr.msk.bf16.gmra.mrb[36].mxu1 %vm2251_vm2, %v11481_v37  ;;  %2879 = vmatpush1.bf16.msra.mxu0 %v9640_v11  ;;  %v9720_v11 = vld [vmem:[%s11426_s25 + $0x84] ss:$408 sps:$4 sm:$0xff]  }
 0x198   : > { %2930 = vmatpush1.bf16.msra.mxu1 %v9643_v12  ;;  %2880 = vmatprep.subr.bf16.mxu0 %v9648_v13  ;;  %v9723_v12 = vld [vmem:[%s11426_s25 + $0x8c] ss:$408 sps:$4 sm:$0xff]   ;;  %v9718_v13 = vld [vmem:[%s11426_s25 + $0x80] ss:$408 sps:$4 sm:$0xff]  }
 0x199   : > { %2931 = vmatprep.subr.bf16.mxu1 %v9651_v14  ;;  %2906 = vmatprep.mubr.bf16.mxu0 %v14133_v62  ;;  %v9721_v14 = vld [vmem:[%s11426_s25 + $0x88] ss:$408 sps:$4 sm:$0xff]  }
 0x19a   : > { %2957 = vmatprep.mubr.bf16.mxu1 %v14133_v62 }
 0x19b   : > { %2881 = vmatpush1.bf16.msra.mxu0 %v9646_v18  ;;  %v11730_v18 = vld [vmem:[%s14126_s1] sm:$0xff]  }
 0x19c   : > { %2932 = vmatpush1.bf16.msra.mxu1 %v9649_v19  ;;  %2882 = vmatprep.subr.bf16.mxu0 %v2326_v22  ;;  %v9724_v19 = vld [vmem:[%s11426_s25 + $0x3b0] ss:$408 sps:$4 sm:$0xff]   ;;  %v9735_v22 = vld [vmem:[%s11426_s25 + $0x6ec] ss:$408 sps:$4 sm:$0xff]  }
 0x19d   : > { %2933 = vmatprep.subr.bf16.mxu1 %v2332_v23  ;;  %v9730_v23 = vld [vmem:[%s11426_s25 + $0x6e0] ss:$408 sps:$4 sm:$0xff]  }
 0x19f   : > { %2883 = vmatpush1.bf16.msra.mxu0 %v2323_v24  ;;  %v9733_v24 = vld [vmem:[%s11426_s25 + $0x6e8] ss:$408 sps:$4 sm:$0xff]  }
 0x1a0   : > { %2934 = vmatpush1.bf16.msra.mxu1 %v2329_v25  ;;  %2976 = vmatprep.subr.bf16.mxu0 %v9660_v26  ;;  %v9738_v25 = vld [vmem:[%s11426_s25 + $0xa14] ss:$408 sps:$4 sm:$0xff]  }
 0x1a1   : > { %3027 = vmatprep.subr.bf16.mxu1 %v9663_v27  ;;  %v9741_v26 = vld [vmem:[%s11426_s25 + $0xa1c] ss:$408 sps:$4 sm:$0xff]  }
 0x1a2   : > { %8874 = vmatmul.mubr.msk.bf16.vlgmr.msra.gmra.mrb[40].mxu0 %vm2251_vm2, %v11464_v28  ;;  %v9744_v27 = vld [vmem:[%s11426_s25 + $0xd44] ss:$408 sps:$4 sm:$0x3f]  }
 0x1a3   : > { %8876 = vmatmul.mubr.msk.bf16.vlgmr.msra.gmra.mrb[40].mxu1 %vm2251_vm2, %v11464_v28  ;;  %2977 = vmatpush1.bf16.msra.mxu0 %v9658_v29  ;;  %v9747_v29 = vld [vmem:[%s11426_s25 + $0xd4c] ss:$408 sps:$4 sm:$0x3f]  }
 0x1a4   : > { %3028 = vmatpush1.bf16.msra.mxu1 %v9661_v30  ;;  %2978 = vmatprep.subr.bf16.mxu0 %v9666_v31  ;;  %v9736_v30 = vld [vmem:[%s11426_s25 + $0xa10] ss:$408 sps:$4 sm:$0xff]  }
 0x1a5   : > { %3029 = vmatprep.subr.bf16.mxu1 %v9669_v32  ;;  %2916 = vmatprep.mubr.bf16.mxu0 %v14133_v62  ;;  %v11752_v31 = vld [vmem:[%s14126_s1 + $0x8] ss:$0 sps:$4 sm:$0xff]  }
 0x1a6   : > { %2967 = vmatprep.mubr.bf16.mxu1 %v14133_v62  ;;  %v9739_v32 = vld [vmem:[%s11426_s25 + $0xa18] ss:$408 sps:$4 sm:$0xff]  }
 0x1a7   : > { %2979 = vmatpush1.bf16.msra.mxu0 %v9664_v33  ;;  %v9742_v33 = vld [vmem:[%s11426_s25 + $0xd40] ss:$408 sps:$4 sm:$0x3f]  }
 0x1a8   : > { %3030 = vmatpush1.bf16.msra.mxu1 %v9667_v34  ;;  %2980 = vmatprep.subr.bf16.mxu0 %v9672_v35  ;;  %v9745_v34 = vld [vmem:[%s11426_s25 + $0xd48] ss:$408 sps:$4 sm:$0x3f]   ;;  %v2362_v35 = vand.u32 %v9744_v27, %v11449_v17 }
 0x1a9   : > { %3031 = vmatprep.subr.bf16.mxu1 %v9675_v36  ;;  %v4221_v36 = vand.u32 %v9747_v29, %v11449_v17  ;;  %v9808_v27 = vld [vmem:[%s11426_s25 + $0xb0] ss:$408 sps:$4 sm:$0xff]  }
 0x1aa   : > { %8875 = vmatmul.mubr.msk.bf16.gmra.mrb[44].mxu0 %vm2251_vm2, %v11481_v37  ;;  %v9811_v29 = vld [vmem:[%s11426_s25 + $0xb8] ss:$408 sps:$4 sm:$0xff]  }
 0x1ab   : > { %8877 = vmatmul.mubr.msk.bf16.gmra.mrb[44].mxu1 %vm2251_vm2, %v11481_v37  ;;  %2981 = vmatpush1.bf16.msra.mxu0 %v9670_v38  ;;  %v2359_v38 = vand.u32 %v9742_v33, %v11449_v17  ;;  %v9814_v33 = vld [vmem:[%s11426_s25 + $0x3e0] ss:$408 sps:$4 sm:$0xff]  }
 0x1ac   : > { %3032 = vmatpush1.bf16.msra.mxu1 %v9673_v39  ;;  %2982 = vmatprep.subr.bf16.mxu0 %v9678_v40  ;;  %v4218_v39 = vand.u32 %v9745_v34, %v11449_v17  ;;  %v9750_v40 = vld [vmem:[%s11426_s25 + $0x94] ss:$408 sps:$4 sm:$0xff]   ;;  %v9817_v34 = vld [vmem:[%s11426_s25 + $0x3e8] ss:$408 sps:$4 sm:$0xff]  }
 0x1ad   : > { %3033 = vmatprep.subr.bf16.mxu1 %v9681_v42  ;;  %3008 = vmatprep.mubr.bf16.mxu0 %v14133_v62  ;;  %v9748_v42 = vld [vmem:[%s11426_s25 + $0x90] ss:$408 sps:$4 sm:$0xff]  }
 0x1ae   : > { %3059 = vmatprep.mubr.bf16.mxu1 %v14133_v62 }
 0x1af   : > { %2983 = vmatpush1.bf16.msra.mxu0 %v9676_v44  ;;  %v9756_v44 = vld [vmem:[%s11426_s25 + $0x3c4] ss:$408 sps:$4 sm:$0xff]  }
 0x1b0   : > { %3034 = vmatpush1.bf16.msra.mxu1 %v9679_v45  ;;  %2984 = vmatprep.subr.bf16.mxu0 %v2338_v48  ;;  %v9759_v45 = vld [vmem:[%s11426_s25 + $0x3cc] ss:$408 sps:$4 sm:$0xff]  }
 0x1b1   : > { %3035 = vmatprep.subr.bf16.mxu1 %v2344_v49  ;;  %v9762_v48 = vld [vmem:[%s11426_s25 + $0x6f4] ss:$408 sps:$4 sm:$0xff]  }
 0x1b2   : > { %v9765_v49 = vld [vmem:[%s11426_s25 + $0x6fc] ss:$408 sps:$4 sm:$0xff]  }
 0x1b3   : > { %2985 = vmatpush1.bf16.msra.mxu0 %v2335_v50  ;;  %v9760_v50 = vld [vmem:[%s11426_s25 + $0x6f0] ss:$408 sps:$4 sm:$0xff]  }
 0x1b4   : > { %3036 = vmatpush1.bf16.msra.mxu1 %v2341_v51  ;;  %3078 = vmatprep.subr.bf16.mxu0 %v9690_v52  ;;  %v9763_v51 = vld [vmem:[%s11426_s25 + $0x6f8] ss:$408 sps:$4 sm:$0xff]   ;;  %v9768_v52 = vld [vmem:[%s11426_s25 + $0xa24] ss:$408 sps:$4 sm:$0xff]  }
 0x1b5   : > { %3129 = vmatprep.subr.bf16.mxu1 %v9693_v53  ;;  %v9771_v53 = vld [vmem:[%s11426_s25 + $0xa2c] ss:$408 sps:$4 sm:$0xff]  }
 0x1b6   : > { %8878 = vmatmul.mubr.msk.bf16.vlgmr.msra.gmra.mrb[48].mxu0 %vm2251_vm2, %v11464_v28 }
 0x1b7   : > { %8880 = vmatmul.mubr.msk.bf16.vlgmr.msra.gmra.mrb[48].mxu1 %vm2251_vm2, %v11464_v28  ;;  %3079 = vmatpush1.bf16.msra.mxu0 %v9688_v54  ;;  %v9708_v28 = vld [vmem:[%s11426_s25 + $0xa04] ss:$408 sps:$4 sm:$0xff]   ;;  %v9774_v54 = vld [vmem:[%s11426_s25 + $0xd54] ss:$408 sps:$4 sm:$0x3f]  }
 0x1b8   : > { %3130 = vmatpush1.bf16.msra.mxu1 %v9691_v55  ;;  %3080 = vmatprep.subr.bf16.mxu0 %v9696_v56  ;;  %v9777_v55 = vld [vmem:[%s11426_s25 + $0xd5c] ss:$408 sps:$4 sm:$0x3f]   ;;  %v9766_v56 = vld [vmem:[%s11426_s25 + $0xa20] ss:$408 sps:$4 sm:$0xff]  }
 0x1b9   : > { %3131 = vmatprep.subr.bf16.mxu1 %v9699_v57  ;;  %3018 = vmatprep.mubr.bf16.mxu0 %v14133_v62  ;;  %v9772_v57 = vld [vmem:[%s11426_s25 + $0xd50] ss:$408 sps:$4 sm:$0x3f]  }
 0x1ba   : > { %3069 = vmatprep.mubr.bf16.mxu1 %v14133_v62 }
 0x1bb   : > { %3081 = vmatpush1.bf16.msra.mxu0 %v9694_v58  ;;  %v9769_v58 = vld [vmem:[%s11426_s25 + $0xa28] ss:$408 sps:$4 sm:$0xff]  }
 0x1bc   : > { %3132 = vmatpush1.bf16.msra.mxu1 %v9697_v59  ;;  %3082 = vmatprep.subr.bf16.mxu0 %v9702_v60  ;;  %v9775_v59 = vld [vmem:[%s11426_s25 + $0xd58] ss:$408 sps:$4 sm:$0x3f]   ;;  %v4227_v60 = vand.u32 %v9774_v54, %v11449_v17 }
 0x1bd   : > { %3133 = vmatprep.subr.bf16.mxu1 %v9705_v61  ;;  %v4233_v61 = vand.u32 %v9777_v55, %v11449_v17 }
 0x1be   : > { %8879 = vmatmul.mubr.msk.bf16.gmra.mrb[52].mxu0 %vm2251_vm2, %v11481_v37 }
 0x1bf   : > { %8881 = vmatmul.mubr.msk.bf16.gmra.mrb[52].mxu1 %vm2251_vm2, %v11481_v37  ;;  %3083 = vmatpush1.bf16.msra.mxu0 %v9700_v63  ;;  %v2347_v37 = vand.u32 %v9712_v5, %v11449_v17  ;;  %v4224_v63 = vand.u32 %v9772_v57, %v11449_v17  ;;  %v9789_v5 = vld [vmem:[%s11426_s25 + $0x3dc] ss:$408 sps:$4 sm:$0xff]  }
 0x1c0   : > { %3134 = vmatpush1.bf16.msra.mxu1 %v9703_v0  ;;  %3084 = vmatprep.subr.bf16.mxu0 %v9708_v28  ;;  %v4230_v0 = vand.u32 %v9775_v59, %v11449_v17  ;;  %v9780_v28 = vld [vmem:[%s11426_s25 + $0xa4] ss:$408 sps:$4 sm:$0xff]  }
 0x1c1   : > { %3135 = vmatprep.subr.bf16.mxu1 %v9711_v1  ;;  %3110 = vmatprep.mubr.bf16.mxu0 %v14133_v62  ;;  %v9783_v1 = vld [vmem:[%s11426_s25 + $0xac] ss:$408 sps:$4 sm:$0xff]  }
 0x1c2   : > { %3161 = vmatprep.mubr.bf16.mxu1 %v14133_v62 }
 0x1c3   : > { %3085 = vmatpush1.bf16.msra.mxu0 %v9706_v4  ;;  %v9786_v4 = vld [vmem:[%s11426_s25 + $0x3d4] ss:$408 sps:$4 sm:$0xff]  }
 0x1c4   : > { %3136 = vmatpush1.bf16.msra.mxu1 %v9709_v6  ;;  %3086 = vmatprep.subr.bf16.mxu0 %v2350_v8  ;;  %v9784_v6 = vld [vmem:[%s11426_s25 + $0x3d0] ss:$408 sps:$4 sm:$0xff]   ;;  %v9792_v8 = vld [vmem:[%s11426_s25 + $0x704] ss:$408 sps:$4 sm:$0xff]  }
 0x1c5   : > { %3137 = vmatprep.subr.bf16.mxu1 %v2356_v9  ;;  %v9795_v9 = vld [vmem:[%s11426_s25 + $0x70c] ss:$408 sps:$4 sm:$0xff]  }
 0x1c7   : > { %3087 = vmatpush1.bf16.msra.mxu0 %v2347_v37  ;;  %v9790_v37 = vld [vmem:[%s11426_s25 + $0x700] ss:$408 sps:$4 sm:$0xff]  }
 0x1c8   : > { %3138 = vmatpush1.bf16.msra.mxu1 %v2353_v10  ;;  %3180 = vmatprep.subr.bf16.mxu0 %v9720_v11  ;;  %v9793_v10 = vld [vmem:[%s11426_s25 + $0x708] ss:$408 sps:$4 sm:$0xff]   ;;  %v9798_v11 = vld [vmem:[%s11426_s25 + $0xa34] ss:$408 sps:$4 sm:$0xff]  }
 0x1c9   : > { %4319 = vmatprep.subr.bf16.mxu1 %v9723_v12  ;;  %v9801_v12 = vld [vmem:[%s11426_s25 + $0xa3c] ss:$408 sps:$4 sm:$0xff]  }
 0x1ca   : > { %8882 = vmatmul.mubr.msk.bf16.vlgmr.msra.gmra.mrb[56].mxu0 %vm2251_vm2, %v11730_v18 }
 0x1cb   : > { %8884 = vmatmul.mubr.msk.bf16.vlgmr.msra.gmra.mrb[56].mxu1 %vm2251_vm2, %v11730_v18  ;;  %3181 = vmatpush1.bf16.msra.mxu0 %v9718_v13  ;;  %v9804_v13 = vld [vmem:[%s11426_s25 + $0xd64] ss:$408 sps:$4 sm:$0x3f]  }
 0x1cc   : > { %4320 = vmatpush1.bf16.msra.mxu1 %v9721_v14  ;;  %3182 = vmatprep.subr.bf16.mxu0 %v9726_v15  ;;  %v9807_v14 = vld [vmem:[%s11426_s25 + $0xd6c] ss:$408 sps:$4 sm:$0x3f]   ;;  %v9796_v15 = vld [vmem:[%s11426_s25 + $0xa30] ss:$408 sps:$4 sm:$0xff]  }
 0x1cd   : > { %4321 = vmatprep.subr.bf16.mxu1 %v9729_v16  ;;  %3120 = vmatprep.mubr.bf16.mxu0 %v14133_v62  ;;  %v9802_v16 = vld [vmem:[%s11426_s25 + $0xd60] ss:$408 sps:$4 sm:$0x3f]  }
 0x1ce   : > { %3171 = vmatprep.mubr.bf16.mxu1 %v14133_v62 }
 0x1cf   : > { %3183 = vmatpush1.bf16.msra.mxu0 %v9724_v19  ;;  %v9799_v19 = vld [vmem:[%s11426_s25 + $0xa38] ss:$408 sps:$4 sm:$0xff]  }
 0x1d0   : > { %4322 = vmatpush1.bf16.msra.mxu1 %v9727_v20  ;;  %3184 = vmatprep.subr.bf16.mxu0 %v9732_v21  ;;  %v9805_v20 = vld [vmem:[%s11426_s25 + $0xd68] ss:$408 sps:$4 sm:$0x3f]   ;;  %v4239_v21 = vand.u32 %v9804_v13, %v11449_v17 }
 0x1d1   : > { %4323 = vmatprep.subr.bf16.mxu1 %v9735_v22  ;;  %v4245_v22 = vand.u32 %v9807_v14, %v11449_v17  ;;  %v9850_v13 = vld [vmem:[%s11426_s25 + $0x720] ss:$408 sps:$4 sm:$0xff]  }
 0x1d2   : > { %8883 = vmatmul.mubr.msk.bf16.gmra.mrb[60].mxu0 %vm2251_vm2, %v11752_v31  ;;  %v9853_v14 = vld [vmem:[%s11426_s25 + $0x728] ss:$408 sps:$4 sm:$0xff]  }
 0x1d3   : > { %8885 = vmatmul.mubr.msk.bf16.gmra.mrb[60].mxu1 %vm2251_vm2, %v11752_v31  ;;  %3185 = vmatpush1.bf16.msra.mxu0 %v9730_v23  ;;  %v4236_v23 = vand.u32 %v9802_v16, %v11449_v17  ;;  %v9864_v16 = vld [vmem:[%s11426_s25 + $0xd84] ss:$408 sps:$4 sm:$0x3f]  }
 0x1d4   : > { %4324 = vmatpush1.bf16.msra.mxu1 %v9733_v24  ;;  %3186 = vmatprep.subr.bf16.mxu0 %v9738_v25  ;;  %v4242_v24 = vand.u32 %v9805_v20, %v11449_v17  ;;  %v9810_v25 = vld [vmem:[%s11426_s25 + $0xb4] ss:$408 sps:$4 sm:$0xff]  }
 0x1d5   : > { %4325 = vmatprep.subr.bf16.mxu1 %v9741_v26  ;;  %3212 = vmatprep.mubr.bf16.mxu0 %v14133_v62  ;;  %v9813_v26 = vld [vmem:[%s11426_s25 + $0xbc] ss:$408 sps:$4 sm:$0xff]   ;;  %v9867_v20 = vld [vmem:[%s11426_s25 + $0xd8c] ss:$408 sps:$4 sm:$0x3f]  }
 0x1d6   : > { %4351 = vmatprep.mubr.bf16.mxu1 %v14133_v62 }
 0x1d7   : > { %3187 = vmatpush1.bf16.msra.mxu0 %v9736_v30  ;;  %v9816_v30 = vld [vmem:[%s11426_s25 + $0x3e4] ss:$408 sps:$4 sm:$0xff]  }
 0x1d8   : > { %4326 = vmatpush1.bf16.msra.mxu1 %v9739_v32  ;;  %3188 = vmatprep.subr.bf16.mxu0 %v2362_v35  ;;  %v9819_v32 = vld [vmem:[%s11426_s25 + $0x3ec] ss:$408 sps:$4 sm:$0xff]  }
 0x1d9   : > { %4327 = vmatprep.subr.bf16.mxu1 %v4221_v36  ;;  %v9822_v35 = vld [vmem:[%s11426_s25 + $0x714] ss:$408 sps:$4 sm:$0xff]  }
 0x1da   : > { %v9825_v36 = vld [vmem:[%s11426_s25 + $0x71c] ss:$408 sps:$4 sm:$0xff]  }
 0x1db   : > { %3189 = vmatpush1.bf16.msra.mxu0 %v2359_v38  ;;  %v9820_v38 = vld [vmem:[%s11426_s25 + $0x710] ss:$408 sps:$4 sm:$0xff]  }
 0x1dc   : > { %4328 = vmatpush1.bf16.msra.mxu1 %v4218_v39  ;;  %4370 = vmatprep.subr.bf16.mxu0 %v9750_v40  ;;  %v9823_v39 = vld [vmem:[%s11426_s25 + $0x718] ss:$408 sps:$4 sm:$0xff]   ;;  %v9828_v40 = vld [vmem:[%s11426_s25 + $0xa44] ss:$408 sps:$4 sm:$0xff]  }
 0x1dd   : > { %4421 = vmatprep.subr.bf16.mxu1 %v9753_v41  ;;  %v9831_v41 = vld [vmem:[%s11426_s25 + $0xa4c] ss:$408 sps:$4 sm:$0xff]  }
 0x1de   : > { %8886 = vmatmul.mubr.msk.bf16.vlgmr.msra.gmra.mrb[64].mxu0 %vm2251_vm2, %v11730_v18 }
 0x1df   : > { %9058 = vmatmul.mubr.msk.bf16.vlgmr.msra.gmra.mrb[64].mxu1 %vm2251_vm2, %v11730_v18  ;;  %4371 = vmatpush1.bf16.msra.mxu0 %v9748_v42  ;;  %v9834_v42 = vld [vmem:[%s11426_s25 + $0xd74] ss:$408 sps:$4 sm:$0x3f]  }
 0x1e0   : > { %4422 = vmatpush1.bf16.msra.mxu1 %v9751_v43  ;;  %4372 = vmatprep.subr.bf16.mxu0 %v9756_v44  ;;  %v9837_v43 = vld [vmem:[%s11426_s25 + $0xd7c] ss:$408 sps:$4 sm:$0x3f]   ;;  %v9826_v44 = vld [vmem:[%s11426_s25 + $0xa40] ss:$408 sps:$4 sm:$0xff]  }
 0x1e1   : > { %4423 = vmatprep.subr.bf16.mxu1 %v9759_v45  ;;  %4361 = vmatprep.mubr.bf16.mxu1 %v14133_v62  ;;  %v9829_v45 = vld [vmem:[%s11426_s25 + $0xa48] ss:$408 sps:$4 sm:$0xff]  }
 0x1e2   : > { %3222 = vmatprep.mubr.bf16.mxu0 %v14133_v62 }
 0x1e3   : > { %4373 = vmatpush1.bf16.msra.mxu0 %v9754_v46  ;;  %v9832_v46 = vld [vmem:[%s11426_s25 + $0xd70] ss:$408 sps:$4 sm:$0x3f]  }
 0x1e4   : > { %4424 = vmatpush1.bf16.msra.mxu1 %v9757_v47  ;;  %4374 = vmatprep.subr.bf16.mxu0 %v9762_v48  ;;  %v9835_v47 = vld [vmem:[%s11426_s25 + $0xd78] ss:$408 sps:$4 sm:$0x3f]   ;;  %v4251_v48 = vand.u32 %v9834_v42, %v11449_v17 }
 0x1e5   : > { %4425 = vmatprep.subr.bf16.mxu1 %v9765_v49  ;;  %v4257_v49 = vand.u32 %v9837_v43, %v11449_v17  ;;  %v4254_v57 = vand.u32 %v9835_v47, %v11449_v17  ;;  %v9868_v42 = vld [vmem:[%s11426_s25 + $0xd0] ss:$408 sps:$4 sm:$0xff]  }
 0x1e6   : > { %8887 = vmatmul.mubr.msk.bf16.gmra.mrb[68].mxu0 %vm2251_vm2, %v11752_v31  ;;  %v9871_v43 = vld [vmem:[%s11426_s25 + $0xd8] ss:$408 sps:$4 sm:$0xff]  }
 0x1e7   : > { %9059 = vmatmul.mubr.msk.bf16.gmra.mrb[68].mxu1 %vm2251_vm2, %v11752_v31  ;;  %4375 = vmatpush1.bf16.msra.mxu0 %v9760_v50 }
 0x1e8   : > { %4426 = vmatpush1.bf16.msra.mxu1 %v9763_v51  ;;  %4376 = vmatprep.subr.bf16.mxu0 %v9768_v52 }
 0x1e9   : > { %4427 = vmatprep.subr.bf16.mxu1 %v9771_v53  ;;  %4402 = vmatprep.mubr.bf16.mxu0 %v14133_v62 }
 0x1ea   : > { %4453 = vmatprep.mubr.bf16.mxu1 %v14133_v62 }
 0x1eb   : > { %4377 = vmatpush1.bf16.msra.mxu0 %v9766_v56  ;;  %v4248_v56 = vand.u32 %v9832_v46, %v11449_v17 }
 0x1ec   : > { %4428 = vmatpush1.bf16.msra.mxu1 %v9769_v58  ;;  %4378 = vmatprep.subr.bf16.mxu0 %v4227_v60  ;;  %v9840_v58 = vld [vmem:[%s11426_s25 + $0xc4] ss:$408 sps:$4 sm:$0xff]  }
 0x1ed   : > { %4429 = vmatprep.subr.bf16.mxu1 %v4233_v61  ;;  %v9843_v61 = vld [vmem:[%s11426_s25 + $0xcc] ss:$408 sps:$4 sm:$0xff]  }
 0x1ef   : > { %4379 = vmatpush1.bf16.msra.mxu0 %v4224_v63  ;;  %v9838_v63 = vld [vmem:[%s11426_s25 + $0xc0] ss:$408 sps:$4 sm:$0xff]  }
 0x1f0   : > { %4430 = vmatpush1.bf16.msra.mxu1 %v4230_v0  ;;  %4472 = vmatprep.subr.bf16.mxu0 %v9780_v28  ;;  %v9841_v0 = vld [vmem:[%s11426_s25 + $0xc8] ss:$408 sps:$4 sm:$0xff]   ;;  %v9846_v28 = vld [vmem:[%s11426_s25 + $0x3f4] ss:$408 sps:$4 sm:$0xff]  }
 0x1f1   : > { %4523 = vmatprep.subr.bf16.mxu1 %v9783_v1  ;;  %v9849_v1 = vld [vmem:[%s11426_s25 + $0x3fc] ss:$408 sps:$4 sm:$0xff]  }
 0x1f2   : > { %9060 = vmatmul.mubr.msk.bf16.vlgmr.msra.gmra.mrb[72].mxu0 %vm2251_vm2, %v11730_v18 }
 0x1f3   : > { %9062 = vmatmul.mubr.msk.bf16.vlgmr.msra.gmra.mrb[72].mxu1 %vm2251_vm2, %v11730_v18  ;;  %4473 = vmatpush1.bf16.msra.mxu0 %v9778_v2 }
 0x1f4   : > { %4524 = vmatpush1.bf16.msra.mxu1 %v9781_v3  ;;  %4474 = vmatprep.subr.bf16.mxu0 %v9786_v4  ;;  %v9844_v4 = vld [vmem:[%s11426_s25 + $0x3f0] ss:$408 sps:$4 sm:$0xff]  }
 0x1f5   : > { %4525 = vmatprep.subr.bf16.mxu1 %v9789_v5  ;;  %4412 = vmatprep.mubr.bf16.mxu0 %v14133_v62  ;;  %v9847_v5 = vld [vmem:[%s11426_s25 + $0x3f8] ss:$408 sps:$4 sm:$0xff]  }
 0x1f6   : > { %4463 = vmatprep.mubr.bf16.mxu1 %v14133_v62 }
 0x1f7   : > { %4475 = vmatpush1.bf16.msra.mxu0 %v9784_v6 }
 0x1f8   : > { %4526 = vmatpush1.bf16.msra.mxu1 %v9787_v7  ;;  %4476 = vmatprep.subr.bf16.mxu0 %v9792_v8  ;;  %v9852_v8 = vld [vmem:[%s11426_s25 + $0x724] ss:$408 sps:$4 sm:$0xff]  }
 0x1f9   : > { %4527 = vmatprep.subr.bf16.mxu1 %v9795_v9 }
 0x1fa   : > { %9061 = vmatmul.mubr.msk.bf16.gmra.mrb[76].mxu0 %vm2251_vm2, %v11752_v31 }
 0x1fb   : > { %9063 = vmatmul.mubr.msk.bf16.gmra.mrb[76].mxu1 %vm2251_vm2, %v11752_v31  ;;  %4477 = vmatpush1.bf16.msra.mxu0 %v9790_v37 }
 0x1fc   : > { %4528 = vmatpush1.bf16.msra.mxu1 %v9793_v10  ;;  %4478 = vmatprep.subr.bf16.mxu0 %v9798_v11 }
 0x1fd   : > { %4529 = vmatprep.subr.bf16.mxu1 %v9801_v12  ;;  %4504 = vmatprep.mubr.bf16.mxu0 %v14133_v62  ;;  %v9855_v12 = vld [vmem:[%s11426_s25 + $0x72c] ss:$408 sps:$4 sm:$0xff]  }
 0x1fe   : > { %4555 = vmatprep.mubr.bf16.mxu1 %v14133_v62 }
 0x1ff   : > { %4479 = vmatpush1.bf16.msra.mxu0 %v9796_v15  ;;  %v9858_v15 = vld [vmem:[%s11426_s25 + $0xa54] ss:$408 sps:$4 sm:$0xff]  }
 0x200   : > { %4530 = vmatpush1.bf16.msra.mxu1 %v9799_v19  ;;  %4480 = vmatprep.subr.bf16.mxu0 %v4239_v21  ;;  %v9861_v19 = vld [vmem:[%s11426_s25 + $0xa5c] ss:$408 sps:$4 sm:$0xff]   ;;  %v9856_v21 = vld [vmem:[%s11426_s25 + $0xa50] ss:$408 sps:$4 sm:$0xff]  }
 0x201   : > { %4531 = vmatprep.subr.bf16.mxu1 %v4245_v22  ;;  %v9859_v22 = vld [vmem:[%s11426_s25 + $0xa58] ss:$408 sps:$4 sm:$0xff]  }
 0x203   : > { %4481 = vmatpush1.bf16.msra.mxu0 %v4236_v23  ;;  %v9862_v23 = vld [vmem:[%s11426_s25 + $0xd80] ss:$408 sps:$4 sm:$0x3f]  }
 0x204   : > { %4532 = vmatpush1.bf16.msra.mxu1 %v4242_v24  ;;  %4574 = vmatprep.subr.bf16.mxu0 %v9810_v25  ;;  %v9865_v24 = vld [vmem:[%s11426_s25 + $0xd88] ss:$408 sps:$4 sm:$0x3f]   ;;  %v4263_v25 = vand.u32 %v9864_v16, %v11449_v17 }
 0x205   : > { %4625 = vmatprep.subr.bf16.mxu1 %v9813_v26  ;;  %v4269_v26 = vand.u32 %v9867_v20, %v11449_v17 }
 0x206   : > { %9064 = vmatmul.mubr.msk.bf16.vlgmr.msra.gmra.mrb[80].mxu0 %vm2251_vm2, %v11730_v18 }
 0x207   : > { %9066 = vmatmul.mubr.msk.bf16.vlgmr.msra.gmra.mrb[80].mxu1 %vm2251_vm2, %v11730_v18  ;;  %4575 = vmatpush1.bf16.msra.mxu0 %v9808_v27 }
 0x208   : > { %4626 = vmatpush1.bf16.msra.mxu1 %v9811_v29  ;;  %4576 = vmatprep.subr.bf16.mxu0 %v9816_v30 }
 0x209   : > { %4627 = vmatprep.subr.bf16.mxu1 %v9819_v32  ;;  %4514 = vmatprep.mubr.bf16.mxu0 %v14133_v62 }
 0x20a   : > { %4565 = vmatprep.mubr.bf16.mxu1 %v14133_v62 }
 0x20b   : > { %4577 = vmatpush1.bf16.msra.mxu0 %v9814_v33 }
 0x20c   : > { %4628 = vmatpush1.bf16.msra.mxu1 %v9817_v34  ;;  %4578 = vmatprep.subr.bf16.mxu0 %v9822_v35  ;;  %v4260_v35 = vand.u32 %v9862_v23, %v11449_v17 }
 0x20d   : > { %4629 = vmatprep.subr.bf16.mxu1 %v9825_v36  ;;  %v4266_v36 = vand.u32 %v9865_v24, %v11449_v17 }
 0x20e   : > { %9065 = vmatmul.mubr.msk.bf16.gmra.mrb[84].mxu0 %vm2251_vm2, %v11752_v31 }
 0x20f   : > { %9067 = vmatmul.mubr.msk.bf16.gmra.mrb[84].mxu1 %vm2251_vm2, %v11752_v31  ;;  %4579 = vmatpush1.bf16.msra.mxu0 %v9820_v38  ;;  %v9870_v38 = vld [vmem:[%s11426_s25 + $0xd4] ss:$408 sps:$4 sm:$0xff]  }
 0x210   : > { %4630 = vmatpush1.bf16.msra.mxu1 %v9823_v39  ;;  %4580 = vmatprep.subr.bf16.mxu0 %v9828_v40 }
 0x211   : > { %4631 = vmatprep.subr.bf16.mxu1 %v9831_v41  ;;  %v11871_v50 = vpop.f32.mrb[0].mxu0  ;;  %4606 = vmatprep.mubr.bf16.mxu0 %v14133_v62  ;;  %v9873_v41 = vld [vmem:[%s11426_s25 + $0xdc] ss:$408 sps:$4 sm:$0xff]  }
 0x212   : > { %14296 = vst [vmem:[#allocation4_spill] sm:$0xff] %v11871_v50  ;;  %v11873_v51 = vpop.f32.mrb[0].mxu1  ;;  %4657 = vmatprep.mubr.bf16.mxu1 %v14133_v62  ;;  %v11877_v52 = vpop.f32.mrb[1].mxu0 }
 0x213   : > { %14297 = vst [vmem:[#allocation5_spill] sm:$0xff] %v11877_v52  ;;  %v11879_v53 = vpop.f32.mrb[1].mxu1  ;;  %v11881_v54 = vpop.f32.mrb[2].mxu0  ;;  %4581 = vmatpush1.bf16.msra.mxu0 %v9826_v44  ;;  %v9876_v44 = vld [vmem:[%s11426_s25 + $0x404] ss:$408 sps:$4 sm:$0xff]  }
 0x214   : > { %14298 = vst [vmem:[#allocation6_spill] sm:$0xff] %v11881_v54  ;;  %v11883_v55 = vpop.f32.mrb[2].mxu1  ;;  %4632 = vmatpush1.bf16.msra.mxu1 %v9829_v45  ;;  %v11888_v59 = vpop.f32.mrb[3].mxu0  ;;  %4582 = vmatprep.subr.bf16.mxu0 %v4251_v48  ;;  %v9879_v45 = vld [vmem:[%s11426_s25 + $0x40c] ss:$408 sps:$4 sm:$0xff]  }
 0x215   : > { %14299 = vst [vmem:[#allocation7_spill] sm:$0xff] %v11888_v59  ;;  %v11890_v60 = vpop.f32.mrb[3].mxu1  ;;  %4633 = vmatprep.subr.bf16.mxu1 %v4257_v49  ;;  %v10083_v52 = vld [vmem:[%s11426_s25 + $0x14c] ss:$408 sps:$4 sm:$0xff]  }
 0x216   : > { %v10095_v59 = vld [vmem:[%s11426_s25 + $0x7ac] ss:$408 sps:$4 sm:$0xff]  }
 0x217   : > { %4583 = vmatpush1.bf16.msra.mxu0 %v4248_v56  ;;  %v9874_v56 = vld [vmem:[%s11426_s25 + $0x400] ss:$408 sps:$4 sm:$0xff]  }
 0x218   : > { %4634 = vmatpush1.bf16.msra.mxu1 %v4254_v57  ;;  %4676 = vmatprep.subr.bf16.mxu0 %v9840_v58  ;;  %v9877_v57 = vld [vmem:[%s11426_s25 + $0x408] ss:$408 sps:$4 sm:$0xff]  }
 0x219   : > { %4727 = vmatprep.subr.bf16.mxu1 %v9843_v61  ;;  %v11897_v2 = vpop.f32.mrb[4].mxu0 }
 0x21a   : > { %14300 = vst [vmem:[#allocation8_spill] sm:$0xff] %v11897_v2  ;;  %v11899_v3 = vpop.f32.mrb[4].mxu1  ;;  %9068 = vmatmul.mubr.msk.bf16.vlgmr.msra.gmra.mrb[88].mxu0 %vm2251_vm2, %v11730_v18  ;;  %v11907_v6 = vpop.f32.mrb[5].mxu0 }
 0x21b   : > { %9070 = vmatmul.mubr.msk.bf16.vlgmr.msra.gmra.mrb[88].mxu1 %vm2251_vm2, %v11730_v18  ;;  %14301 = vst [vmem:[#allocation9_spill] sm:$0xff] %v11907_v6  ;;  %v11909_v7 = vpop.f32.mrb[5].mxu1  ;;  %4677 = vmatpush1.bf16.msra.mxu0 %v9838_v63  ;;  %v2412_v9 = vpop.f32.mrb[6].mxu0  ;;  %v9882_v63 = vld [vmem:[%s11426_s25 + $0x734] ss:$408 sps:$4 sm:$0xff]  }
 0x21c   : > { %4728 = vmatpush1.bf16.msra.mxu1 %v9841_v0  ;;  %v2463_v37 = vpop.f32.mrb[6].mxu1  ;;  %v2413_v10 = vpop.f32.mrb[7].mxu0  ;;  %4678 = vmatprep.subr.bf16.mxu0 %v9846_v28  ;;  %v9885_v28 = vld [vmem:[%s11426_s25 + $0x73c] ss:$408 sps:$4 sm:$0xff]  }
 0x21d   : > { %4729 = vmatprep.subr.bf16.mxu1 %v9849_v1  ;;  %v2464_v11 = vpop.f32.mrb[7].mxu1  ;;  %4616 = vmatprep.mubr.bf16.mxu0 %v14133_v62  ;;  %v9880_v1 = vld [vmem:[%s11426_s25 + $0x730] ss:$408 sps:$4 sm:$0xff]   ;;  %v9894_v9 = vld [vmem:[%s11426_s25 + $0xd94] ss:$408 sps:$4 sm:$0x3f]  }
 0x21e   : > { %4667 = vmatprep.mubr.bf16.mxu1 %v14133_v62  ;;  %v9897_v37 = vld [vmem:[%s11426_s25 + $0xd9c] ss:$408 sps:$4 sm:$0x3f]   ;;  %v9886_v10 = vld [vmem:[%s11426_s25 + $0xa60] ss:$408 sps:$4 sm:$0xff]  }
 0x21f   : > { %4679 = vmatpush1.bf16.msra.mxu0 %v9844_v4  ;;  %v9883_v4 = vld [vmem:[%s11426_s25 + $0x738] ss:$408 sps:$4 sm:$0xff]   ;;  %v9889_v11 = vld [vmem:[%s11426_s25 + $0xa68] ss:$408 sps:$4 sm:$0xff]  }
 0x220   : > { %4730 = vmatpush1.bf16.msra.mxu1 %v9847_v5  ;;  %4680 = vmatprep.subr.bf16.mxu0 %v9852_v8  ;;  %v9888_v5 = vld [vmem:[%s11426_s25 + $0xa64] ss:$408 sps:$4 sm:$0xff]  }
 0x221   : > { %4731 = vmatprep.subr.bf16.mxu1 %v9855_v12  ;;  %v9891_v8 = vld [vmem:[%s11426_s25 + $0xa6c] ss:$408 sps:$4 sm:$0xff]   ;;  %v9892_v12 = vld [vmem:[%s11426_s25 + $0xd90] ss:$408 sps:$4 sm:$0x3f]  }
 0x222   : > { %9069 = vmatmul.mubr.msk.bf16.gmra.mrb[92].mxu0 %vm2251_vm2, %v11752_v31  ;;  %v4272_v23 = vand.u32 %v9892_v12, %v11449_v17  ;;  %v9927_v12 = vld [vmem:[%s11426_s25 + $0xdac] ss:$408 sps:$4 sm:$0x3f]  }
 0x223   : > { %9071 = vmatmul.mubr.msk.bf16.gmra.mrb[92].mxu1 %vm2251_vm2, %v11752_v31  ;;  %4681 = vmatpush1.bf16.msra.mxu0 %v9850_v13  ;;  %v9895_v13 = vld [vmem:[%s11426_s25 + $0xd98] ss:$408 sps:$4 sm:$0x3f]  }
 0x224   : > { %4732 = vmatpush1.bf16.msra.mxu1 %v9853_v14  ;;  %4682 = vmatprep.subr.bf16.mxu0 %v9858_v15  ;;  %v4275_v14 = vand.u32 %v9894_v9, %v11449_v17  ;;  %v4281_v15 = vand.u32 %v9897_v37, %v11449_v17  ;;  %v4278_v24 = vand.u32 %v9895_v13, %v11449_v17  ;;  %v9913_v9 = vld [vmem:[%s11426_s25 + $0x748] ss:$408 sps:$4 sm:$0xff]   ;;  %v9918_v37 = vld [vmem:[%s11426_s25 + $0xa74] ss:$408 sps:$4 sm:$0xff]  }
 0x225   : > { %4733 = vmatprep.subr.bf16.mxu1 %v9861_v19  ;;  %v11931_v27 = vpop.f32.mrb[8].mxu0  ;;  %4708 = vmatprep.mubr.bf16.mxu0 %v14133_v62  ;;  %v9916_v13 = vld [vmem:[%s11426_s25 + $0xa70] ss:$408 sps:$4 sm:$0xff]  }
 0x226   : > { %14302 = vst [vmem:[#allocation10_spill] sm:$0xff] %v11931_v27  ;;  %v11933_v29 = vpop.f32.mrb[8].mxu1  ;;  %4759 = vmatprep.mubr.bf16.mxu1 %v14133_v62  ;;  %v11937_v30 = vpop.f32.mrb[9].mxu0 }
 0x227   : > { %14303 = vst [vmem:[#allocation11_spill] sm:$0xff] %v11937_v30  ;;  %v11939_v32 = vpop.f32.mrb[9].mxu1  ;;  %v11941_v33 = vpop.f32.mrb[10].mxu0  ;;  %4683 = vmatpush1.bf16.msra.mxu0 %v9856_v21  ;;  %v10111_v30 = vld [vmem:[%s11426_s25 + $0x158] ss:$408 sps:$4 sm:$0xff]  }
 0x228   : > { %14304 = vst [vmem:[#allocation12_spill] sm:$0xff] %v11941_v33  ;;  %v11943_v34 = vpop.f32.mrb[10].mxu1  ;;  %4734 = vmatpush1.bf16.msra.mxu1 %v9859_v22  ;;  %v11948_v39 = vpop.f32.mrb[11].mxu0  ;;  %4684 = vmatprep.subr.bf16.mxu0 %v4263_v25  ;;  %v9900_v25 = vld [vmem:[%s11426_s25 + $0xe4] ss:$408 sps:$4 sm:$0xff]  }
 0x229   : > { %14305 = vst [vmem:[#allocation13_spill] sm:$0xff] %v11948_v39  ;;  %v11950_v40 = vpop.f32.mrb[11].mxu1  ;;  %4735 = vmatprep.subr.bf16.mxu1 %v4269_v26  ;;  %v10125_v33 = vld [vmem:[%s11426_s25 + $0x7bc] ss:$408 sps:$4 sm:$0xff]  }
 0x22b   : > { %4685 = vmatpush1.bf16.msra.mxu0 %v4260_v35 }
 0x22c   : > { %4736 = vmatpush1.bf16.msra.mxu1 %v4266_v36  ;;  %4778 = vmatprep.subr.bf16.mxu0 %v9870_v38  ;;  %v9903_v36 = vld [vmem:[%s11426_s25 + $0xec] ss:$408 sps:$4 sm:$0xff]   ;;  %v9898_v38 = vld [vmem:[%s11426_s25 + $0xe0] ss:$408 sps:$4 sm:$0xff]  }
 0x22d   : > { %4829 = vmatprep.subr.bf16.mxu1 %v9873_v41  ;;  %v11957_v46 = vpop.f32.mrb[12].mxu0  ;;  %v9901_v41 = vld [vmem:[%s11426_s25 + $0xe8] ss:$408 sps:$4 sm:$0xff]  }
 0x22e   : > { %14306 = vst [vmem:[#allocation14_spill] sm:$0xff] %v11957_v46  ;;  %v11959_v47 = vpop.f32.mrb[12].mxu1  ;;  %9072 = vmatmul.mubr.msk.bf16.vlgmr.msra.gmra.mrb[96].mxu0 %vm2251_vm2, %v11730_v18  ;;  %v11965_v48 = vpop.f32.mrb[13].mxu0  ;;  %v10117_v46 = vld [vmem:[%s11426_s25 + $0x488] ss:$408 sps:$4 sm:$0xff]  }
 0x22f   : > { %9074 = vmatmul.mubr.msk.bf16.vlgmr.msra.gmra.mrb[96].mxu1 %vm2251_vm2, %v11730_v18  ;;  %14307 = vst [vmem:[#allocation15_spill] sm:$0xff] %v11965_v48  ;;  %v11967_v49 = vpop.f32.mrb[13].mxu1  ;;  %4779 = vmatpush1.bf16.msra.mxu0 %v9868_v42  ;;  %v2514_v58 = vpop.f32.mrb[14].mxu0  ;;  %v9906_v42 = vld [vmem:[%s11426_s25 + $0x414] ss:$408 sps:$4 sm:$0xff]  }
 0x230   : > { %4830 = vmatpush1.bf16.msra.mxu1 %v9871_v43  ;;  %v2565_v61 = vpop.f32.mrb[14].mxu1  ;;  %v2515_v0 = vpop.f32.mrb[15].mxu0  ;;  %4780 = vmatprep.subr.bf16.mxu0 %v9876_v44  ;;  %v9909_v43 = vld [vmem:[%s11426_s25 + $0x41c] ss:$408 sps:$4 sm:$0xff]  }
 0x231   : > { %4831 = vmatprep.subr.bf16.mxu1 %v9879_v45  ;;  %v2566_v18 = vpop.f32.mrb[15].mxu1  ;;  %4718 = vmatprep.mubr.bf16.mxu0 %v14133_v62  ;;  %v9912_v0 = vld [vmem:[%s11426_s25 + $0x744] ss:$408 sps:$4 sm:$0xff]  }
 0x232   : > { %4769 = vmatprep.mubr.bf16.mxu1 %v14133_v62 }
 0x233   : > { %4781 = vmatpush1.bf16.msra.mxu0 %v9874_v56  ;;  %v9904_v56 = vld [vmem:[%s11426_s25 + $0x410] ss:$408 sps:$4 sm:$0xff]  }
 0x234   : > { %4832 = vmatpush1.bf16.msra.mxu1 %v9877_v57  ;;  %4782 = vmatprep.subr.bf16.mxu0 %v9882_v63  ;;  %v12025_v57 = vld [vmem:[%s14126_s1] sm:$0xff]  }
 0x235   : > { %4833 = vmatprep.subr.bf16.mxu1 %v9885_v28  ;;  %v9907_v63 = vld [vmem:[%s11426_s25 + $0x418] ss:$408 sps:$4 sm:$0xff]  }
 0x236   : > { %9073 = vmatmul.mubr.msk.bf16.gmra.mrb[100].mxu0 %vm2251_vm2, %v11752_v31 }
 0x237   : > { %9075 = vmatmul.mubr.msk.bf16.gmra.mrb[100].mxu1 %vm2251_vm2, %v11752_v31  ;;  %4783 = vmatpush1.bf16.msra.mxu0 %v9880_v1 }
 0x238   : > { %4834 = vmatpush1.bf16.msra.mxu1 %v9883_v4  ;;  %4784 = vmatprep.subr.bf16.mxu0 %v9888_v5  ;;  %v9915_v5 = vld [vmem:[%s11426_s25 + $0x74c] ss:$408 sps:$4 sm:$0xff]  }
 0x239   : > { %4835 = vmatprep.subr.bf16.mxu1 %v9891_v8  ;;  %v11991_v16 = vpop.f32.mrb[16].mxu0  ;;  %4810 = vmatprep.mubr.bf16.mxu0 %v14133_v62  ;;  %v9910_v8 = vld [vmem:[%s11426_s25 + $0x740] ss:$408 sps:$4 sm:$0xff]  }
 0x23a   : > { %14308 = vst [vmem:[#allocation16_spill] sm:$0xff] %v11991_v16  ;;  %v11993_v19 = vpop.f32.mrb[16].mxu1  ;;  %4861 = vmatprep.mubr.bf16.mxu1 %v14133_v62  ;;  %v11997_v31 = vpop.f32.mrb[17].mxu0 }
 0x23b   : > { %14309 = vst [vmem:[#allocation17_spill] sm:$0xff] %v11997_v31  ;;  %v11999_v20 = vpop.f32.mrb[17].mxu1  ;;  %v12001_v21 = vpop.f32.mrb[18].mxu0  ;;  %4785 = vmatpush1.bf16.msra.mxu0 %v9886_v10  ;;  %v9921_v10 = vld [vmem:[%s11426_s25 + $0xa7c] ss:$408 sps:$4 sm:$0xff]  }
 0x23c   : > { %14310 = vst [vmem:[#allocation18_spill] sm:$0xff] %v12001_v21  ;;  %v12003_v22 = vpop.f32.mrb[18].mxu1  ;;  %4836 = vmatpush1.bf16.msra.mxu1 %v9889_v11  ;;  %v12008_v26 = vpop.f32.mrb[19].mxu0  ;;  %4786 = vmatprep.subr.bf16.mxu0 %v4275_v14  ;;  %v9924_v11 = vld [vmem:[%s11426_s25 + $0xda4] ss:$408 sps:$4 sm:$0x3f]  }
 0x23d   : > { %14311 = vst [vmem:[#allocation19_spill] sm:$0xff] %v12008_v26  ;;  %v12010_v35 = vpop.f32.mrb[19].mxu1  ;;  %4837 = vmatprep.subr.bf16.mxu1 %v4281_v15  ;;  %v9919_v14 = vld [vmem:[%s11426_s25 + $0xa78] ss:$408 sps:$4 sm:$0xff]   ;;  %v10141_v31 = vld [vmem:[%s11426_s25 + $0x168] ss:$408 sps:$4 sm:$0xff]  }
 0x23e   : > { %v9922_v15 = vld [vmem:[%s11426_s25 + $0xda0] ss:$408 sps:$4 sm:$0x3f]   ;;  %v10155_v21 = vld [vmem:[%s11426_s25 + $0x7cc] ss:$408 sps:$4 sm:$0xff]  }
 0x23f   : > { %4787 = vmatpush1.bf16.msra.mxu0 %v4272_v23  ;;  %v9925_v23 = vld [vmem:[%s11426_s25 + $0xda8] ss:$408 sps:$4 sm:$0x3f]  }
 0x240   : > { %4838 = vmatpush1.bf16.msra.mxu1 %v4278_v24  ;;  %4880 = vmatprep.subr.bf16.mxu0 %v9900_v25  ;;  %v12053_v24 = vld [vmem:[%s14126_s1 + $0x8] ss:$0 sps:$4 sm:$0xff]   ;;  %v4287_v25 = vand.u32 %v9924_v11, %v11449_v17 }
 0x241   : > { %4931 = vmatprep.subr.bf16.mxu1 %v9903_v36  ;;  %v12017_v44 = vpop.f32.mrb[20].mxu0  ;;  %v4293_v36 = vand.u32 %v9927_v12, %v11449_v17 }
 0x242   : > { %14312 = vst [vmem:[#allocation20_spill] sm:$0xff] %v12017_v44  ;;  %v12019_v45 = vpop.f32.mrb[20].mxu1  ;;  %9076 = vmatmul.mubr.msk.bf16.vlgmr.msra.gmra.mrb[104].mxu0 %vm2251_vm2, %v12025_v57  ;;  %v12031_v58 = vpop.f32.mrb[21].mxu0  ;;  %v10147_v44 = vld [vmem:[%s11426_s25 + $0x498] ss:$408 sps:$4 sm:$0xff]  }
 0x243   : > { %9078 = vmatmul.mubr.msk.bf16.vlgmr.msra.gmra.mrb[104].mxu1 %vm2251_vm2, %v12025_v57  ;;  %14313 = vst [vmem:[#allocation21_spill] sm:$0xff] %v12031_v58  ;;  %v12033_v61 = vpop.f32.mrb[21].mxu1  ;;  %4881 = vmatpush1.bf16.msra.mxu0 %v9898_v38  ;;  %v2616_v18 = vpop.f32.mrb[22].mxu0 }
 0x244   : > { %4932 = vmatpush1.bf16.msra.mxu1 %v9901_v41  ;;  %v2667_v28 = vpop.f32.mrb[22].mxu1  ;;  %v2617_v1 = vpop.f32.mrb[23].mxu0  ;;  %4882 = vmatprep.subr.bf16.mxu0 %v9906_v42  ;;  %v4290_v18 = vand.u32 %v9925_v23, %v11449_v17 }
 0x245   : > { %4933 = vmatprep.subr.bf16.mxu1 %v9909_v43  ;;  %v2668_v4 = vpop.f32.mrb[23].mxu1  ;;  %4820 = vmatprep.mubr.bf16.mxu0 %v14133_v62 }
 0x246   : > { %4871 = vmatprep.mubr.bf16.mxu1 %v14133_v62  ;;  %v9930_v4 = vld [vmem:[%s11426_s25 + $0xf4] ss:$408 sps:$4 sm:$0xff]  }
 0x247   : > { %4883 = vmatpush1.bf16.msra.mxu0 %v9904_v56 }
 0x248   : > { %4934 = vmatpush1.bf16.msra.mxu1 %v9907_v63  ;;  %4884 = vmatprep.subr.bf16.mxu0 %v9912_v0  ;;  %v4284_v0 = vand.u32 %v9922_v15, %v11449_v17 }
 0x249   : > { %4935 = vmatprep.subr.bf16.mxu1 %v9915_v5  ;;  %v9933_v5 = vld [vmem:[%s11426_s25 + $0xfc] ss:$408 sps:$4 sm:$0xff]  }
 0x24a   : > { %9077 = vmatmul.mubr.msk.bf16.gmra.mrb[108].mxu0 %vm2251_vm2, %v12053_v24 }
 0x24b   : > { %9079 = vmatmul.mubr.msk.bf16.gmra.mrb[108].mxu1 %vm2251_vm2, %v12053_v24  ;;  %4885 = vmatpush1.bf16.msra.mxu0 %v9910_v8  ;;  %v9928_v8 = vld [vmem:[%s11426_s25 + $0xf0] ss:$408 sps:$4 sm:$0xff]  }
 0x24c   : > { %4936 = vmatpush1.bf16.msra.mxu1 %v9913_v9  ;;  %4886 = vmatprep.subr.bf16.mxu0 %v9918_v37  ;;  %v9931_v9 = vld [vmem:[%s11426_s25 + $0xf8] ss:$408 sps:$4 sm:$0xff]   ;;  %v9936_v37 = vld [vmem:[%s11426_s25 + $0x424] ss:$408 sps:$4 sm:$0xff]  }
 0x24d   : > { %4937 = vmatprep.subr.bf16.mxu1 %v9921_v10  ;;  %v12061_v38 = vpop.f32.mrb[24].mxu0  ;;  %4912 = vmatprep.mubr.bf16.mxu0 %v14133_v62  ;;  %v9939_v10 = vld [vmem:[%s11426_s25 + $0x42c] ss:$408 sps:$4 sm:$0xff]  }
 0x24e   : > { %14314 = vst [vmem:[#allocation22_spill] sm:$0xff] %v12061_v38  ;;  %v12063_v41 = vpop.f32.mrb[24].mxu1  ;;  %4963 = vmatprep.mubr.bf16.mxu1 %v14133_v62  ;;  %v12067_v42 = vpop.f32.mrb[25].mxu0 }
 0x24f   : > { %14315 = vst [vmem:[#allocation23_spill] sm:$0xff] %v12067_v42  ;;  %v12069_v43 = vpop.f32.mrb[25].mxu1  ;;  %v12071_v56 = vpop.f32.mrb[26].mxu0  ;;  %4887 = vmatpush1.bf16.msra.mxu0 %v9916_v13  ;;  %v9934_v13 = vld [vmem:[%s11426_s25 + $0x420] ss:$408 sps:$4 sm:$0xff]  }
 0x250   : > { %14316 = vst [vmem:[#allocation24_spill] sm:$0xff] %v12069_v43  ;;  %14317 = vst [vmem:[#allocation25_spill] sm:$0xff] %v12071_v56  ;;  %v12073_v63 = vpop.f32.mrb[26].mxu1  ;;  %4938 = vmatpush1.bf16.msra.mxu1 %v9919_v14  ;;  %v12077_v28 = vpop.f32.mrb[27].mxu0  ;;  %4888 = vmatprep.subr.bf16.mxu0 %v4287_v25  ;;  %v9937_v14 = vld [vmem:[%s11426_s25 + $0x428] ss:$408 sps:$4 sm:$0xff]  }
 0x251   : > { %14318 = vst [vmem:[#allocation26_spill] sm:$0xff] %v12073_v63  ;;  %14319 = vst [vmem:[#allocation27_spill] sm:$0xff] %v12077_v28  ;;  %v12079_v1 = vpop.f32.mrb[27].mxu1  ;;  %4939 = vmatprep.subr.bf16.mxu1 %v4293_v36  ;;  %v9985_v63 = vld [vmem:[%s11426_s25 + $0xdc8] ss:$408 sps:$4 sm:$0x3f]  }
 0x252   : > { %14320 = vst [vmem:[#allocation28_spill] sm:$0xff] %v12079_v1  ;;  %v9963_v1 = vld [vmem:[%s11426_s25 + $0x10c] ss:$408 sps:$4 sm:$0xff]   ;;  %v10171_v42 = vld [vmem:[%s11426_s25 + $0x178] ss:$408 sps:$4 sm:$0xff]  }
 0x253   : > { %4889 = vmatpush1.bf16.msra.mxu0 %v4284_v0  ;;  %v10185_v56 = vld [vmem:[%s11426_s25 + $0x7dc] ss:$408 sps:$4 sm:$0xff]  }
 0x254   : > { %4940 = vmatpush1.bf16.msra.mxu1 %v4290_v18  ;;  %4982 = vmatprep.subr.bf16.mxu0 %v9930_v4  ;;  %v9942_v4 = vld [vmem:[%s11426_s25 + $0x754] ss:$408 sps:$4 sm:$0xff]  }
 0x255   : > { %5033 = vmatprep.subr.bf16.mxu1 %v9933_v5  ;;  %v12087_v11 = vpop.f32.mrb[28].mxu0  ;;  %v9945_v5 = vld [vmem:[%s11426_s25 + $0x75c] ss:$408 sps:$4 sm:$0xff]  }
 0x256   : > { %14321 = vst [vmem:[#allocation29_spill] sm:$0xff] %v12087_v11  ;;  %v12089_v12 = vpop.f32.mrb[28].mxu1  ;;  %9080 = vmatmul.mubr.msk.bf16.vlgmr.msra.gmra.mrb[112].mxu0 %vm2251_vm2, %v12025_v57  ;;  %v12097_v15 = vpop.f32.mrb[29].mxu0  ;;  %v10177_v11 = vld [vmem:[%s11426_s25 + $0x4a8] ss:$408 sps:$4 sm:$0xff]  }
 0x257   : > { %14322 = vst [vmem:[#allocation30_spill] sm:$0xff] %v12089_v12  ;;  %9082 = vmatmul.mubr.msk.bf16.vlgmr.msra.gmra.mrb[112].mxu1 %vm2251_vm2, %v12025_v57  ;;  %14323 = vst [vmem:[#allocation31_spill] sm:$0xff] %v12097_v15  ;;  %v12099_v23 = vpop.f32.mrb[29].mxu1  ;;  %4983 = vmatpush1.bf16.msra.mxu0 %v9928_v8  ;;  %v2718_v25 = vpop.f32.mrb[30].mxu0  ;;  %v9940_v8 = vld [vmem:[%s11426_s25 + $0x750] ss:$408 sps:$4 sm:$0xff]  }
 0x258   : > { %14324 = vst [vmem:[#allocation32_spill] sm:$0xff] %v12099_v23  ;;  %5034 = vmatpush1.bf16.msra.mxu1 %v9931_v9  ;;  %v2769_v36 = vpop.f32.mrb[30].mxu1  ;;  %v2719_v0 = vpop.f32.mrb[31].mxu0  ;;  %4984 = vmatprep.subr.bf16.mxu0 %v9936_v37  ;;  %v9943_v9 = vld [vmem:[%s11426_s25 + $0x758] ss:$408 sps:$4 sm:$0xff]  }
 0x259   : > { %5035 = vmatprep.subr.bf16.mxu1 %v9939_v10  ;;  %v2770_v18 = vpop.f32.mrb[31].mxu1  ;;  %4922 = vmatprep.mubr.bf16.mxu0 %v14133_v62  ;;  %v9948_v25 = vld [vmem:[%s11426_s25 + $0xa84] ss:$408 sps:$4 sm:$0xff]   ;;  %v9954_v36 = vld [vmem:[%s11426_s25 + $0xdb4] ss:$408 sps:$4 sm:$0x3f]  }
 0x25a   : > { %4973 = vmatprep.mubr.bf16.mxu1 %v14133_v62  ;;  %v9951_v23 = vld [vmem:[%s11426_s25 + $0xa8c] ss:$408 sps:$4 sm:$0xff]   ;;  %v9957_v37 = vld [vmem:[%s11426_s25 + $0xdbc] ss:$408 sps:$4 sm:$0x3f]  }
 0x25b   : > { %4985 = vmatpush1.bf16.msra.mxu0 %v9934_v13  ;;  %v9946_v10 = vld [vmem:[%s11426_s25 + $0xa80] ss:$408 sps:$4 sm:$0xff]   ;;  %v9952_v18 = vld [vmem:[%s11426_s25 + $0xdb0] ss:$408 sps:$4 sm:$0x3f]   ;;  %v4299_v13 = vand.u32 %v9954_v36, %v11449_v17 }
 0x25c   : > { %5036 = vmatpush1.bf16.msra.mxu1 %v9937_v14  ;;  %4986 = vmatprep.subr.bf16.mxu0 %v9942_v4  ;;  %v9949_v0 = vld [vmem:[%s11426_s25 + $0xa88] ss:$408 sps:$4 sm:$0xff]   ;;  %v9955_v12 = vld [vmem:[%s11426_s25 + $0xdb8] ss:$408 sps:$4 sm:$0x3f]   ;;  %v4305_v14 = vand.u32 %v9957_v37, %v11449_v17  ;;  %v4296_v36 = vand.u32 %v9952_v18, %v11449_v17 }
 0x25d   : > { %5037 = vmatprep.subr.bf16.mxu1 %v9945_v5  ;;  %v4302_v37 = vand.u32 %v9955_v12, %v11449_v17 }
 0x25e   : > { %9081 = vmatmul.mubr.msk.bf16.gmra.mrb[116].mxu0 %vm2251_vm2, %v12053_v24 }
 0x25f   : > { %9083 = vmatmul.mubr.msk.bf16.gmra.mrb[116].mxu1 %vm2251_vm2, %v12053_v24  ;;  %4987 = vmatpush1.bf16.msra.mxu0 %v9940_v8 }
 0x260   : > { %5038 = vmatpush1.bf16.msra.mxu1 %v9943_v9  ;;  %4988 = vmatprep.subr.bf16.mxu0 %v9948_v25 }
 0x261   : > { %5039 = vmatprep.subr.bf16.mxu1 %v9951_v23  ;;  %v12121_v4 = vpop.f32.mrb[32].mxu0  ;;  %5014 = vmatprep.mubr.bf16.mxu0 %v14133_v62 }
 0x262   : > { %14325 = vst [vmem:[#allocation33_spill] sm:$0xff] %v12121_v4  ;;  %v12123_v5 = vpop.f32.mrb[32].mxu1  ;;  %5065 = vmatprep.mubr.bf16.mxu1 %v14133_v62  ;;  %v12127_v8 = vpop.f32.mrb[33].mxu0  ;;  %v10198_v4 = vld [vmem:[%s11426_s25 + $0x180] ss:$408 sps:$4 sm:$0xff]  }
 0x263   : > { %14326 = vst [vmem:[#allocation34_spill] sm:$0xff] %v12123_v5  ;;  %14327 = vst [vmem:[#allocation35_spill] sm:$0xff] %v12127_v8  ;;  %v12129_v9 = vpop.f32.mrb[33].mxu1  ;;  %v12131_v23 = vpop.f32.mrb[34].mxu0  ;;  %4989 = vmatpush1.bf16.msra.mxu0 %v9946_v10  ;;  %v9966_v10 = vld [vmem:[%s11426_s25 + $0x434] ss:$408 sps:$4 sm:$0xff]  }
 0x264   : > { %14328 = vst [vmem:[#allocation36_spill] sm:$0xff] %v12129_v9  ;;  %14329 = vst [vmem:[#allocation37_spill] sm:$0xff] %v12131_v23  ;;  %v12133_v25 = vpop.f32.mrb[34].mxu1  ;;  %5040 = vmatpush1.bf16.msra.mxu1 %v9949_v0  ;;  %v12137_v5 = vpop.f32.mrb[35].mxu0  ;;  %4990 = vmatprep.subr.bf16.mxu0 %v4299_v13  ;;  %v9960_v9 = vld [vmem:[%s11426_s25 + $0x104] ss:$408 sps:$4 sm:$0xff]  }
 0x265   : > { %14330 = vst [vmem:[#allocation38_spill] sm:$0xff] %v12133_v25  ;;  %14331 = vst [vmem:[#allocation39_spill] sm:$0xff] %v12137_v5  ;;  %v12139_v62 = vpop.f32.mrb[35].mxu1  ;;  %5041 = vmatprep.subr.bf16.mxu1 %v4305_v14  ;;  %v9958_v23 = vld [vmem:[%s11426_s25 + $0x100] ss:$408 sps:$4 sm:$0xff]  }
 0x266   : > { %14332 = vst [vmem:[#allocation40_spill] sm:$0xff] %v12139_v62  ;;  %v9961_v25 = vld [vmem:[%s11426_s25 + $0x108] ss:$408 sps:$4 sm:$0xff]   ;;  %v9969_v0 = vld [vmem:[%s11426_s25 + $0x43c] ss:$408 sps:$4 sm:$0xff]  }
 0x267   : > { %4991 = vmatpush1.bf16.msra.mxu0 %v4296_v36  ;;  %v9964_v62 = vld [vmem:[%s11426_s25 + $0x430] ss:$408 sps:$4 sm:$0xff]  }
 0x268   : > { %5042 = vmatpush1.bf16.msra.mxu1 %v4302_v37  ;;  %5084 = vmatprep.subr.bf16.mxu0 %v9960_v9  ;;  %v9967_v5 = vld [vmem:[%s11426_s25 + $0x438] ss:$408 sps:$4 sm:$0xff]  }
 0x269   : > { %5135 = vmatprep.subr.bf16.mxu1 %v9963_v1  ;;  %v12147_v18 = vpop.f32.mrb[36].mxu0 }
 0x26a   : > { %14333 = vst [vmem:[#allocation41_spill] sm:$0xff] %v12147_v18  ;;  %v12149_v12 = vpop.f32.mrb[36].mxu1  ;;  %9084 = vmatmul.mubr.msk.bf16.vlgmr.msra.gmra.mrb[120].mxu0 %vm2251_vm2, %v12025_v57  ;;  %v12157_v13 = vpop.f32.mrb[37].mxu0  ;;  %v9975_v18 = vld [vmem:[%s11426_s25 + $0x76c] ss:$408 sps:$4 sm:$0xff]  }
 0x26b   : > { %14334 = vst [vmem:[#allocation42_spill] sm:$0xff] %v12149_v12  ;;  %9086 = vmatmul.mubr.msk.bf16.vlgmr.msra.gmra.mrb[120].mxu1 %vm2251_vm2, %v12025_v57  ;;  %14335 = vst [vmem:[#allocation43_spill] sm:$0xff] %v12157_v13  ;;  %v12159_v1 = vpop.f32.mrb[37].mxu1  ;;  %5085 = vmatpush1.bf16.msra.mxu0 %v9958_v23  ;;  %v2820_v14 = vpop.f32.mrb[38].mxu0  ;;  %v9972_v12 = vld [vmem:[%s11426_s25 + $0x764] ss:$408 sps:$4 sm:$0xff]  }
 0x26c   : > { %14336 = vst [vmem:[#allocation44_spill] sm:$0xff] %v12159_v1  ;;  %5136 = vmatpush1.bf16.msra.mxu1 %v9961_v25  ;;  %v2871_v9 = vpop.f32.mrb[38].mxu1  ;;  %v2821_v36 = vpop.f32.mrb[39].mxu0  ;;  %5086 = vmatprep.subr.bf16.mxu0 %v9966_v10  ;;  %v14337_v13 = vmov 0   ;;  %v9970_v23 = vld [vmem:[%s11426_s25 + $0x760] ss:$408 sps:$4 sm:$0xff]  }
 0x26d   : > { %5137 = vmatprep.subr.bf16.mxu1 %v9969_v0  ;;  %v2872_v37 = vpop.f32.mrb[39].mxu1  ;;  %5024 = vmatprep.mubr.bf16.mxu0 %v14337_v13  ;;  %v9973_v25 = vld [vmem:[%s11426_s25 + $0x768] ss:$408 sps:$4 sm:$0xff]   ;;  %v9978_v14 = vld [vmem:[%s11426_s25 + $0xa94] ss:$408 sps:$4 sm:$0xff]  }
 0x26e   : > { %5075 = vmatprep.mubr.bf16.mxu1 %v14337_v13  ;;  %v9981_v1 = vld [vmem:[%s11426_s25 + $0xa9c] ss:$408 sps:$4 sm:$0xff]   ;;  %v9987_v10 = vld [vmem:[%s11426_s25 + $0xdcc] ss:$408 sps:$4 sm:$0x3f]  }
 0x26f   : > { %5087 = vmatpush1.bf16.msra.mxu0 %v9964_v62  ;;  %v9984_v9 = vld [vmem:[%s11426_s25 + $0xdc4] ss:$408 sps:$4 sm:$0x3f]   ;;  %v9976_v0 = vld [vmem:[%s11426_s25 + $0xa90] ss:$408 sps:$4 sm:$0xff]  }
 0x270   : > { %5138 = vmatpush1.bf16.msra.mxu1 %v9967_v5  ;;  %5088 = vmatprep.subr.bf16.mxu0 %v9972_v12  ;;  %v9979_v36 = vld [vmem:[%s11426_s25 + $0xa98] ss:$408 sps:$4 sm:$0xff]   ;;  %v4311_v62 = vand.u32 %v9984_v9, %v11449_v17  ;;  %v4317_v5 = vand.u32 %v9987_v10, %v11449_v17  ;;  %v4314_v9 = vand.u32 %v9985_v63, %v11449_v17 }
 0x271   : > { %5139 = vmatprep.subr.bf16.mxu1 %v9975_v18  ;;  %v9982_v37 = vld [vmem:[%s11426_s25 + $0xdc0] ss:$408 sps:$4 sm:$0x3f]  }
 0x272   : > { %9085 = vmatmul.mubr.msk.bf16.gmra.mrb[124].mxu0 %vm2251_vm2, %v12053_v24  ;;  %v14428_v15 = vld [vmem:[#allocation34_spill] sm:$0xff] }
 0x273   : > { %9087 = vmatmul.mubr.msk.bf16.gmra.mrb[124].mxu1 %vm2251_vm2, %v12053_v24  ;;  %5089 = vmatpush1.bf16.msra.mxu0 %v9970_v23 }
 0x274   : > { %5140 = vmatpush1.bf16.msra.mxu1 %v9973_v25  ;;  %5090 = vmatprep.subr.bf16.mxu0 %v9978_v14  ;;  %v4308_v14 = vand.u32 %v9982_v37, %v11449_v17  ;;  %v9999_v37 = vld [vmem:[%s11426_s25 + $0x44c] ss:$408 sps:$4 sm:$0xff]  }
 0x275   : > { %5141 = vmatprep.subr.bf16.mxu1 %v9981_v1  ;;  %v12181_v12 = vpop.f32.mrb[40].mxu0  ;;  %5116 = vmatprep.mubr.bf16.mxu0 %v14337_v13 }
 0x276   : > { %14338 = vst [vmem:[#allocation45_spill] sm:$0xff] %v12181_v12  ;;  %v12183_v18 = vpop.f32.mrb[40].mxu1  ;;  %5167 = vmatprep.mubr.bf16.mxu1 %v14337_v13  ;;  %v12187_v8 = vpop.f32.mrb[41].mxu0 }
 0x277   : > { %14339 = vst [vmem:[#allocation46_spill] sm:$0xff] %v12183_v18  ;;  %14340 = vst [vmem:[#allocation47_spill] sm:$0xff] %v12187_v8  ;;  %v12189_v23 = vpop.f32.mrb[41].mxu1  ;;  %v12191_v1 = vpop.f32.mrb[42].mxu0  ;;  %5091 = vmatpush1.bf16.msra.mxu0 %v9976_v0  ;;  %v9993_v8 = vld [vmem:[%s11426_s25 + $0x11c] ss:$408 sps:$4 sm:$0xff]  }
 0x278   : > { %14341 = vst [vmem:[#allocation48_spill] sm:$0xff] %v12189_v23  ;;  %14342 = vst [vmem:[#allocation49_spill] sm:$0xff] %v12191_v1  ;;  %v12193_v25 = vpop.f32.mrb[42].mxu1  ;;  %5142 = vmatpush1.bf16.msra.mxu1 %v9979_v36  ;;  %v12197_v10 = vpop.f32.mrb[43].mxu0  ;;  %5092 = vmatprep.subr.bf16.mxu0 %v4311_v62  ;;  %v9990_v23 = vld [vmem:[%s11426_s25 + $0x114] ss:$408 sps:$4 sm:$0xff]  }
 0x279   : > { %14343 = vst [vmem:[#allocation50_spill] sm:$0xff] %v12193_v25  ;;  %14344 = vst [vmem:[#allocation51_spill] sm:$0xff] %v12197_v10  ;;  %v12199_v18 = vpop.f32.mrb[43].mxu1  ;;  %5143 = vmatprep.subr.bf16.mxu1 %v4317_v5  ;;  %v9988_v1 = vld [vmem:[%s11426_s25 + $0x110] ss:$408 sps:$4 sm:$0xff]  }
 0x27a   : > { %14345 = vst [vmem:[#allocation52_spill] sm:$0xff] %v12199_v18  ;;  %v9991_v0 = vld [vmem:[%s11426_s25 + $0x118] ss:$408 sps:$4 sm:$0xff]   ;;  %v9996_v36 = vld [vmem:[%s11426_s25 + $0x444] ss:$408 sps:$4 sm:$0xff]  }
 0x27b   : > { %5093 = vmatpush1.bf16.msra.mxu0 %v4308_v14  ;;  %v9994_v14 = vld [vmem:[%s11426_s25 + $0x440] ss:$408 sps:$4 sm:$0xff]  }
 0x27c   : > { %5144 = vmatpush1.bf16.msra.mxu1 %v4314_v9  ;;  %6376 = vmatprep.subr.bf16.mxu0 %v9990_v23  ;;  %v9997_v9 = vld [vmem:[%s11426_s25 + $0x448] ss:$408 sps:$4 sm:$0xff]  }
 0x27d   : > { %6427 = vmatprep.subr.bf16.mxu1 %v9993_v8  ;;  %v12207_v25 = vpop.f32.mrb[44].mxu0 }
 0x27e   : > { %14346 = vst [vmem:[#allocation53_spill] sm:$0xff] %v12207_v25  ;;  %v12209_v63 = vpop.f32.mrb[44].mxu1  ;;  %9088 = vmatmul.mubr.msk.bf16.vlgmr.msra.gmra.mrb[128].mxu0 %vm2251_vm2, %v12025_v57  ;;  %v12215_v62 = vpop.f32.mrb[45].mxu0  ;;  %v10002_v25 = vld [vmem:[%s11426_s25 + $0x774] ss:$408 sps:$4 sm:$0xff]  }
 0x27f   : > { %14347 = vst [vmem:[#allocation54_spill] sm:$0xff] %v12209_v63  ;;  %9090 = vmatmul.mubr.msk.bf16.vlgmr.msra.gmra.mrb[128].mxu1 %vm2251_vm2, %v12025_v57  ;;  %14348 = vst [vmem:[#allocation55_spill] sm:$0xff] %v12215_v62  ;;  %v12217_v5 = vpop.f32.mrb[45].mxu1  ;;  %6377 = vmatpush1.bf16.msra.mxu0 %v9988_v1  ;;  %v2922_v8 = vpop.f32.mrb[46].mxu0  ;;  %v10005_v62 = vld [vmem:[%s11426_s25 + $0x77c] ss:$408 sps:$4 sm:$0xff]  }
 0x280   : > { %14349 = vst [vmem:[#allocation56_spill] sm:$0xff] %v12217_v5  ;;  %6428 = vmatpush1.bf16.msra.mxu1 %v9991_v0  ;;  %v2973_v23 = vpop.f32.mrb[46].mxu1  ;;  %v2923_v63 = vpop.f32.mrb[47].mxu0  ;;  %6378 = vmatprep.subr.bf16.mxu0 %v9996_v36  ;;  %v10000_v1 = vld [vmem:[%s11426_s25 + $0x770] ss:$408 sps:$4 sm:$0xff]  }
 0x281   : > { %6429 = vmatprep.subr.bf16.mxu1 %v9999_v37  ;;  %v2974_v18 = vpop.f32.mrb[47].mxu1  ;;  %5126 = vmatprep.mubr.bf16.mxu0 %v14337_v13  ;;  %v10003_v0 = vld [vmem:[%s11426_s25 + $0x778] ss:$408 sps:$4 sm:$0xff]   ;;  %v10008_v63 = vld [vmem:[%s11426_s25 + $0xaa4] ss:$408 sps:$4 sm:$0xff]  }
 0x282   : > { %5177 = vmatprep.mubr.bf16.mxu1 %v14337_v13  ;;  %v10011_v8 = vld [vmem:[%s11426_s25 + $0xaac] ss:$408 sps:$4 sm:$0xff]   ;;  %v10017_v18 = vld [vmem:[%s11426_s25 + $0xddc] ss:$408 sps:$4 sm:$0x3f]  }
 0x283   : > { %6379 = vmatpush1.bf16.msra.mxu0 %v9994_v14  ;;  %v10014_v36 = vld [vmem:[%s11426_s25 + $0xdd4] ss:$408 sps:$4 sm:$0x3f]   ;;  %v10006_v37 = vld [vmem:[%s11426_s25 + $0xaa0] ss:$408 sps:$4 sm:$0xff]  }
 0x284   : > { %6430 = vmatpush1.bf16.msra.mxu1 %v9997_v9  ;;  %6380 = vmatprep.subr.bf16.mxu0 %v10002_v25  ;;  %v10009_v23 = vld [vmem:[%s11426_s25 + $0xaa8] ss:$408 sps:$4 sm:$0xff]   ;;  %v10015_v5 = vld [vmem:[%s11426_s25 + $0xdd8] ss:$408 sps:$4 sm:$0x3f]   ;;  %v6278_v9 = vand.u32 %v10014_v36, %v11449_v17  ;;  %v6284_v25 = vand.u32 %v10017_v18, %v11449_v17 }
 0x285   : > { %6431 = vmatprep.subr.bf16.mxu1 %v10005_v62  ;;  %v10012_v14 = vld [vmem:[%s11426_s25 + $0xdd0] ss:$408 sps:$4 sm:$0x3f]   ;;  %v6281_v18 = vand.u32 %v10015_v5, %v11449_v17 }
 0x286   : > { %9089 = vmatmul.mubr.msk.bf16.gmra.mrb[132].mxu0 %vm2251_vm2, %v12053_v24  ;;  %v6275_v36 = vand.u32 %v10012_v14, %v11449_v17  ;;  %v10029_v14 = vld [vmem:[%s11426_s25 + $0x45c] ss:$408 sps:$4 sm:$0xff]  }
 0x287   : > { %9091 = vmatmul.mubr.msk.bf16.gmra.mrb[132].mxu1 %vm2251_vm2, %v12053_v24  ;;  %6381 = vmatpush1.bf16.msra.mxu0 %v10000_v1 }
 0x288   : > { %6432 = vmatpush1.bf16.msra.mxu1 %v10003_v0  ;;  %6382 = vmatprep.subr.bf16.mxu0 %v10008_v63 }
 0x289   : > { %6433 = vmatprep.subr.bf16.mxu1 %v10011_v8  ;;  %v12241_v62 = vpop.f32.mrb[48].mxu0  ;;  %6408 = vmatprep.mubr.bf16.mxu0 %v14337_v13 }
 0x28a   : > { %14350 = vst [vmem:[#allocation57_spill] sm:$0xff] %v12241_v62  ;;  %v12243_v10 = vpop.f32.mrb[48].mxu1  ;;  %6459 = vmatprep.mubr.bf16.mxu1 %v14337_v13  ;;  %v12247_v1 = vpop.f32.mrb[49].mxu0 }
 0x28b   : > { %14351 = vst [vmem:[#allocation58_spill] sm:$0xff] %v12243_v10  ;;  %14352 = vst [vmem:[#allocation59_spill] sm:$0xff] %v12247_v1  ;;  %v12249_v0 = vpop.f32.mrb[49].mxu1  ;;  %v12251_v63 = vpop.f32.mrb[50].mxu0  ;;  %6383 = vmatpush1.bf16.msra.mxu0 %v10006_v37  ;;  %v10023_v1 = vld [vmem:[%s11426_s25 + $0x12c] ss:$408 sps:$4 sm:$0xff]  }
 0x28c   : > { %14353 = vst [vmem:[#allocation60_spill] sm:$0xff] %v12249_v0  ;;  %14354 = vst [vmem:[#allocation61_spill] sm:$0xff] %v12251_v63  ;;  %v12253_v8 = vpop.f32.mrb[50].mxu1  ;;  %6434 = vmatpush1.bf16.msra.mxu1 %v10009_v23  ;;  %v12257_v10 = vpop.f32.mrb[51].mxu0  ;;  %6384 = vmatprep.subr.bf16.mxu0 %v6278_v9  ;;  %v10020_v0 = vld [vmem:[%s11426_s25 + $0x124] ss:$408 sps:$4 sm:$0xff]  }
 0x28d   : > { %14355 = vst [vmem:[#allocation62_spill] sm:$0xff] %v12253_v8  ;;  %14356 = vst [vmem:[#allocation63_spill] sm:$0xff] %v12257_v10  ;;  %v12259_v62 = vpop.f32.mrb[51].mxu1  ;;  %6435 = vmatprep.subr.bf16.mxu1 %v6284_v25  ;;  %v10018_v63 = vld [vmem:[%s11426_s25 + $0x120] ss:$408 sps:$4 sm:$0xff]  }
 0x28e   : > { %14357 = vst [vmem:[#allocation64_spill] sm:$0xff] %v12259_v62  ;;  %v10021_v37 = vld [vmem:[%s11426_s25 + $0x128] ss:$408 sps:$4 sm:$0xff]   ;;  %v10026_v23 = vld [vmem:[%s11426_s25 + $0x454] ss:$408 sps:$4 sm:$0xff]  }
 0x28f   : > { %6385 = vmatpush1.bf16.msra.mxu0 %v6275_v36  ;;  %v10024_v36 = vld [vmem:[%s11426_s25 + $0x450] ss:$408 sps:$4 sm:$0xff]  }
 0x290   : > { %6436 = vmatpush1.bf16.msra.mxu1 %v6281_v18  ;;  %6478 = vmatprep.subr.bf16.mxu0 %v10020_v0  ;;  %v10027_v18 = vld [vmem:[%s11426_s25 + $0x458] ss:$408 sps:$4 sm:$0xff]  }
 0x291   : > { %6529 = vmatprep.subr.bf16.mxu1 %v10023_v1  ;;  %v12267_v8 = vpop.f32.mrb[52].mxu0 }
 0x292   : > { %14358 = vst [vmem:[#allocation65_spill] sm:$0xff] %v12267_v8  ;;  %v12269_v5 = vpop.f32.mrb[52].mxu1  ;;  %9262 = vmatmul.mubr.msk.bf16.vlgmr.msra.gmra.mrb[136].mxu0 %vm2251_vm2, %v12025_v57  ;;  %v12275_v9 = vpop.f32.mrb[53].mxu0  ;;  %v10032_v8 = vld [vmem:[%s11426_s25 + $0x784] ss:$408 sps:$4 sm:$0xff]  }
 0x293   : > { %14359 = vst [vmem:[#allocation66_spill] sm:$0xff] %v12269_v5  ;;  %9264 = vmatmul.mubr.msk.bf16.vlgmr.msra.gmra.mrb[136].mxu1 %vm2251_vm2, %v12025_v57  ;;  %14360 = vst [vmem:[#allocation67_spill] sm:$0xff] %v12275_v9  ;;  %v12277_v25 = vpop.f32.mrb[53].mxu1  ;;  %6479 = vmatpush1.bf16.msra.mxu0 %v10018_v63  ;;  %v3024_v1 = vpop.f32.mrb[54].mxu0  ;;  %v10035_v9 = vld [vmem:[%s11426_s25 + $0x78c] ss:$408 sps:$4 sm:$0xff]  }
 0x294   : > { %14361 = vst [vmem:[#allocation68_spill] sm:$0xff] %v12277_v25  ;;  %6530 = vmatpush1.bf16.msra.mxu1 %v10021_v37  ;;  %v3075_v0 = vpop.f32.mrb[54].mxu1  ;;  %v3025_v5 = vpop.f32.mrb[55].mxu0  ;;  %6480 = vmatprep.subr.bf16.mxu0 %v10026_v23  ;;  %v10030_v63 = vld [vmem:[%s11426_s25 + $0x780] ss:$408 sps:$4 sm:$0xff]  }
 0x295   : > { %6531 = vmatprep.subr.bf16.mxu1 %v10029_v14  ;;  %v3076_v62 = vpop.f32.mrb[55].mxu1  ;;  %6418 = vmatprep.mubr.bf16.mxu0 %v14337_v13  ;;  %v10033_v37 = vld [vmem:[%s11426_s25 + $0x788] ss:$408 sps:$4 sm:$0xff]   ;;  %v10038_v5 = vld [vmem:[%s11426_s25 + $0xab4] ss:$408 sps:$4 sm:$0xff]  }
 0x296   : > { %6469 = vmatprep.mubr.bf16.mxu1 %v14337_v13  ;;  %v10041_v1 = vld [vmem:[%s11426_s25 + $0xabc] ss:$408 sps:$4 sm:$0xff]   ;;  %v10047_v62 = vld [vmem:[%s11426_s25 + $0xdec] ss:$408 sps:$4 sm:$0x3f]  }
 0x297   : > { %6481 = vmatpush1.bf16.msra.mxu0 %v10024_v36  ;;  %v10044_v23 = vld [vmem:[%s11426_s25 + $0xde4] ss:$408 sps:$4 sm:$0x3f]   ;;  %v10036_v14 = vld [vmem:[%s11426_s25 + $0xab0] ss:$408 sps:$4 sm:$0xff]  }
 0x298   : > { %6532 = vmatpush1.bf16.msra.mxu1 %v10027_v18  ;;  %6482 = vmatprep.subr.bf16.mxu0 %v10032_v8  ;;  %v10039_v0 = vld [vmem:[%s11426_s25 + $0xab8] ss:$408 sps:$4 sm:$0xff]   ;;  %v10045_v25 = vld [vmem:[%s11426_s25 + $0xde8] ss:$408 sps:$4 sm:$0x3f]   ;;  %v6290_v18 = vand.u32 %v10044_v23, %v11449_v17  ;;  %v6296_v8 = vand.u32 %v10047_v62, %v11449_v17 }
 0x299   : > { %6533 = vmatprep.subr.bf16.mxu1 %v10035_v9  ;;  %v10042_v36 = vld [vmem:[%s11426_s25 + $0xde0] ss:$408 sps:$4 sm:$0x3f]   ;;  %v6293_v62 = vand.u32 %v10045_v25, %v11449_v17 }
 0x29a   : > { %9263 = vmatmul.mubr.msk.bf16.gmra.mrb[140].mxu0 %vm2251_vm2, %v12053_v24  ;;  %v6287_v23 = vand.u32 %v10042_v36, %v11449_v17  ;;  %v10059_v36 = vld [vmem:[%s11426_s25 + $0x46c] ss:$408 sps:$4 sm:$0xff]  }
 0x29b   : > { %9265 = vmatmul.mubr.msk.bf16.gmra.mrb[140].mxu1 %vm2251_vm2, %v12053_v24  ;;  %6483 = vmatpush1.bf16.msra.mxu0 %v10030_v63 }
 0x29c   : > { %6534 = vmatpush1.bf16.msra.mxu1 %v10033_v37  ;;  %6484 = vmatprep.subr.bf16.mxu0 %v10038_v5 }
 0x29d   : > { %6535 = vmatprep.subr.bf16.mxu1 %v10041_v1  ;;  %v12301_v9 = vpop.f32.mrb[56].mxu0  ;;  %6510 = vmatprep.mubr.bf16.mxu0 %v14337_v13 }
 0x29e   : > { %14362 = vst [vmem:[#allocation69_spill] sm:$0xff] %v12301_v9  ;;  %v12303_v10 = vpop.f32.mrb[56].mxu1  ;;  %6561 = vmatprep.mubr.bf16.mxu1 %v14337_v13  ;;  %v12307_v63 = vpop.f32.mrb[57].mxu0 }
 0x29f   : > { %14363 = vst [vmem:[#allocation70_spill] sm:$0xff] %v12303_v10  ;;  %14364 = vst [vmem:[#allocation71_spill] sm:$0xff] %v12307_v63  ;;  %v12309_v37 = vpop.f32.mrb[57].mxu1  ;;  %v12311_v5 = vpop.f32.mrb[58].mxu0  ;;  %6485 = vmatpush1.bf16.msra.mxu0 %v10036_v14  ;;  %v10053_v63 = vld [vmem:[%s11426_s25 + $0x13c] ss:$408 sps:$4 sm:$0xff]  }
 0x2a0   : > { %14365 = vst [vmem:[#allocation72_spill] sm:$0xff] %v12309_v37  ;;  %14366 = vst [vmem:[#allocation73_spill] sm:$0xff] %v12311_v5  ;;  %v12313_v1 = vpop.f32.mrb[58].mxu1  ;;  %6536 = vmatpush1.bf16.msra.mxu1 %v10039_v0  ;;  %v12317_v10 = vpop.f32.mrb[59].mxu0  ;;  %6486 = vmatprep.subr.bf16.mxu0 %v6290_v18  ;;  %v10050_v37 = vld [vmem:[%s11426_s25 + $0x134] ss:$408 sps:$4 sm:$0xff]  }
 0x2a1   : > { %14367 = vst [vmem:[#allocation74_spill] sm:$0xff] %v12313_v1  ;;  %14368 = vst [vmem:[#allocation75_spill] sm:$0xff] %v12317_v10  ;;  %v12319_v9 = vpop.f32.mrb[59].mxu1  ;;  %6537 = vmatprep.subr.bf16.mxu1 %v6296_v8  ;;  %v10048_v5 = vld [vmem:[%s11426_s25 + $0x130] ss:$408 sps:$4 sm:$0xff]  }
 0x2a2   : > { %14369 = vst [vmem:[#allocation76_spill] sm:$0xff] %v12319_v9  ;;  %v10051_v14 = vld [vmem:[%s11426_s25 + $0x138] ss:$408 sps:$4 sm:$0xff]   ;;  %v10056_v0 = vld [vmem:[%s11426_s25 + $0x464] ss:$408 sps:$4 sm:$0xff]  }
 0x2a3   : > { %6487 = vmatpush1.bf16.msra.mxu0 %v6287_v23  ;;  %v10054_v23 = vld [vmem:[%s11426_s25 + $0x460] ss:$408 sps:$4 sm:$0xff]  }
 0x2a4   : > { %6538 = vmatpush1.bf16.msra.mxu1 %v6293_v62  ;;  %6580 = vmatprep.subr.bf16.mxu0 %v10050_v37  ;;  %v10057_v62 = vld [vmem:[%s11426_s25 + $0x468] ss:$408 sps:$4 sm:$0xff]  }
 0x2a5   : > { %6631 = vmatprep.subr.bf16.mxu1 %v10053_v63  ;;  %v12327_v1 = vpop.f32.mrb[60].mxu0 }
 0x2a6   : > { %14370 = vst [vmem:[#allocation77_spill] sm:$0xff] %v12327_v1  ;;  %v12329_v25 = vpop.f32.mrb[60].mxu1  ;;  %9266 = vmatmul.mubr.msk.bf16.vlgmr.msra.gmra.mrb[144].mxu0 %vm2251_vm2, %v12025_v57  ;;  %v12335_v18 = vpop.f32.mrb[61].mxu0  ;;  %v10062_v1 = vld [vmem:[%s11426_s25 + $0x794] ss:$408 sps:$4 sm:$0xff]  }
 0x2a7   : > { %14371 = vst [vmem:[#allocation78_spill] sm:$0xff] %v12329_v25  ;;  %9268 = vmatmul.mubr.msk.bf16.vlgmr.msra.gmra.mrb[144].mxu1 %vm2251_vm2, %v12025_v57  ;;  %14372 = vst [vmem:[#allocation79_spill] sm:$0xff] %v12335_v18  ;;  %v12337_v8 = vpop.f32.mrb[61].mxu1  ;;  %6581 = vmatpush1.bf16.msra.mxu0 %v10048_v5  ;;  %v3126_v63 = vpop.f32.mrb[62].mxu0  ;;  %v10065_v18 = vld [vmem:[%s11426_s25 + $0x79c] ss:$408 sps:$4 sm:$0xff]  }
 0x2a8   : > { %14373 = vst [vmem:[#allocation80_spill] sm:$0xff] %v12337_v8  ;;  %6632 = vmatpush1.bf16.msra.mxu1 %v10051_v14  ;;  %v3177_v37 = vpop.f32.mrb[62].mxu1  ;;  %v3127_v25 = vpop.f32.mrb[63].mxu0  ;;  %6582 = vmatprep.subr.bf16.mxu0 %v10056_v0  ;;  %v10060_v5 = vld [vmem:[%s11426_s25 + $0x790] ss:$408 sps:$4 sm:$0xff]  }
 0x2a9   : > { %6633 = vmatprep.subr.bf16.mxu1 %v10059_v36  ;;  %v3178_v9 = vpop.f32.mrb[63].mxu1  ;;  %6520 = vmatprep.mubr.bf16.mxu0 %v14337_v13  ;;  %v10063_v14 = vld [vmem:[%s11426_s25 + $0x798] ss:$408 sps:$4 sm:$0xff]   ;;  %v10068_v25 = vld [vmem:[%s11426_s25 + $0xac4] ss:$408 sps:$4 sm:$0xff]  }
 0x2aa   : > { %6571 = vmatprep.mubr.bf16.mxu1 %v14337_v13  ;;  %v10071_v63 = vld [vmem:[%s11426_s25 + $0xacc] ss:$408 sps:$4 sm:$0xff]   ;;  %v10077_v9 = vld [vmem:[%s11426_s25 + $0xdfc] ss:$408 sps:$4 sm:$0x3f]  }
 0x2ab   : > { %6583 = vmatpush1.bf16.msra.mxu0 %v10054_v23  ;;  %v10074_v0 = vld [vmem:[%s11426_s25 + $0xdf4] ss:$408 sps:$4 sm:$0x3f]   ;;  %v10066_v36 = vld [vmem:[%s11426_s25 + $0xac0] ss:$408 sps:$4 sm:$0xff]  }
 0x2ac   : > { %6634 = vmatpush1.bf16.msra.mxu1 %v10057_v62  ;;  %6584 = vmatprep.subr.bf16.mxu0 %v10062_v1  ;;  %v10069_v37 = vld [vmem:[%s11426_s25 + $0xac8] ss:$408 sps:$4 sm:$0xff]   ;;  %v10075_v8 = vld [vmem:[%s11426_s25 + $0xdf8] ss:$408 sps:$4 sm:$0x3f]   ;;  %v6302_v62 = vand.u32 %v10074_v0, %v11449_v17  ;;  %v6308_v1 = vand.u32 %v10077_v9, %v11449_v17 }
 0x2ad   : > { %6635 = vmatprep.subr.bf16.mxu1 %v10065_v18  ;;  %v10072_v23 = vld [vmem:[%s11426_s25 + $0xdf0] ss:$408 sps:$4 sm:$0x3f]  }
 0x2ae   : > { %9267 = vmatmul.mubr.msk.bf16.gmra.mrb[148].mxu0 %vm2251_vm2, %v12053_v24 }
 0x2af   : > { %9269 = vmatmul.mubr.msk.bf16.gmra.mrb[148].mxu1 %vm2251_vm2, %v12053_v24  ;;  %6585 = vmatpush1.bf16.msra.mxu0 %v10060_v5  ;;  %v6305_v5 = vand.u32 %v10075_v8, %v11449_v17  ;;  %v10086_v8 = vld [vmem:[%s11426_s25 + $0x474] ss:$408 sps:$4 sm:$0xff]  }
 0x2b0   : > { %6636 = vmatpush1.bf16.msra.mxu1 %v10063_v14  ;;  %6586 = vmatprep.subr.bf16.mxu0 %v10068_v25 }
 0x2b1   : > { %6637 = vmatprep.subr.bf16.mxu1 %v10071_v63  ;;  %v12361_v18 = vpop.f32.mrb[64].mxu0  ;;  %6612 = vmatprep.mubr.bf16.mxu0 %v14337_v13 }
 0x2b2   : > { %14374 = vst [vmem:[#allocation81_spill] sm:$0xff] %v12361_v18  ;;  %v12363_v10 = vpop.f32.mrb[64].mxu1  ;;  %6663 = vmatprep.mubr.bf16.mxu1 %v14337_v13  ;;  %v12369_v14 = vpop.f32.mrb[65].mxu0  ;;  %v6299_v18 = vand.u32 %v10072_v23, %v11449_v17  ;;  %v10081_v23 = vld [vmem:[%s11426_s25 + $0x148] ss:$408 sps:$4 sm:$0xff]  }
 0x2b3   : > { %14375 = vst [vmem:[#allocation82_spill] sm:$0xff] %v12363_v10  ;;  %14376 = vst [vmem:[#allocation83_spill] sm:$0xff] %v12369_v14  ;;  %v12371_v25 = vpop.f32.mrb[65].mxu1  ;;  %v12375_v0 = vpop.f32.mrb[66].mxu0  ;;  %6587 = vmatpush1.bf16.msra.mxu0 %v10066_v36  ;;  %v10089_v10 = vld [vmem:[%s11426_s25 + $0x47c] ss:$408 sps:$4 sm:$0xff]  }
 0x2b4   : > { %14377 = vst [vmem:[#allocation84_spill] sm:$0xff] %v12371_v25  ;;  %14378 = vst [vmem:[#allocation85_spill] sm:$0xff] %v12375_v0  ;;  %v12377_v9 = vpop.f32.mrb[66].mxu1  ;;  %6638 = vmatpush1.bf16.msra.mxu1 %v10069_v37  ;;  %v12383_v50 = vpop.f32.mrb[67].mxu0  ;;  %6588 = vmatprep.subr.bf16.mxu0 %v6302_v62  ;;  %v10080_v25 = vld [vmem:[%s11426_s25 + $0x144] ss:$408 sps:$4 sm:$0xff]  }
 0x2b5   : > { %14379 = vst [vmem:[#allocation86_spill] sm:$0xff] %v12377_v9  ;;  %14380 = vst [vmem:[#allocation87_spill] sm:$0xff] %v12383_v50  ;;  %v12385_v63 = vpop.f32.mrb[67].mxu1  ;;  %6639 = vmatprep.subr.bf16.mxu1 %v6308_v1  ;;  %v10078_v37 = vld [vmem:[%s11426_s25 + $0x140] ss:$408 sps:$4 sm:$0xff]  }
 0x2b6   : > { %14381 = vst [vmem:[#allocation88_spill] sm:$0xff] %v12385_v63  ;;  %v10084_v62 = vld [vmem:[%s11426_s25 + $0x470] ss:$408 sps:$4 sm:$0xff]   ;;  %v10092_v63 = vld [vmem:[%s11426_s25 + $0x7a4] ss:$408 sps:$4 sm:$0xff]  }
 0x2b7   : > { %6589 = vmatpush1.bf16.msra.mxu0 %v6299_v18  ;;  %v10087_v36 = vld [vmem:[%s11426_s25 + $0x478] ss:$408 sps:$4 sm:$0xff]  }
 0x2b8   : > { %6640 = vmatpush1.bf16.msra.mxu1 %v6305_v5  ;;  %6682 = vmatprep.subr.bf16.mxu0 %v10080_v25  ;;  %v10105_v5 = vld [vmem:[%s11426_s25 + $0xe08] ss:$408 sps:$4 sm:$0x3f]  }
 0x2b9   : > { %6733 = vmatprep.subr.bf16.mxu1 %v10083_v52  ;;  %v12397_v54 = vpop.f32.mrb[68].mxu0  ;;  %v12408_v52 = vld [vmem:[%s14126_s1] sm:$0xff]  }
 0x2ba   : > { %v12395_v9 = vpop.f32.mrb[68].mxu1  ;;  %14383 = vst [vmem:[#allocation90_spill] sm:$0xff] %v12397_v54  ;;  %9270 = vmatmul.mubr.msk.bf16.vlgmr.msra.gmra.mrb[152].mxu0 %vm2251_vm2, %v12025_v57  ;;  %v12412_v18 = vpop.f32.mrb[69].mxu0 }
 0x2bb   : > { %14382 = vst [vmem:[#allocation89_spill] sm:$0xff] %v12395_v9  ;;  %v12401_v1 = vpop.f32.mrb[69].mxu1  ;;  %9272 = vmatmul.mubr.msk.bf16.vlgmr.msra.gmra.mrb[152].mxu1 %vm2251_vm2, %v12408_v52  ;;  %6683 = vmatpush1.bf16.msra.mxu0 %v10078_v37  ;;  %v3228_v25 = vpop.f32.mrb[70].mxu0  ;;  %v10090_v37 = vld [vmem:[%s11426_s25 + $0x7a0] ss:$408 sps:$4 sm:$0xff]  }
 0x2bc   : > { %14384 = vst [vmem:[#allocation91_spill] sm:$0xff] %v12401_v1  ;;  %6734 = vmatpush1.bf16.msra.mxu1 %v10081_v23  ;;  %v4367_v57 = vpop.f32.mrb[70].mxu1  ;;  %v3229_v9 = vpop.f32.mrb[71].mxu0  ;;  %6684 = vmatprep.subr.bf16.mxu0 %v10086_v8  ;;  %v10093_v23 = vld [vmem:[%s11426_s25 + $0x7a8] ss:$408 sps:$4 sm:$0xff]  }
 0x2bd   : > { %6735 = vmatprep.subr.bf16.mxu1 %v10089_v10  ;;  %v4368_v2 = vpop.f32.mrb[71].mxu1  ;;  %6622 = vmatprep.mubr.bf16.mxu0 %v14337_v13  ;;  %v10098_v9 = vld [vmem:[%s11426_s25 + $0xad4] ss:$408 sps:$4 sm:$0xff]   ;;  %v10104_v10 = vld [vmem:[%s11426_s25 + $0xe04] ss:$408 sps:$4 sm:$0x3f]  }
 0x2be   : > { %6673 = vmatprep.mubr.bf16.mxu1 %v14337_v13  ;;  %v10101_v25 = vld [vmem:[%s11426_s25 + $0xadc] ss:$408 sps:$4 sm:$0xff]   ;;  %v10107_v2 = vld [vmem:[%s11426_s25 + $0xe0c] ss:$408 sps:$4 sm:$0x3f]  }
 0x2bf   : > { %6685 = vmatpush1.bf16.msra.mxu0 %v10084_v62  ;;  %v10096_v8 = vld [vmem:[%s11426_s25 + $0xad0] ss:$408 sps:$4 sm:$0xff]   ;;  %v10102_v57 = vld [vmem:[%s11426_s25 + $0xe00] ss:$408 sps:$4 sm:$0x3f]  }
 0x2c0   : > { %6736 = vmatpush1.bf16.msra.mxu1 %v10087_v36  ;;  %6686 = vmatprep.subr.bf16.mxu0 %v10092_v63  ;;  %v10099_v62 = vld [vmem:[%s11426_s25 + $0xad8] ss:$408 sps:$4 sm:$0xff]   ;;  %v6314_v36 = vand.u32 %v10104_v10, %v11449_v17 }
 0x2c1   : > { %6737 = vmatprep.subr.bf16.mxu1 %v10095_v59  ;;  %v6320_v59 = vand.u32 %v10107_v2, %v11449_v17 }
 0x2c2   : > { %9271 = vmatmul.mubr.msk.bf16.gmra.mrb[156].mxu0 %vm2251_vm2, %v12053_v24 }
 0x2c3   : > { %9273 = vmatmul.mubr.msk.bf16.gmra.mrb[156].mxu1 %vm2251_vm2, %v12053_v24  ;;  %6687 = vmatpush1.bf16.msra.mxu0 %v10090_v37  ;;  %v6317_v37 = vand.u32 %v10105_v5, %v11449_v17 }
 0x2c4   : > { %6738 = vmatpush1.bf16.msra.mxu1 %v10093_v23  ;;  %6688 = vmatprep.subr.bf16.mxu0 %v10098_v9 }
 0x2c5   : > { %6739 = vmatprep.subr.bf16.mxu1 %v10101_v25  ;;  %v12438_v63 = vpop.f32.mrb[72].mxu0  ;;  %6714 = vmatprep.mubr.bf16.mxu0 %v14337_v13  ;;  %v6311_v25 = vand.u32 %v10102_v57, %v11449_v17  ;;  %v10116_v57 = vld [vmem:[%s11426_s25 + $0x484] ss:$408 sps:$4 sm:$0xff]  }
 0x2c6   : > { %v12440_v1 = vpop.f32.mrb[72].mxu1  ;;  %6765 = vmatprep.mubr.bf16.mxu1 %v14337_v13  ;;  %v12448_v23 = vpop.f32.mrb[73].mxu0 }
 0x2c7   : > { %14385 = vst [vmem:[#allocation92_spill] sm:$0xff] %v12440_v1  ;;  %v12450_v9 = vpop.f32.mrb[73].mxu1  ;;  %v12457_v6 = vpop.f32.mrb[74].mxu0  ;;  %6689 = vmatpush1.bf16.msra.mxu0 %v10096_v8  ;;  %v10113_v8 = vld [vmem:[%s11426_s25 + $0x15c] ss:$408 sps:$4 sm:$0xff]  }
 0x2c8   : > { %14386 = vst [vmem:[#allocation93_spill] sm:$0xff] %v12450_v9  ;;  %v12459_v24 = vpop.f32.mrb[74].mxu1  ;;  %6740 = vmatpush1.bf16.msra.mxu1 %v10099_v62  ;;  %v12466_v10 = vpop.f32.mrb[75].mxu0  ;;  %6690 = vmatprep.subr.bf16.mxu0 %v6314_v36  ;;  %v10110_v9 = vld [vmem:[%s11426_s25 + $0x154] ss:$408 sps:$4 sm:$0xff]  }
 0x2c9   : > { %14387 = vst [vmem:[#allocation94_spill] sm:$0xff] %v12459_v24  ;;  %v12468_v2 = vpop.f32.mrb[75].mxu1  ;;  %6741 = vmatprep.subr.bf16.mxu1 %v6320_v59  ;;  %v10108_v1 = vld [vmem:[%s11426_s25 + $0x150] ss:$408 sps:$4 sm:$0xff]   ;;  %v10119_v24 = vld [vmem:[%s11426_s25 + $0x48c] ss:$408 sps:$4 sm:$0xff]  }
 0x2ca   : > { %14388 = vst [vmem:[#allocation95_spill] sm:$0xff] %v12468_v2 }
 0x2cb   : > { %6691 = vmatpush1.bf16.msra.mxu0 %v6311_v25 }
 0x2cc   : > { %6742 = vmatpush1.bf16.msra.mxu1 %v6317_v37  ;;  %6784 = vmatprep.subr.bf16.mxu0 %v10110_v9  ;;  %v10122_v9 = vld [vmem:[%s11426_s25 + $0x7b4] ss:$408 sps:$4 sm:$0xff]  }
 0x2cd   : > { %6835 = vmatprep.subr.bf16.mxu1 %v10113_v8  ;;  %v12480_v36 = vpop.f32.mrb[76].mxu0 }
 0x2ce   : > { %v12482_v59 = vpop.f32.mrb[76].mxu1  ;;  %v12488_v25 = vpop.f32.mrb[77].mxu0  ;;  %9274 = vmatmul.mubr.msk.bf16.vlgmr.msra.gmra.mrb[160].mxu0 %vm2251_vm2, %v12408_v52 }
 0x2cf   : > { %14389 = vst [vmem:[#allocation96_spill] sm:$0xff] %v12482_v59  ;;  %14390 = vst [vmem:[#allocation97_spill] sm:$0xff] %v12488_v25  ;;  %v12490_v37 = vpop.f32.mrb[77].mxu1  ;;  %9276 = vmatmul.mubr.msk.bf16.vlgmr.msra.gmra.mrb[160].mxu1 %vm2251_vm2, %v12408_v52  ;;  %6785 = vmatpush1.bf16.msra.mxu0 %v10108_v1  ;;  %v4418_v5 = vpop.f32.mrb[78].mxu0  ;;  %v10114_v59 = vld [vmem:[%s11426_s25 + $0x480] ss:$408 sps:$4 sm:$0xff]  }
 0x2d0   : > { %14391 = vst [vmem:[#allocation98_spill] sm:$0xff] %v12490_v37  ;;  %6836 = vmatpush1.bf16.msra.mxu1 %v10111_v30  ;;  %v4469_v62 = vpop.f32.mrb[78].mxu1  ;;  %v4419_v2 = vpop.f32.mrb[79].mxu0  ;;  %6786 = vmatprep.subr.bf16.mxu0 %v10116_v57  ;;  %v10120_v30 = vld [vmem:[%s11426_s25 + $0x7b0] ss:$408 sps:$4 sm:$0xff]  }
 0x2d1   : > { %6837 = vmatprep.subr.bf16.mxu1 %v10119_v24  ;;  %v4470_v39 = vpop.f32.mrb[79].mxu1  ;;  %6724 = vmatprep.mubr.bf16.mxu0 %v14337_v13  ;;  %v10123_v1 = vld [vmem:[%s11426_s25 + $0x7b8] ss:$408 sps:$4 sm:$0xff]   ;;  %v10128_v2 = vld [vmem:[%s11426_s25 + $0xae4] ss:$408 sps:$4 sm:$0xff]  }
 0x2d2   : > { %6775 = vmatprep.mubr.bf16.mxu1 %v14337_v13  ;;  %v10131_v62 = vld [vmem:[%s11426_s25 + $0xaec] ss:$408 sps:$4 sm:$0xff]   ;;  %v10137_v39 = vld [vmem:[%s11426_s25 + $0xe1c] ss:$408 sps:$4 sm:$0x3f]  }
 0x2d3   : > { %6787 = vmatpush1.bf16.msra.mxu0 %v10114_v59  ;;  %v10134_v24 = vld [vmem:[%s11426_s25 + $0xe14] ss:$408 sps:$4 sm:$0x3f]   ;;  %v12515_v57 = vld [vmem:[%s14126_s1 + $0x8] ss:$0 sps:$4 sm:$0xff]   ;;  %v6332_v8 = vand.u32 %v10137_v39, %v11449_v17 }
 0x2d4   : > { %6838 = vmatpush1.bf16.msra.mxu1 %v10117_v46  ;;  %6788 = vmatprep.subr.bf16.mxu0 %v10122_v9  ;;  %v10126_v46 = vld [vmem:[%s11426_s25 + $0xae0] ss:$408 sps:$4 sm:$0xff]   ;;  %v10132_v5 = vld [vmem:[%s11426_s25 + $0xe10] ss:$408 sps:$4 sm:$0x3f]  }
 0x2d5   : > { %6839 = vmatprep.subr.bf16.mxu1 %v10125_v33  ;;  %v10129_v59 = vld [vmem:[%s11426_s25 + $0xae8] ss:$408 sps:$4 sm:$0xff]   ;;  %v10135_v9 = vld [vmem:[%s11426_s25 + $0xe18] ss:$408 sps:$4 sm:$0x3f]   ;;  %v6326_v33 = vand.u32 %v10134_v24, %v11449_v17  ;;  %v6323_v24 = vand.u32 %v10132_v5, %v11449_v17 }
 0x2d6   : > { %9275 = vmatmul.mubr.msk.bf16.gmra.mrb[164].mxu0 %vm2251_vm2, %v12515_v57  ;;  %v10146_v5 = vld [vmem:[%s11426_s25 + $0x494] ss:$408 sps:$4 sm:$0xff]  }
 0x2d7   : > { %9277 = vmatmul.mubr.msk.bf16.gmra.mrb[164].mxu1 %vm2251_vm2, %v12515_v57  ;;  %6789 = vmatpush1.bf16.msra.mxu0 %v10120_v30 }
 0x2d8   : > { %6840 = vmatpush1.bf16.msra.mxu1 %v10123_v1  ;;  %6790 = vmatprep.subr.bf16.mxu0 %v10128_v2  ;;  %v6329_v1 = vand.u32 %v10135_v9, %v11449_v17 }
 0x2d9   : > { %6841 = vmatprep.subr.bf16.mxu1 %v10131_v62  ;;  %v12527_v37 = vpop.f32.mrb[80].mxu0  ;;  %6816 = vmatprep.mubr.bf16.mxu0 %v14337_v13 }
 0x2da   : > { %v12529_v48 = vpop.f32.mrb[80].mxu1  ;;  %6867 = vmatprep.mubr.bf16.mxu1 %v14337_v13  ;;  %v12537_v2 = vpop.f32.mrb[81].mxu0 }
 0x2db   : > { %14392 = vst [vmem:[#allocation99_spill] sm:$0xff] %v12529_v48  ;;  %v12539_v62 = vpop.f32.mrb[81].mxu1  ;;  %v12546_v25 = vpop.f32.mrb[82].mxu0  ;;  %6791 = vmatpush1.bf16.msra.mxu0 %v10126_v46  ;;  %v10143_v46 = vld [vmem:[%s11426_s25 + $0x16c] ss:$408 sps:$4 sm:$0xff]  }
 0x2dc   : > { %14393 = vst [vmem:[#allocation100_spill] sm:$0xff] %v12539_v62  ;;  %v12548_v30 = vpop.f32.mrb[82].mxu1  ;;  %6842 = vmatpush1.bf16.msra.mxu1 %v10129_v59  ;;  %v12555_v39 = vpop.f32.mrb[83].mxu0  ;;  %6792 = vmatprep.subr.bf16.mxu0 %v6326_v33  ;;  %v10140_v62 = vld [vmem:[%s11426_s25 + $0x164] ss:$408 sps:$4 sm:$0xff]  }
 0x2dd   : > { %14394 = vst [vmem:[#allocation101_spill] sm:$0xff] %v12548_v30  ;;  %v12557_v27 = vpop.f32.mrb[83].mxu1  ;;  %6843 = vmatprep.subr.bf16.mxu1 %v6332_v8  ;;  %v10138_v48 = vld [vmem:[%s11426_s25 + $0x160] ss:$408 sps:$4 sm:$0xff]   ;;  %v10149_v30 = vld [vmem:[%s11426_s25 + $0x49c] ss:$408 sps:$4 sm:$0xff]  }
 0x2de   : > { %14395 = vst [vmem:[#allocation102_spill] sm:$0xff] %v12557_v27 }
 0x2df   : > { %6793 = vmatpush1.bf16.msra.mxu0 %v6323_v24 }
 0x2e0   : > { %6844 = vmatpush1.bf16.msra.mxu1 %v6329_v1  ;;  %6886 = vmatprep.subr.bf16.mxu0 %v10140_v62  ;;  %v10152_v62 = vld [vmem:[%s11426_s25 + $0x7c4] ss:$408 sps:$4 sm:$0xff]  }
 0x2e1   : > { %6937 = vmatprep.subr.bf16.mxu1 %v10143_v46  ;;  %v12569_v33 = vpop.f32.mrb[84].mxu0  ;;  %v10165_v46 = vld [vmem:[%s11426_s25 + $0xe28] ss:$408 sps:$4 sm:$0x3f]  }
 0x2e2   : > { %v12571_v8 = vpop.f32.mrb[84].mxu1  ;;  %v12577_v24 = vpop.f32.mrb[85].mxu0  ;;  %9278 = vmatmul.mubr.msk.bf16.vlgmr.msra.gmra.mrb[168].mxu0 %vm2251_vm2, %v12408_v52 }
 0x2e3   : > { %14396 = vst [vmem:[#allocation103_spill] sm:$0xff] %v12571_v8  ;;  %v12579_v1 = vpop.f32.mrb[85].mxu1  ;;  %9280 = vmatmul.mubr.msk.bf16.vlgmr.msra.gmra.mrb[168].mxu1 %vm2251_vm2, %v12408_v52  ;;  %6887 = vmatpush1.bf16.msra.mxu0 %v10138_v48  ;;  %v4520_v9 = vpop.f32.mrb[86].mxu0  ;;  %v10144_v8 = vld [vmem:[%s11426_s25 + $0x490] ss:$408 sps:$4 sm:$0xff]  }
 0x2e4   : > { %14397 = vst [vmem:[#allocation104_spill] sm:$0xff] %v12579_v1  ;;  %6938 = vmatpush1.bf16.msra.mxu1 %v10141_v31  ;;  %v4571_v59 = vpop.f32.mrb[86].mxu1  ;;  %v4521_v27 = vpop.f32.mrb[87].mxu0  ;;  %6888 = vmatprep.subr.bf16.mxu0 %v10146_v5  ;;  %v10150_v48 = vld [vmem:[%s11426_s25 + $0x7c0] ss:$408 sps:$4 sm:$0xff]  }
 0x2e5   : > { %6939 = vmatprep.subr.bf16.mxu1 %v10149_v30  ;;  %v4572_v26 = vpop.f32.mrb[87].mxu1  ;;  %6826 = vmatprep.mubr.bf16.mxu0 %v14337_v13  ;;  %v10153_v31 = vld [vmem:[%s11426_s25 + $0x7c8] ss:$408 sps:$4 sm:$0xff]   ;;  %v10158_v27 = vld [vmem:[%s11426_s25 + $0xaf4] ss:$408 sps:$4 sm:$0xff]  }
 0x2e6   : > { %6877 = vmatprep.mubr.bf16.mxu1 %v14337_v13  ;;  %v10161_v59 = vld [vmem:[%s11426_s25 + $0xafc] ss:$408 sps:$4 sm:$0xff]   ;;  %v10167_v26 = vld [vmem:[%s11426_s25 + $0xe2c] ss:$408 sps:$4 sm:$0x3f]  }
 0x2e7   : > { %6889 = vmatpush1.bf16.msra.mxu0 %v10144_v8  ;;  %v10164_v30 = vld [vmem:[%s11426_s25 + $0xe24] ss:$408 sps:$4 sm:$0x3f]   ;;  %v10156_v5 = vld [vmem:[%s11426_s25 + $0xaf0] ss:$408 sps:$4 sm:$0xff]  }
 0x2e8   : > { %6940 = vmatpush1.bf16.msra.mxu1 %v10147_v44  ;;  %6890 = vmatprep.subr.bf16.mxu0 %v10152_v62  ;;  %v10162_v9 = vld [vmem:[%s11426_s25 + $0xe20] ss:$408 sps:$4 sm:$0x3f]   ;;  %v6338_v44 = vand.u32 %v10164_v30, %v11449_v17 }
 0x2e9   : > { %6941 = vmatprep.subr.bf16.mxu1 %v10155_v21  ;;  %v10159_v8 = vld [vmem:[%s11426_s25 + $0xaf8] ss:$408 sps:$4 sm:$0xff]   ;;  %v6344_v21 = vand.u32 %v10167_v26, %v11449_v17  ;;  %v6335_v30 = vand.u32 %v10162_v9, %v11449_v17  ;;  %v10176_v9 = vld [vmem:[%s11426_s25 + $0x4a4] ss:$408 sps:$4 sm:$0xff]  }
 0x2ea   : > { %9279 = vmatmul.mubr.msk.bf16.gmra.mrb[172].mxu0 %vm2251_vm2, %v12515_v57 }
 0x2eb   : > { %9281 = vmatmul.mubr.msk.bf16.gmra.mrb[172].mxu1 %vm2251_vm2, %v12515_v57  ;;  %6891 = vmatpush1.bf16.msra.mxu0 %v10150_v48 }
 0x2ec   : > { %6942 = vmatpush1.bf16.msra.mxu1 %v10153_v31  ;;  %6892 = vmatprep.subr.bf16.mxu0 %v10158_v27  ;;  %v6341_v31 = vand.u32 %v10165_v46, %v11449_v17 }
 0x2ed   : > { %6943 = vmatprep.subr.bf16.mxu1 %v10161_v59  ;;  %v12611_v62 = vpop.f32.mrb[88].mxu0  ;;  %6918 = vmatprep.mubr.bf16.mxu0 %v14337_v13 }
 0x2ee   : > { %v12613_v1 = vpop.f32.mrb[88].mxu1  ;;  %6969 = vmatprep.mubr.bf16.mxu1 %v14337_v13  ;;  %v12621_v27 = vpop.f32.mrb[89].mxu0 }
 0x2ef   : > { %14398 = vst [vmem:[#allocation105_spill] sm:$0xff] %v12613_v1  ;;  %v12623_v59 = vpop.f32.mrb[89].mxu1  ;;  %v12630_v16 = vpop.f32.mrb[90].mxu0  ;;  %6893 = vmatpush1.bf16.msra.mxu0 %v10156_v5  ;;  %v10173_v5 = vld [vmem:[%s11426_s25 + $0x17c] ss:$408 sps:$4 sm:$0xff]  }
 0x2f0   : > { %14399 = vst [vmem:[#allocation106_spill] sm:$0xff] %v12623_v59  ;;  %v12632_v48 = vpop.f32.mrb[90].mxu1  ;;  %6944 = vmatpush1.bf16.msra.mxu1 %v10159_v8  ;;  %v12639_v26 = vpop.f32.mrb[91].mxu0  ;;  %6894 = vmatprep.subr.bf16.mxu0 %v6338_v44  ;;  %v10170_v59 = vld [vmem:[%s11426_s25 + $0x174] ss:$408 sps:$4 sm:$0xff]  }
 0x2f1   : > { %14400 = vst [vmem:[#allocation107_spill] sm:$0xff] %v12632_v48  ;;  %v12641_v58 = vpop.f32.mrb[91].mxu1  ;;  %6945 = vmatprep.subr.bf16.mxu1 %v6344_v21  ;;  %v10168_v1 = vld [vmem:[%s11426_s25 + $0x170] ss:$408 sps:$4 sm:$0xff]   ;;  %v10179_v48 = vld [vmem:[%s11426_s25 + $0x4ac] ss:$408 sps:$4 sm:$0xff]  }
 0x2f2   : > { %14401 = vst [vmem:[#allocation108_spill] sm:$0xff] %v12641_v58 }
 0x2f3   : > { %6895 = vmatpush1.bf16.msra.mxu0 %v6335_v30 }
 0x2f4   : > { %6946 = vmatpush1.bf16.msra.mxu1 %v6341_v31  ;;  %6988 = vmatprep.subr.bf16.mxu0 %v10170_v59  ;;  %v10182_v59 = vld [vmem:[%s11426_s25 + $0x7d4] ss:$408 sps:$4 sm:$0xff]  }
 0x2f5   : > { %7039 = vmatprep.subr.bf16.mxu1 %v10173_v5  ;;  %v12653_v44 = vpop.f32.mrb[92].mxu0  ;;  %v10195_v5 = vld [vmem:[%s11426_s25 + $0xe38] ss:$408 sps:$4 sm:$0x3f]  }
 0x2f6   : > { %v12655_v21 = vpop.f32.mrb[92].mxu1  ;;  %v12661_v30 = vpop.f32.mrb[93].mxu0  ;;  %9282 = vmatmul.mubr.msk.bf16.vlgmr.msra.gmra.mrb[176].mxu0 %vm2251_vm2, %v12408_v52 }
 0x2f7   : > { %14402 = vst [vmem:[#allocation109_spill] sm:$0xff] %v12655_v21  ;;  %14403 = vst [vmem:[#allocation110_spill] sm:$0xff] %v12661_v30  ;;  %v12663_v31 = vpop.f32.mrb[93].mxu1  ;;  %9284 = vmatmul.mubr.msk.bf16.vlgmr.msra.gmra.mrb[176].mxu1 %vm2251_vm2, %v12408_v52  ;;  %6989 = vmatpush1.bf16.msra.mxu0 %v10168_v1  ;;  %v4622_v46 = vpop.f32.mrb[94].mxu0  ;;  %v10174_v21 = vld [vmem:[%s11426_s25 + $0x4a0] ss:$408 sps:$4 sm:$0xff]  }
 0x2f8   : > { %14404 = vst [vmem:[#allocation111_spill] sm:$0xff] %v12663_v31  ;;  %7040 = vmatpush1.bf16.msra.mxu1 %v10171_v42  ;;  %v4673_v8 = vpop.f32.mrb[94].mxu1  ;;  %v4623_v58 = vpop.f32.mrb[95].mxu0  ;;  %6990 = vmatprep.subr.bf16.mxu0 %v10176_v9  ;;  %v10180_v42 = vld [vmem:[%s11426_s25 + $0x7d0] ss:$408 sps:$4 sm:$0xff]  }
 0x2f9   : > { %7041 = vmatprep.subr.bf16.mxu1 %v10179_v48  ;;  %v4674_v28 = vpop.f32.mrb[95].mxu1  ;;  %6928 = vmatprep.mubr.bf16.mxu0 %v14337_v13  ;;  %v10183_v1 = vld [vmem:[%s11426_s25 + $0x7d8] ss:$408 sps:$4 sm:$0xff]   ;;  %v10188_v58 = vld [vmem:[%s11426_s25 + $0xb04] ss:$408 sps:$4 sm:$0xff]  }
 0x2fa   : > { %6979 = vmatprep.mubr.bf16.mxu1 %v14337_v13  ;;  %v10191_v8 = vld [vmem:[%s11426_s25 + $0xb0c] ss:$408 sps:$4 sm:$0xff]   ;;  %v10197_v28 = vld [vmem:[%s11426_s25 + $0xe3c] ss:$408 sps:$4 sm:$0x3f]  }
 0x2fb   : > { %6991 = vmatpush1.bf16.msra.mxu0 %v10174_v21  ;;  %v10194_v48 = vld [vmem:[%s11426_s25 + $0xe34] ss:$408 sps:$4 sm:$0x3f]   ;;  %v10186_v9 = vld [vmem:[%s11426_s25 + $0xb00] ss:$408 sps:$4 sm:$0xff]  }
 0x2fc   : > { %7042 = vmatpush1.bf16.msra.mxu1 %v10177_v11  ;;  %6992 = vmatprep.subr.bf16.mxu0 %v10182_v59  ;;  %v10192_v46 = vld [vmem:[%s11426_s25 + $0xe30] ss:$408 sps:$4 sm:$0x3f]   ;;  %v6350_v11 = vand.u32 %v10194_v48, %v11449_v17 }
 0x2fd   : > { %7043 = vmatprep.subr.bf16.mxu1 %v10185_v56  ;;  %v10189_v21 = vld [vmem:[%s11426_s25 + $0xb08] ss:$408 sps:$4 sm:$0xff]   ;;  %v6356_v56 = vand.u32 %v10197_v28, %v11449_v17  ;;  %v6347_v48 = vand.u32 %v10192_v46, %v11449_v17  ;;  %v10206_v28 = vld [vmem:[%s11426_s25 + $0x4b4] ss:$408 sps:$4 sm:$0xff]  }
 0x2fe   : > { %9283 = vmatmul.mubr.msk.bf16.gmra.mrb[180].mxu0 %vm2251_vm2, %v12515_v57 }
 0x2ff   : > { %9285 = vmatmul.mubr.msk.bf16.gmra.mrb[180].mxu1 %vm2251_vm2, %v12515_v57  ;;  %6993 = vmatpush1.bf16.msra.mxu0 %v10180_v42 }
 0x300   : > { %7044 = vmatpush1.bf16.msra.mxu1 %v10183_v1  ;;  %6994 = vmatprep.subr.bf16.mxu0 %v10188_v58  ;;  %v6353_v1 = vand.u32 %v10195_v5, %v11449_v17  ;;  %v10207_v5 = vld [vmem:[%s11426_s25 + $0x4b8] ss:$408 sps:$4 sm:$0xff]  }
 0x301   : > { %7045 = vmatprep.subr.bf16.mxu1 %v10191_v8  ;;  %v12695_v59 = vpop.f32.mrb[96].mxu0  ;;  %7020 = vmatprep.mubr.bf16.mxu0 %v14337_v13 }
 0x302   : > { %14405 = vst [vmem:[#allocation112_spill] sm:$0xff] %v12695_v59  ;;  %v12697_v31 = vpop.f32.mrb[96].mxu1  ;;  %7071 = vmatprep.mubr.bf16.mxu1 %v14337_v13  ;;  %v12705_v58 = vpop.f32.mrb[97].mxu0 }
 0x303   : > { %14406 = vst [vmem:[#allocation113_spill] sm:$0xff] %v12697_v31  ;;  %14407 = vst [vmem:[#allocation114_spill] sm:$0xff] %v12705_v58  ;;  %v12707_v8 = vpop.f32.mrb[97].mxu1  ;;  %v12714_v30 = vpop.f32.mrb[98].mxu0  ;;  %6995 = vmatpush1.bf16.msra.mxu0 %v10186_v9  ;;  %v10203_v9 = vld [vmem:[%s11426_s25 + $0x18c] ss:$408 sps:$4 sm:$0xff]  }
 0x304   : > { %14408 = vst [vmem:[#allocation115_spill] sm:$0xff] %v12707_v8  ;;  %14410 = vst [vmem:[#allocation116_spill] sm:$0xff] %v12714_v30  ;;  %v12716_v42 = vpop.f32.mrb[98].mxu1  ;;  %7046 = vmatpush1.bf16.msra.mxu1 %v10189_v21  ;;  %v12723_v58 = vpop.f32.mrb[99].mxu0  ;;  %6996 = vmatprep.subr.bf16.mxu0 %v6350_v11  ;;  %v10200_v8 = vld [vmem:[%s11426_s25 + $0x184] ss:$408 sps:$4 sm:$0xff]  }
 0x305   : > { %14411 = vst [vmem:[#allocation117_spill] sm:$0xff] %v12716_v42  ;;  %14414 = vst [vmem:[#allocation118_spill] sm:$0xff] %v12723_v58  ;;  %v12725_v38 = vpop.f32.mrb[99].mxu1  ;;  %7047 = vmatprep.subr.bf16.mxu1 %v6356_v56  ;;  %v10201_v30 = vld [vmem:[%s11426_s25 + $0x188] ss:$408 sps:$4 sm:$0xff]  }
 0x306   : > { %14415 = vst [vmem:[#allocation119_spill] sm:$0xff] %v12725_v38  ;;  %v10209_v42 = vld [vmem:[%s11426_s25 + $0x4bc] ss:$408 sps:$4 sm:$0xff]   ;;  %v10204_v58 = vld [vmem:[%s11426_s25 + $0x4b0] ss:$408 sps:$4 sm:$0xff]  }
 0x307   : > { %6997 = vmatpush1.bf16.msra.mxu0 %v6347_v48  ;;  %v10225_v38 = vld [vmem:[%s11426_s25 + $0xe48] ss:$408 sps:$4 sm:$0x3f]   ;;  %v10230_v31 = vld [vmem:[%s11426_s25 + $0x194] ss:$408 sps:$4 sm:$0xff]  }
 0x308   : > { %7048 = vmatpush1.bf16.msra.mxu1 %v6353_v1  ;;  %7090 = vmatprep.subr.bf16.mxu0 %v10200_v8 }
 0x309   : > { %7141 = vmatprep.subr.bf16.mxu1 %v10203_v9  ;;  %v12737_v11 = vpop.f32.mrb[100].mxu0  ;;  %v10212_v9 = vld [vmem:[%s11426_s25 + $0x7e4] ss:$408 sps:$4 sm:$0xff]  }
 0x30a   : > { %14418 = vst [vmem:[#allocation120_spill] sm:$0xff] %v12737_v11  ;;  %v12739_v56 = vpop.f32.mrb[100].mxu1  ;;  %v12745_v48 = vpop.f32.mrb[101].mxu0  ;;  %9286 = vmatmul.mubr.msk.bf16.vlgmr.msra.gmra.mrb[184].mxu0 %vm2251_vm2, %v12408_v52 }
 0x30b   : > { %14419 = vst [vmem:[#allocation121_spill] sm:$0xff] %v12739_v56  ;;  %14422 = vst [vmem:[#allocation122_spill] sm:$0xff] %v12745_v48  ;;  %v12747_v1 = vpop.f32.mrb[101].mxu1  ;;  %9288 = vmatmul.mubr.msk.bf16.vlgmr.msra.gmra.mrb[184].mxu1 %vm2251_vm2, %v12408_v52  ;;  %7091 = vmatpush1.bf16.msra.mxu0 %v10198_v4  ;;  %v4724_v43 = vpop.f32.mrb[102].mxu0  ;;  %v10215_v48 = vld [vmem:[%s11426_s25 + $0x7ec] ss:$408 sps:$4 sm:$0xff]  }
 0x30c   : > { %14423 = vst [vmem:[#allocation123_spill] sm:$0xff] %v12747_v1  ;;  %7142 = vmatpush1.bf16.msra.mxu1 %v10201_v30  ;;  %v4775_v56 = vpop.f32.mrb[102].mxu1  ;;  %v4725_v11 = vpop.f32.mrb[103].mxu0  ;;  %7092 = vmatprep.subr.bf16.mxu0 %v10206_v28  ;;  %v10210_v43 = vld [vmem:[%s11426_s25 + $0x7e0] ss:$408 sps:$4 sm:$0xff]  }
 0x30d   : > { %7143 = vmatprep.subr.bf16.mxu1 %v10209_v42  ;;  %v4776_v46 = vpop.f32.mrb[103].mxu1  ;;  %7030 = vmatprep.mubr.bf16.mxu0 %v14337_v13  ;;  %v10213_v4 = vld [vmem:[%s11426_s25 + $0x7e8] ss:$408 sps:$4 sm:$0xff]   ;;  %v10218_v30 = vld [vmem:[%s11426_s25 + $0xb14] ss:$408 sps:$4 sm:$0xff]  }
 0x30e   : > { %7081 = vmatprep.mubr.bf16.mxu1 %v14337_v13  ;;  %v10221_v11 = vld [vmem:[%s11426_s25 + $0xb1c] ss:$408 sps:$4 sm:$0xff]   ;;  %v10227_v28 = vld [vmem:[%s11426_s25 + $0xe4c] ss:$408 sps:$4 sm:$0x3f]  }
 0x30f   : > { %7093 = vmatpush1.bf16.msra.mxu0 %v10204_v58  ;;  %v10224_v42 = vld [vmem:[%s11426_s25 + $0xe44] ss:$408 sps:$4 sm:$0x3f]   ;;  %v10216_v46 = vld [vmem:[%s11426_s25 + $0xb10] ss:$408 sps:$4 sm:$0xff]  }
 0x310   : > { %7144 = vmatpush1.bf16.msra.mxu1 %v10207_v5  ;;  %7094 = vmatprep.subr.bf16.mxu0 %v10212_v9  ;;  %v10222_v56 = vld [vmem:[%s11426_s25 + $0xe40] ss:$408 sps:$4 sm:$0x3f]   ;;  %v6362_v5 = vand.u32 %v10224_v42, %v11449_v17 }
 0x311   : > { %7145 = vmatprep.subr.bf16.mxu1 %v10215_v48  ;;  %v10219_v58 = vld [vmem:[%s11426_s25 + $0xb18] ss:$408 sps:$4 sm:$0xff]   ;;  %v6368_v48 = vand.u32 %v10227_v28, %v11449_v17  ;;  %v6359_v42 = vand.u32 %v10222_v56, %v11449_v17 }
 0x312   : > { %9287 = vmatmul.mubr.msk.bf16.gmra.mrb[188].mxu0 %vm2251_vm2, %v12515_v57  ;;  %v14431_v28 = vld [vmem:[#allocation36_spill] sm:$0xff] }
 0x313   : > { %9289 = vmatmul.mubr.msk.bf16.gmra.mrb[188].mxu1 %vm2251_vm2, %v12515_v57  ;;  %7095 = vmatpush1.bf16.msra.mxu0 %v10210_v43  ;;  %v10231_v56 = vld [vmem:[%s11426_s25 + $0x4c0] ss:$408 sps:$4 sm:$0xff]  }
 0x314   : > { %7146 = vmatpush1.bf16.msra.mxu1 %v10213_v4  ;;  %7096 = vmatprep.subr.bf16.mxu0 %v10218_v30  ;;  %v6365_v4 = vand.u32 %v10225_v38, %v11449_v17  ;;  %v10228_v38 = vld [vmem:[%s11426_s25 + $0x190] ss:$408 sps:$4 sm:$0xff]  }
 0x315   : > { %7147 = vmatprep.subr.bf16.mxu1 %v10221_v11  ;;  %v12779_v9 = vpop.f32.mrb[104].mxu0  ;;  %7122 = vmatprep.mubr.bf16.mxu0 %v14337_v13 }
 0x316   : > { %14426 = vst [vmem:[#allocation124_spill] sm:$0xff] %v12779_v9  ;;  %v12781_v1 = vpop.f32.mrb[104].mxu1  ;;  %7173 = vmatprep.mubr.bf16.mxu1 %v14337_v13  ;;  %v12789_v30 = vpop.f32.mrb[105].mxu0  ;;  %v10233_v9 = vld [vmem:[%s11426_s25 + $0x4c4] ss:$408 sps:$4 sm:$0xff]  }
 0x317   : > { %14427 = vst [vmem:[#allocation125_spill] sm:$0xff] %v12781_v1  ;;  %14429 = vst [vmem:[#allocation34_spill] sm:$0xff] %v12789_v30  ;;  %v12791_v11 = vpop.f32.mrb[105].mxu1  ;;  %v12798_v59 = vpop.f32.mrb[106].mxu0  ;;  %7097 = vmatpush1.bf16.msra.mxu0 %v10216_v46  ;;  %v14435_v1 = vld [vmem:[#allocation38_spill] sm:$0xff] }
 0x318   : > { %14430 = vst [vmem:[#allocation126_spill] sm:$0xff] %v12791_v11  ;;  %14433 = vst [vmem:[#allocation36_spill] sm:$0xff] %v12798_v59  ;;  %v12800_v43 = vpop.f32.mrb[106].mxu1  ;;  %7148 = vmatpush1.bf16.msra.mxu1 %v10219_v58  ;;  %v12807_v8 = vpop.f32.mrb[107].mxu0  ;;  %7098 = vmatprep.subr.bf16.mxu0 %v6362_v5 }
 0x319   : > { %14434 = vst [vmem:[#allocation127_spill] sm:$0xff] %v12800_v43  ;;  %14437 = vst [vmem:[#allocation38_spill] sm:$0xff] %v12807_v8  ;;  %v12809_v30 = vpop.f32.mrb[107].mxu1  ;;  %7149 = vmatprep.subr.bf16.mxu1 %v6368_v48  ;;  %v10234_v48 = vld [vmem:[%s11426_s25 + $0x7f0] ss:$408 sps:$4 sm:$0xff]  }
 0x31a   : > { %14438 = vst [vmem:[#allocation128_spill] sm:$0xff] %v12809_v30 }
 0x31b   : > { %7099 = vmatpush1.bf16.msra.mxu0 %v6359_v42 }
 0x31c   : > { %7150 = vmatpush1.bf16.msra.mxu1 %v6365_v4  ;;  %7192 = vmatprep.subr.bf16.mxu0 %v10230_v31 }
 0x31d   : > { %9403 = vmatprep.subr.bf16.mxu1 %v10230_v31  ;;  %v12818_v12 = vpop.f32.mrb[108].mxu0 }
 0x31e   : > { %14441 = vst [vmem:[#allocation129_spill] sm:$0xff] %v12818_v12  ;;  %v12820_v43 = vpop.f32.mrb[108].mxu1  ;;  %v12826_v8 = vpop.f32.mrb[109].mxu0  ;;  %9290 = vmatmul.mubr.msk.bf16.vlgmr.msra.gmra.mrb[192].mxu0 %vm2251_vm2, %v12408_v52  ;;  %v10236_v12 = vld [vmem:[%s11426_s25 + $0x7f4] ss:$408 sps:$4 sm:$0xff]  }
 0x31f   : > { %14442 = vst [vmem:[#allocation130_spill] sm:$0xff] %v12820_v43  ;;  %14445 = vst [vmem:[#allocation131_spill] sm:$0xff] %v12826_v8  ;;  %v12828_v42 = vpop.f32.mrb[109].mxu1  ;;  %9292 = vmatmul.mubr.msk.bf16.vlgmr.msra.gmra.mrb[192].mxu1 %vm2251_vm2, %v12408_v52  ;;  %7193 = vmatpush1.bf16.msra.mxu0 %v10228_v38  ;;  %v4826_v46 = vpop.f32.mrb[110].mxu0 }
 0x320   : > { %14446 = vst [vmem:[#allocation132_spill] sm:$0xff] %v12828_v42  ;;  %9408 = vmatpush1.bf16.msra.mxu1 %v10228_v38  ;;  %v4877_v43 = vpop.f32.mrb[110].mxu1  ;;  %v4827_v30 = vpop.f32.mrb[111].mxu0  ;;  %7194 = vmatprep.subr.bf16.mxu0 %v10233_v9  ;;  %v10239_v46 = vld [vmem:[%s11426_s25 + $0xb24] ss:$408 sps:$4 sm:$0xff]  }
 0x321   : > { %9404 = vmatprep.subr.bf16.mxu1 %v10233_v9  ;;  %v4878_v58 = vpop.f32.mrb[111].mxu1  ;;  %7132 = vmatprep.mubr.bf16.mxu0 %v14337_v13  ;;  %v10242_v38 = vld [vmem:[%s11426_s25 + $0xe54] ss:$408 sps:$4 sm:$0x3f]   ;;  %v10237_v9 = vld [vmem:[%s11426_s25 + $0xb20] ss:$408 sps:$4 sm:$0xff]  }
 0x322   : > { %7183 = vmatprep.mubr.bf16.mxu1 %v14337_v13  ;;  %v10240_v43 = vld [vmem:[%s11426_s25 + $0xe50] ss:$408 sps:$4 sm:$0x3f]   ;;  %v6374_v30 = vand.u32 %v10242_v38, %v11449_v17 }
 0x323   : > { %7195 = vmatpush1.bf16.msra.mxu0 %v10231_v56 }
 0x324   : > { %9409 = vmatpush1.bf16.msra.mxu1 %v10231_v56  ;;  %7196 = vmatprep.subr.bf16.mxu0 %v10236_v12 }
 0x325   : > { %9405 = vmatprep.subr.bf16.mxu1 %v10236_v12  ;;  %v14451_v12 = vld [vmem:[#allocation46_spill] sm:$0xff] }
 0x326   : > { %9291 = vmatmul.mubr.msk.bf16.gmra.mrb[196].mxu0 %vm2251_vm2, %v12515_v57 }
 0x327   : > { %9293 = vmatmul.mubr.msk.bf16.gmra.mrb[196].mxu1 %vm2251_vm2, %v12515_v57  ;;  %7197 = vmatpush1.bf16.msra.mxu0 %v10234_v48 }
 0x328   : > { %9410 = vmatpush1.bf16.msra.mxu1 %v10234_v48  ;;  %7198 = vmatprep.subr.bf16.mxu0 %v10239_v46  ;;  %v14458_v48 = vld [vmem:[#allocation50_spill] sm:$0xff] }
 0x329   : > { %9406 = vmatprep.subr.bf16.mxu1 %v10239_v46  ;;  %v12852_v56 = vpop.f32.mrb[112].mxu0  ;;  %7224 = vmatprep.mubr.bf16.mxu0 %v14337_v13  ;;  %v14454_v46 = vld [vmem:[#allocation48_spill] sm:$0xff] }
 0x32a   : > { %14449 = vst [vmem:[#allocation133_spill] sm:$0xff] %v12852_v56  ;;  %v12854_v58 = vpop.f32.mrb[112].mxu1  ;;  %7234 = vmatprep.mubr.bf16.mxu1 %v14337_v13  ;;  %v12862_v21 = vpop.f32.mrb[113].mxu0  ;;  %v6371_v13 = vand.u32 %v10240_v43, %v11449_v17 }
 0x32b   : > { %14450 = vst [vmem:[#allocation134_spill] sm:$0xff] %v12854_v58  ;;  %v12864_v8 = vpop.f32.mrb[113].mxu1  ;;  %v12870_v11 = vpop.f32.mrb[114].mxu0  ;;  %7199 = vmatpush1.bf16.msra.mxu0 %v10237_v9 }
 0x32c   : > { %14453 = vst [vmem:[#allocation46_spill] sm:$0xff] %v12864_v8  ;;  %14456 = vst [vmem:[#allocation48_spill] sm:$0xff] %v12870_v11  ;;  %v12872_v59 = vpop.f32.mrb[114].mxu1  ;;  %9411 = vmatpush1.bf16.msra.mxu1 %v10237_v9  ;;  %v12879_v56 = vpop.f32.mrb[115].mxu0  ;;  %7200 = vmatprep.subr.bf16.mxu0 %v6374_v30  ;;  %v14493_v8 = vld [vmem:[#allocation68_spill] sm:$0xff] }
 0x32d   : > { %14457 = vst [vmem:[#allocation135_spill] sm:$0xff] %v12872_v59  ;;  %14460 = vst [vmem:[#allocation50_spill] sm:$0xff] %v12879_v56  ;;  %v12881_v38 = vpop.f32.mrb[115].mxu1  ;;  %9407 = vmatprep.subr.bf16.mxu1 %v6374_v30 }
 0x32e   : > { %14461 = vst [vmem:[#allocation136_spill] sm:$0xff] %v12881_v38 }
 0x32f   : > { %7201 = vmatpush1.bf16.msra.mxu0 %v6371_v13 }
 0x330   : > { %9412 = vmatpush1.bf16.msra.mxu1 %v6371_v13 }
 0x331   : > { %v12887_v17 = vpop.f32.mrb[116].mxu0 }
 0x332   : > { %14464 = vst [vmem:[#allocation137_spill] sm:$0xff] %v12887_v17  ;;  %v12889_v43 = vpop.f32.mrb[116].mxu1  ;;  %v12895_v11 = vpop.f32.mrb[117].mxu0  ;;  %9294 = vmatmul.mubr.msk.bf16.vlgmr.msra.gmra.mrb[200].mxu0 %vm2251_vm2, %v12408_v52 }
 0x333   : > { %14465 = vst [vmem:[#allocation138_spill] sm:$0xff] %v12889_v43  ;;  %14468 = vst [vmem:[#allocation139_spill] sm:$0xff] %v12895_v11  ;;  %v12897_v30 = vpop.f32.mrb[117].mxu1  ;;  %9295 = vmatmul.mubr.msk.bf16.vlgmr.msra.gmra.mrb[200].mxu1 %vm2251_vm2, %v12515_v57  ;;  %v4928_v4 = vpop.f32.mrb[118].mxu0  ;;  %v14496_v57 = vld [vmem:[#allocation70_spill] sm:$0xff] }
 0x334   : > { %14469 = vst [vmem:[#allocation140_spill] sm:$0xff] %v12897_v30  ;;  %v4979_v31 = vpop.f32.mrb[118].mxu1  ;;  %v4929_v17 = vpop.f32.mrb[119].mxu0 }
 0x335   : > { %v4980_v58 = vpop.f32.mrb[119].mxu1 }
 0x33d   : > { %v12907_v43 = vpop.f32.mrb[120].mxu0 }
 0x33e   : > { %14472 = vst [vmem:[#allocation141_spill] sm:$0xff] %v12907_v43  ;;  %v12909_v59 = vpop.f32.mrb[120].mxu1  ;;  %v12915_v5 = vpop.f32.mrb[121].mxu0 }
 0x33f   : > { %14473 = vst [vmem:[#allocation142_spill] sm:$0xff] %v12909_v59  ;;  %14476 = vst [vmem:[#allocation143_spill] sm:$0xff] %v12915_v5  ;;  %v12917_v9 = vpop.f32.mrb[121].mxu1  ;;  %v12923_v17 = vpop.f32.mrb[122].mxu0 }
 0x340   : > { %14477 = vst [vmem:[#allocation144_spill] sm:$0xff] %v12917_v9  ;;  %14480 = vst [vmem:[#allocation145_spill] sm:$0xff] %v12923_v17  ;;  %v12925_v30 = vpop.f32.mrb[122].mxu1  ;;  %v12931_v59 = vpop.f32.mrb[123].mxu0 }
 0x341   : > { %14481 = vst [vmem:[#allocation146_spill] sm:$0xff] %v12925_v30  ;;  %14484 = vst [vmem:[#allocation147_spill] sm:$0xff] %v12931_v59  ;;  %v12933_v56 = vpop.f32.mrb[123].mxu1 }
 0x342   : > { %14485 = vst [vmem:[#allocation148_spill] sm:$0xff] %v12933_v56 }
 0x345   : > { %v12939_v9 = vpop.f32.mrb[124].mxu0 }
 0x346   : > { %14488 = vst [vmem:[#allocation149_spill] sm:$0xff] %v12939_v9  ;;  %v12941_v31 = vpop.f32.mrb[124].mxu1  ;;  %v12947_v30 = vpop.f32.mrb[125].mxu0 }
 0x347   : > { %14489 = vst [vmem:[#allocation150_spill] sm:$0xff] %v12941_v31  ;;  %v12949_v43 = vpop.f32.mrb[125].mxu1  ;;  %v5030_v56 = vpop.f32.mrb[126].mxu0  ;;  %v14512_v31 = vld [vmem:[#allocation4_spill] sm:$0xff] }
 0x348   : > { %14492 = vst [vmem:[#allocation151_spill] sm:$0xff] %v12949_v43  ;;  %v5081_v5 = vpop.f32.mrb[126].mxu1  ;;  %v5031_v42 = vpop.f32.mrb[127].mxu0 }
 0x349   : > { %v5082_v11 = vpop.f32.mrb[127].mxu1 }
 0x34a   : > { %v14518_v11 = vld [vmem:[#allocation84_spill] sm:$0xff] }
 0x351   : > { %v12955_v13 = vpop.f32.mrb[128].mxu0 }
 0x352   : > { %v12957_v52 = vpop.f32.mrb[128].mxu1  ;;  %v12963_v38 = vpop.f32.mrb[129].mxu0 }
 0x353   : > { %14495 = vst [vmem:[#allocation68_spill] sm:$0xff] %v12957_v52  ;;  %14498 = vst [vmem:[#allocation70_spill] sm:$0xff] %v12963_v38  ;;  %v12965_v4 = vpop.f32.mrb[129].mxu1  ;;  %v12971_v5 = vpop.f32.mrb[130].mxu0 }
 0x354   : > { %14499 = vst [vmem:[#allocation152_spill] sm:$0xff] %v12965_v4  ;;  %14501 = vst [vmem:[#allocation153_spill] sm:$0xff] %v12971_v5  ;;  %v12973_v42 = vpop.f32.mrb[130].mxu1  ;;  %v12979_v52 = vpop.f32.mrb[131].mxu0  ;;  %v14517_v5 = vld [vmem:[#allocation5_spill] sm:$0xff] }
 0x355   : > { %14502 = vst [vmem:[#allocation154_spill] sm:$0xff] %v12973_v42  ;;  %14504 = vst [vmem:[#allocation155_spill] sm:$0xff] %v12979_v52  ;;  %v12981_v17 = vpop.f32.mrb[131].mxu1 }
 0x356   : > { %14505 = vst [vmem:[#allocation156_spill] sm:$0xff] %v12981_v17 }
 0x359   : > { %v12987_v4 = vpop.f32.mrb[132].mxu0 }
 0x35a   : > { %14507 = vst [vmem:[#allocation157_spill] sm:$0xff] %v12987_v4  ;;  %v12989_v14 = vpop.f32.mrb[132].mxu1  ;;  %v12995_v42 = vpop.f32.mrb[133].mxu0  ;;  %v14513_v4 = vld [vmem:[#allocation82_spill] sm:$0xff] }
 0x35b   : > { %14508 = vst [vmem:[#allocation158_spill] sm:$0xff] %v12989_v14  ;;  %14510 = vst [vmem:[#allocation159_spill] sm:$0xff] %v12995_v42  ;;  %v12997_v0 = vpop.f32.mrb[133].mxu1  ;;  %v5132_v17 = vpop.f32.mrb[134].mxu0  ;;  %v14514_v38 = vmax.f32 %v14512_v31, %v14513_v4  ;;  %v14516_v14 = vmax.f32 %v11873_v51, %v12438_v63  ;;  %v14522_v31 = vld [vmem:[#allocation86_spill] sm:$0xff] }
 0x35c   : > { %v5183_v50 = vpop.f32.mrb[134].mxu1  ;;  %v5133_v52 = vpop.f32.mrb[135].mxu0  ;;  %v14519_v17 = vmax.f32 %v14517_v5, %v14518_v11  ;;  %v14525_v11 = vld [vmem:[#allocation7_spill] sm:$0xff]  ;;  %v14526_v5 = vld [vmem:[#allocation88_spill] sm:$0xff] }
 0x35d   : > { %v5184_v59 = vpop.f32.mrb[135].mxu1 }
 0x35e   : > { %v14520_v59 = vmax.f32 %v11879_v53, %v12448_v23  ;;  %v14528_v23 = vmax.f32 %v11890_v60, %v12466_v10  ;;  %v14539_v10 = vld [vmem:[#allocation97_spill] sm:$0xff] }
 0x365   : > { %v6410_v43 = vpop.f32.mrb[136].mxu0 }
 0x366   : > { %v6461_v58 = vpop.f32.mrb[136].mxu1  ;;  %v13006_v9 = vmax.f32 %v14514_v38, %v6410_v43  ;;  %v6412_v56 = vpop.f32.mrb[137].mxu0  ;;  %v14521_v43 = vld [vmem:[#allocation6_spill] sm:$0xff] }
 0x367   : > { %v13011_v54 = vmax.f32 %v14516_v14, %v6461_v58  ;;  %v6463_v42 = vpop.f32.mrb[137].mxu1  ;;  %v13016_v50 = vmax.f32 %v14519_v17, %v6412_v56  ;;  %v6414_v4 = vpop.f32.mrb[138].mxu0  ;;  %v14524_v14 = vmax.f32 %v11883_v55, %v12457_v6  ;;  %v14527_v17 = vmax.f32 %v14525_v11, %v14526_v5  ;;  %v14535_v11 = vld [vmem:[#allocation9_spill] sm:$0xff]  ;;  %v14536_v5 = vld [vmem:[#allocation91_spill] sm:$0xff] }
 0x368   : > { %14515 = vst [vmem:[#allocation4_spill] sm:$0xff] %v13006_v9  ;;  %v13021_v52 = vmax.f32 %v14520_v59, %v6463_v42  ;;  %v6465_v38 = vpop.f32.mrb[138].mxu1  ;;  %v14523_v9 = vmax.f32 %v14521_v43, %v14522_v31  ;;  %v6416_v58 = vpop.f32.mrb[139].mxu0  ;;  %v14530_v43 = vld [vmem:[#allocation89_spill] sm:$0xff]  ;;  %v14533_v6 = vmax.f32 %v11899_v3, %v12480_v36  ;;  %v14542_v36 = vld [vmem:[#allocation10_spill] sm:$0xff] }
 0x369   : > { %v13031_v63 = vmax.f32 %v14524_v14, %v6465_v38  ;;  %v6467_v56 = vpop.f32.mrb[139].mxu1  ;;  %v13036_v53 = vmax.f32 %v14527_v17, %v6416_v58  ;;  %v14537_v17 = vmax.f32 %v14535_v11, %v14536_v5  ;;  %7350 = vst [vmem:[#allocation2 + $0x8] sm:$0xff] (!%p9296_p11), %v13016_v50  ;;  %7351 = vst [vmem:[#allocation2 + $0x10] sm:$0xff] (!%p9296_p11), %v13011_v54 }
 0x36a   : > { %v13026_v51 = vmax.f32 %v14523_v9, %v6414_v4  ;;  %v13041_v42 = vmax.f32 %v14528_v23, %v6467_v56  ;;  %v14529_v4 = vld [vmem:[#allocation8_spill] sm:$0xff]  ;;  %v14540_v56 = vmax.f32 %v11909_v7, %v14539_v10  ;;  %7352 = vst [vmem:[#allocation2 + $0x18] sm:$0xff] (!%p9296_p11), %v13021_v52 }
 0x36b   : > { %v14531_v31 = vmax.f32 %v14529_v4, %v14530_v43  ;;  %7384 = vst [vmem:[#allocation2 + $0x118] sm:$0xff] (!%p9296_p11), %v13036_v53  ;;  %7385 = vst [vmem:[#allocation2 + $0x120] sm:$0xff] (!%p9296_p11), %v13031_v63 }
 0x36c   : > { %7383 = vst [vmem:[#allocation2 + $0x110] sm:$0xff] (!%p9296_p11), %v13026_v51  ;;  %7386 = vst [vmem:[#allocation2 + $0x128] sm:$0xff] (!%p9296_p11), %v13041_v42 }
 0x36d   : > { %v6420_v59 = vpop.f32.mrb[140].mxu0 }
 0x36e   : > { %v6471_v9 = vpop.f32.mrb[140].mxu1  ;;  %v13046_v55 = vmax.f32 %v14531_v31, %v6420_v59  ;;  %v6422_v14 = vpop.f32.mrb[141].mxu0 }
 0x36f   : > { %v13051_v38 = vmax.f32 %v14533_v6, %v6471_v9  ;;  %v6473_v58 = vpop.f32.mrb[141].mxu1  ;;  %v13056_v60 = vmax.f32 %v14537_v17, %v6422_v14  ;;  %v6424_v4 = vpop.f32.mrb[142].mxu0  ;;  %v14543_v9 = vld [vmem:[#allocation92_spill] sm:$0xff]  ;;  %v14545_v14 = vmax.f32 %v11933_v29, %v12527_v37  ;;  %v14547_v17 = vld [vmem:[#allocation93_spill] sm:$0xff]  ;;  %v14553_v37 = vmax.f32 %v11943_v34, %v12546_v25 }
 0x370   : > { %14532 = vst [vmem:[#allocation82_spill] sm:$0xff] %v13046_v55  ;;  %v13061_v23 = vmax.f32 %v14540_v56, %v6473_v58  ;;  %v6475_v59 = vpop.f32.mrb[142].mxu1  ;;  %v6425_v43 = vpop.f32.mrb[143].mxu0  ;;  %v14544_v6 = vmax.f32 %v14542_v36, %v14543_v9  ;;  %v14546_v58 = vld [vmem:[#allocation11_spill] sm:$0xff]  ;;  %v14549_v4 = vmax.f32 %v11939_v32, %v12537_v2  ;;  %v14551_v36 = vld [vmem:[#allocation94_spill] sm:$0xff]  ;;  %v14557_v2 = vmax.f32 %v11950_v40, %v12555_v39 }
 0x371   : > { %14534 = vst [vmem:[#allocation5_spill] sm:$0xff] %v13051_v38  ;;  %14538 = vst [vmem:[#allocation84_spill] sm:$0xff] %v13056_v60  ;;  %v6476_v31 = vpop.f32.mrb[143].mxu1  ;;  %v14548_v10 = vmax.f32 %v14546_v58, %v14547_v17  ;;  %v14555_v58 = vld [vmem:[#allocation95_spill] sm:$0xff]  ;;  %v14562_v25 = vmax.f32 %v11959_v47, %v12569_v33  ;;  %v14568_v39 = vmax.f32 %v11967_v49, %v12577_v24  ;;  %v14570_v33 = vld [vmem:[#allocation16_spill] sm:$0xff] }
 0x372   : > { %14541 = vst [vmem:[#allocation6_spill] sm:$0xff] %v13061_v23  ;;  %v14550_v31 = vld [vmem:[#allocation12_spill] sm:$0xff]  ;;  %v14574_v24 = vld [vmem:[#allocation17_spill] sm:$0xff] }
 0x373   : > { %v14552_v9 = vmax.f32 %v14550_v31, %v14551_v36  ;;  %v14559_v31 = vld [vmem:[#allocation96_spill] sm:$0xff] }
 0x379   : > { %v6512_v55 = vpop.f32.mrb[144].mxu0 }
 0x37a   : > { %v6563_v3 = vpop.f32.mrb[144].mxu1  ;;  %v13066_v38 = vmax.f32 %v14544_v6, %v6512_v55  ;;  %v6514_v5 = vpop.f32.mrb[145].mxu0 }
 0x37b   : > { %v13071_v11 = vmax.f32 %v14545_v14, %v6563_v3  ;;  %v6565_v7 = vpop.f32.mrb[145].mxu1  ;;  %v13076_v56 = vmax.f32 %v14548_v10, %v6514_v5  ;;  %v6516_v43 = vpop.f32.mrb[146].mxu0  ;;  %v14554_v5 = vld [vmem:[#allocation13_spill] sm:$0xff] }
 0x37c   : > { %v13081_v59 = vmax.f32 %v14549_v4, %v6565_v7  ;;  %v6567_v55 = vpop.f32.mrb[146].mxu1  ;;  %v13086_v29 = vmax.f32 %v14552_v9, %v6516_v43  ;;  %v6518_v6 = vpop.f32.mrb[147].mxu0  ;;  %v14556_v17 = vmax.f32 %v14554_v5, %v14555_v58  ;;  %v14558_v43 = vld [vmem:[#allocation14_spill] sm:$0xff]  ;;  %7353 = vst [vmem:[#allocation2 + $0x20] sm:$0xff] (!%p9296_p11), %v13066_v38 }
 0x37d   : > { %v13091_v3 = vmax.f32 %v14553_v37, %v6567_v55  ;;  %v6569_v14 = vpop.f32.mrb[147].mxu1  ;;  %v14560_v36 = vmax.f32 %v14558_v43, %v14559_v31  ;;  %v14565_v5 = vld [vmem:[#allocation98_spill] sm:$0xff]  ;;  %7354 = vst [vmem:[#allocation2 + $0x28] sm:$0xff] (!%p9296_p11), %v13076_v56  ;;  %7355 = vst [vmem:[#allocation2 + $0x30] sm:$0xff] (!%p9296_p11), %v13071_v11 }
 0x37e   : > { %v13096_v32 = vmax.f32 %v14556_v17, %v6518_v6  ;;  %v13101_v7 = vmax.f32 %v14557_v2, %v6569_v14  ;;  %v14564_v6 = vld [vmem:[#allocation15_spill] sm:$0xff]  ;;  %7356 = vst [vmem:[#allocation2 + $0x38] sm:$0xff] (!%p9296_p11), %v13081_v59  ;;  %7387 = vst [vmem:[#allocation2 + $0x130] sm:$0xff] (!%p9296_p11), %v13086_v29 }
 0x37f   : > { %v14566_v58 = vmax.f32 %v14564_v6, %v14565_v5  ;;  %7389 = vst [vmem:[#allocation2 + $0x140] sm:$0xff] (!%p9296_p11), %v13091_v3 }
 0x380   : > { %7388 = vst [vmem:[#allocation2 + $0x138] sm:$0xff] (!%p9296_p11), %v13096_v32  ;;  %7390 = vst [vmem:[#allocation2 + $0x148] sm:$0xff] (!%p9296_p11), %v13101_v7 }
 0x381   : > { %v6522_v10 = vpop.f32.mrb[148].mxu0 }
 0x382   : > { %v6573_v4 = vpop.f32.mrb[148].mxu1  ;;  %v13106_v34 = vmax.f32 %v14560_v36, %v6522_v10  ;;  %v6524_v9 = vpop.f32.mrb[149].mxu0 }
 0x383   : > { %v13111_v55 = vmax.f32 %v14562_v25, %v6573_v4  ;;  %v6575_v37 = vpop.f32.mrb[149].mxu1  ;;  %v13116_v40 = vmax.f32 %v14566_v58, %v6524_v9  ;;  %v6526_v17 = vpop.f32.mrb[150].mxu0  ;;  %v14571_v4 = vld [vmem:[#allocation99_spill] sm:$0xff]  ;;  %v14573_v9 = vmax.f32 %v11993_v19, %v12611_v62  ;;  %v14581_v62 = vmax.f32 %v12003_v22, %v12630_v16 }
 0x384   : > { %14561 = vst [vmem:[#allocation86_spill] sm:$0xff] %v13106_v34  ;;  %v13121_v14 = vmax.f32 %v14568_v39, %v6575_v37  ;;  %v6577_v2 = vpop.f32.mrb[150].mxu1  ;;  %v6527_v10 = vpop.f32.mrb[151].mxu0  ;;  %v14572_v36 = vmax.f32 %v14570_v33, %v14571_v4  ;;  %v14575_v37 = vld [vmem:[#allocation100_spill] sm:$0xff]  ;;  %v14577_v17 = vmax.f32 %v11999_v20, %v12621_v27  ;;  %v14579_v33 = vld [vmem:[#allocation101_spill] sm:$0xff]  ;;  %v14586_v27 = vmax.f32 %v12010_v35, %v12639_v26  ;;  %v14598_v26 = vld [vmem:[#allocation110_spill] sm:$0xff] }
 0x385   : > { %14563 = vst [vmem:[#allocation7_spill] sm:$0xff] %v13111_v55  ;;  %14567 = vst [vmem:[#allocation88_spill] sm:$0xff] %v13116_v40  ;;  %v6578_v43 = vpop.f32.mrb[151].mxu1  ;;  %v14576_v58 = vmax.f32 %v14574_v24, %v14575_v37  ;;  %v14584_v24 = vld [vmem:[#allocation102_spill] sm:$0xff]  ;;  %v14592_v22 = vmax.f32 %v12019_v45, %v12653_v44 }
 0x386   : > { %14569 = vst [vmem:[#allocation8_spill] sm:$0xff] %v13121_v14  ;;  %v14601_v44 = vld [vmem:[#allocation22_spill] sm:$0xff] }
 0x38d   : > { %v6614_v31 = vpop.f32.mrb[152].mxu0 }
 0x38e   : > { %v6665_v47 = vpop.f32.mrb[152].mxu1  ;;  %v13126_v25 = vmax.f32 %v14572_v36, %v6614_v31  ;;  %v6616_v5 = vpop.f32.mrb[153].mxu0  ;;  %v14578_v31 = vld [vmem:[#allocation18_spill] sm:$0xff] }
 0x38f   : > { %v13131_v6 = vmax.f32 %v14573_v9, %v6665_v47  ;;  %v6667_v49 = vpop.f32.mrb[153].mxu1  ;;  %v13136_v39 = vmax.f32 %v14576_v58, %v6616_v5  ;;  %v6618_v10 = vpop.f32.mrb[154].mxu0  ;;  %v14580_v4 = vmax.f32 %v14578_v31, %v14579_v33  ;;  %v14583_v5 = vld [vmem:[#allocation19_spill] sm:$0xff] }
 0x390   : > { %v13141_v2 = vmax.f32 %v14577_v17, %v6667_v49  ;;  %v6669_v43 = vpop.f32.mrb[154].mxu1  ;;  %v6620_v36 = vpop.f32.mrb[155].mxu0  ;;  %v14585_v37 = vmax.f32 %v14583_v5, %v14584_v24  ;;  %v14589_v31 = vld [vmem:[#allocation103_spill] sm:$0xff]  ;;  %v14595_v5 = vld [vmem:[#allocation104_spill] sm:$0xff]  ;;  %7357 = vst [vmem:[#allocation2 + $0x40] sm:$0xff] (!%p9296_p11), %v13126_v25 }
 0x391   : > { %v13146_v19 = vmax.f32 %v14580_v4, %v6618_v10  ;;  %v13151_v47 = vmax.f32 %v14581_v62, %v6669_v43  ;;  %v6671_v9 = vpop.f32.mrb[155].mxu1  ;;  %v14588_v10 = vld [vmem:[#allocation20_spill] sm:$0xff]  ;;  %7358 = vst [vmem:[#allocation2 + $0x48] sm:$0xff] (!%p9296_p11), %v13136_v39  ;;  %7359 = vst [vmem:[#allocation2 + $0x50] sm:$0xff] (!%p9296_p11), %v13131_v6 }
 0x392   : > { %v13156_v20 = vmax.f32 %v14585_v37, %v6620_v36  ;;  %v13161_v49 = vmax.f32 %v14586_v27, %v6671_v9  ;;  %v14590_v33 = vmax.f32 %v14588_v10, %v14589_v31  ;;  %v14594_v36 = vld [vmem:[#allocation21_spill] sm:$0xff]  ;;  %v14599_v9 = vmax.f32 %v12033_v61, %v14598_v26  ;;  %v14607_v26 = vld [vmem:[#allocation106_spill] sm:$0xff]  ;;  %7360 = vst [vmem:[#allocation2 + $0x58] sm:$0xff] (!%p9296_p11), %v13141_v2 }
 0x393   : > { %14582 = vst [vmem:[#allocation89_spill] sm:$0xff] %v13151_v47  ;;  %v14596_v24 = vmax.f32 %v14594_v36, %v14595_v5  ;;  %v14604_v36 = vld [vmem:[#allocation112_spill] sm:$0xff]  ;;  %v14811_v47 = vld [vmem:[#allocation90_spill] sm:$0xff]  ;;  %7391 = vst [vmem:[#allocation2 + $0x150] sm:$0xff] (!%p9296_p11), %v13146_v19 }
 0x394   : > { %14587 = vst [vmem:[#allocation9_spill] sm:$0xff] %v13161_v49  ;;  %7392 = vst [vmem:[#allocation2 + $0x158] sm:$0xff] (!%p9296_p11), %v13156_v20 }
 0x395   : > { %v6624_v58 = vpop.f32.mrb[156].mxu0 }
 0x396   : > { %v6675_v17 = vpop.f32.mrb[156].mxu1  ;;  %v13166_v16 = vmax.f32 %v14590_v33, %v6624_v58  ;;  %v6626_v4 = vpop.f32.mrb[157].mxu0 }
 0x397   : > { %v13171_v43 = vmax.f32 %v14592_v22, %v6675_v17  ;;  %v6677_v62 = vpop.f32.mrb[157].mxu1  ;;  %v13176_v35 = vmax.f32 %v14596_v24, %v6626_v4  ;;  %v6628_v27 = vpop.f32.mrb[158].mxu0  ;;  %v14602_v17 = vld [vmem:[#allocation105_spill] sm:$0xff]  ;;  %v14605_v4 = vmax.f32 %v12063_v41, %v14604_v36  ;;  %v14617_v36 = vld [vmem:[#allocation116_spill] sm:$0xff] }
 0x398   : > { %14591 = vst [vmem:[#allocation91_spill] sm:$0xff] %v13166_v16  ;;  %v13181_v37 = vmax.f32 %v14599_v9, %v6677_v62  ;;  %v6679_v58 = vpop.f32.mrb[158].mxu1  ;;  %v6629_v10 = vpop.f32.mrb[159].mxu0  ;;  %v14603_v22 = vmax.f32 %v14601_v44, %v14602_v17  ;;  %v14606_v62 = vld [vmem:[#allocation23_spill] sm:$0xff]  ;;  %v14612_v17 = vld [vmem:[#allocation25_spill] sm:$0xff] }
 0x399   : > { %14593 = vst [vmem:[#allocation97_spill] sm:$0xff] %v13171_v43  ;;  %14597 = vst [vmem:[#allocation10_spill] sm:$0xff] %v13176_v35  ;;  %v6680_v31 = vpop.f32.mrb[159].mxu1  ;;  %v14608_v9 = vmax.f32 %v14606_v62, %v14607_v26  ;;  %v14609_v58 = vld [vmem:[#allocation24_spill] sm:$0xff]  ;;  %v14610_v10 = vld [vmem:[#allocation114_spill] sm:$0xff] }
 0x39a   : > { %14600 = vst [vmem:[#allocation92_spill] sm:$0xff] %v13181_v37  ;;  %v14611_v31 = vmax.f32 %v14609_v58, %v14610_v10  ;;  %v14620_v26 = vld [vmem:[#allocation27_spill] sm:$0xff]  ;;  %v14625_v10 = vld [vmem:[#allocation118_spill] sm:$0xff] }
 0x3a1   : > { %v6716_v33 = vpop.f32.mrb[160].mxu0 }
 0x3a2   : > { %v6767_v45 = vpop.f32.mrb[160].mxu1  ;;  %v13186_v43 = vmax.f32 %v14603_v22, %v6716_v33  ;;  %v6718_v24 = vpop.f32.mrb[161].mxu0  ;;  %v14613_v22 = vld [vmem:[#allocation107_spill] sm:$0xff] }
 0x3a3   : > { %v13191_v5 = vmax.f32 %v14605_v4, %v6767_v45  ;;  %v6769_v61 = vpop.f32.mrb[161].mxu1  ;;  %v13196_v27 = vmax.f32 %v14608_v9, %v6718_v24  ;;  %v6720_v44 = vpop.f32.mrb[162].mxu0  ;;  %v14614_v35 = vmax.f32 %v14612_v17, %v14613_v22  ;;  %v14616_v45 = vld [vmem:[#allocation26_spill] sm:$0xff]  ;;  %v14621_v9 = vld [vmem:[#allocation108_spill] sm:$0xff]  ;;  %v14629_v22 = vld [vmem:[#allocation109_spill] sm:$0xff] }
 0x3a4   : > { %v13201_v37 = vmax.f32 %v14611_v31, %v6769_v61  ;;  %v6771_v33 = vpop.f32.mrb[162].mxu1  ;;  %v14618_v4 = vmax.f32 %v14616_v45, %v14617_v36  ;;  %v6722_v62 = vpop.f32.mrb[163].mxu0  ;;  %v14622_v14 = vmax.f32 %v14620_v26, %v14621_v9  ;;  %v14624_v61 = vld [vmem:[#allocation28_spill] sm:$0xff]  ;;  %v14637_v9 = vld [vmem:[#allocation111_spill] sm:$0xff]  ;;  %7361 = vst [vmem:[#allocation2 + $0x60] sm:$0xff] (!%p9296_p11), %v13186_v43 }
 0x3a5   : > { %v13206_v41 = vmax.f32 %v14614_v35, %v6720_v44  ;;  %v6773_v24 = vpop.f32.mrb[163].mxu1  ;;  %v14626_v31 = vmax.f32 %v14624_v61, %v14625_v10  ;;  %v14628_v44 = vld [vmem:[#allocation29_spill] sm:$0xff]  ;;  %v14633_v36 = vld [vmem:[#allocation120_spill] sm:$0xff]  ;;  %v14641_v10 = vld [vmem:[#allocation122_spill] sm:$0xff]  ;;  %7362 = vst [vmem:[#allocation2 + $0x68] sm:$0xff] (!%p9296_p11), %v13196_v27 }
 0x3a6   : > { %v13211_v16 = vmax.f32 %v14618_v4, %v6771_v33  ;;  %v13216_v58 = vmax.f32 %v14622_v14, %v6722_v62  ;;  %v14630_v40 = vmax.f32 %v14628_v44, %v14629_v22  ;;  %v14632_v33 = vld [vmem:[#allocation30_spill] sm:$0xff]  ;;  %v14636_v62 = vld [vmem:[#allocation31_spill] sm:$0xff]  ;;  %7363 = vst [vmem:[#allocation2 + $0x70] sm:$0xff] (!%p9296_p11), %v13191_v5  ;;  %7364 = vst [vmem:[#allocation2 + $0x78] sm:$0xff] (!%p9296_p11), %v13201_v37 }
 0x3a7   : > { %14615 = vst [vmem:[#allocation11_spill] sm:$0xff] %v13206_v41  ;;  %v13221_v55 = vmax.f32 %v14626_v31, %v6773_v24  ;;  %v14634_v4 = vmax.f32 %v14632_v33, %v14633_v36  ;;  %v14638_v23 = vmax.f32 %v14636_v62, %v14637_v9  ;;  %v14640_v24 = vld [vmem:[#allocation32_spill] sm:$0xff]  ;;  %v14645_v36 = vld [vmem:[#allocation113_spill] sm:$0xff] }
 0x3a8   : > { %14619 = vst [vmem:[#allocation93_spill] sm:$0xff] %v13211_v16  ;;  %14623 = vst [vmem:[#allocation12_spill] sm:$0xff] %v13216_v58  ;;  %v14642_v31 = vmax.f32 %v14640_v24, %v14641_v10  ;;  %v14647_v62 = vld [vmem:[#allocation124_spill] sm:$0xff]  ;;  %v14650_v10 = vld [vmem:[#allocation115_spill] sm:$0xff] }
 0x3a9   : > { %14627 = vst [vmem:[#allocation94_spill] sm:$0xff] %v13221_v55  ;;  %v6726_v17 = vpop.f32.mrb[164].mxu0  ;;  %v14728_v16 = vld [vmem:[#allocation58_spill] sm:$0xff] }
 0x3aa   : > { %v6777_v35 = vpop.f32.mrb[164].mxu1  ;;  %v13226_v45 = vmax.f32 %v14630_v40, %v6726_v17  ;;  %v6728_v26 = vpop.f32.mrb[165].mxu0 }
 0x3ab   : > { %v13231_v34 = vmax.f32 %v14634_v4, %v6777_v35  ;;  %v6779_v14 = vpop.f32.mrb[165].mxu1  ;;  %v13236_v61 = vmax.f32 %v14638_v23, %v6728_v26  ;;  %v6730_v44 = vpop.f32.mrb[166].mxu0  ;;  %v14644_v35 = vld [vmem:[#allocation33_spill] sm:$0xff]  ;;  %v14648_v23 = vmax.f32 %v14428_v15, %v14647_v62 }
 0x3ac   : > { %14631 = vst [vmem:[#allocation13_spill] sm:$0xff] %v13226_v45  ;;  %v13241_v60 = vmax.f32 %v14642_v31, %v6779_v14  ;;  %v6781_v40 = vpop.f32.mrb[166].mxu1  ;;  %v6731_v17 = vpop.f32.mrb[167].mxu0  ;;  %v14646_v4 = vmax.f32 %v14644_v35, %v14645_v36  ;;  %v14649_v14 = vld [vmem:[#allocation35_spill] sm:$0xff]  ;;  %v14654_v36 = vld [vmem:[#allocation37_spill] sm:$0xff] }
 0x3ad   : > { %14635 = vst [vmem:[#allocation95_spill] sm:$0xff] %v13231_v34  ;;  %14639 = vst [vmem:[#allocation14_spill] sm:$0xff] %v13236_v61  ;;  %v6782_v22 = vpop.f32.mrb[167].mxu1  ;;  %v14651_v31 = vmax.f32 %v14649_v14, %v14650_v10  ;;  %v14652_v40 = vld [vmem:[#allocation34_spill] sm:$0xff]  ;;  %v14661_v10 = vld [vmem:[#allocation39_spill] sm:$0xff] }
 0x3ae   : > { %14643 = vst [vmem:[#allocation96_spill] sm:$0xff] %v13241_v60  ;;  %v14653_v17 = vmax.f32 %v14431_v28, %v14652_v40  ;;  %v14666_v40 = vld [vmem:[#allocation38_spill] sm:$0xff] }
 0x3b5   : > { %v6818_v45 = vpop.f32.mrb[168].mxu0 }
 0x3b6   : > { %v6869_v33 = vpop.f32.mrb[168].mxu1  ;;  %v13246_v34 = vmax.f32 %v14646_v4, %v6818_v45  ;;  %v6820_v9 = vpop.f32.mrb[169].mxu0  ;;  %v14655_v4 = vld [vmem:[#allocation117_spill] sm:$0xff] }
 0x3b7   : > { %v13251_v26 = vmax.f32 %v14648_v23, %v6869_v33  ;;  %v6871_v24 = vpop.f32.mrb[169].mxu1  ;;  %v13256_v44 = vmax.f32 %v14651_v31, %v6820_v9  ;;  %v6822_v35 = vpop.f32.mrb[170].mxu0  ;;  %v14656_v60 = vmax.f32 %v14654_v36, %v14655_v4  ;;  %v14658_v33 = vld [vmem:[#allocation36_spill] sm:$0xff]  ;;  %v14662_v31 = vld [vmem:[#allocation119_spill] sm:$0xff]  ;;  %v14670_v4 = vld [vmem:[#allocation121_spill] sm:$0xff] }
 0x3b8   : > { %v13261_v22 = vmax.f32 %v14653_v17, %v6871_v24  ;;  %v6873_v45 = vpop.f32.mrb[170].mxu1  ;;  %v14659_v62 = vmax.f32 %v14435_v1, %v14658_v33  ;;  %v6824_v14 = vpop.f32.mrb[171].mxu0  ;;  %v14663_v61 = vmax.f32 %v14661_v10, %v14662_v31  ;;  %v14665_v24 = vld [vmem:[#allocation40_spill] sm:$0xff]  ;;  %v14674_v33 = vld [vmem:[#allocation129_spill] sm:$0xff]  ;;  %v14678_v31 = vld [vmem:[#allocation123_spill] sm:$0xff]  ;;  %7365 = vst [vmem:[#allocation2 + $0x80] sm:$0xff] (!%p9296_p11), %v13246_v34 }
 0x3b9   : > { %v13266_v15 = vmax.f32 %v14656_v60, %v6822_v35  ;;  %v6875_v9 = vpop.f32.mrb[171].mxu1  ;;  %v14667_v17 = vmax.f32 %v14665_v24, %v14666_v40  ;;  %v14669_v35 = vld [vmem:[#allocation41_spill] sm:$0xff]  ;;  %v14682_v40 = vld [vmem:[#allocation131_spill] sm:$0xff]  ;;  %7366 = vst [vmem:[#allocation2 + $0x88] sm:$0xff] (!%p9296_p11), %v13256_v44  ;;  %7367 = vst [vmem:[#allocation2 + $0x90] sm:$0xff] (!%p9296_p11), %v13251_v26 }
 0x3ba   : > { %v13271_v23 = vmax.f32 %v14659_v62, %v6873_v45  ;;  %v13276_v28 = vmax.f32 %v14663_v61, %v6824_v14  ;;  %v14673_v45 = vld [vmem:[#allocation42_spill] sm:$0xff]  ;;  %v14677_v14 = vld [vmem:[#allocation43_spill] sm:$0xff]  ;;  %7368 = vst [vmem:[#allocation2 + $0x98] sm:$0xff] (!%p9296_p11), %v13261_v22 }
 0x3bb   : > { %14657 = vst [vmem:[#allocation15_spill] sm:$0xff] %v13266_v15  ;;  %v13281_v55 = vmax.f32 %v14667_v17, %v6875_v9  ;;  %v14671_v15 = vmax.f32 %v14669_v35, %v14670_v4  ;;  %v14675_v62 = vmax.f32 %v14673_v45, %v14674_v33  ;;  %v14681_v9 = vld [vmem:[#allocation44_spill] sm:$0xff]  ;;  %v14686_v33 = vld [vmem:[#allocation125_spill] sm:$0xff] }
 0x3bc   : > { %14660 = vst [vmem:[#allocation98_spill] sm:$0xff] %v13271_v23  ;;  %14664 = vst [vmem:[#allocation16_spill] sm:$0xff] %v13276_v28  ;;  %v14679_v28 = vmax.f32 %v14677_v14, %v14678_v31  ;;  %v14683_v17 = vmax.f32 %v14681_v9, %v14682_v40  ;;  %v14688_v14 = vld [vmem:[#allocation133_spill] sm:$0xff]  ;;  %v14691_v40 = vld [vmem:[#allocation126_spill] sm:$0xff] }
 0x3bd   : > { %14668 = vst [vmem:[#allocation99_spill] sm:$0xff] %v13281_v55  ;;  %v6828_v36 = vpop.f32.mrb[172].mxu0 }
 0x3be   : > { %v6879_v60 = vpop.f32.mrb[172].mxu1  ;;  %v13286_v1 = vmax.f32 %v14671_v15, %v6828_v36  ;;  %v6830_v10 = vpop.f32.mrb[173].mxu0 }
 0x3bf   : > { %v13291_v23 = vmax.f32 %v14675_v62, %v6879_v60  ;;  %v6881_v61 = vpop.f32.mrb[173].mxu1  ;;  %v13296_v24 = vmax.f32 %v14679_v28, %v6830_v10  ;;  %v6832_v35 = vpop.f32.mrb[174].mxu0  ;;  %v14685_v60 = vld [vmem:[#allocation45_spill] sm:$0xff]  ;;  %v14689_v28 = vmax.f32 %v14451_v12, %v14688_v14 }
 0x3c0   : > { %14672 = vst [vmem:[#allocation17_spill] sm:$0xff] %v13286_v1  ;;  %v13301_v55 = vmax.f32 %v14683_v17, %v6881_v61  ;;  %v6883_v15 = vpop.f32.mrb[174].mxu1  ;;  %v6833_v36 = vpop.f32.mrb[175].mxu0  ;;  %v14687_v62 = vmax.f32 %v14685_v60, %v14686_v33  ;;  %v14690_v61 = vld [vmem:[#allocation47_spill] sm:$0xff]  ;;  %v14694_v60 = vld [vmem:[#allocation49_spill] sm:$0xff] }
 0x3c1   : > { %14676 = vst [vmem:[#allocation100_spill] sm:$0xff] %v13291_v23  ;;  %14680 = vst [vmem:[#allocation18_spill] sm:$0xff] %v13296_v24  ;;  %v6884_v4 = vpop.f32.mrb[175].mxu1  ;;  %v14692_v17 = vmax.f32 %v14690_v61, %v14691_v40  ;;  %v14693_v15 = vmax.f32 %v14454_v46, %v12862_v21  ;;  %v14695_v33 = vld [vmem:[#allocation127_spill] sm:$0xff]  ;;  %v14705_v46 = vld [vmem:[#allocation52_spill] sm:$0xff] }
 0x3c2   : > { %14684 = vst [vmem:[#allocation101_spill] sm:$0xff] %v13301_v55  ;;  %v14701_v40 = vld [vmem:[#allocation51_spill] sm:$0xff] }
 0x3c9   : > { %v6920_v1 = vpop.f32.mrb[176].mxu0 }
 0x3ca   : > { %v6971_v45 = vpop.f32.mrb[176].mxu1  ;;  %v13306_v23 = vmax.f32 %v14687_v62, %v6920_v1  ;;  %v6922_v31 = vpop.f32.mrb[177].mxu0  ;;  %v14696_v62 = vmax.f32 %v14694_v60, %v14695_v33  ;;  %v14709_v33 = vld [vmem:[#allocation53_spill] sm:$0xff] }
 0x3cb   : > { %v13311_v10 = vmax.f32 %v14689_v28, %v6971_v45  ;;  %v6973_v9 = vpop.f32.mrb[177].mxu1  ;;  %v13316_v35 = vmax.f32 %v14692_v17, %v6922_v31  ;;  %v6924_v4 = vpop.f32.mrb[178].mxu0  ;;  %v14698_v45 = vld [vmem:[#allocation48_spill] sm:$0xff] }
 0x3cc   : > { %v13321_v36 = vmax.f32 %v14693_v15, %v6973_v9  ;;  %v6975_v1 = vpop.f32.mrb[178].mxu1  ;;  %v13326_v12 = vmax.f32 %v14696_v62, %v6924_v4  ;;  %v14699_v14 = vmax.f32 %v14458_v48, %v14698_v45  ;;  %v6926_v61 = vpop.f32.mrb[179].mxu0  ;;  %v14702_v17 = vld [vmem:[#allocation128_spill] sm:$0xff]  ;;  %v14706_v9 = vld [vmem:[#allocation50_spill] sm:$0xff]  ;;  %v14714_v45 = vld [vmem:[#allocation137_spill] sm:$0xff]  ;;  %7369 = vst [vmem:[#allocation2 + $0xa0] sm:$0xff] (!%p9296_p11), %v13306_v23 }
 0x3cd   : > { %v6977_v31 = vpop.f32.mrb[179].mxu1  ;;  %v14703_v55 = vmax.f32 %v14701_v40, %v14702_v17  ;;  %v14707_v15 = vmax.f32 %v14705_v46, %v14706_v9  ;;  %v14710_v62 = vld [vmem:[#allocation130_spill] sm:$0xff]  ;;  %v14718_v17 = vld [vmem:[#allocation132_spill] sm:$0xff]  ;;  %v14722_v9 = vld [vmem:[#allocation139_spill] sm:$0xff]  ;;  %7370 = vst [vmem:[#allocation2 + $0xa8] sm:$0xff] (!%p9296_p11), %v13316_v35 }
 0x3ce   : > { %14697 = vst [vmem:[#allocation19_spill] sm:$0xff] %v13326_v12  ;;  %v13331_v28 = vmax.f32 %v14699_v14, %v6975_v1  ;;  %v14711_v12 = vmax.f32 %v14709_v33, %v14710_v62  ;;  %v14713_v1 = vld [vmem:[#allocation54_spill] sm:$0xff]  ;;  %7371 = vst [vmem:[#allocation2 + $0xb0] sm:$0xff] (!%p9296_p11), %v13311_v10 }
 0x3cf   : > { %v13336_v21 = vmax.f32 %v14703_v55, %v6926_v61  ;;  %v13341_v24 = vmax.f32 %v14707_v15, %v6977_v31  ;;  %v14715_v14 = vmax.f32 %v14713_v1, %v14714_v45  ;;  %v14717_v61 = vld [vmem:[#allocation55_spill] sm:$0xff]  ;;  %v14721_v31 = vld [vmem:[#allocation56_spill] sm:$0xff]  ;;  %v14726_v45 = vld [vmem:[#allocation134_spill] sm:$0xff]  ;;  %7372 = vst [vmem:[#allocation2 + $0xb8] sm:$0xff] (!%p9296_p11), %v13321_v36 }
 0x3d0   : > { %14700 = vst [vmem:[#allocation102_spill] sm:$0xff] %v13331_v28  ;;  %v14723_v15 = vmax.f32 %v14721_v31, %v14722_v9  ;;  %v14732_v9 = vld [vmem:[#allocation46_spill] sm:$0xff] }
 0x3d1   : > { %14704 = vst [vmem:[#allocation20_spill] sm:$0xff] %v13336_v21  ;;  %14708 = vst [vmem:[#allocation103_spill] sm:$0xff] %v13341_v24  ;;  %v6930_v60 = vpop.f32.mrb[180].mxu0  ;;  %v14719_v21 = vmax.f32 %v14717_v61, %v14718_v17  ;;  %v14729_v61 = vld [vmem:[#allocation141_spill] sm:$0xff] }
 0x3d2   : > { %v6981_v4 = vpop.f32.mrb[180].mxu1  ;;  %v13346_v48 = vmax.f32 %v14711_v12, %v6930_v60  ;;  %v6932_v40 = vpop.f32.mrb[181].mxu0 }
 0x3d3   : > { %v13351_v28 = vmax.f32 %v14715_v14, %v6981_v4  ;;  %v6983_v55 = vpop.f32.mrb[181].mxu1  ;;  %v13356_v46 = vmax.f32 %v14719_v21, %v6932_v40  ;;  %v6934_v33 = vpop.f32.mrb[182].mxu0  ;;  %v14725_v4 = vld [vmem:[#allocation57_spill] sm:$0xff]  ;;  %v14730_v21 = vmax.f32 %v14728_v16, %v14729_v61 }
 0x3d4   : > { %14712 = vst [vmem:[#allocation21_spill] sm:$0xff] %v13346_v48  ;;  %v13361_v24 = vmax.f32 %v14723_v15, %v6983_v55  ;;  %v6985_v12 = vpop.f32.mrb[182].mxu1  ;;  %v6935_v60 = vpop.f32.mrb[183].mxu0  ;;  %v14727_v14 = vmax.f32 %v14725_v4, %v14726_v45  ;;  %v14731_v55 = vld [vmem:[#allocation59_spill] sm:$0xff]  ;;  %v14737_v45 = vld [vmem:[#allocation61_spill] sm:$0xff] }
 0x3d5   : > { %14716 = vst [vmem:[#allocation104_spill] sm:$0xff] %v13351_v28  ;;  %14720 = vst [vmem:[#allocation110_spill] sm:$0xff] %v13356_v46  ;;  %v6986_v62 = vpop.f32.mrb[183].mxu1  ;;  %v14733_v15 = vmax.f32 %v14731_v55, %v14732_v9  ;;  %v14734_v12 = vld [vmem:[#allocation60_spill] sm:$0xff]  ;;  %v14735_v60 = vld [vmem:[#allocation143_spill] sm:$0xff] }
 0x3d6   : > { %14724 = vst [vmem:[#allocation22_spill] sm:$0xff] %v13361_v24  ;;  %v14736_v62 = vmax.f32 %v14734_v12, %v14735_v60  ;;  %v14742_v61 = vld [vmem:[#allocation145_spill] sm:$0xff]  ;;  %v14745_v9 = vld [vmem:[#allocation63_spill] sm:$0xff] }
 0x3d7   : > { %v14750_v60 = vld [vmem:[#allocation147_spill] sm:$0xff] }
 0x3dd   : > { %v7022_v48 = vpop.f32.mrb[184].mxu0 }
 0x3de   : > { %v7073_v1 = vpop.f32.mrb[184].mxu1  ;;  %v13366_v28 = vmax.f32 %v14727_v14, %v7022_v48  ;;  %v7024_v17 = vpop.f32.mrb[185].mxu0  ;;  %v14738_v14 = vld [vmem:[#allocation135_spill] sm:$0xff] }
 0x3df   : > { %v13371_v40 = vmax.f32 %v14730_v21, %v7073_v1  ;;  %v7075_v31 = vpop.f32.mrb[185].mxu1  ;;  %v13376_v33 = vmax.f32 %v14733_v15, %v7024_v17  ;;  %v7026_v4 = vpop.f32.mrb[186].mxu0  ;;  %v14739_v46 = vmax.f32 %v14737_v45, %v14738_v14  ;;  %v14741_v1 = vld [vmem:[#allocation62_spill] sm:$0xff]  ;;  %v14746_v15 = vld [vmem:[#allocation136_spill] sm:$0xff] }
 0x3e0   : > { %v13381_v24 = vmax.f32 %v14736_v62, %v7075_v31  ;;  %v7077_v48 = vpop.f32.mrb[186].mxu1  ;;  %v14743_v21 = vmax.f32 %v14741_v1, %v14742_v61  ;;  %v7028_v55 = vpop.f32.mrb[187].mxu0  ;;  %v14747_v41 = vmax.f32 %v14745_v9, %v14746_v15  ;;  %v14749_v31 = vld [vmem:[#allocation64_spill] sm:$0xff]  ;;  %v14754_v14 = vld [vmem:[#allocation138_spill] sm:$0xff]  ;;  %v14758_v61 = vld [vmem:[#allocation149_spill] sm:$0xff]  ;;  %7373 = vst [vmem:[#allocation2 + $0xc0] sm:$0xff] (!%p9296_p11), %v13366_v28 }
 0x3e1   : > { %v13386_v16 = vmax.f32 %v14739_v46, %v7026_v4  ;;  %v7079_v17 = vpop.f32.mrb[187].mxu1  ;;  %v14751_v62 = vmax.f32 %v14749_v31, %v14750_v60  ;;  %v14753_v4 = vld [vmem:[#allocation65_spill] sm:$0xff]  ;;  %v14762_v15 = vld [vmem:[#allocation140_spill] sm:$0xff]  ;;  %7374 = vst [vmem:[#allocation2 + $0xc8] sm:$0xff] (!%p9296_p11), %v13376_v33  ;;  %7375 = vst [vmem:[#allocation2 + $0xd0] sm:$0xff] (!%p9296_p11), %v13371_v40 }
 0x3e2   : > { %v13391_v58 = vmax.f32 %v14743_v21, %v7077_v48  ;;  %v13396_v12 = vmax.f32 %v14747_v41, %v7028_v55  ;;  %v14757_v48 = vld [vmem:[#allocation66_spill] sm:$0xff]  ;;  %v14761_v55 = vld [vmem:[#allocation67_spill] sm:$0xff]  ;;  %7376 = vst [vmem:[#allocation2 + $0xd8] sm:$0xff] (!%p9296_p11), %v13381_v24 }
 0x3e3   : > { %14740 = vst [vmem:[#allocation105_spill] sm:$0xff] %v13386_v16  ;;  %v13401_v49 = vmax.f32 %v14751_v62, %v7079_v17  ;;  %v14755_v16 = vmax.f32 %v14753_v4, %v14754_v14  ;;  %v14759_v21 = vmax.f32 %v14757_v48, %v14758_v61  ;;  %v14765_v17 = vmax.f32 %v14493_v8, %v12947_v30  ;;  %v14768_v61 = vld [vmem:[#allocation142_spill] sm:$0xff]  ;;  %v14771_v30 = vld [vmem:[#allocation71_spill] sm:$0xff] }
 0x3e4   : > { %14744 = vst [vmem:[#allocation112_spill] sm:$0xff] %v13391_v58  ;;  %14748 = vst [vmem:[#allocation23_spill] sm:$0xff] %v13396_v12  ;;  %v14763_v12 = vmax.f32 %v14761_v55, %v14762_v15 }
 0x3e5   : > { %14752 = vst [vmem:[#allocation106_spill] sm:$0xff] %v13401_v49  ;;  %v7032_v45 = vpop.f32.mrb[188].mxu0 }
 0x3e6   : > { %v7083_v46 = vpop.f32.mrb[188].mxu1  ;;  %v13406_v1 = vmax.f32 %v14755_v16, %v7032_v45  ;;  %v7034_v9 = vpop.f32.mrb[189].mxu0 }
 0x3e7   : > { %v13411_v58 = vmax.f32 %v14759_v21, %v7083_v46  ;;  %v7085_v41 = vpop.f32.mrb[189].mxu1  ;;  %v13416_v31 = vmax.f32 %v14763_v12, %v7034_v9  ;;  %v7036_v62 = vpop.f32.mrb[190].mxu0  ;;  %v14767_v46 = vld [vmem:[#allocation69_spill] sm:$0xff]  ;;  %v14770_v12 = vmax.f32 %v14496_v57, %v12955_v13  ;;  %v14781_v57 = vld [vmem:[#allocation74_spill] sm:$0xff] }
 0x3e8   : > { %14756 = vst [vmem:[#allocation24_spill] sm:$0xff] %v13406_v1  ;;  %v13421_v60 = vmax.f32 %v14765_v17, %v7085_v41  ;;  %v7087_v16 = vpop.f32.mrb[190].mxu1  ;;  %v7037_v45 = vpop.f32.mrb[191].mxu0  ;;  %v14769_v21 = vmax.f32 %v14767_v46, %v14768_v61  ;;  %v14772_v41 = vld [vmem:[#allocation144_spill] sm:$0xff]  ;;  %v14777_v61 = vld [vmem:[#allocation73_spill] sm:$0xff] }
 0x3e9   : > { %14760 = vst [vmem:[#allocation114_spill] sm:$0xff] %v13411_v58  ;;  %14764 = vst [vmem:[#allocation25_spill] sm:$0xff] %v13416_v31  ;;  %v7088_v4 = vpop.f32.mrb[191].mxu1  ;;  %v14773_v15 = vmax.f32 %v14771_v30, %v14772_v41  ;;  %v14774_v62 = vld [vmem:[#allocation72_spill] sm:$0xff]  ;;  %v14775_v16 = vld [vmem:[#allocation70_spill] sm:$0xff] }
 0x3ea   : > { %14766 = vst [vmem:[#allocation107_spill] sm:$0xff] %v13421_v60  ;;  %v14776_v45 = vmax.f32 %v14774_v62, %v14775_v16  ;;  %v14785_v41 = vld [vmem:[#allocation75_spill] sm:$0xff] }
 0x3eb   : > { %v14790_v16 = vld [vmem:[#allocation155_spill] sm:$0xff] }
 0x3f1   : > { %v7124_v14 = vpop.f32.mrb[192].mxu0 }
 0x3f2   : > { %v7175_v48 = vpop.f32.mrb[192].mxu1  ;;  %v13426_v58 = vmax.f32 %v14769_v21, %v7124_v14  ;;  %v7126_v55 = vpop.f32.mrb[193].mxu0  ;;  %v14778_v21 = vld [vmem:[#allocation146_spill] sm:$0xff] }
 0x3f3   : > { %v13431_v9 = vmax.f32 %v14770_v12, %v7175_v48  ;;  %v7177_v8 = vpop.f32.mrb[193].mxu1  ;;  %v13436_v17 = vmax.f32 %v14773_v15, %v7126_v55  ;;  %v7128_v46 = vpop.f32.mrb[194].mxu0  ;;  %v14779_v60 = vmax.f32 %v14777_v61, %v14778_v21  ;;  %v14782_v48 = vld [vmem:[#allocation153_spill] sm:$0xff]  ;;  %v14786_v15 = vld [vmem:[#allocation148_spill] sm:$0xff]  ;;  %v14794_v21 = vld [vmem:[#allocation150_spill] sm:$0xff] }
 0x3f4   : > { %v13441_v4 = vmax.f32 %v14776_v45, %v7177_v8  ;;  %v7179_v14 = vpop.f32.mrb[194].mxu1  ;;  %v14783_v12 = vmax.f32 %v14781_v57, %v14782_v48  ;;  %v7130_v30 = vpop.f32.mrb[195].mxu0  ;;  %v14787_v1 = vmax.f32 %v14785_v41, %v14786_v15  ;;  %v14789_v8 = vld [vmem:[#allocation76_spill] sm:$0xff]  ;;  %v14798_v48 = vld [vmem:[#allocation157_spill] sm:$0xff]  ;;  %v14802_v15 = vld [vmem:[#allocation151_spill] sm:$0xff]  ;;  %7377 = vst [vmem:[#allocation2 + $0xe0] sm:$0xff] (!%p9296_p11), %v13426_v58 }
 0x3f5   : > { %v13446_v13 = vmax.f32 %v14779_v60, %v7128_v46  ;;  %v7181_v55 = vpop.f32.mrb[195].mxu1  ;;  %v14791_v45 = vmax.f32 %v14789_v8, %v14790_v16  ;;  %v14793_v46 = vld [vmem:[#allocation77_spill] sm:$0xff]  ;;  %v14805_v16 = vld [vmem:[#allocation159_spill] sm:$0xff]  ;;  %7378 = vst [vmem:[#allocation2 + $0xe8] sm:$0xff] (!%p9296_p11), %v13436_v17  ;;  %7379 = vst [vmem:[#allocation2 + $0xf0] sm:$0xff] (!%p9296_p11), %v13431_v9 }
 0x3f6   : > { %v13451_v31 = vmax.f32 %v14783_v12, %v7179_v14  ;;  %v13456_v62 = vmax.f32 %v14787_v1, %v7130_v30  ;;  %v14797_v14 = vld [vmem:[#allocation78_spill] sm:$0xff]  ;;  %v14801_v30 = vld [vmem:[#allocation79_spill] sm:$0xff]  ;;  %7380 = vst [vmem:[#allocation2 + $0xf8] sm:$0xff] (!%p9296_p11), %v13441_v4 }
 0x3f7   : > { %14780 = vst [vmem:[#allocation26_spill] sm:$0xff] %v13446_v13  ;;  %v13461_v49 = vmax.f32 %v14791_v45, %v7181_v55  ;;  %v14795_v13 = vmax.f32 %v14793_v46, %v14794_v21  ;;  %v14799_v12 = vmax.f32 %v14797_v14, %v14798_v48  ;;  %v14804_v55 = vld [vmem:[#allocation80_spill] sm:$0xff] }
 0x3f8   : > { %14784 = vst [vmem:[#allocation116_spill] sm:$0xff] %v13451_v31  ;;  %14788 = vst [vmem:[#allocation27_spill] sm:$0xff] %v13456_v62  ;;  %v14803_v62 = vmax.f32 %v14801_v30, %v14802_v15  ;;  %v14806_v45 = vmax.f32 %v14804_v55, %v14805_v16  ;;  %v14809_v48 = vld [vmem:[#allocation68_spill] sm:$0xff]  ;;  %v14812_v30 = vld [vmem:[#allocation158_spill] sm:$0xff] }
 0x3f9   : > { %14792 = vst [vmem:[#allocation108_spill] sm:$0xff] %v13461_v49  ;;  %v7134_v61 = vpop.f32.mrb[196].mxu0  ;;  %v14816_v16 = vld [vmem:[#allocation152_spill] sm:$0xff] }
 0x3fa   : > { %v7185_v60 = vpop.f32.mrb[196].mxu1  ;;  %v13466_v57 = vmax.f32 %v14795_v13, %v7134_v61  ;;  %v7136_v41 = vpop.f32.mrb[197].mxu0 }
 0x3fb   : > { %v13471_v31 = vmax.f32 %v14799_v12, %v7185_v60  ;;  %v7187_v1 = vpop.f32.mrb[197].mxu1  ;;  %v13476_v8 = vmax.f32 %v14803_v62, %v7136_v41  ;;  %v7138_v46 = vpop.f32.mrb[198].mxu0  ;;  %v14808_v60 = vld [vmem:[#allocation81_spill] sm:$0xff]  ;;  %v14813_v62 = vmax.f32 %v14811_v47, %v14812_v30 }
 0x3fc   : > { %14796 = vst [vmem:[#allocation28_spill] sm:$0xff] %v13466_v57  ;;  %v13481_v49 = vmax.f32 %v14806_v45, %v7187_v1  ;;  %v7189_v13 = vpop.f32.mrb[198].mxu1  ;;  %v7139_v61 = vpop.f32.mrb[199].mxu0  ;;  %v14810_v12 = vmax.f32 %v14808_v60, %v14809_v48  ;;  %v14815_v1 = vld [vmem:[#allocation83_spill] sm:$0xff]  ;;  %v14819_v60 = vld [vmem:[#allocation85_spill] sm:$0xff]  ;;  %v14820_v48 = vld [vmem:[#allocation154_spill] sm:$0xff] }
 0x3fd   : > { %14800 = vst [vmem:[#allocation118_spill] sm:$0xff] %v13471_v31  ;;  %v7190_v21 = vpop.f32.mrb[199].mxu1  ;;  %v14817_v45 = vmax.f32 %v14815_v1, %v14816_v16  ;;  %v14818_v13 = vmax.f32 %v12412_v18, %v12997_v0  ;;  %v14825_v0 = vld [vmem:[#allocation4_spill] sm:$0xff] (!%p9296_p11)  ;;  %v14826_v18 = vld [vmem:[#allocation89_spill] sm:$0xff] (!%p9296_p11)  ;;  %v14831_v16 = vld [vmem:[#allocation94_spill] sm:$0xff] (!%p9296_p11) }
 0x3fe   : > { %14807 = vst [vmem:[#allocation29_spill] sm:$0xff] %v13481_v49  ;;  %7349 = vst [vmem:[#allocation2] sm:$0xff] (!%p9296_p11), %v14825_v0  ;;  %v14842_v0 = vld [vmem:[#allocation112_spill] sm:$0xff] (!%p9296_p11) }
 0x3ff   : > { %7393 = vst [vmem:[#allocation2 + $0x160] sm:$0xff] (!%p9296_p11), %v14826_v18  ;;  %7398 = vst [vmem:[#allocation2 + $0x188] sm:$0xff] (!%p9296_p11), %v14831_v16  ;;  %v14843_v18 = vld [vmem:[#allocation106_spill] sm:$0xff] (!%p9296_p11) }
 0x400   : > { %7409 = vst [vmem:[#allocation2 + $0x1e0] sm:$0xff] (!%p9296_p11), %v14842_v0  ;;  %7410 = vst [vmem:[#allocation2 + $0x1e8] sm:$0xff] (!%p9296_p11), %v14843_v18  ;;  %v14848_v16 = vld [vmem:[#allocation82_spill] sm:$0xff] (!%p9296_p11)  ;;  %v14859_v0 = vld [vmem:[#allocation92_spill] sm:$0xff] (!%p9296_p11) }
 0x401   : > { %7417 = vst [vmem:[#allocation2 + $0x220] sm:$0xff] (!%p9296_p11), %v14848_v16  ;;  %7428 = vst [vmem:[#allocation2 + $0x278] sm:$0xff] (!%p9296_p11), %v14859_v0  ;;  %v14860_v18 = vld [vmem:[#allocation13_spill] sm:$0xff] (!%p9296_p11)  ;;  %v14865_v16 = vld [vmem:[#allocation18_spill] sm:$0xff] (!%p9296_p11) }
 0x402   : > { %7429 = vst [vmem:[#allocation2 + $0x280] sm:$0xff] (!%p9296_p11), %v14860_v18  ;;  %7434 = vst [vmem:[#allocation2 + $0x2a8] sm:$0xff] (!%p9296_p11), %v14865_v16 }
 0x403   : > { %v14876_v0 = vld [vmem:[#allocation28_spill] sm:$0xff] (!%p9296_p11)  ;;  %7446 = vst [vmem:[#allocation2 + $0x308] sm:$0xff] (!%p9296_p11), %v13476_v8 }
 0x404   : > { %7445 = vst [vmem:[#allocation2 + $0x300] sm:$0xff] (!%p9296_p11), %v14876_v0  ;;  %v14877_v18 = vld [vmem:[#allocation118_spill] sm:$0xff] (!%p9296_p11) }
 0x405   : > { %v7226_v57 = vpop.f32.mrb[200].mxu0  ;;  %7447 = vst [vmem:[#allocation2 + $0x310] sm:$0xff] (!%p9296_p11), %v14877_v18 }
 0x406   : > { %v7236_v14 = vpop.f32.mrb[200].mxu1  ;;  %v13486_v31 = vmax.f32 %v14810_v12, %v7226_v57  ;;  %v7228_v15 = vpop.f32.mrb[201].mxu0  ;;  %v14821_v12 = vmax.f32 %v14819_v60, %v14820_v48  ;;  %7348 = sbr.rel (%p9296_p11) target bundleno = 1056 (0x420), region = 63  ;;  %v14836_v60 = vld [vmem:[#allocation19_spill] sm:$0xff] (!%p9296_p11)  ;;  %v14837_v48 = vld [vmem:[#allocation20_spill] sm:$0xff] (!%p9296_p11) }
 0x407   : > { %v13491_v41 = vmax.f32 %v14813_v62, %v7236_v14  ;;  %v7238_v55 = vpop.f32.mrb[201].mxu1  ;;  %v13496_v46 = vmax.f32 %v14817_v45, %v7228_v15  ;;  %v7230_v21 = vpop.f32.mrb[202].mxu0  ;;  %v14822_v62 = vld [vmem:[#allocation87_spill] sm:$0xff]  ;;  %v14829_v15 = vld [vmem:[#allocation12_spill] sm:$0xff] (!%p9296_p11)  ;;  %7403 = vst [vmem:[#allocation2 + $0x1b0] sm:$0xff] (!%p9296_p11), %v14836_v60  ;;  %7404 = vst [vmem:[#allocation2 + $0x1b8] sm:$0xff] (!%p9296_p11), %v14837_v48 }
 0x408   : > { %v13501_v61 = vmax.f32 %v14818_v13, %v7238_v55  ;;  %v7240_v57 = vpop.f32.mrb[202].mxu1  ;;  %v13506_v47 = vmax.f32 %v14821_v12, %v7230_v21  ;;  %v7232_v14 = vpop.f32.mrb[203].mxu0  ;;  %7381 = vst [vmem:[#allocation2 + $0x100] sm:$0xff] (!%p9296_p11), %v13486_v31  ;;  %7396 = vst [vmem:[#allocation2 + $0x178] sm:$0xff] (!%p9296_p11), %v14829_v15  ;;  %v14830_v55 = vld [vmem:[#allocation93_spill] sm:$0xff] (!%p9296_p11)  ;;  %v14832_v45 = vld [vmem:[#allocation15_spill] sm:$0xff] (!%p9296_p11) }
 0x409   : > { %14814 = vst [vmem:[#allocation109_spill] sm:$0xff] %v13491_v41  ;;  %v7241_v30 = vpop.f32.mrb[203].mxu1  ;;  %v14823_v41 = vld [vmem:[#allocation156_spill] sm:$0xff]  ;;  %7382 = vst [vmem:[#allocation2 + $0x108] sm:$0xff] (!%p9296_p11), %v13496_v46  ;;  %v14834_v21 = vld [vmem:[#allocation98_spill] sm:$0xff] (!%p9296_p11) }
 0x40a   : > { %v14824_v49 = vmax.f32 %v14822_v62, %v14823_v41  ;;  %v14828_v41 = vld [vmem:[#allocation11_spill] sm:$0xff] (!%p9296_p11)  ;;  %7397 = vst [vmem:[#allocation2 + $0x180] sm:$0xff] (!%p9296_p11), %v14830_v55  ;;  %7399 = vst [vmem:[#allocation2 + $0x190] sm:$0xff] (!%p9296_p11), %v14832_v45  ;;  %v14833_v13 = vld [vmem:[#allocation16_spill] sm:$0xff] (!%p9296_p11) }
 0x40b   : > { %7395 = vst [vmem:[#allocation2 + $0x170] sm:$0xff] (!%p9296_p11), %v14828_v41  ;;  %7400 = vst [vmem:[#allocation2 + $0x198] sm:$0xff] (!%p9296_p11), %v14833_v13  ;;  %v14835_v57 = vld [vmem:[#allocation99_spill] sm:$0xff] (!%p9296_p11)  ;;  %v14838_v12 = vld [vmem:[#allocation102_spill] sm:$0xff] (!%p9296_p11) }
 0x40c   : > { %v13511_v1 = vmax.f32 %v14824_v49, %v7232_v14  ;;  %v14827_v49 = vld [vmem:[#allocation9_spill] sm:$0xff] (!%p9296_p11)  ;;  %7401 = vst [vmem:[#allocation2 + $0x1a0] sm:$0xff] (!%p9296_p11), %v14834_v21  ;;  %7402 = vst [vmem:[#allocation2 + $0x1a8] sm:$0xff] (!%p9296_p11), %v14835_v57  ;;  %v14839_v14 = vld [vmem:[#allocation103_spill] sm:$0xff] (!%p9296_p11) }
 0x40d   : > { %7394 = vst [vmem:[#allocation2 + $0x168] sm:$0xff] %v14827_v49  ;;  %7405 = vst [vmem:[#allocation2 + $0x1c0] sm:$0xff] %v14838_v12  ;;  %v14840_v30 = vld [vmem:[#allocation105_spill] sm:$0xff]  ;;  %v14841_v62 = vld [vmem:[#allocation23_spill] sm:$0xff] }
 0x40e   : > { %7406 = vst [vmem:[#allocation2 + $0x1c8] sm:$0xff] %v14839_v14  ;;  %7407 = vst [vmem:[#allocation2 + $0x1d0] sm:$0xff] %v14840_v30  ;;  %v14844_v49 = vld [vmem:[#allocation26_spill] sm:$0xff]  ;;  %v14845_v41 = vld [vmem:[#allocation27_spill] sm:$0xff] }
 0x40f   : > { %7408 = vst [vmem:[#allocation2 + $0x1d8] sm:$0xff] %v14841_v62  ;;  %7411 = vst [vmem:[#allocation2 + $0x1f0] sm:$0xff] %v14844_v49  ;;  %v14846_v15 = vld [vmem:[#allocation116_spill] sm:$0xff]  ;;  %v14850_v13 = vld [vmem:[#allocation5_spill] sm:$0xff] }
 0x410   : > { %7412 = vst [vmem:[#allocation2 + $0x1f8] sm:$0xff] %v14845_v41  ;;  %7413 = vst [vmem:[#allocation2 + $0x200] sm:$0xff] %v14846_v15  ;;  %v14847_v55 = vld [vmem:[#allocation108_spill] sm:$0xff]  ;;  %v14851_v21 = vld [vmem:[#allocation6_spill] sm:$0xff] }
 0x411   : > { %7414 = vst [vmem:[#allocation2 + $0x208] sm:$0xff] %v14847_v55  ;;  %7415 = vst [vmem:[#allocation2 + $0x210] sm:$0xff] %v13506_v47  ;;  %v14849_v45 = vld [vmem:[#allocation84_spill] sm:$0xff]  ;;  %v14852_v57 = vld [vmem:[#allocation86_spill] sm:$0xff] }
 0x412   : > { %7416 = vst [vmem:[#allocation2 + $0x218] sm:$0xff] %v13511_v1  ;;  %7418 = vst [vmem:[#allocation2 + $0x228] sm:$0xff] %v14849_v45  ;;  %v14853_v60 = vld [vmem:[#allocation88_spill] sm:$0xff]  ;;  %v14854_v48 = vld [vmem:[#allocation7_spill] sm:$0xff] }
 0x413   : > { %7419 = vst [vmem:[#allocation2 + $0x230] sm:$0xff] %v14850_v13  ;;  %7420 = vst [vmem:[#allocation2 + $0x238] sm:$0xff] %v14851_v21  ;;  %v14855_v12 = vld [vmem:[#allocation8_spill] sm:$0xff]  ;;  %v14856_v14 = vld [vmem:[#allocation91_spill] sm:$0xff] }
 0x414   : > { %7421 = vst [vmem:[#allocation2 + $0x240] sm:$0xff] %v14852_v57  ;;  %7422 = vst [vmem:[#allocation2 + $0x248] sm:$0xff] %v14853_v60  ;;  %v14857_v30 = vld [vmem:[#allocation10_spill] sm:$0xff]  ;;  %v14858_v62 = vld [vmem:[#allocation97_spill] sm:$0xff] }
 0x415   : > { %7423 = vst [vmem:[#allocation2 + $0x250] sm:$0xff] %v14854_v48  ;;  %7424 = vst [vmem:[#allocation2 + $0x258] sm:$0xff] %v14855_v12  ;;  %v14861_v49 = vld [vmem:[#allocation14_spill] sm:$0xff]  ;;  %v14862_v41 = vld [vmem:[#allocation95_spill] sm:$0xff] }
 0x416   : > { %7425 = vst [vmem:[#allocation2 + $0x260] sm:$0xff] %v14856_v14  ;;  %7426 = vst [vmem:[#allocation2 + $0x268] sm:$0xff] %v14857_v30  ;;  %v14863_v15 = vld [vmem:[#allocation96_spill] sm:$0xff]  ;;  %v14864_v55 = vld [vmem:[#allocation17_spill] sm:$0xff] }
 0x417   : > { %7427 = vst [vmem:[#allocation2 + $0x270] sm:$0xff] %v14858_v62  ;;  %7430 = vst [vmem:[#allocation2 + $0x288] sm:$0xff] %v14861_v49  ;;  %v14866_v45 = vld [vmem:[#allocation100_spill] sm:$0xff]  ;;  %v14867_v13 = vld [vmem:[#allocation101_spill] sm:$0xff] }
 0x418   : > { %7431 = vst [vmem:[#allocation2 + $0x290] sm:$0xff] %v14862_v41  ;;  %7432 = vst [vmem:[#allocation2 + $0x298] sm:$0xff] %v14863_v15  ;;  %v14868_v21 = vld [vmem:[#allocation21_spill] sm:$0xff]  ;;  %v14869_v57 = vld [vmem:[#allocation110_spill] sm:$0xff] }
 0x419   : > { %7433 = vst [vmem:[#allocation2 + $0x2a0] sm:$0xff] %v14864_v55  ;;  %7435 = vst [vmem:[#allocation2 + $0x2b0] sm:$0xff] %v14866_v45  ;;  %v14870_v60 = vld [vmem:[#allocation104_spill] sm:$0xff]  ;;  %v14871_v48 = vld [vmem:[#allocation22_spill] sm:$0xff] }
 0x41a   : > { %7436 = vst [vmem:[#allocation2 + $0x2b8] sm:$0xff] %v14867_v13  ;;  %7437 = vst [vmem:[#allocation2 + $0x2c0] sm:$0xff] %v14868_v21  ;;  %v14872_v12 = vld [vmem:[#allocation24_spill] sm:$0xff]  ;;  %v14873_v14 = vld [vmem:[#allocation25_spill] sm:$0xff] }
 0x41b   : > { %7438 = vst [vmem:[#allocation2 + $0x2c8] sm:$0xff] %v14869_v57  ;;  %7439 = vst [vmem:[#allocation2 + $0x2d0] sm:$0xff] %v14870_v60  ;;  %v14874_v30 = vld [vmem:[#allocation114_spill] sm:$0xff]  ;;  %v14875_v62 = vld [vmem:[#allocation107_spill] sm:$0xff] }
 0x41c   : > { %7440 = vst [vmem:[#allocation2 + $0x2d8] sm:$0xff] %v14871_v48  ;;  %7441 = vst [vmem:[#allocation2 + $0x2e0] sm:$0xff] %v14872_v12  ;;  %v14878_v49 = vld [vmem:[#allocation29_spill] sm:$0xff] }
 0x41d   : > { %7442 = vst [vmem:[#allocation2 + $0x2e8] sm:$0xff] %v14873_v14  ;;  %7443 = vst [vmem:[#allocation2 + $0x2f0] sm:$0xff] %v14874_v30  ;;  %v14879_v41 = vld [vmem:[#allocation109_spill] sm:$0xff] }
 0x41e   : > { %7444 = vst [vmem:[#allocation2 + $0x2f8] sm:$0xff] %v14875_v62  ;;  %7448 = vst [vmem:[#allocation2 + $0x318] sm:$0xff] %v14878_v49 }
 0x41f   : > { %7449 = vst [vmem:[#allocation2 + $0x320] sm:$0xff] %v14879_v41  ;;  %7450 = vst [vmem:[#allocation2 + $0x328] sm:$0xff] %v13501_v61 }
 0x420 PF: > { %p9297_p12 = scmp.eq.s32.totalorder %s10289_s17, 0 }
 0x421   : > { %v7455_v15 = vld [vmem:[#allocation2] sm:$0xff] (!%p9297_p12)  ;;  %v7456_v55 = vld [vmem:[#allocation2 + $0x8] sm:$0xff] (!%p9297_p12)  ;;  %v7457_v16 = vld [vmem:[#allocation2 + $0x10] sm:$0xff] (!%p9297_p12) }
 0x422   : > { %7454 = sbr.rel (%p9297_p12) target bundleno = 1126 (0x466), region = 67  ;;  %v14880_v45 = vld [vmem:[#allocation4_spill] sm:$0xff] (!%p9297_p12)  ;;  %v7558_v21 = vmax.f32 (!%p9297_p12), %v7456_v55, %v13016_v50  ;;  %v7559_v57 = vmax.f32 (!%p9297_p12), %v7457_v16, %v13011_v54  ;;  %v7458_v60 = vld [vmem:[#allocation2 + $0x18] sm:$0xff] (!%p9297_p12)  ;;  %v7459_v48 = vld [vmem:[#allocation2 + $0x20] sm:$0xff] (!%p9297_p12) }
 0x423   : > { %v7557_v13 = vmax.f32 (!%p9297_p12), %v7455_v15, %v14880_v45  ;;  %v7460_v12 = vld [vmem:[#allocation2 + $0x28] sm:$0xff] (!%p9297_p12)  ;;  %v7560_v14 = vmax.f32 (!%p9297_p12), %v7458_v60, %v13021_v52  ;;  %v7561_v30 = vmax.f32 (!%p9297_p12), %v7459_v48, %v13066_v38  ;;  %v7461_v0 = vld [vmem:[#allocation2 + $0x30] sm:$0xff] (!%p9297_p12)  ;;  %v7462_v18 = vld [vmem:[#allocation2 + $0x38] sm:$0xff] (!%p9297_p12) }
 0x424   : > { %v7562_v62 = vmax.f32 (!%p9297_p12), %v7460_v12, %v13076_v56  ;;  %v7463_v49 = vld [vmem:[#allocation2 + $0x40] sm:$0xff] (!%p9297_p12)  ;;  %7660 = vst [vmem:[#allocation2 + $0x8] sm:$0xff] (!%p9297_p12), %v7558_v21  ;;  %7661 = vst [vmem:[#allocation2 + $0x10] sm:$0xff] (!%p9297_p12), %v7559_v57  ;;  %v7563_v41 = vmax.f32 (!%p9297_p12), %v7461_v0, %v13071_v11  ;;  %v7564_v50 = vmax.f32 (!%p9297_p12), %v7462_v18, %v13081_v59  ;;  %v7464_v15 = vld [vmem:[#allocation2 + $0x48] sm:$0xff] (!%p9297_p12) }
 0x425   : > { %7659 = vst [vmem:[#allocation2] sm:$0xff] (!%p9297_p12), %v7557_v13  ;;  %v7565_v54 = vmax.f32 (!%p9297_p12), %v7463_v49, %v13126_v25  ;;  %v7465_v55 = vld [vmem:[#allocation2 + $0x50] sm:$0xff] (!%p9297_p12)  ;;  %v7466_v16 = vld [vmem:[#allocation2 + $0x58] sm:$0xff] (!%p9297_p12)  ;;  %7662 = vst [vmem:[#allocation2 + $0x18] sm:$0xff] (!%p9297_p12), %v7560_v14  ;;  %v7566_v52 = vmax.f32 (!%p9297_p12), %v7464_v15, %v13136_v39 }
 0x426   : > { %7663 = vst [vmem:[#allocation2 + $0x20] sm:$0xff] (!%p9297_p12), %v7561_v30  ;;  %7664 = vst [vmem:[#allocation2 + $0x28] sm:$0xff] (!%p9297_p12), %v7562_v62  ;;  %v7567_v38 = vmax.f32 (!%p9297_p12), %v7465_v55, %v13131_v6  ;;  %v7568_v56 = vmax.f32 (!%p9297_p12), %v7466_v16, %v13141_v2  ;;  %v7467_v45 = vld [vmem:[#allocation2 + $0x60] sm:$0xff] (!%p9297_p12)  ;;  %v7468_v13 = vld [vmem:[#allocation2 + $0x68] sm:$0xff] (!%p9297_p12) }
 0x427   : > { %v7469_v21 = vld [vmem:[#allocation2 + $0x70] sm:$0xff] (!%p9297_p12)  ;;  %7665 = vst [vmem:[#allocation2 + $0x30] sm:$0xff] (!%p9297_p12), %v7563_v41  ;;  %7666 = vst [vmem:[#allocation2 + $0x38] sm:$0xff] (!%p9297_p12), %v7564_v50  ;;  %v7569_v11 = vmax.f32 (!%p9297_p12), %v7467_v45, %v13186_v43  ;;  %v7570_v59 = vmax.f32 (!%p9297_p12), %v7468_v13, %v13196_v27  ;;  %v7470_v57 = vld [vmem:[#allocation2 + $0x78] sm:$0xff] (!%p9297_p12) }
 0x428   : > { %7667 = vst [vmem:[#allocation2 + $0x40] sm:$0xff] (!%p9297_p12), %v7565_v54  ;;  %v7571_v25 = vmax.f32 (!%p9297_p12), %v7469_v21, %v13191_v5  ;;  %v7471_v60 = vld [vmem:[#allocation2 + $0x80] sm:$0xff] (!%p9297_p12)  ;;  %v7472_v48 = vld [vmem:[#allocation2 + $0x88] sm:$0xff] (!%p9297_p12)  ;;  %7668 = vst [vmem:[#allocation2 + $0x48] sm:$0xff] (!%p9297_p12), %v7566_v52  ;;  %v7572_v6 = vmax.f32 (!%p9297_p12), %v7470_v57, %v13201_v37 }
 0x429   : > { %7669 = vst [vmem:[#allocation2 + $0x50] sm:$0xff] %v7567_v38  ;;  %7670 = vst [vmem:[#allocation2 + $0x58] sm:$0xff] %v7568_v56  ;;  %v7573_v39 = vmax.f32 %v7471_v60, %v13246_v34  ;;  %v7574_v2 = vmax.f32 %v7472_v48, %v13256_v44  ;;  %v7473_v12 = vld [vmem:[#allocation2 + $0x90] sm:$0xff]  ;;  %v7474_v14 = vld [vmem:[#allocation2 + $0x98] sm:$0xff] }
 0x42a   : > { %v7475_v30 = vld [vmem:[#allocation2 + $0xa0] sm:$0xff]  ;;  %7671 = vst [vmem:[#allocation2 + $0x60] sm:$0xff] %v7569_v11  ;;  %7672 = vst [vmem:[#allocation2 + $0x68] sm:$0xff] %v7570_v59  ;;  %v7575_v43 = vmax.f32 %v7473_v12, %v13251_v26  ;;  %v7576_v5 = vmax.f32 %v7474_v14, %v13261_v22  ;;  %v7476_v62 = vld [vmem:[#allocation2 + $0xa8] sm:$0xff] }
 0x42b   : > { %7673 = vst [vmem:[#allocation2 + $0x70] sm:$0xff] %v7571_v25  ;;  %v7577_v27 = vmax.f32 %v7475_v30, %v13306_v23  ;;  %v7477_v0 = vld [vmem:[#allocation2 + $0xb0] sm:$0xff]  ;;  %v7478_v18 = vld [vmem:[#allocation2 + $0xb8] sm:$0xff]  ;;  %7674 = vst [vmem:[#allocation2 + $0x78] sm:$0xff] %v7572_v6  ;;  %v7578_v34 = vmax.f32 %v7476_v62, %v13316_v35 }
 0x42c   : > { %7675 = vst [vmem:[#allocation2 + $0x80] sm:$0xff] %v7573_v39  ;;  %7676 = vst [vmem:[#allocation2 + $0x88] sm:$0xff] %v7574_v2  ;;  %v7579_v37 = vmax.f32 %v7477_v0, %v13311_v10  ;;  %v7580_v44 = vmax.f32 %v7478_v18, %v13321_v36  ;;  %v7479_v49 = vld [vmem:[#allocation2 + $0xc0] sm:$0xff]  ;;  %v7480_v41 = vld [vmem:[#allocation2 + $0xc8] sm:$0xff] }
 0x42d   : > { %v7481_v50 = vld [vmem:[#allocation2 + $0xd0] sm:$0xff]  ;;  %7677 = vst [vmem:[#allocation2 + $0x90] sm:$0xff] %v7575_v43  ;;  %7678 = vst [vmem:[#allocation2 + $0x98] sm:$0xff] %v7576_v5  ;;  %v7581_v26 = vmax.f32 %v7479_v49, %v13366_v28  ;;  %v7582_v22 = vmax.f32 %v7480_v41, %v13376_v33  ;;  %v7482_v54 = vld [vmem:[#allocation2 + $0xd8] sm:$0xff] }
 0x42e   : > { %7679 = vst [vmem:[#allocation2 + $0xa0] sm:$0xff] %v7577_v27  ;;  %v7583_v23 = vmax.f32 %v7481_v50, %v13371_v40  ;;  %v7483_v15 = vld [vmem:[#allocation2 + $0xe0] sm:$0xff]  ;;  %v7484_v55 = vld [vmem:[#allocation2 + $0xe8] sm:$0xff]  ;;  %7680 = vst [vmem:[#allocation2 + $0xa8] sm:$0xff] %v7578_v34  ;;  %v7584_v10 = vmax.f32 %v7482_v54, %v13381_v24 }
 0x42f   : > { %7681 = vst [vmem:[#allocation2 + $0xb0] sm:$0xff] %v7579_v37  ;;  %7682 = vst [vmem:[#allocation2 + $0xb8] sm:$0xff] %v7580_v44  ;;  %v7585_v35 = vmax.f32 %v7483_v15, %v13426_v58  ;;  %v7586_v36 = vmax.f32 %v7484_v55, %v13436_v17  ;;  %v7485_v16 = vld [vmem:[#allocation2 + $0xf0] sm:$0xff]  ;;  %v7486_v52 = vld [vmem:[#allocation2 + $0xf8] sm:$0xff] }
 0x430   : > { %v7487_v38 = vld [vmem:[#allocation2 + $0x100] sm:$0xff]  ;;  %7683 = vst [vmem:[#allocation2 + $0xc0] sm:$0xff] %v7581_v26  ;;  %7684 = vst [vmem:[#allocation2 + $0xc8] sm:$0xff] %v7582_v22  ;;  %v7587_v28 = vmax.f32 %v7485_v16, %v13431_v9  ;;  %v7588_v40 = vmax.f32 %v7486_v52, %v13441_v4  ;;  %v7488_v56 = vld [vmem:[#allocation2 + $0x108] sm:$0xff] }
 0x431   : > { %7685 = vst [vmem:[#allocation2 + $0xd0] sm:$0xff] %v7583_v23  ;;  %v7589_v33 = vmax.f32 %v7487_v38, %v13486_v31  ;;  %v7489_v45 = vld [vmem:[#allocation2 + $0x110] sm:$0xff]  ;;  %v7490_v13 = vld [vmem:[#allocation2 + $0x118] sm:$0xff]  ;;  %7686 = vst [vmem:[#allocation2 + $0xd8] sm:$0xff] %v7584_v10  ;;  %v7590_v58 = vmax.f32 %v7488_v56, %v13496_v46 }
 0x432   : > { %7687 = vst [vmem:[#allocation2 + $0xe0] sm:$0xff] %v7585_v35  ;;  %7688 = vst [vmem:[#allocation2 + $0xe8] sm:$0xff] %v7586_v36  ;;  %v7591_v24 = vmax.f32 %v7489_v45, %v13026_v51  ;;  %v7592_v17 = vmax.f32 %v7490_v13, %v13036_v53  ;;  %v7491_v21 = vld [vmem:[#allocation2 + $0x120] sm:$0xff]  ;;  %v7492_v11 = vld [vmem:[#allocation2 + $0x128] sm:$0xff] }
 0x433   : > { %v7493_v59 = vld [vmem:[#allocation2 + $0x130] sm:$0xff]  ;;  %7689 = vst [vmem:[#allocation2 + $0xf0] sm:$0xff] %v7587_v28  ;;  %7690 = vst [vmem:[#allocation2 + $0xf8] sm:$0xff] %v7588_v40  ;;  %v7593_v31 = vmax.f32 %v7491_v21, %v13031_v63  ;;  %v7594_v9 = vmax.f32 %v7492_v11, %v13041_v42  ;;  %v7494_v25 = vld [vmem:[#allocation2 + $0x138] sm:$0xff] }
 0x434   : > { %7691 = vst [vmem:[#allocation2 + $0x100] sm:$0xff] %v7589_v33  ;;  %v7595_v4 = vmax.f32 %v7493_v59, %v13086_v29  ;;  %v7495_v57 = vld [vmem:[#allocation2 + $0x140] sm:$0xff]  ;;  %v7496_v60 = vld [vmem:[#allocation2 + $0x148] sm:$0xff]  ;;  %7692 = vst [vmem:[#allocation2 + $0x108] sm:$0xff] %v7590_v58  ;;  %v7596_v51 = vmax.f32 %v7494_v25, %v13096_v32 }
 0x435   : > { %7693 = vst [vmem:[#allocation2 + $0x110] sm:$0xff] %v7591_v24  ;;  %7694 = vst [vmem:[#allocation2 + $0x118] sm:$0xff] %v7592_v17  ;;  %v7597_v53 = vmax.f32 %v7495_v57, %v13091_v3  ;;  %v7598_v46 = vmax.f32 %v7496_v60, %v13101_v7  ;;  %v7497_v48 = vld [vmem:[#allocation2 + $0x150] sm:$0xff]  ;;  %v7498_v6 = vld [vmem:[#allocation2 + $0x158] sm:$0xff] }
 0x436   : > { %v7499_v39 = vld [vmem:[#allocation2 + $0x160] sm:$0xff]  ;;  %7695 = vst [vmem:[#allocation2 + $0x120] sm:$0xff] %v7593_v31  ;;  %7696 = vst [vmem:[#allocation2 + $0x128] sm:$0xff] %v7594_v9  ;;  %v7599_v63 = vmax.f32 %v7497_v48, %v13146_v19  ;;  %v7600_v42 = vmax.f32 %v7498_v6, %v13156_v20  ;;  %v14881_v29 = vld [vmem:[#allocation89_spill] sm:$0xff] }
 0x437   : > { %7697 = vst [vmem:[#allocation2 + $0x130] sm:$0xff] %v7595_v4  ;;  %v7601_v2 = vmax.f32 %v7499_v39, %v14881_v29  ;;  %v7500_v12 = vld [vmem:[#allocation2 + $0x168] sm:$0xff]  ;;  %v7501_v14 = vld [vmem:[#allocation2 + $0x170] sm:$0xff]  ;;  %v7502_v30 = vld [vmem:[#allocation2 + $0x178] sm:$0xff] }
 0x438   : > { %7698 = vst [vmem:[#allocation2 + $0x138] sm:$0xff] %v7596_v51  ;;  %7699 = vst [vmem:[#allocation2 + $0x140] sm:$0xff] %v7597_v53  ;;  %v14882_v3 = vld [vmem:[#allocation9_spill] sm:$0xff]  ;;  %v14883_v7 = vld [vmem:[#allocation11_spill] sm:$0xff] }
 0x439   : > { %7700 = vst [vmem:[#allocation2 + $0x148] sm:$0xff] %v7598_v46  ;;  %v7602_v32 = vmax.f32 %v7500_v12, %v14882_v3  ;;  %v7603_v43 = vmax.f32 %v7501_v14, %v14883_v7  ;;  %v14884_v5 = vld [vmem:[#allocation12_spill] sm:$0xff]  ;;  %v7503_v62 = vld [vmem:[#allocation2 + $0x180] sm:$0xff]  ;;  %v7504_v0 = vld [vmem:[#allocation2 + $0x188] sm:$0xff] }
 0x43a   : > { %v7604_v27 = vmax.f32 %v7502_v30, %v14884_v5  ;;  %v7505_v18 = vld [vmem:[#allocation2 + $0x190] sm:$0xff]  ;;  %7701 = vst [vmem:[#allocation2 + $0x150] sm:$0xff] %v7599_v63  ;;  %7702 = vst [vmem:[#allocation2 + $0x158] sm:$0xff] %v7600_v42  ;;  %v14885_v19 = vld [vmem:[#allocation93_spill] sm:$0xff] }
 0x43b   : > { %7703 = vst [vmem:[#allocation2 + $0x160] sm:$0xff] %v7601_v2  ;;  %v7605_v20 = vmax.f32 %v7503_v62, %v14885_v19  ;;  %v14886_v34 = vld [vmem:[#allocation94_spill] sm:$0xff]  ;;  %v14887_v44 = vld [vmem:[#allocation15_spill] sm:$0xff]  ;;  %v7506_v41 = vld [vmem:[#allocation2 + $0x198] sm:$0xff] }
 0x43c   : > { %v7606_v37 = vmax.f32 %v7504_v0, %v14886_v34  ;;  %v7607_v49 = vmax.f32 %v7505_v18, %v14887_v44  ;;  %v7507_v50 = vld [vmem:[#allocation2 + $0x1a0] sm:$0xff]  ;;  %v7508_v26 = vld [vmem:[#allocation2 + $0x1a8] sm:$0xff]  ;;  %7704 = vst [vmem:[#allocation2 + $0x168] sm:$0xff] %v7602_v32  ;;  %7705 = vst [vmem:[#allocation2 + $0x170] sm:$0xff] %v7603_v43 }
 0x43d   : > { %7706 = vst [vmem:[#allocation2 + $0x178] sm:$0xff] %v7604_v27  ;;  %v14888_v22 = vld [vmem:[#allocation16_spill] sm:$0xff]  ;;  %v14889_v54 = vld [vmem:[#allocation98_spill] sm:$0xff]  ;;  %v14890_v55 = vld [vmem:[#allocation99_spill] sm:$0xff] }
 0x43e   : > { %v7608_v23 = vmax.f32 %v7506_v41, %v14888_v22  ;;  %v7609_v15 = vmax.f32 %v7507_v50, %v14889_v54  ;;  %v7610_v10 = vmax.f32 %v7508_v26, %v14890_v55  ;;  %v7509_v35 = vld [vmem:[#allocation2 + $0x1b0] sm:$0xff]  ;;  %v7510_v36 = vld [vmem:[#allocation2 + $0x1b8] sm:$0xff]  ;;  %v7511_v16 = vld [vmem:[#allocation2 + $0x1c0] sm:$0xff]  ;;  %7707 = vst [vmem:[#allocation2 + $0x180] sm:$0xff] %v7605_v20 }
 0x43f   : > { %7708 = vst [vmem:[#allocation2 + $0x188] sm:$0xff] %v7606_v37  ;;  %7709 = vst [vmem:[#allocation2 + $0x190] sm:$0xff] %v7607_v49  ;;  %v14891_v52 = vld [vmem:[#allocation19_spill] sm:$0xff]  ;;  %v14892_v28 = vld [vmem:[#allocation20_spill] sm:$0xff] }
 0x440   : > { %v7611_v38 = vmax.f32 %v7509_v35, %v14891_v52  ;;  %v7612_v40 = vmax.f32 %v7510_v36, %v14892_v28  ;;  %v14893_v33 = vld [vmem:[#allocation102_spill] sm:$0xff]  ;;  %v7512_v45 = vld [vmem:[#allocation2 + $0x1c8] sm:$0xff]  ;;  %v7513_v13 = vld [vmem:[#allocation2 + $0x1d0] sm:$0xff]  ;;  %7710 = vst [vmem:[#allocation2 + $0x198] sm:$0xff] %v7608_v23 }
 0x441   : > { %v7613_v56 = vmax.f32 %v7511_v16, %v14893_v33  ;;  %v7514_v58 = vld [vmem:[#allocation2 + $0x1d8] sm:$0xff]  ;;  %7711 = vst [vmem:[#allocation2 + $0x1a0] sm:$0xff] %v7609_v15  ;;  %7712 = vst [vmem:[#allocation2 + $0x1a8] sm:$0xff] %v7610_v10  ;;  %v14894_v24 = vld [vmem:[#allocation103_spill] sm:$0xff] }
 0x442   : > { %v7614_v17 = vmax.f32 %v7512_v45, %v14894_v24  ;;  %v14895_v21 = vld [vmem:[#allocation105_spill] sm:$0xff]  ;;  %v14896_v59 = vld [vmem:[#allocation23_spill] sm:$0xff]  ;;  %v7515_v9 = vld [vmem:[#allocation2 + $0x1e0] sm:$0xff]  ;;  %7713 = vst [vmem:[#allocation2 + $0x1b0] sm:$0xff] %v7611_v38 }
 0x443   : > { %v7615_v11 = vmax.f32 %v7513_v13, %v14895_v21  ;;  %v7616_v31 = vmax.f32 %v7514_v58, %v14896_v59  ;;  %v7516_v4 = vld [vmem:[#allocation2 + $0x1e8] sm:$0xff]  ;;  %v7517_v25 = vld [vmem:[#allocation2 + $0x1f0] sm:$0xff]  ;;  %7714 = vst [vmem:[#allocation2 + $0x1b8] sm:$0xff] %v7612_v40  ;;  %7715 = vst [vmem:[#allocation2 + $0x1c0] sm:$0xff] %v7613_v56 }
 0x444   : > { %v14897_v57 = vld [vmem:[#allocation112_spill] sm:$0xff]  ;;  %v14898_v51 = vld [vmem:[#allocation106_spill] sm:$0xff]  ;;  %v7518_v6 = vld [vmem:[#allocation2 + $0x1f8] sm:$0xff]  ;;  %7716 = vst [vmem:[#allocation2 + $0x1c8] sm:$0xff] %v7614_v17 }
 0x445   : > { %v7617_v60 = vmax.f32 %v7515_v9, %v14897_v57  ;;  %v7618_v53 = vmax.f32 %v7516_v4, %v14898_v51  ;;  %v14899_v46 = vld [vmem:[#allocation26_spill] sm:$0xff]  ;;  %v7520_v63 = vld [vmem:[#allocation2 + $0x208] sm:$0xff]  ;;  %7717 = vst [vmem:[#allocation2 + $0x1d0] sm:$0xff] %v7615_v11  ;;  %7718 = vst [vmem:[#allocation2 + $0x1d8] sm:$0xff] %v7616_v31 }
 0x446   : > { %v7619_v48 = vmax.f32 %v7517_v25, %v14899_v46  ;;  %v7519_v39 = vld [vmem:[#allocation2 + $0x200] sm:$0xff]  ;;  %v14900_v42 = vld [vmem:[#allocation27_spill] sm:$0xff]  ;;  %v14901_v2 = vld [vmem:[#allocation116_spill] sm:$0xff] }
 0x447   : > { %v7620_v29 = vmax.f32 %v7518_v6, %v14900_v42  ;;  %v7621_v12 = vmax.f32 %v7519_v39, %v14901_v2  ;;  %v14902_v14 = vld [vmem:[#allocation108_spill] sm:$0xff]  ;;  %v7522_v32 = vld [vmem:[#allocation2 + $0x218] sm:$0xff]  ;;  %v7523_v7 = vld [vmem:[#allocation2 + $0x220] sm:$0xff]  ;;  %7719 = vst [vmem:[#allocation2 + $0x1e0] sm:$0xff] %v7617_v60 }
 0x448   : > { %v7622_v30 = vmax.f32 %v7520_v63, %v14902_v14  ;;  %v7521_v3 = vld [vmem:[#allocation2 + $0x210] sm:$0xff]  ;;  %7720 = vst [vmem:[#allocation2 + $0x1e8] sm:$0xff] %v7618_v53  ;;  %7721 = vst [vmem:[#allocation2 + $0x1f0] sm:$0xff] %v7619_v48  ;;  %v7624_v5 = vmax.f32 %v7522_v32, %v13511_v1  ;;  %v14903_v27 = vld [vmem:[#allocation82_spill] sm:$0xff] }
 0x449   : > { %v7623_v43 = vmax.f32 %v7521_v3, %v13506_v47  ;;  %v7625_v62 = vmax.f32 %v7523_v7, %v14903_v27  ;;  %v7524_v0 = vld [vmem:[#allocation2 + $0x228] sm:$0xff]  ;;  %v7525_v18 = vld [vmem:[#allocation2 + $0x230] sm:$0xff]  ;;  %v7526_v19 = vld [vmem:[#allocation2 + $0x238] sm:$0xff]  ;;  %7722 = vst [vmem:[#allocation2 + $0x1f8] sm:$0xff] %v7620_v29 }
 0x44a   : > { %7723 = vst [vmem:[#allocation2 + $0x200] sm:$0xff] %v7621_v12  ;;  %7724 = vst [vmem:[#allocation2 + $0x208] sm:$0xff] %v7622_v30  ;;  %v14904_v20 = vld [vmem:[#allocation84_spill] sm:$0xff]  ;;  %v14905_v37 = vld [vmem:[#allocation5_spill] sm:$0xff] }
 0x44b   : > { %v7626_v34 = vmax.f32 %v7524_v0, %v14904_v20  ;;  %v7627_v44 = vmax.f32 %v7525_v18, %v14905_v37  ;;  %v14906_v49 = vld [vmem:[#allocation6_spill] sm:$0xff]  ;;  %v7528_v26 = vld [vmem:[#allocation2 + $0x248] sm:$0xff]  ;;  %v7529_v22 = vld [vmem:[#allocation2 + $0x250] sm:$0xff]  ;;  %7725 = vst [vmem:[#allocation2 + $0x210] sm:$0xff] %v7623_v43 }
 0x44c   : > { %v7628_v41 = vmax.f32 %v7526_v19, %v14906_v49  ;;  %v7527_v50 = vld [vmem:[#allocation2 + $0x240] sm:$0xff]  ;;  %7726 = vst [vmem:[#allocation2 + $0x218] sm:$0xff] %v7624_v5  ;;  %7727 = vst [vmem:[#allocation2 + $0x220] sm:$0xff] %v7625_v62  ;;  %v14908_v23 = vld [vmem:[#allocation88_spill] sm:$0xff] }
 0x44d   : > { %v14907_v47 = vld [vmem:[#allocation86_spill] sm:$0xff]  ;;  %v7630_v54 = vmax.f32 %v7528_v26, %v14908_v23  ;;  %v14909_v15 = vld [vmem:[#allocation7_spill] sm:$0xff]  ;;  %v7530_v10 = vld [vmem:[#allocation2 + $0x258] sm:$0xff]  ;;  %7728 = vst [vmem:[#allocation2 + $0x228] sm:$0xff] %v7626_v34 }
 0x44e   : > { %v7629_v1 = vmax.f32 %v7527_v50, %v14907_v47  ;;  %v7631_v55 = vmax.f32 %v7529_v22, %v14909_v15  ;;  %v7531_v35 = vld [vmem:[#allocation2 + $0x260] sm:$0xff]  ;;  %v7532_v36 = vld [vmem:[#allocation2 + $0x268] sm:$0xff]  ;;  %7729 = vst [vmem:[#allocation2 + $0x230] sm:$0xff] %v7627_v44  ;;  %7730 = vst [vmem:[#allocation2 + $0x238] sm:$0xff] %v7628_v41 }
 0x44f   : > { %v14910_v16 = vld [vmem:[#allocation8_spill] sm:$0xff]  ;;  %v14911_v38 = vld [vmem:[#allocation91_spill] sm:$0xff]  ;;  %v14912_v40 = vld [vmem:[#allocation10_spill] sm:$0xff]  ;;  %7732 = vst [vmem:[#allocation2 + $0x248] sm:$0xff] %v7630_v54 }
 0x450   : > { %v7632_v52 = vmax.f32 %v7530_v10, %v14910_v16  ;;  %v7633_v28 = vmax.f32 %v7531_v35, %v14911_v38  ;;  %v7634_v33 = vmax.f32 %v7532_v36, %v14912_v40  ;;  %v7533_v56 = vld [vmem:[#allocation2 + $0x270] sm:$0xff]  ;;  %v7534_v45 = vld [vmem:[#allocation2 + $0x278] sm:$0xff]  ;;  %v7535_v13 = vld [vmem:[#allocation2 + $0x280] sm:$0xff]  ;;  %7731 = vst [vmem:[#allocation2 + $0x240] sm:$0xff] %v7629_v1 }
 0x451   : > { %7733 = vst [vmem:[#allocation2 + $0x250] sm:$0xff] %v7631_v55  ;;  %v14913_v58 = vld [vmem:[#allocation97_spill] sm:$0xff]  ;;  %v14914_v17 = vld [vmem:[#allocation92_spill] sm:$0xff]  ;;  %v7536_v31 = vld [vmem:[#allocation2 + $0x288] sm:$0xff] }
 0x452   : > { %v7635_v24 = vmax.f32 %v7533_v56, %v14913_v58  ;;  %v7636_v21 = vmax.f32 %v7534_v45, %v14914_v17  ;;  %v14915_v11 = vld [vmem:[#allocation13_spill] sm:$0xff]  ;;  %v7537_v9 = vld [vmem:[#allocation2 + $0x290] sm:$0xff]  ;;  %7734 = vst [vmem:[#allocation2 + $0x258] sm:$0xff] %v7632_v52  ;;  %7735 = vst [vmem:[#allocation2 + $0x260] sm:$0xff] %v7633_v28 }
 0x453   : > { %v7637_v59 = vmax.f32 %v7535_v13, %v14915_v11  ;;  %v7538_v4 = vld [vmem:[#allocation2 + $0x298] sm:$0xff]  ;;  %7736 = vst [vmem:[#allocation2 + $0x268] sm:$0xff] %v7634_v33  ;;  %v14916_v25 = vld [vmem:[#allocation14_spill] sm:$0xff]  ;;  %v14917_v60 = vld [vmem:[#allocation95_spill] sm:$0xff] }
 0x454   : > { %v7638_v57 = vmax.f32 %v7536_v31, %v14916_v25  ;;  %v7639_v51 = vmax.f32 %v7537_v9, %v14917_v60  ;;  %v14918_v53 = vld [vmem:[#allocation96_spill] sm:$0xff]  ;;  %v7539_v48 = vld [vmem:[#allocation2 + $0x2a0] sm:$0xff]  ;;  %v7540_v6 = vld [vmem:[#allocation2 + $0x2a8] sm:$0xff]  ;;  %7737 = vst [vmem:[#allocation2 + $0x270] sm:$0xff] %v7635_v24 }
 0x455   : > { %v7640_v46 = vmax.f32 %v7538_v4, %v14918_v53  ;;  %v7541_v39 = vld [vmem:[#allocation2 + $0x2b0] sm:$0xff]  ;;  %7738 = vst [vmem:[#allocation2 + $0x278] sm:$0xff] %v7636_v21  ;;  %7739 = vst [vmem:[#allocation2 + $0x280] sm:$0xff] %v7637_v59  ;;  %v14919_v63 = vld [vmem:[#allocation17_spill] sm:$0xff] }
 0x456   : > { %v7641_v42 = vmax.f32 %v7539_v48, %v14919_v63  ;;  %v14920_v29 = vld [vmem:[#allocation18_spill] sm:$0xff]  ;;  %v14921_v12 = vld [vmem:[#allocation100_spill] sm:$0xff]  ;;  %v7542_v30 = vld [vmem:[#allocation2 + $0x2b8] sm:$0xff]  ;;  %7740 = vst [vmem:[#allocation2 + $0x288] sm:$0xff] %v7638_v57 }
 0x457   : > { %v7642_v2 = vmax.f32 %v7540_v6, %v14920_v29  ;;  %v7643_v14 = vmax.f32 %v7541_v39, %v14921_v12  ;;  %v7543_v3 = vld [vmem:[#allocation2 + $0x2c0] sm:$0xff]  ;;  %v7544_v32 = vld [vmem:[#allocation2 + $0x2c8] sm:$0xff]  ;;  %7741 = vst [vmem:[#allocation2 + $0x290] sm:$0xff] %v7639_v51  ;;  %7742 = vst [vmem:[#allocation2 + $0x298] sm:$0xff] %v7640_v46 }
 0x458   : > { %v14922_v7 = vld [vmem:[#allocation101_spill] sm:$0xff]  ;;  %v14924_v62 = vld [vmem:[#allocation110_spill] sm:$0xff]  ;;  %v7545_v18 = vld [vmem:[#allocation2 + $0x2d0] sm:$0xff]  ;;  %7743 = vst [vmem:[#allocation2 + $0x2a0] sm:$0xff] %v7641_v42 }
 0x459   : > { %v7644_v43 = vmax.f32 %v7542_v30, %v14922_v7  ;;  %v14923_v5 = vld [vmem:[#allocation21_spill] sm:$0xff]  ;;  %v7646_v0 = vmax.f32 %v7544_v32, %v14924_v62  ;;  %v7547_v20 = vld [vmem:[#allocation2 + $0x2e0] sm:$0xff]  ;;  %7744 = vst [vmem:[#allocation2 + $0x2a8] sm:$0xff] %v7642_v2  ;;  %7745 = vst [vmem:[#allocation2 + $0x2b0] sm:$0xff] %v7643_v14 }
 0x45a   : > { %v7645_v27 = vmax.f32 %v7543_v3, %v14923_v5  ;;  %v7546_v19 = vld [vmem:[#allocation2 + $0x2d8] sm:$0xff]  ;;  %v14925_v34 = vld [vmem:[#allocation104_spill] sm:$0xff]  ;;  %v14926_v44 = vld [vmem:[#allocation22_spill] sm:$0xff] }
 0x45b   : > { %v7647_v37 = vmax.f32 %v7545_v18, %v14925_v34  ;;  %v7648_v49 = vmax.f32 %v7546_v19, %v14926_v44  ;;  %v14927_v41 = vld [vmem:[#allocation24_spill] sm:$0xff]  ;;  %v7548_v26 = vld [vmem:[#allocation2 + $0x2e8] sm:$0xff]  ;;  %v7550_v47 = vld [vmem:[#allocation2 + $0x2f8] sm:$0xff]  ;;  %7746 = vst [vmem:[#allocation2 + $0x2b8] sm:$0xff] %v7644_v43 }
 0x45c   : > { %v7649_v50 = vmax.f32 %v7547_v20, %v14927_v41  ;;  %v7549_v22 = vld [vmem:[#allocation2 + $0x2f0] sm:$0xff]  ;;  %7747 = vst [vmem:[#allocation2 + $0x2c0] sm:$0xff] %v7645_v27  ;;  %7748 = vst [vmem:[#allocation2 + $0x2c8] sm:$0xff] %v7646_v0  ;;  %v14928_v1 = vld [vmem:[#allocation25_spill] sm:$0xff] }
 0x45d   : > { %v7650_v23 = vmax.f32 %v7548_v26, %v14928_v1  ;;  %v14929_v54 = vld [vmem:[#allocation114_spill] sm:$0xff]  ;;  %v14930_v55 = vld [vmem:[#allocation107_spill] sm:$0xff]  ;;  %v7553_v16 = vld [vmem:[#allocation2 + $0x310] sm:$0xff]  ;;  %7749 = vst [vmem:[#allocation2 + $0x2d0] sm:$0xff] %v7647_v37 }
 0x45e   : > { %v7651_v15 = vmax.f32 %v7549_v22, %v14929_v54  ;;  %v7652_v10 = vmax.f32 %v7550_v47, %v14930_v55  ;;  %v7551_v35 = vld [vmem:[#allocation2 + $0x300] sm:$0xff]  ;;  %v7552_v36 = vld [vmem:[#allocation2 + $0x308] sm:$0xff]  ;;  %7750 = vst [vmem:[#allocation2 + $0x2d8] sm:$0xff] %v7648_v49  ;;  %7751 = vst [vmem:[#allocation2 + $0x2e0] sm:$0xff] %v7649_v50 }
 0x45f   : > { %v14931_v52 = vld [vmem:[#allocation28_spill] sm:$0xff]  ;;  %v7654_v28 = vmax.f32 %v7552_v36, %v13476_v8  ;;  %v14932_v40 = vld [vmem:[#allocation118_spill] sm:$0xff]  ;;  %v7554_v56 = vld [vmem:[#allocation2 + $0x318] sm:$0xff]  ;;  %7752 = vst [vmem:[#allocation2 + $0x2e8] sm:$0xff] %v7650_v23 }
 0x460   : > { %v7653_v38 = vmax.f32 %v7551_v35, %v14931_v52  ;;  %v7655_v33 = vmax.f32 %v7553_v16, %v14932_v40  ;;  %v7555_v45 = vld [vmem:[#allocation2 + $0x320] sm:$0xff]  ;;  %v7556_v13 = vld [vmem:[#allocation2 + $0x328] sm:$0xff]  ;;  %7753 = vst [vmem:[#allocation2 + $0x2f0] sm:$0xff] %v7651_v15  ;;  %7754 = vst [vmem:[#allocation2 + $0x2f8] sm:$0xff] %v7652_v10 }
 0x461   : > { %v14933_v58 = vld [vmem:[#allocation29_spill] sm:$0xff]  ;;  %v7658_v11 = vmax.f32 %v7556_v13, %v13501_v61  ;;  %7756 = vst [vmem:[#allocation2 + $0x308] sm:$0xff] %v7654_v28 }
 0x462   : > { %v7656_v24 = vmax.f32 %v7554_v56, %v14933_v58  ;;  %v14934_v17 = vld [vmem:[#allocation109_spill] sm:$0xff]  ;;  %7755 = vst [vmem:[#allocation2 + $0x300] sm:$0xff] %v7653_v38  ;;  %7757 = vst [vmem:[#allocation2 + $0x310] sm:$0xff] %v7655_v33 }
 0x463   : > { %v7657_v21 = vmax.f32 %v7555_v45, %v14934_v17  ;;  %7760 = vst [vmem:[#allocation2 + $0x328] sm:$0xff] %v7658_v11 }
 0x464   : > { %7758 = vst [vmem:[#allocation2 + $0x318] sm:$0xff] %v7656_v24 }
 0x465   : > { %7759 = vst [vmem:[#allocation2 + $0x320] sm:$0xff] %v7657_v21 }
 0x466 PF: > { %p9298_p13 = scmp.ne.s32.totalorder %s10289_s17, 2 }
 0x467   : > { %v7869_v8 = vld [vmem:[%s14127_s2 + $0x10] sm:$0xff] (!%p9298_p13)  ;;  %v7867_v59 = vld [vmem:[%s14127_s2] sm:$0xff] (!%p9298_p13)  ;;  %v10309_v31 = vmov (!%p9298_p13), 0   ;;  %v7868_v9 = vld [vmem:[%s14127_s2 + $0x8] sm:$0xff] (!%p9298_p13) }
 0x468   : > { %7764 = sbr.rel (%p9298_p13) target bundleno = 1357 (0x54d), region = 71  ;;  %10250 = vset.pattern.permute.xlu1 (!%p9298_p13), %v10309_v31  ;;  %10249 = vset.pattern.permute.xlu0 (!%p9298_p13), %v10309_v31  ;;  %v7987_v61 = vld [vmem:[%s14128_s3] sm:$0xff] (!%p9298_p13)  ;;  %v7989_v4 = vld [vmem:[%s14128_s3 + $0x10] sm:$0xff] (!%p9298_p13)  ;;  %v7988_v25 = vld [vmem:[%s14128_s3 + $0x8] sm:$0xff] (!%p9298_p13) }
 0x469   : > { %7882 = vperm.xlu1 (!%p9298_p13), %10250, %v7869_v8   ;;  %7872 = vperm.xlu0 (!%p9298_p13), %10249, %v7867_v59   ;;  %v7765_v57 = vld [vmem:[#allocation2] sm:$0xff] (!%p9298_p13)  ;;  %v7766_v60 = vld [vmem:[#allocation2 + $0x8] sm:$0xff] (!%p9298_p13)  ;;  %v7767_v51 = vld [vmem:[#allocation2 + $0x10] sm:$0xff] (!%p9298_p13) }
 0x46a   : > { %v7768_v53 = vld [vmem:[#allocation2 + $0x18] sm:$0xff] (!%p9298_p13)  ;;  %v7769_v46 = vld [vmem:[#allocation2 + $0x20] sm:$0xff] (!%p9298_p13)  ;;  %v7770_v48 = vld [vmem:[#allocation2 + $0x28] sm:$0xff] (!%p9298_p13) }
 0x46b   : > { %v7771_v6 = vld [vmem:[#allocation2 + $0x30] sm:$0xff] (!%p9298_p13)  ;;  %v7772_v39 = vld [vmem:[#allocation2 + $0x38] sm:$0xff] (!%p9298_p13)  ;;  %v7777_v12 = vld [vmem:[#allocation2 + $0x60] sm:$0xff] (!%p9298_p13) }
 0x46c   : > { %v7773_v63 = vld [vmem:[#allocation2 + $0x40] sm:$0xff] (!%p9298_p13)  ;;  %v7774_v42 = vld [vmem:[#allocation2 + $0x48] sm:$0xff] (!%p9298_p13)  ;;  %v7779_v32 = vld [vmem:[#allocation2 + $0x70] sm:$0xff] (!%p9298_p13) }
 0x46d   : > { %7992 = vperm.xlu1 (!%p9298_p13), %10250, %v7987_v61   ;;  %7877 = vperm.xlu0 (!%p9298_p13), %10249, %v7868_v9   ;;  %v7775_v29 = vld [vmem:[#allocation2 + $0x50] sm:$0xff] (!%p9298_p13)  ;;  %v7776_v2 = vld [vmem:[#allocation2 + $0x58] sm:$0xff] (!%p9298_p13)  ;;  %v7778_v14 = vld [vmem:[#allocation2 + $0x68] sm:$0xff] (!%p9298_p13) }
 0x46e   : > { %v7780_v7 = vld [vmem:[#allocation2 + $0x78] sm:$0xff] (!%p9298_p13)  ;;  %v7781_v43 = vld [vmem:[#allocation2 + $0x80] sm:$0xff] (!%p9298_p13)  ;;  %v7782_v5 = vld [vmem:[#allocation2 + $0x88] sm:$0xff] (!%p9298_p13) }
 0x46f   : > { %v7783_v27 = vld [vmem:[#allocation2 + $0x90] sm:$0xff]  ;;  %v7784_v62 = vld [vmem:[#allocation2 + $0x98] sm:$0xff]  ;;  %v7785_v34 = vld [vmem:[#allocation2 + $0xa0] sm:$0xff] }
 0x470   : > { %v7786_v37 = vld [vmem:[#allocation2 + $0xa8] sm:$0xff]  ;;  %v7787_v44 = vld [vmem:[#allocation2 + $0xb0] sm:$0xff]  ;;  %v7788_v22 = vld [vmem:[#allocation2 + $0xb8] sm:$0xff] }
 0x471   : > { %8002 = vperm.xlu1 %10250, %v7989_v4   ;;  %7997 = vperm.xlu0 %10249, %v7988_v25   ;;  %v7789_v47 = vld [vmem:[#allocation2 + $0xc0] sm:$0xff]  ;;  %v7790_v1 = vld [vmem:[#allocation2 + $0xc8] sm:$0xff]  ;;  %v7791_v10 = vld [vmem:[#allocation2 + $0xd0] sm:$0xff] }
 0x472   : > { %v7792_v35 = vld [vmem:[#allocation2 + $0xd8] sm:$0xff]  ;;  %v7793_v36 = vld [vmem:[#allocation2 + $0xe0] sm:$0xff]  ;;  %v7794_v40 = vld [vmem:[#allocation2 + $0xe8] sm:$0xff] }
 0x473   : > { %v7795_v33 = vld [vmem:[#allocation2 + $0xf0] sm:$0xff]  ;;  %v7796_v56 = vld [vmem:[#allocation2 + $0xf8] sm:$0xff]  ;;  %v7797_v17 = vld [vmem:[#allocation2 + $0x100] sm:$0xff] }
 0x474   : > { %v7798_v21 = vld [vmem:[#allocation2 + $0x108] sm:$0xff] }
 0x4e8   : > { %v13738_v30 = vpop.permute.xlu1 %7882  ;;  %v7873_v3 = vpop.permute.xlu0 %7872 }
 0x4e9   : > { %v7885_v0 = vmul.f32 %v7873_v3, %v7765_v57  ;;  %v7886_v18 = vmul.f32 %v7873_v3, %v7766_v60  ;;  %v7887_v19 = vmul.f32 %v7873_v3, %v7767_v51  ;;  %v7888_v20 = vmul.f32 %v7873_v3, %v7768_v53 }
 0x4ea   : > { %v7889_v49 = vmul.f32 %v7873_v3, %v7769_v46  ;;  %v7890_v41 = vmul.f32 %v7873_v3, %v7770_v48  ;;  %v7891_v50 = vmul.f32 %v7873_v3, %v7771_v6  ;;  %v7892_v26 = vmul.f32 %v7873_v3, %v7772_v39 }
 0x4eb   : > { %v7893_v23 = vmul.f32 %v7873_v3, %v7773_v63  ;;  %v7894_v54 = vmul.f32 %v7873_v3, %v7774_v42  ;;  %v7895_v15 = vmul.f32 %v7873_v3, %v7775_v29  ;;  %v7896_v55 = vmul.f32 %v7873_v3, %v7776_v2 }
 0x4ec   : > { %v7897_v16 = vmul.f32 %v7873_v3, %v7777_v12  ;;  %v7898_v52 = vmul.f32 %v7873_v3, %v7778_v14  ;;  %v7899_v38 = vmul.f32 %v7873_v3, %v7779_v32  ;;  %v7900_v28 = vmul.f32 %v7873_v3, %v7780_v7  ;;  %v7993_v61 = vpop.permute.xlu1 %7992 }
 0x4ed   : > { %v7901_v45 = vmul.f32 %v7873_v3, %v7781_v43  ;;  %v7902_v13 = vmul.f32 %v7873_v3, %v7782_v5  ;;  %v7903_v58 = vmul.f32 %v7873_v3, %v7783_v27  ;;  %v7904_v24 = vmul.f32 %v7873_v3, %v7784_v62 }
 0x4ee   : > { %v7905_v11 = vmul.f32 %v7873_v3, %v7785_v34  ;;  %v7906_v8 = vmul.f32 %v7873_v3, %v7786_v37  ;;  %v7907_v59 = vmul.f32 %v7873_v3, %v7787_v44  ;;  %v7908_v31 = vmul.f32 %v7873_v3, %v7788_v22 }
 0x4ef   : > { %v7909_v9 = vmul.f32 %v7873_v3, %v7789_v47  ;;  %v7910_v4 = vmul.f32 %v7873_v3, %v7790_v1  ;;  %v7911_v25 = vmul.f32 %v7873_v3, %v7791_v10  ;;  %v7912_v57 = vmul.f32 %v7873_v3, %v7792_v35 }
 0x4f0   : > { %v7913_v60 = vmul.f32 %v7873_v3, %v7793_v36  ;;  %v7914_v51 = vmul.f32 %v7873_v3, %v7794_v40  ;;  %v7915_v53 = vmul.f32 %v7873_v3, %v7795_v33  ;;  %v7916_v46 = vmul.f32 %v7873_v3, %v7796_v56 }
 0x4f1   : > { %v7917_v48 = vmul.f32 %v7873_v3, %v7797_v17  ;;  %v7918_v6 = vmul.f32 %v7873_v3, %v7798_v21  ;;  %v13740_v39 = vadd.f32 %v7993_v61, %v7885_v0  ;;  %v13742_v63 = vadd.f32 %v7993_v61, %v7886_v18 }
 0x4f2   : > { %v13744_v42 = vadd.f32 %v7993_v61, %v7887_v19  ;;  %v13746_v29 = vadd.f32 %v7993_v61, %v7888_v20  ;;  %v13748_v2 = vadd.f32 %v7993_v61, %v7889_v49  ;;  %v13750_v12 = vadd.f32 %v7993_v61, %v7890_v41 }
 0x4f3   : > { %v13752_v14 = vadd.f32 %v7993_v61, %v7891_v50  ;;  %v13754_v32 = vadd.f32 %v7993_v61, %v7892_v26  ;;  %v13756_v7 = vadd.f32 %v7993_v61, %v7893_v23  ;;  %v13758_v43 = vadd.f32 %v7993_v61, %v7894_v54 }
 0x4f4   : > { %v13760_v3 = vadd.f32 %v7993_v61, %v7895_v15  ;;  %v13762_v5 = vadd.f32 %v7993_v61, %v7896_v55  ;;  %v13764_v27 = vadd.f32 %v7993_v61, %v7897_v16  ;;  %v13766_v62 = vadd.f32 %v7993_v61, %v7898_v52 }
 0x4f5   : > { %v13768_v0 = vadd.f32 %v7993_v61, %v7899_v38  ;;  %v13770_v18 = vadd.f32 %v7993_v61, %v7900_v28  ;;  %v13772_v19 = vadd.f32 %v7993_v61, %v7901_v45  ;;  %v13774_v20 = vadd.f32 %v7993_v61, %v7902_v13 }
 0x4f6   : > { %v13776_v34 = vadd.f32 %v7993_v61, %v7903_v58  ;;  %v13778_v37 = vadd.f32 %v7993_v61, %v7904_v24  ;;  %v13780_v44 = vadd.f32 %v7993_v61, %v7905_v11  ;;  %v13782_v49 = vadd.f32 %v7993_v61, %v7906_v8 }
 0x4f7   : > { %v13784_v41 = vadd.f32 %v7993_v61, %v7907_v59  ;;  %v13786_v50 = vadd.f32 %v7993_v61, %v7908_v31  ;;  %v13788_v26 = vadd.f32 %v7993_v61, %v7909_v9  ;;  %v13790_v22 = vadd.f32 %v7993_v61, %v7910_v4 }
 0x4f8   : > { %v13792_v47 = vadd.f32 %v7993_v61, %v7911_v25  ;;  %v13794_v1 = vadd.f32 %v7993_v61, %v7912_v57  ;;  %v13796_v23 = vadd.f32 %v7993_v61, %v7913_v60  ;;  %v13798_v54 = vadd.f32 %v7993_v61, %v7914_v51 }
 0x4f9   : > { %v13800_v15 = vadd.f32 %v7993_v61, %v7915_v53  ;;  %v13802_v55 = vadd.f32 %v7993_v61, %v7916_v46  ;;  %v13804_v10 = vadd.f32 %v7993_v61, %v7917_v48  ;;  %v13806_v35 = vadd.f32 %v7993_v61, %v7918_v6 }
 0x4fa   : > { %v8107_v36 = vmax.f32 %v13740_v39, 0.0  ;;  %v8108_v16 = vmax.f32 %v13742_v63, 0.0  ;;  %v8109_v52 = vmax.f32 %v13744_v42, 0.0  ;;  %v8110_v38 = vmax.f32 %v13746_v29, 0.0  ;;  %v7833_v29 = vld [vmem:[#allocation2 + $0x220] sm:$0xff] }
 0x4fb   : > { %v8111_v28 = vmax.f32 %v13748_v2, 0.0  ;;  %v8112_v40 = vmax.f32 %v13750_v12, 0.0  ;;  %v8113_v33 = vmax.f32 %v13752_v14, 0.0  ;;  %v8114_v56 = vmax.f32 %v13754_v32, 0.0 }
 0x4fc   : > { %v8115_v45 = vmax.f32 %v13756_v7, 0.0  ;;  %v8116_v13 = vmax.f32 %v13758_v43, 0.0  ;;  %v8117_v58 = vmax.f32 %v13760_v3, 0.0  ;;  %v8118_v24 = vmax.f32 %v13762_v5, 0.0  ;;  %v7834_v7 = vld [vmem:[#allocation2 + $0x228] sm:$0xff]  ;;  %v7835_v43 = vld [vmem:[#allocation2 + $0x230] sm:$0xff] }
 0x4fd   : > { %v8119_v17 = vmax.f32 %v13764_v27, 0.0  ;;  %v8120_v21 = vmax.f32 %v13766_v62, 0.0  ;;  %v8121_v11 = vmax.f32 %v13768_v0, 0.0  ;;  %v8122_v8 = vmax.f32 %v13770_v18, 0.0  ;;  %v7836_v3 = vld [vmem:[#allocation2 + $0x238] sm:$0xff]  ;;  %v7837_v5 = vld [vmem:[#allocation2 + $0x240] sm:$0xff] }
 0x4fe   : > { %v8123_v59 = vmax.f32 %v13772_v19, 0.0  ;;  %v8124_v31 = vmax.f32 %v13774_v20, 0.0  ;;  %v8125_v61 = vmax.f32 %v13776_v34, 0.0  ;;  %v8126_v9 = vmax.f32 %v13778_v37, 0.0  ;;  %v7838_v19 = vld [vmem:[#allocation2 + $0x248] sm:$0xff]  ;;  %v7839_v20 = vld [vmem:[#allocation2 + $0x250] sm:$0xff] }
 0x4ff   : > { %v8127_v4 = vmax.f32 %v13780_v44, 0.0  ;;  %v8128_v25 = vmax.f32 %v13782_v49, 0.0  ;;  %v8129_v57 = vmax.f32 %v13784_v41, 0.0  ;;  %v8130_v60 = vmax.f32 %v13786_v50, 0.0  ;;  %v7840_v34 = vld [vmem:[#allocation2 + $0x258] sm:$0xff]  ;;  %v7841_v37 = vld [vmem:[#allocation2 + $0x260] sm:$0xff] }
 0x500   : > { %v8131_v51 = vmax.f32 %v13788_v26, 0.0  ;;  %v8132_v53 = vmax.f32 %v13790_v22, 0.0  ;;  %v8133_v46 = vmax.f32 %v13792_v47, 0.0  ;;  %v8134_v48 = vmax.f32 %v13794_v1, 0.0  ;;  %v7842_v26 = vld [vmem:[#allocation2 + $0x268] sm:$0xff]  ;;  %v7843_v22 = vld [vmem:[#allocation2 + $0x270] sm:$0xff] }
 0x501   : > { %v8135_v6 = vmax.f32 %v13796_v23, 0.0  ;;  %v8136_v39 = vmax.f32 %v13798_v54, 0.0  ;;  %v8137_v63 = vmax.f32 %v13800_v15, 0.0  ;;  %v8138_v42 = vmax.f32 %v13802_v55, 0.0  ;;  %v7844_v47 = vld [vmem:[#allocation2 + $0x278] sm:$0xff]  ;;  %v7845_v55 = vld [vmem:[#allocation2 + $0x280] sm:$0xff] }
 0x502   : > { %v8139_v2 = vmax.f32 %v13804_v10, 0.0  ;;  %v8140_v12 = vmax.f32 %v13806_v35, 0.0  ;;  %v9352_v14 = vpack.c.bf16 %v8108_v16, %v8107_v36  ;;  %v9353_v32 = vpack.c.bf16 %v8110_v38, %v8109_v52  ;;  %v7846_v10 = vld [vmem:[#allocation2 + $0x288] sm:$0xff]  ;;  %v7847_v35 = vld [vmem:[#allocation2 + $0x290] sm:$0xff]  ;;  %v7848_v38 = vld [vmem:[#allocation2 + $0x298] sm:$0xff] }
 0x503   : > { %v9354_v27 = vpack.c.bf16 %v8112_v40, %v8111_v28  ;;  %v9355_v62 = vpack.c.bf16 %v8114_v56, %v8113_v33  ;;  %v9356_v0 = vpack.c.bf16 %v8116_v13, %v8115_v45  ;;  %v9357_v18 = vpack.c.bf16 %v8118_v24, %v8117_v58  ;;  %v7849_v28 = vld [vmem:[#allocation2 + $0x2a0] sm:$0xff]  ;;  %v7850_v40 = vld [vmem:[#allocation2 + $0x2a8] sm:$0xff]  ;;  %v7851_v56 = vld [vmem:[#allocation2 + $0x2b0] sm:$0xff] }
 0x504   : > { %v9358_v44 = vpack.c.bf16 %v8120_v21, %v8119_v17  ;;  %v9359_v49 = vpack.c.bf16 %v8122_v8, %v8121_v11  ;;  %v9360_v41 = vpack.c.bf16 %v8124_v31, %v8123_v59  ;;  %v9361_v50 = vpack.c.bf16 %v8126_v9, %v8125_v61  ;;  %8549 = vst [vmem:[%s11433_s27] sm:$0xff] %v9352_v14  ;;  %v7852_v45 = vld [vmem:[#allocation2 + $0x2b8] sm:$0xff]  ;;  %v7853_v13 = vld [vmem:[#allocation2 + $0x2c0] sm:$0xff]  ;;  %v7854_v11 = vld [vmem:[#allocation2 + $0x2c8] sm:$0xff] }
 0x505   : > { %8550 = vst [vmem:[%s11433_s27 + $0x8] sm:$0xff] %v9353_v32  ;;  %v9362_v1 = vpack.c.bf16 %v8128_v25, %v8127_v4  ;;  %v9363_v23 = vpack.c.bf16 %v8130_v60, %v8129_v57  ;;  %v9364_v54 = vpack.c.bf16 %v8132_v53, %v8131_v51  ;;  %v9365_v15 = vpack.c.bf16 %v8134_v48, %v8133_v46  ;;  %v7855_v8 = vld [vmem:[#allocation2 + $0x2d0] sm:$0xff]  ;;  %v7856_v59 = vld [vmem:[#allocation2 + $0x2d8] sm:$0xff]  ;;  %v7857_v25 = vld [vmem:[#allocation2 + $0x2e0] sm:$0xff] }
 0x506   : > { %8551 = vst [vmem:[%s11433_s27 + $0x10] sm:$0xff] %v9354_v27  ;;  %8552 = vst [vmem:[%s11433_s27 + $0x18] sm:$0xff] %v9355_v62  ;;  %v9366_v36 = vpack.c.bf16 %v8136_v39, %v8135_v6  ;;  %v9367_v16 = vpack.c.bf16 %v8138_v42, %v8137_v63  ;;  %v9368_v52 = vpack.c.bf16 %v8140_v12, %v8139_v2  ;;  %v7858_v57 = vld [vmem:[#allocation2 + $0x2e8] sm:$0xff]  ;;  %v7859_v60 = vld [vmem:[#allocation2 + $0x2f0] sm:$0xff]  ;;  %v8003_v62 = vpop.permute.xlu1 %8002 }
 0x507   : > { %8553 = vst [vmem:[%s11433_s27 + $0x20] sm:$0xff] %v9356_v0  ;;  %8554 = vst [vmem:[%s11433_s27 + $0x28] sm:$0xff] %v9357_v18  ;;  %v7953_v33 = vmul.f32 %v13738_v30, %v7833_v29  ;;  %v7954_v58 = vmul.f32 %v13738_v30, %v7834_v7  ;;  %v7955_v24 = vmul.f32 %v13738_v30, %v7835_v43  ;;  %v7860_v6 = vld [vmem:[#allocation2 + $0x2f8] sm:$0xff]  ;;  %v7861_v39 = vld [vmem:[#allocation2 + $0x300] sm:$0xff] }
 0x508   : > { %8555 = vst [vmem:[%s11433_s27 + $0x30] sm:$0xff] %v9358_v44  ;;  %8556 = vst [vmem:[%s11433_s27 + $0x38] sm:$0xff] %v9359_v49  ;;  %v7956_v17 = vmul.f32 %v13738_v30, %v7836_v3  ;;  %v7957_v21 = vmul.f32 %v13738_v30, %v7837_v5  ;;  %v7958_v31 = vmul.f32 %v13738_v30, %v7838_v19  ;;  %v7862_v63 = vld [vmem:[#allocation2 + $0x308] sm:$0xff]  ;;  %v7863_v14 = vld [vmem:[#allocation2 + $0x310] sm:$0xff] }
 0x509   : > { %8557 = vst [vmem:[%s11433_s27 + $0x40] sm:$0xff] %v9360_v41  ;;  %8558 = vst [vmem:[%s11433_s27 + $0x48] sm:$0xff] %v9361_v50  ;;  %v7959_v61 = vmul.f32 %v13738_v30, %v7839_v20  ;;  %v7960_v9 = vmul.f32 %v13738_v30, %v7840_v34  ;;  %v7961_v4 = vmul.f32 %v13738_v30, %v7841_v37  ;;  %v7864_v32 = vld [vmem:[#allocation2 + $0x318] sm:$0xff]  ;;  %v7865_v7 = vld [vmem:[#allocation2 + $0x320] sm:$0xff] }
 0x50a   : > { %8559 = vst [vmem:[%s11433_s27 + $0x50] sm:$0xff] %v9362_v1  ;;  %8560 = vst [vmem:[%s11433_s27 + $0x58] sm:$0xff] %v9363_v23  ;;  %v7962_v51 = vmul.f32 %v13738_v30, %v7842_v26  ;;  %v7963_v53 = vmul.f32 %v13738_v30, %v7843_v22  ;;  %v7964_v46 = vmul.f32 %v13738_v30, %v7844_v47  ;;  %v7866_v0 = vld [vmem:[#allocation2 + $0x328] sm:$0xff] }
 0x50b   : > { %8561 = vst [vmem:[%s11433_s27 + $0x60] sm:$0xff] %v9364_v54  ;;  %8562 = vst [vmem:[%s11433_s27 + $0x68] sm:$0xff] %v9365_v15  ;;  %v7965_v48 = vmul.f32 %v13738_v30, %v7845_v55  ;;  %v7966_v42 = vmul.f32 %v13738_v30, %v7846_v10  ;;  %v7967_v29 = vmul.f32 %v13738_v30, %v7847_v35 }
 0x50c   : > { %8563 = vst [vmem:[%s11433_s27 + $0x70] sm:$0xff] %v9366_v36  ;;  %8564 = vst [vmem:[%s11433_s27 + $0x78] sm:$0xff] %v9367_v16  ;;  %v7968_v2 = vmul.f32 %v13738_v30, %v7848_v38  ;;  %v7969_v12 = vmul.f32 %v13738_v30, %v7849_v28  ;;  %v7970_v43 = vmul.f32 %v13738_v30, %v7850_v40 }
 0x50d   : > { %8565 = vst [vmem:[%s11433_s27 + $0x80] sm:$0xff] %v9368_v52  ;;  %v7971_v3 = vmul.f32 %v13738_v30, %v7851_v56  ;;  %v7972_v5 = vmul.f32 %v13738_v30, %v7852_v45  ;;  %v7973_v27 = vmul.f32 %v13738_v30, %v7853_v13  ;;  %v7974_v18 = vmul.f32 %v13738_v30, %v7854_v11 }
 0x50e   : > { %v7975_v19 = vmul.f32 %v13738_v30, %v7855_v8  ;;  %v7976_v20 = vmul.f32 %v13738_v30, %v7856_v59  ;;  %v7977_v34 = vmul.f32 %v13738_v30, %v7857_v25  ;;  %v7978_v37 = vmul.f32 %v13738_v30, %v7858_v57 }
 0x50f   : > { %v7979_v44 = vmul.f32 %v13738_v30, %v7859_v60  ;;  %v7980_v49 = vmul.f32 %v13738_v30, %v7860_v6  ;;  %v7981_v41 = vmul.f32 %v13738_v30, %v7861_v39  ;;  %v7982_v50 = vmul.f32 %v13738_v30, %v7862_v63 }
 0x510   : > { %v7983_v26 = vmul.f32 %v13738_v30, %v7863_v14  ;;  %v7984_v22 = vmul.f32 %v13738_v30, %v7864_v32  ;;  %v7985_v47 = vmul.f32 %v13738_v30, %v7865_v7  ;;  %v7986_v1 = vmul.f32 %v13738_v30, %v7866_v0 }
 0x511   : > { %v13893_v23 = vadd.f32 %v8003_v62, %v7953_v33  ;;  %v13895_v54 = vadd.f32 %v8003_v62, %v7954_v58  ;;  %v13897_v15 = vadd.f32 %v8003_v62, %v7955_v24  ;;  %v13899_v55 = vadd.f32 %v8003_v62, %v7956_v17 }
 0x512   : > { %v13901_v10 = vadd.f32 %v8003_v62, %v7957_v21  ;;  %v13903_v35 = vadd.f32 %v8003_v62, %v7958_v31  ;;  %v13905_v36 = vadd.f32 %v8003_v62, %v7959_v61  ;;  %v13907_v16 = vadd.f32 %v8003_v62, %v7960_v9 }
 0x513   : > { %v13909_v52 = vadd.f32 %v8003_v62, %v7961_v4  ;;  %v13911_v38 = vadd.f32 %v8003_v62, %v7962_v51  ;;  %v13913_v30 = vadd.f32 %v8003_v62, %v7963_v53  ;;  %v13915_v28 = vadd.f32 %v8003_v62, %v7964_v46 }
 0x514   : > { %v13917_v40 = vadd.f32 %v8003_v62, %v7965_v48  ;;  %v13919_v33 = vadd.f32 %v8003_v62, %v7966_v42  ;;  %v13921_v56 = vadd.f32 %v8003_v62, %v7967_v29  ;;  %v13923_v45 = vadd.f32 %v8003_v62, %v7968_v2 }
 0x515   : > { %v13925_v13 = vadd.f32 %v8003_v62, %v7969_v12  ;;  %v13927_v58 = vadd.f32 %v8003_v62, %v7970_v43  ;;  %v13929_v24 = vadd.f32 %v8003_v62, %v7971_v3  ;;  %v13931_v17 = vadd.f32 %v8003_v62, %v7972_v5 }
 0x516   : > { %v13933_v21 = vadd.f32 %v8003_v62, %v7973_v27  ;;  %v13935_v11 = vadd.f32 %v8003_v62, %v7974_v18  ;;  %v13937_v8 = vadd.f32 %v8003_v62, %v7975_v19  ;;  %v13939_v59 = vadd.f32 %v8003_v62, %v7976_v20 }
 0x517   : > { %v13941_v31 = vadd.f32 %v8003_v62, %v7977_v34  ;;  %v13943_v61 = vadd.f32 %v8003_v62, %v7978_v37  ;;  %v13945_v9 = vadd.f32 %v8003_v62, %v7979_v44  ;;  %v13947_v4 = vadd.f32 %v8003_v62, %v7980_v49 }
 0x518   : > { %v13949_v25 = vadd.f32 %v8003_v62, %v7981_v41  ;;  %v13951_v57 = vadd.f32 %v8003_v62, %v7982_v50  ;;  %v13953_v60 = vadd.f32 %v8003_v62, %v7983_v26  ;;  %v13955_v51 = vadd.f32 %v8003_v62, %v7984_v22 }
 0x519   : > { %v13957_v53 = vadd.f32 %v8003_v62, %v7985_v47  ;;  %v13959_v46 = vadd.f32 %v8003_v62, %v7986_v1  ;;  %v8175_v48 = vmax.f32 %v13893_v23, 0.0  ;;  %v8176_v6 = vmax.f32 %v13895_v54, 0.0 }
 0x51a   : > { %v8177_v39 = vmax.f32 %v13897_v15, 0.0  ;;  %v8178_v63 = vmax.f32 %v13899_v55, 0.0  ;;  %v8179_v42 = vmax.f32 %v13901_v10, 0.0  ;;  %v8180_v29 = vmax.f32 %v13903_v35, 0.0  ;;  %v7799_v55 = vld [vmem:[#allocation2 + $0x110] sm:$0xff]  ;;  %v7800_v10 = vld [vmem:[#allocation2 + $0x118] sm:$0xff] }
 0x51b   : > { %v8181_v2 = vmax.f32 %v13905_v36, 0.0  ;;  %v8182_v12 = vmax.f32 %v13907_v16, 0.0  ;;  %v8183_v14 = vmax.f32 %v13909_v52, 0.0  ;;  %v8184_v32 = vmax.f32 %v13911_v38, 0.0  ;;  %v7801_v38 = vld [vmem:[#allocation2 + $0x120] sm:$0xff] }
 0x51c   : > { %v8185_v7 = vmax.f32 %v13913_v30, 0.0  ;;  %v8186_v43 = vmax.f32 %v13915_v28, 0.0  ;;  %v8187_v3 = vmax.f32 %v13917_v40, 0.0  ;;  %v8188_v5 = vmax.f32 %v13919_v33, 0.0  ;;  %v7802_v30 = vld [vmem:[#allocation2 + $0x128] sm:$0xff]  ;;  %v7803_v28 = vld [vmem:[#allocation2 + $0x130] sm:$0xff]  ;;  %v13995_v33 = vpop.permute.xlu0 %7877 }
 0x51d   : > { %v8189_v27 = vmax.f32 %v13921_v56, 0.0  ;;  %v8190_v62 = vmax.f32 %v13923_v45, 0.0  ;;  %v8191_v0 = vmax.f32 %v13925_v13, 0.0  ;;  %v8192_v18 = vmax.f32 %v13927_v58, 0.0  ;;  %v7804_v40 = vld [vmem:[#allocation2 + $0x138] sm:$0xff] }
 0x51e   : > { %v8193_v19 = vmax.f32 %v13929_v24, 0.0  ;;  %v8194_v20 = vmax.f32 %v13931_v17, 0.0  ;;  %v8195_v34 = vmax.f32 %v13933_v21, 0.0  ;;  %v8196_v37 = vmax.f32 %v13935_v11, 0.0  ;;  %v7805_v24 = vld [vmem:[#allocation2 + $0x140] sm:$0xff]  ;;  %v7806_v17 = vld [vmem:[#allocation2 + $0x148] sm:$0xff] }
 0x51f   : > { %v8197_v44 = vmax.f32 %v13937_v8, 0.0  ;;  %v8198_v49 = vmax.f32 %v13939_v59, 0.0  ;;  %v8199_v41 = vmax.f32 %v13941_v31, 0.0  ;;  %v8200_v50 = vmax.f32 %v13943_v61, 0.0  ;;  %v7807_v21 = vld [vmem:[#allocation2 + $0x150] sm:$0xff]  ;;  %v7808_v11 = vld [vmem:[#allocation2 + $0x158] sm:$0xff] }
 0x520   : > { %v8201_v26 = vmax.f32 %v13945_v9, 0.0  ;;  %v8202_v22 = vmax.f32 %v13947_v4, 0.0  ;;  %v8203_v47 = vmax.f32 %v13949_v25, 0.0  ;;  %v8204_v1 = vmax.f32 %v13951_v57, 0.0  ;;  %v7809_v9 = vld [vmem:[#allocation2 + $0x160] sm:$0xff]  ;;  %v7810_v4 = vld [vmem:[#allocation2 + $0x168] sm:$0xff] }
 0x521   : > { %v8205_v23 = vmax.f32 %v13953_v60, 0.0  ;;  %v8206_v54 = vmax.f32 %v13955_v51, 0.0  ;;  %v8207_v15 = vmax.f32 %v13957_v53, 0.0  ;;  %v8208_v35 = vmax.f32 %v13959_v46, 0.0  ;;  %v7811_v25 = vld [vmem:[#allocation2 + $0x170] sm:$0xff]  ;;  %v7812_v46 = vld [vmem:[#allocation2 + $0x178] sm:$0xff] }
 0x522   : > { %v9386_v36 = vpack.c.bf16 %v8176_v6, %v8175_v48  ;;  %v9387_v16 = vpack.c.bf16 %v8178_v63, %v8177_v39  ;;  %v9388_v52 = vpack.c.bf16 %v8180_v29, %v8179_v42  ;;  %v9389_v56 = vpack.c.bf16 %v8182_v12, %v8181_v2  ;;  %v7813_v48 = vld [vmem:[#allocation2 + $0x180] sm:$0xff]  ;;  %v7814_v6 = vld [vmem:[#allocation2 + $0x188] sm:$0xff]  ;;  %v7815_v42 = vld [vmem:[#allocation2 + $0x190] sm:$0xff] }
 0x523   : > { %v9390_v45 = vpack.c.bf16 %v8184_v32, %v8183_v14  ;;  %v9391_v13 = vpack.c.bf16 %v8186_v43, %v8185_v7  ;;  %v9392_v58 = vpack.c.bf16 %v8188_v5, %v8187_v3  ;;  %v9393_v8 = vpack.c.bf16 %v8190_v62, %v8189_v27  ;;  %v7816_v29 = vld [vmem:[#allocation2 + $0x198] sm:$0xff]  ;;  %v7817_v2 = vld [vmem:[#allocation2 + $0x1a0] sm:$0xff]  ;;  %v7818_v32 = vld [vmem:[#allocation2 + $0x1a8] sm:$0xff] }
 0x524   : > { %v9394_v59 = vpack.c.bf16 %v8192_v18, %v8191_v0  ;;  %v9395_v31 = vpack.c.bf16 %v8194_v20, %v8193_v19  ;;  %v9396_v61 = vpack.c.bf16 %v8196_v37, %v8195_v34  ;;  %8583 = vst [vmem:[%s11433_s27 + $0x110] sm:$0xff] %v9386_v36  ;;  %8584 = vst [vmem:[%s11433_s27 + $0x118] sm:$0xff] %v9387_v16  ;;  %v7819_v7 = vld [vmem:[#allocation2 + $0x1b0] sm:$0xff]  ;;  %v7820_v43 = vld [vmem:[#allocation2 + $0x1b8] sm:$0xff] }
 0x525   : > { %8585 = vst [vmem:[%s11433_s27 + $0x120] sm:$0xff] %v9388_v52  ;;  %v9397_v57 = vpack.c.bf16 %v8198_v49, %v8197_v44  ;;  %v9398_v60 = vpack.c.bf16 %v8200_v50, %v8199_v41  ;;  %v9399_v51 = vpack.c.bf16 %v8202_v22, %v8201_v26  ;;  %v9400_v53 = vpack.c.bf16 %v8204_v1, %v8203_v47  ;;  %v7821_v0 = vld [vmem:[#allocation2 + $0x1c0] sm:$0xff]  ;;  %v7822_v18 = vld [vmem:[#allocation2 + $0x1c8] sm:$0xff]  ;;  %v7823_v19 = vld [vmem:[#allocation2 + $0x1d0] sm:$0xff] }
 0x526   : > { %8586 = vst [vmem:[%s11433_s27 + $0x128] sm:$0xff] %v9389_v56  ;;  %8587 = vst [vmem:[%s11433_s27 + $0x130] sm:$0xff] %v9390_v45  ;;  %v9401_v39 = vpack.c.bf16 %v8206_v54, %v8205_v23  ;;  %v9402_v63 = vpack.c.bf16 %v8208_v35, %v8207_v15  ;;  %v7919_v12 = vmul.f32 %v13995_v33, %v7799_v55  ;;  %v7824_v49 = vld [vmem:[#allocation2 + $0x1d8] sm:$0xff]  ;;  %v7825_v41 = vld [vmem:[#allocation2 + $0x1e0] sm:$0xff]  ;;  %v7998_v45 = vpop.permute.xlu0 %7997 }
 0x527   : > { %8588 = vst [vmem:[%s11433_s27 + $0x138] sm:$0xff] %v9391_v13  ;;  %8589 = vst [vmem:[%s11433_s27 + $0x140] sm:$0xff] %v9392_v58  ;;  %v7920_v14 = vmul.f32 %v13995_v33, %v7800_v10  ;;  %v7921_v3 = vmul.f32 %v13995_v33, %v7801_v38  ;;  %v7922_v5 = vmul.f32 %v13995_v33, %v7802_v30  ;;  %v7826_v50 = vld [vmem:[#allocation2 + $0x1e8] sm:$0xff]  ;;  %v7827_v23 = vld [vmem:[#allocation2 + $0x1f0] sm:$0xff] }
 0x528   : > { %8590 = vst [vmem:[%s11433_s27 + $0x148] sm:$0xff] %v9393_v8  ;;  %8591 = vst [vmem:[%s11433_s27 + $0x150] sm:$0xff] %v9394_v59  ;;  %v7923_v27 = vmul.f32 %v13995_v33, %v7803_v28  ;;  %v7924_v62 = vmul.f32 %v13995_v33, %v7804_v40  ;;  %v7925_v20 = vmul.f32 %v13995_v33, %v7805_v24  ;;  %v7828_v54 = vld [vmem:[#allocation2 + $0x1f8] sm:$0xff]  ;;  %v7829_v15 = vld [vmem:[#allocation2 + $0x200] sm:$0xff] }
 0x529   : > { %8592 = vst [vmem:[%s11433_s27 + $0x158] sm:$0xff] %v9395_v31  ;;  %8593 = vst [vmem:[%s11433_s27 + $0x160] sm:$0xff] %v9396_v61  ;;  %v7926_v34 = vmul.f32 %v13995_v33, %v7806_v17  ;;  %v7927_v37 = vmul.f32 %v13995_v33, %v7807_v21  ;;  %v7928_v44 = vmul.f32 %v13995_v33, %v7808_v11  ;;  %v7830_v16 = vld [vmem:[#allocation2 + $0x208] sm:$0xff]  ;;  %v7831_v52 = vld [vmem:[#allocation2 + $0x210] sm:$0xff] }
 0x52a   : > { %8594 = vst [vmem:[%s11433_s27 + $0x168] sm:$0xff] %v9397_v57  ;;  %8595 = vst [vmem:[%s11433_s27 + $0x170] sm:$0xff] %v9398_v60  ;;  %v7929_v26 = vmul.f32 %v13995_v33, %v7809_v9  ;;  %v7930_v22 = vmul.f32 %v13995_v33, %v7810_v4  ;;  %v7931_v47 = vmul.f32 %v13995_v33, %v7811_v25  ;;  %v7832_v38 = vld [vmem:[#allocation2 + $0x218] sm:$0xff] }
 0x52b   : > { %8596 = vst [vmem:[%s11433_s27 + $0x178] sm:$0xff] %v9399_v51  ;;  %8597 = vst [vmem:[%s11433_s27 + $0x180] sm:$0xff] %v9400_v53  ;;  %v7932_v1 = vmul.f32 %v13995_v33, %v7812_v46  ;;  %v7933_v55 = vmul.f32 %v13995_v33, %v7813_v48  ;;  %v7934_v10 = vmul.f32 %v13995_v33, %v7814_v6 }
 0x52c   : > { %8598 = vst [vmem:[%s11433_s27 + $0x188] sm:$0xff] %v9401_v39  ;;  %8599 = vst [vmem:[%s11433_s27 + $0x190] sm:$0xff] %v9402_v63  ;;  %v7935_v35 = vmul.f32 %v13995_v33, %v7815_v42  ;;  %v7936_v36 = vmul.f32 %v13995_v33, %v7816_v29  ;;  %v7937_v30 = vmul.f32 %v13995_v33, %v7817_v2 }
 0x52d   : > { %v7938_v28 = vmul.f32 %v13995_v33, %v7818_v32  ;;  %v7939_v40 = vmul.f32 %v13995_v33, %v7819_v7  ;;  %v7940_v56 = vmul.f32 %v13995_v33, %v7820_v43  ;;  %v7941_v13 = vmul.f32 %v13995_v33, %v7821_v0 }
 0x52e   : > { %v7942_v58 = vmul.f32 %v13995_v33, %v7822_v18  ;;  %v7943_v24 = vmul.f32 %v13995_v33, %v7823_v19  ;;  %v7944_v17 = vmul.f32 %v13995_v33, %v7824_v49  ;;  %v7945_v21 = vmul.f32 %v13995_v33, %v7825_v41 }
 0x52f   : > { %v7946_v11 = vmul.f32 %v13995_v33, %v7826_v50  ;;  %v7947_v8 = vmul.f32 %v13995_v33, %v7827_v23  ;;  %v7948_v59 = vmul.f32 %v13995_v33, %v7828_v54  ;;  %v7949_v31 = vmul.f32 %v13995_v33, %v7829_v15 }
 0x530   : > { %v7950_v61 = vmul.f32 %v13995_v33, %v7830_v16  ;;  %v7951_v9 = vmul.f32 %v13995_v33, %v7831_v52  ;;  %v7952_v4 = vmul.f32 %v13995_v33, %v7832_v38  ;;  %v14048_v25 = vadd.f32 %v7998_v45, %v7919_v12 }
 0x531   : > { %v14050_v57 = vadd.f32 %v7998_v45, %v7920_v14  ;;  %v14052_v60 = vadd.f32 %v7998_v45, %v7921_v3  ;;  %v14054_v51 = vadd.f32 %v7998_v45, %v7922_v5  ;;  %v14056_v53 = vadd.f32 %v7998_v45, %v7923_v27 }
 0x532   : > { %v14058_v46 = vadd.f32 %v7998_v45, %v7924_v62  ;;  %v14060_v48 = vadd.f32 %v7998_v45, %v7925_v20  ;;  %v14062_v6 = vadd.f32 %v7998_v45, %v7926_v34  ;;  %v14064_v39 = vadd.f32 %v7998_v45, %v7927_v37 }
 0x533   : > { %v14066_v63 = vadd.f32 %v7998_v45, %v7928_v44  ;;  %v14068_v33 = vadd.f32 %v7998_v45, %v7929_v26  ;;  %v14070_v42 = vadd.f32 %v7998_v45, %v7930_v22  ;;  %v14072_v29 = vadd.f32 %v7998_v45, %v7931_v47 }
 0x534   : > { %v8052_v2 = vadd.f32 %v7998_v45, %v7932_v1  ;;  %v8053_v12 = vadd.f32 %v7998_v45, %v7933_v55  ;;  %v8054_v14 = vadd.f32 %v7998_v45, %v7934_v10  ;;  %v8055_v32 = vadd.f32 %v7998_v45, %v7935_v35 }
 0x535   : > { %v8056_v7 = vadd.f32 %v7998_v45, %v7936_v36  ;;  %v8057_v43 = vadd.f32 %v7998_v45, %v7937_v30  ;;  %v8058_v3 = vadd.f32 %v7998_v45, %v7938_v28  ;;  %v8059_v5 = vadd.f32 %v7998_v45, %v7939_v40 }
 0x536   : > { %v8060_v27 = vadd.f32 %v7998_v45, %v7940_v56  ;;  %v8061_v62 = vadd.f32 %v7998_v45, %v7941_v13  ;;  %v8062_v0 = vadd.f32 %v7998_v45, %v7942_v58  ;;  %v8063_v18 = vadd.f32 %v7998_v45, %v7943_v24 }
 0x537   : > { %v8064_v19 = vadd.f32 %v7998_v45, %v7944_v17  ;;  %v8065_v20 = vadd.f32 %v7998_v45, %v7945_v21  ;;  %v8066_v34 = vadd.f32 %v7998_v45, %v7946_v11  ;;  %v8067_v37 = vadd.f32 %v7998_v45, %v7947_v8 }
 0x538   : > { %v8068_v44 = vadd.f32 %v7998_v45, %v7948_v59  ;;  %v8069_v49 = vadd.f32 %v7998_v45, %v7949_v31  ;;  %v8070_v41 = vadd.f32 %v7998_v45, %v7950_v61  ;;  %v8071_v50 = vadd.f32 %v7998_v45, %v7951_v9 }
 0x539   : > { %v8072_v26 = vadd.f32 %v7998_v45, %v7952_v4  ;;  %v8141_v22 = vmax.f32 %v14048_v25, 0.0  ;;  %v8142_v47 = vmax.f32 %v14050_v57, 0.0  ;;  %v8143_v1 = vmax.f32 %v14052_v60, 0.0 }
 0x53a   : > { %v8144_v23 = vmax.f32 %v14054_v51, 0.0  ;;  %v8145_v54 = vmax.f32 %v14056_v53, 0.0  ;;  %v8146_v15 = vmax.f32 %v14058_v46, 0.0  ;;  %v8147_v55 = vmax.f32 %v14060_v48, 0.0 }
 0x53b   : > { %v8148_v10 = vmax.f32 %v14062_v6, 0.0  ;;  %v8149_v35 = vmax.f32 %v14064_v39, 0.0  ;;  %v8150_v36 = vmax.f32 %v14066_v63, 0.0  ;;  %v8151_v16 = vmax.f32 %v14068_v33, 0.0 }
 0x53c   : > { %v8152_v52 = vmax.f32 %v14070_v42, 0.0  ;;  %v8153_v38 = vmax.f32 %v14072_v29, 0.0  ;;  %v8154_v30 = vmax.f32 %v8052_v2, 0.0  ;;  %v8155_v28 = vmax.f32 %v8053_v12, 0.0 }
 0x53d   : > { %v8156_v40 = vmax.f32 %v8054_v14, 0.0  ;;  %v8157_v56 = vmax.f32 %v8055_v32, 0.0  ;;  %v8158_v45 = vmax.f32 %v8056_v7, 0.0  ;;  %v8159_v13 = vmax.f32 %v8057_v43, 0.0 }
 0x53e   : > { %v8160_v58 = vmax.f32 %v8058_v3, 0.0  ;;  %v8161_v24 = vmax.f32 %v8059_v5, 0.0  ;;  %v8162_v17 = vmax.f32 %v8060_v27, 0.0  ;;  %v8163_v21 = vmax.f32 %v8061_v62, 0.0 }
 0x53f   : > { %v8164_v11 = vmax.f32 %v8062_v0, 0.0  ;;  %v8165_v8 = vmax.f32 %v8063_v18, 0.0  ;;  %v8166_v59 = vmax.f32 %v8064_v19, 0.0  ;;  %v8167_v31 = vmax.f32 %v8065_v20, 0.0 }
 0x540   : > { %v8168_v61 = vmax.f32 %v8066_v34, 0.0  ;;  %v8169_v9 = vmax.f32 %v8067_v37, 0.0  ;;  %v8170_v4 = vmax.f32 %v8068_v44, 0.0  ;;  %v8171_v25 = vmax.f32 %v8069_v49, 0.0 }
 0x541   : > { %v8172_v57 = vmax.f32 %v8070_v41, 0.0  ;;  %v8173_v60 = vmax.f32 %v8071_v50, 0.0  ;;  %v8174_v51 = vmax.f32 %v8072_v26, 0.0  ;;  %v9369_v53 = vpack.c.bf16 %v8142_v47, %v8141_v22 }
 0x542   : > { %v9370_v46 = vpack.c.bf16 %v8144_v23, %v8143_v1  ;;  %v9371_v48 = vpack.c.bf16 %v8146_v15, %v8145_v54  ;;  %v9372_v6 = vpack.c.bf16 %v8148_v10, %v8147_v55  ;;  %v9373_v39 = vpack.c.bf16 %v8150_v36, %v8149_v35 }
 0x543   : > { %v9374_v63 = vpack.c.bf16 %v8152_v52, %v8151_v16  ;;  %v9375_v33 = vpack.c.bf16 %v8154_v30, %v8153_v38  ;;  %v9376_v42 = vpack.c.bf16 %v8156_v40, %v8155_v28  ;;  %v9377_v29 = vpack.c.bf16 %v8158_v45, %v8157_v56  ;;  %8566 = vst [vmem:[%s11433_s27 + $0x88] sm:$0xff] %v9369_v53 }
 0x544   : > { %v9378_v2 = vpack.c.bf16 %v8160_v58, %v8159_v13  ;;  %v9379_v12 = vpack.c.bf16 %v8162_v17, %v8161_v24  ;;  %v9380_v14 = vpack.c.bf16 %v8164_v11, %v8163_v21  ;;  %8567 = vst [vmem:[%s11433_s27 + $0x90] sm:$0xff] %v9370_v46  ;;  %8568 = vst [vmem:[%s11433_s27 + $0x98] sm:$0xff] %v9371_v48 }
 0x545   : > { %8569 = vst [vmem:[%s11433_s27 + $0xa0] sm:$0xff] %v9372_v6  ;;  %v9381_v32 = vpack.c.bf16 %v8166_v59, %v8165_v8  ;;  %v9382_v7 = vpack.c.bf16 %v8168_v61, %v8167_v31  ;;  %v9383_v43 = vpack.c.bf16 %v8170_v4, %v8169_v9  ;;  %v9384_v3 = vpack.c.bf16 %v8172_v57, %v8171_v25 }
 0x546   : > { %8570 = vst [vmem:[%s11433_s27 + $0xa8] sm:$0xff] %v9373_v39  ;;  %8571 = vst [vmem:[%s11433_s27 + $0xb0] sm:$0xff] %v9374_v63  ;;  %v9385_v5 = vpack.c.bf16 %v8174_v51, %v8173_v60 }
 0x547   : > { %8572 = vst [vmem:[%s11433_s27 + $0xb8] sm:$0xff] %v9375_v33  ;;  %8573 = vst [vmem:[%s11433_s27 + $0xc0] sm:$0xff] %v9376_v42 }
 0x548   : > { %8574 = vst [vmem:[%s11433_s27 + $0xc8] sm:$0xff] %v9377_v29  ;;  %8575 = vst [vmem:[%s11433_s27 + $0xd0] sm:$0xff] %v9378_v2 }
 0x549   : > { %8576 = vst [vmem:[%s11433_s27 + $0xd8] sm:$0xff] %v9379_v12  ;;  %8577 = vst [vmem:[%s11433_s27 + $0xe0] sm:$0xff] %v9380_v14 }
 0x54a   : > { %8578 = vst [vmem:[%s11433_s27 + $0xe8] sm:$0xff] %v9381_v32  ;;  %8579 = vst [vmem:[%s11433_s27 + $0xf0] sm:$0xff] %v9382_v7 }
 0x54b   : > { %8580 = vst [vmem:[%s11433_s27 + $0xf8] sm:$0xff] %v9383_v43  ;;  %8581 = vst [vmem:[%s11433_s27 + $0x100] sm:$0xff] %v9384_v3 }
 0x54c   : > { %8582 = vst [vmem:[%s11433_s27 + $0x108] sm:$0xff] %v9385_v5 }
 0x54d PF: > { %s14_s21 = sadd.s32 1, %s10305_s21   ;;  %s14935_s15 = smov %s10285_s16 }
 0x54e   : > { %p11_p0 = scmp.ge.s32.totalorder %s14_s21, 8   ;;  %s14936_s16 = smov %s10386_s28 }
 0x54f   : > { %s14937_s17 = smov %s10297_s19  ;;  %s14938_s18 = smov %s10301_s20 }
 0x550   : > { %s14939_s19 = smov %s14942_s22  ;;  %s14940_s20 = smov %s14946_s23 }
 0x551   :  { %13 = sbr.rel (!%p11_p0) target bundleno = 4 (0x4), region = 106 }

// kernel: imgnet_forward.3
= control target key start
LH: loop header
LB: loop body
LE: loop exit
PB: predicated region body
PF: predicated region fallthrough
CT: control target
= control target key end

     0   :  { %s9016_s0 = inlined_call_operand.vmem [shape: bf16[2,216,4608], index: 0, kind: input, shape index: {}]   ;;  %s9017_s1 = inlined_call_operand.vmem [shape: bf16[40,216], index: 1, kind: input, shape index: {}]   ;;  %s9018_s2 = inlined_call_operand.vmem [shape: f32[40,1], index: 2, kind: input, shape index: {}]   ;;  %s9019_s3 = inlined_call_operand.vmem [shape: f32[40,1], index: 3, kind: input, shape index: {}]   ;;  %s9020_s4 = inlined_call_operand.vmem [shape: f32[1,512], index: 4, kind: input, shape index: {}]   ;;  %s9021_s5 = inlined_call_operand.<no memory space> [shape: f32[1,1], index: 5, kind: input, shape index: {}]   ;;  %s9022_s6 = inlined_call_operand.vmem [shape: f32[512,10], index: 6, kind: input, shape index: {}]   ;;  %s9023_s7 = inlined_call_operand.vmem [shape: f32[1,10], index: 7, kind: input, shape index: {}]   ;;  %s9024_s8 = inlined_call_operand.vmem [shape: f32[1,10], index: 8, kind: input, shape index: {}]   ;;  %s9025_s9 = inlined_call_operand.vmem [shape: f32[1,10], index: 9, kind: input, shape index: {}]   ;;  %s9026_s10 = inlined_call_operand.hbm [shape: f32[2,1,10], index: 10, kind: output, shape index: {}]  }
   0x1   :  { %9027 = sst [smem:[#allocation7_spill]] %s9016_s0  ;;  %v15_v0 = vstv %s9021_s5 }
   0x2   :  { %16 = vst [vmem:[#allocation3] sm:$0x1] %v15_v0 }
   0x3   :  { %17 = vsyncpa [#allocation5], 0 }
   0x4   :  { %19 = vsyncpa [#allocation5 + $0x1], 0  ;;  %s7168_s15 = smov 0   ;;  %s7170_s16 = smov 0  }
   0x5   :  { %s7172_s17 = smov 0   ;;  %s7174_s18 = smov 0  }
   0x6   :  { %s7176_s19 = smov 0   ;;  %s7178_s20 = smov 0  }
   0x7 LB: > { %s5452_s5 = sadd.s32 4294967295, %s7106_s20   ;;  %s5453_s21 = sadd.s32 4294967294, %s7106_s20   ;;  %s7106_s20 = sphi %s7178_s20, %s25_s20   ;;  %s7102_s19 = sphi %s7176_s19, %s9094_s19   ;;  %s7098_s18 = sphi %s7174_s18, %s9093_s18   ;;  %s7094_s17 = sphi %s7172_s17, %s9092_s17   ;;  %s7090_s16 = sphi %s7170_s16, %s9091_s16   ;;  %s7086_s15 = sphi %s7168_s15, %s9090_s15  }
   0x8   : > { %s37_s22 = sadd.s32 1, %s7102_s19  ;;  %s261_s23 = sadd.s32 1, %s7094_s17 }
   0x9   : > { %p39_p0 = scmp.ge.s32.totalorder %s37_s22, 2  ;;  %p271_p1 = scmp.ne.s32.totalorder %s7094_s17, %s7090_s16 }
   0xa   : > { %p272_p2 = scmp.eq.s32.totalorder %s5452_s5, 1  ;;  %p277_p3 = scmp.ne.s32.totalorder %s7090_s16, %s7086_s15 }
   0xb   : > { %s9096_s22 = smov (%p39_p0, %s37_s22), 0  ;;  %p278_p5 = scmp.eq.s32.totalorder %s5453_s21, 1 }
   0xc   : > { %p7208_p4 = por %p272_p2, %p271_p1  ;;  %s258_s25 = ssub.s32 %s7102_s19, %s9096_s22 }
   0xd   : > { %p5456_p6 = scmp.ge.s32.totalorder %s7106_s20, 1  ;;  %p259_p7 = scmp.eq.s32.totalorder %s258_s25, 0 }
   0xe   : > { %p7215_p8 = por %p278_p5, %p277_p3  ;;  %p336_p9 = scmp.lt.s32.totalorder %s7106_s20, 3 }
   0xf   : > { %s7221_s27 = scalar_select %p259_p7, %s7094_s17, %s261_s23  }
  0x10   : > { %p337_p10 = pnand %p5456_p6, %p336_p9 }
  0x11   : > { %p378_p11 = scmp.lt.s32.totalorder (!%p337_p10), %s7098_s18, 1  ;;  %v7227_v1 = vld [vmem:[%s9017_s1 + $0x4] ss:$8 sps:$4 sm:$0xff] (!%p337_p10)   ;;  %vm741_vm0 = vcmask (!%p337_p10), 719872   ;;  %s9030_s0 = sld [smem:[#allocation7_spill]] (!%p337_p10)  ;;  %vm751_vm1 = vcmask (!%p337_p10), 1043456  }
  0x12   : > { %340 = sbr.rel (%p337_p10) target bundleno = 1175 (0x497), region = 60  ;;  %5521 = vmatprep.mubr.msk.bf16.mxu0 (!%p337_p10), %vm741_vm0, %v7227_v1  ;;  %5525 = vmatprep.mubr.msk.bf16.mxu1 (!%p337_p10), %vm741_vm0, %v7227_v1  ;;  %v7302_v0 = vld [vmem:[%s9017_s1] ss:$8 sps:$4 sm:$0xff] (!%p337_p10)   ;;  %vm5020_vm2 = vcmask (!%p337_p10), 7168   ;;  %vm5346_vm3 = vcmask (!%p337_p10), 80896   ;;  %s375_s12 = sand.u32 (!%p337_p10), 1, %s7090_s16  }
  0x13   : > { %s6041_s29 = sshll.u32 (!%p337_p10), %s7098_s18, 4  ;;  %vm5368_vm4 = vcmask (!%p337_p10), 73728   ;;  %s5371_s5 = scalar_lea.sflag (!%p337_p10), [#allocation5], %s375_s12 }
  0x14   : > { %s8969_s13 = scalar_lea.hbm (!%p337_p10), %s9026_s10, %s6041_s29 }
  0x19   : > { %s379_s30 = scalar_select %p378_p11, %s7098_s18, 1 }
  0x1a   : > { %s7109_s18 = smov [#allocation4]  }
  0x1b   : > { %s6202_s11 = smul.u32 3888, %s379_s30  ;;  %s7032_s23 = sshll.u32 %s7109_s18, 4  ;;  %s7033_s23 = int_to_ptr.vmem [resolvable:$false] %s7032_s23 }
  0x1c   : > { %s7034_s25 = scalar_lea.vmem %s7033_s23, 32 }
  0x1d   : > { %s7237_s14 = scalar_lea.vmem %s9030_s0, %s6202_s11  ;;  %s376_s0 = scalar_lea.vmem [#allocation4], %s375_s12 }
  0x1e   : > { %v6261_v2 = vld [vmem:[%s7237_s14 + $0x4] ss:$144 sps:$4 sm:$0xff]   ;;  %v6263_v3 = vld [vmem:[%s7237_s14 + $0xc] ss:$144 sps:$4 sm:$0xff]   ;;  %v6265_v4 = vld [vmem:[%s7237_s14] ss:$144 sps:$4 sm:$0xff]  }
  0x1f   : > { %764 = vmatprep.subr.bf16.mxu0 %v6261_v2  ;;  %v6266_v5 = vld [vmem:[%s7237_s14 + $0x8] ss:$144 sps:$4 sm:$0xff]   ;;  %825 = vmatprep.subr.bf16.mxu1 %v6263_v3  ;;  %v6267_v6 = vld [vmem:[%s7237_s14 + $0x124] ss:$144 sps:$4 sm:$0xff]   ;;  %v6269_v7 = vld [vmem:[%s7237_s14 + $0x12c] ss:$144 sps:$4 sm:$0xff]  }
  0x20   : > { %765 = vmatpush1.bf16.msra.mxu0 %v6265_v4  ;;  %826 = vmatpush1.bf16.msra.mxu1 %v6266_v5  ;;  %v6271_v8 = vld [vmem:[%s7237_s14 + $0x120] ss:$144 sps:$4 sm:$0xff]   ;;  %v6272_v9 = vld [vmem:[%s7237_s14 + $0x128] ss:$144 sps:$4 sm:$0xff]   ;;  %v6273_v10 = vld [vmem:[%s7237_s14 + $0x244] ss:$144 sps:$4 sm:$0xff]  }
  0x21   : > { %766 = vmatprep.subr.bf16.mxu0 %v6267_v6  ;;  %827 = vmatprep.subr.bf16.mxu1 %v6269_v7  ;;  %v6275_v11 = vld [vmem:[%s7237_s14 + $0x24c] ss:$144 sps:$4 sm:$0xff]   ;;  %v6277_v12 = vld [vmem:[%s7237_s14 + $0x240] ss:$144 sps:$4 sm:$0xff]   ;;  %v6278_v13 = vld [vmem:[%s7237_s14 + $0x248] ss:$144 sps:$4 sm:$0xff]  }
  0x22   : > { %v6279_v14 = vld [vmem:[%s7237_s14 + $0x364] ss:$144 sps:$4 sm:$0xff]   ;;  %v6281_v15 = vld [vmem:[%s7237_s14 + $0x36c] ss:$144 sps:$4 sm:$0xff]   ;;  %v6283_v16 = vld [vmem:[%s7237_s14 + $0x360] ss:$144 sps:$4 sm:$0xff]  }
  0x23   : > { %v6284_v17 = vld [vmem:[%s7237_s14 + $0x368] ss:$144 sps:$4 sm:$0xff]   ;;  %v6285_v18 = vld [vmem:[%s7237_s14 + $0x484] ss:$144 sps:$4 sm:$0xff]   ;;  %v6287_v19 = vld [vmem:[%s7237_s14 + $0x48c] ss:$144 sps:$4 sm:$0xff]  }
  0x24   : > { %767 = vmatpush1.bf16.msra.mxu0 %v6271_v8  ;;  %828 = vmatpush1.bf16.msra.mxu1 %v6272_v9  ;;  %v6289_v20 = vld [vmem:[%s7237_s14 + $0x480] ss:$144 sps:$4 sm:$0xff]   ;;  %v6290_v21 = vld [vmem:[%s7237_s14 + $0x488] ss:$144 sps:$4 sm:$0xff]   ;;  %v6291_v22 = vld [vmem:[%s7237_s14 + $0x5a4] ss:$144 sps:$4 sm:$0xff]  }
  0x25   : > { %768 = vmatprep.subr.bf16.mxu0 %v6273_v10  ;;  %829 = vmatprep.subr.bf16.mxu1 %v6275_v11  ;;  %v6293_v23 = vld [vmem:[%s7237_s14 + $0x5ac] ss:$144 sps:$4 sm:$0xff]   ;;  %v6295_v24 = vld [vmem:[%s7237_s14 + $0x5a0] ss:$144 sps:$4 sm:$0xff]   ;;  %v6296_v25 = vld [vmem:[%s7237_s14 + $0x5a8] ss:$144 sps:$4 sm:$0xff]  }
  0x26   : > { %v6297_v26 = vld [vmem:[%s7237_s14 + $0x6c4] ss:$144 sps:$4 sm:$0xff]   ;;  %v6299_v27 = vld [vmem:[%s7237_s14 + $0x6cc] ss:$144 sps:$4 sm:$0xff]   ;;  %v6301_v28 = vld [vmem:[%s7237_s14 + $0x6c0] ss:$144 sps:$4 sm:$0xff]  }
  0x27   : > { %v6302_v29 = vld [vmem:[%s7237_s14 + $0x6c8] ss:$144 sps:$4 sm:$0xff]   ;;  %v6303_v30 = vld [vmem:[%s7237_s14 + $0x7e4] ss:$144 sps:$4 sm:$0xff]   ;;  %v6305_v31 = vld [vmem:[%s7237_s14 + $0x7ec] ss:$144 sps:$4 sm:$0xff]  }
  0x28   : > { %769 = vmatpush1.bf16.msra.mxu0 %v6277_v12  ;;  %830 = vmatpush1.bf16.msra.mxu1 %v6278_v13  ;;  %v6307_v32 = vld [vmem:[%s7237_s14 + $0x7e0] ss:$144 sps:$4 sm:$0xff]   ;;  %v6308_v33 = vld [vmem:[%s7237_s14 + $0x7e8] ss:$144 sps:$4 sm:$0xff]   ;;  %v6309_v34 = vld [vmem:[%s7237_s14 + $0x904] ss:$144 sps:$4 sm:$0xff]  }
  0x29   : > { %770 = vmatprep.subr.bf16.mxu0 %v6279_v14  ;;  %831 = vmatprep.subr.bf16.mxu1 %v6281_v15  ;;  %v6311_v35 = vld [vmem:[%s7237_s14 + $0x90c] ss:$144 sps:$4 sm:$0xff]   ;;  %v6313_v36 = vld [vmem:[%s7237_s14 + $0x900] ss:$144 sps:$4 sm:$0xff]   ;;  %v6314_v37 = vld [vmem:[%s7237_s14 + $0x908] ss:$144 sps:$4 sm:$0xff]  }
  0x2a   : > { %v6315_v38 = vld [vmem:[%s7237_s14 + $0xa24] ss:$144 sps:$4 sm:$0xff]   ;;  %v6317_v39 = vld [vmem:[%s7237_s14 + $0xa2c] ss:$144 sps:$4 sm:$0xff]   ;;  %v6319_v40 = vld [vmem:[%s7237_s14 + $0xa20] ss:$144 sps:$4 sm:$0xff]  }
  0x2b   : > { %v6320_v41 = vld [vmem:[%s7237_s14 + $0xa28] ss:$144 sps:$4 sm:$0xff]   ;;  %v6321_v42 = vld [vmem:[%s7237_s14 + $0xb44] ss:$144 sps:$4 sm:$0xff]   ;;  %v6323_v43 = vld [vmem:[%s7237_s14 + $0xb4c] ss:$144 sps:$4 sm:$0xff]  }
  0x2c   : > { %771 = vmatpush1.bf16.msra.mxu0 %v6283_v16  ;;  %832 = vmatpush1.bf16.msra.mxu1 %v6284_v17  ;;  %v6325_v44 = vld [vmem:[%s7237_s14 + $0xb40] ss:$144 sps:$4 sm:$0xff]   ;;  %v6326_v45 = vld [vmem:[%s7237_s14 + $0xb48] ss:$144 sps:$4 sm:$0xff]   ;;  %v6327_v46 = vld [vmem:[%s7237_s14 + $0xc64] ss:$144 sps:$4 sm:$0xff]  }
  0x2d   : > { %772 = vmatprep.subr.bf16.mxu0 %v6285_v18  ;;  %833 = vmatprep.subr.bf16.mxu1 %v6287_v19  ;;  %v6329_v47 = vld [vmem:[%s7237_s14 + $0xc6c] ss:$144 sps:$4 sm:$0xff]   ;;  %v6331_v48 = vld [vmem:[%s7237_s14 + $0xc60] ss:$144 sps:$4 sm:$0xff]   ;;  %v6332_v49 = vld [vmem:[%s7237_s14 + $0xc68] ss:$144 sps:$4 sm:$0xff]  }
  0x2e   : > { %v6333_v50 = vld [vmem:[%s7237_s14 + $0xd84] ss:$144 sps:$4 sm:$0xff]   ;;  %v6335_v51 = vld [vmem:[%s7237_s14 + $0xd8c] ss:$144 sps:$4 sm:$0xff]   ;;  %v6337_v54 = vld [vmem:[%s7237_s14 + $0xd80] ss:$144 sps:$4 sm:$0xff]  }
  0x2f   : > { %v445_v52 = vld [vmem:[%s7237_s14 + $0xea0] sm:$0xff]  ;;  %v446_v53 = vld [vmem:[%s7237_s14 + $0xea8] sm:$0xff]  ;;  %v7311_v6 = vld [vmem:[%s9017_s1 + $0x14] ss:$8 sps:$4 sm:$0xff]  }
  0x30   : > { %773 = vmatpush1.bf16.msra.mxu0 %v6289_v20  ;;  %834 = vmatpush1.bf16.msra.mxu1 %v6290_v21  ;;  %v6338_v55 = vld [vmem:[%s7237_s14 + $0xd88] ss:$144 sps:$4 sm:$0xff]   ;;  %v5517_v56 = vcombine.high %v445_v52, %v445_v52  ;;  %v5519_v57 = vcombine.high %v446_v53, %v446_v53  ;;  %v5516_v58 = vcombine.low %v445_v52, %v445_v52  ;;  %v6348_v60 = vld [vmem:[%s7237_s14 + $0x14] ss:$144 sps:$4 sm:$0xff]   ;;  %v6351_v63 = vld [vmem:[%s7237_s14 + $0x1c] ss:$144 sps:$4 sm:$0xff]  }
  0x31   : > { %774 = vmatprep.subr.bf16.mxu0 %v6291_v22  ;;  %835 = vmatprep.subr.bf16.mxu1 %v6293_v23  ;;  %v5518_v59 = vcombine.low %v446_v53, %v446_v53  ;;  %v6346_v2 = vld [vmem:[%s7237_s14 + $0x10] ss:$144 sps:$4 sm:$0xff]   ;;  %v6349_v3 = vld [vmem:[%s7237_s14 + $0x18] ss:$144 sps:$4 sm:$0xff]   ;;  %v6354_v4 = vld [vmem:[%s7237_s14 + $0x134] ss:$144 sps:$4 sm:$0xff]  }
  0x32   : > { %v753_v61 = vsel %vm751_vm1, %v5516_v58, 0  ;;  %v6357_v5 = vld [vmem:[%s7237_s14 + $0x13c] ss:$144 sps:$4 sm:$0xff]   ;;  %v6352_v7 = vld [vmem:[%s7237_s14 + $0x130] ss:$144 sps:$4 sm:$0xff]  }
  0x33   : > { %v759_v62 = vsel %vm751_vm1, %v5518_v59, 0  ;;  %v6355_v8 = vld [vmem:[%s7237_s14 + $0x138] ss:$144 sps:$4 sm:$0xff]   ;;  %v6360_v9 = vld [vmem:[%s7237_s14 + $0x254] ss:$144 sps:$4 sm:$0xff]  }
  0x34   : > { %775 = vmatpush1.bf16.msra.mxu0 %v6295_v24  ;;  %836 = vmatpush1.bf16.msra.mxu1 %v6296_v25  ;;  %v6363_v10 = vld [vmem:[%s7237_s14 + $0x25c] ss:$144 sps:$4 sm:$0xff]   ;;  %v7324_v11 = vld [vmem:[%s9017_s1 + $0x10] ss:$8 sps:$4 sm:$0xff]   ;;  %v392_v12 = vld [vmem:[%s9017_s1 + $0x20] sm:$0xff] }
  0x35   : > { %776 = vmatprep.subr.bf16.mxu0 %v6297_v26  ;;  %837 = vmatprep.subr.bf16.mxu1 %v6299_v27  ;;  %v6358_v13 = vld [vmem:[%s7237_s14 + $0x250] ss:$144 sps:$4 sm:$0xff]   ;;  %v6361_v14 = vld [vmem:[%s7237_s14 + $0x258] ss:$144 sps:$4 sm:$0xff]   ;;  %v6366_v15 = vld [vmem:[%s7237_s14 + $0x374] ss:$144 sps:$4 sm:$0xff]   ;;  %v7335_v17 = vcombine.high %v392_v12, %v392_v12  ;;  %v7349_v24 = vcombine.low %v392_v12, %v392_v12 }
  0x36   : > { %v6369_v16 = vld [vmem:[%s7237_s14 + $0x37c] ss:$144 sps:$4 sm:$0xff]   ;;  %v6364_v18 = vld [vmem:[%s7237_s14 + $0x370] ss:$144 sps:$4 sm:$0xff]   ;;  %v6367_v19 = vld [vmem:[%s7237_s14 + $0x378] ss:$144 sps:$4 sm:$0xff]  }
  0x37   : > { %v6372_v20 = vld [vmem:[%s7237_s14 + $0x494] ss:$144 sps:$4 sm:$0xff]   ;;  %v6375_v21 = vld [vmem:[%s7237_s14 + $0x49c] ss:$144 sps:$4 sm:$0xff]   ;;  %v6370_v22 = vld [vmem:[%s7237_s14 + $0x490] ss:$144 sps:$4 sm:$0xff]  }
  0x38   : > { %777 = vmatpush1.bf16.msra.mxu0 %v6301_v28  ;;  %838 = vmatpush1.bf16.msra.mxu1 %v6302_v29  ;;  %v6373_v23 = vld [vmem:[%s7237_s14 + $0x498] ss:$144 sps:$4 sm:$0xff]   ;;  %v6378_v25 = vld [vmem:[%s7237_s14 + $0x5b4] ss:$144 sps:$4 sm:$0xff]   ;;  %v6381_v26 = vld [vmem:[%s7237_s14 + $0x5bc] ss:$144 sps:$4 sm:$0xff]  }
  0x39   : > { %778 = vmatprep.subr.bf16.mxu0 %v6303_v30  ;;  %839 = vmatprep.subr.bf16.mxu1 %v6305_v31  ;;  %v6376_v27 = vld [vmem:[%s7237_s14 + $0x5b0] ss:$144 sps:$4 sm:$0xff]   ;;  %v6379_v28 = vld [vmem:[%s7237_s14 + $0x5b8] ss:$144 sps:$4 sm:$0xff]   ;;  %v6384_v29 = vld [vmem:[%s7237_s14 + $0x6d4] ss:$144 sps:$4 sm:$0xff]  }
  0x3a   : > { %v6387_v30 = vld [vmem:[%s7237_s14 + $0x6dc] ss:$144 sps:$4 sm:$0xff]   ;;  %v6382_v31 = vld [vmem:[%s7237_s14 + $0x6d0] ss:$144 sps:$4 sm:$0xff]   ;;  %v6425_v52 = vld [vmem:[%s7237_s14 + $0xd94] ss:$144 sps:$4 sm:$0xff]  }
  0x3b   : > { %v6428_v53 = vld [vmem:[%s7237_s14 + $0xd9c] ss:$144 sps:$4 sm:$0xff]   ;;  %v6447_v12 = vld [vmem:[%s7237_s14 + $0x264] ss:$144 sps:$4 sm:$0xff]  }
  0x3c   : > { %779 = vmatpush1.bf16.msra.mxu0 %v6307_v32  ;;  %840 = vmatpush1.bf16.msra.mxu1 %v6308_v33  ;;  %v6385_v32 = vld [vmem:[%s7237_s14 + $0x6d8] ss:$144 sps:$4 sm:$0xff]   ;;  %v6390_v33 = vld [vmem:[%s7237_s14 + $0x7f4] ss:$144 sps:$4 sm:$0xff]  }
  0x3d   : > { %780 = vmatprep.subr.bf16.mxu0 %v6309_v34  ;;  %841 = vmatprep.subr.bf16.mxu1 %v6311_v35  ;;  %v6393_v34 = vld [vmem:[%s7237_s14 + $0x7fc] ss:$144 sps:$4 sm:$0xff]   ;;  %v6388_v35 = vld [vmem:[%s7237_s14 + $0x7f0] ss:$144 sps:$4 sm:$0xff]  }
  0x40   : > { %781 = vmatpush1.bf16.msra.mxu0 %v6313_v36  ;;  %842 = vmatpush1.bf16.msra.mxu1 %v6314_v37  ;;  %v6391_v36 = vld [vmem:[%s7237_s14 + $0x7f8] ss:$144 sps:$4 sm:$0xff]   ;;  %v6399_v37 = vld [vmem:[%s7237_s14 + $0x91c] ss:$144 sps:$4 sm:$0xff]  }
  0x41   : > { %782 = vmatprep.subr.bf16.mxu0 %v6315_v38  ;;  %843 = vmatprep.subr.bf16.mxu1 %v6317_v39  ;;  %v6394_v38 = vld [vmem:[%s7237_s14 + $0x910] ss:$144 sps:$4 sm:$0xff]   ;;  %v6397_v39 = vld [vmem:[%s7237_s14 + $0x918] ss:$144 sps:$4 sm:$0xff]  }
  0x44   : > { %783 = vmatpush1.bf16.msra.mxu0 %v6319_v40  ;;  %844 = vmatpush1.bf16.msra.mxu1 %v6320_v41  ;;  %v6402_v40 = vld [vmem:[%s7237_s14 + $0xa34] ss:$144 sps:$4 sm:$0xff]   ;;  %v6405_v41 = vld [vmem:[%s7237_s14 + $0xa3c] ss:$144 sps:$4 sm:$0xff]  }
  0x45   : > { %784 = vmatprep.subr.bf16.mxu0 %v6321_v42  ;;  %845 = vmatprep.subr.bf16.mxu1 %v6323_v43  ;;  %v6400_v42 = vld [vmem:[%s7237_s14 + $0xa30] ss:$144 sps:$4 sm:$0xff]   ;;  %v6403_v43 = vld [vmem:[%s7237_s14 + $0xa38] ss:$144 sps:$4 sm:$0xff]  }
  0x48   : > { %785 = vmatpush1.bf16.msra.mxu0 %v6325_v44  ;;  %846 = vmatpush1.bf16.msra.mxu1 %v6326_v45  ;;  %v6411_v44 = vld [vmem:[%s7237_s14 + $0xb54] ss:$144 sps:$4 sm:$0xff]   ;;  %v6414_v45 = vld [vmem:[%s7237_s14 + $0xb5c] ss:$144 sps:$4 sm:$0xff]  }
  0x49   : > { %786 = vmatprep.subr.bf16.mxu0 %v6327_v46  ;;  %847 = vmatprep.subr.bf16.mxu1 %v6329_v47  ;;  %v6409_v46 = vld [vmem:[%s7237_s14 + $0xb50] ss:$144 sps:$4 sm:$0xff]   ;;  %v6412_v47 = vld [vmem:[%s7237_s14 + $0xb58] ss:$144 sps:$4 sm:$0xff]  }
  0x4c   : > { %787 = vmatpush1.bf16.msra.mxu0 %v6331_v48  ;;  %848 = vmatpush1.bf16.msra.mxu1 %v6332_v49  ;;  %v6417_v48 = vld [vmem:[%s7237_s14 + $0xc74] ss:$144 sps:$4 sm:$0xff]   ;;  %v6420_v49 = vld [vmem:[%s7237_s14 + $0xc7c] ss:$144 sps:$4 sm:$0xff]  }
  0x4d   : > { %788 = vmatprep.subr.bf16.mxu0 %v6333_v50  ;;  %849 = vmatprep.subr.bf16.mxu1 %v6335_v51  ;;  %v6415_v50 = vld [vmem:[%s7237_s14 + $0xc70] ss:$144 sps:$4 sm:$0xff]   ;;  %v6418_v51 = vld [vmem:[%s7237_s14 + $0xc78] ss:$144 sps:$4 sm:$0xff]  }
  0x50   : > { %789 = vmatpush1.bf16.msra.mxu0 %v6337_v54  ;;  %850 = vmatpush1.bf16.msra.mxu1 %v6338_v55  ;;  %v938_v54 = vld [vmem:[%s7237_s14 + $0xeb0] sm:$0xff]  ;;  %v939_v55 = vld [vmem:[%s7237_s14 + $0xeb8] sm:$0xff] }
  0x51   : > { %5520 = vmatprep.subr.msk.bf16.mxu0 %vm751_vm1, %v5517_v56  ;;  %5524 = vmatprep.subr.msk.bf16.mxu1 %vm751_vm1, %v5519_v57  ;;  %v6423_v56 = vld [vmem:[%s7237_s14 + $0xd90] ss:$144 sps:$4 sm:$0xff]   ;;  %v6426_v57 = vld [vmem:[%s7237_s14 + $0xd98] ss:$144 sps:$4 sm:$0xff]   ;;  %v5581_v58 = vcombine.high %v938_v54, %v938_v54  ;;  %v5583_v59 = vcombine.high %v939_v55, %v939_v55 }
  0x54   : > { %791 = vmatpush1.bf16.msra.mxu0 %v753_v61  ;;  %852 = vmatpush1.bf16.msra.mxu1 %v759_v62  ;;  %v5582_v61 = vcombine.low %v939_v55, %v939_v55  ;;  %v6435_v62 = vld [vmem:[%s7237_s14 + $0x24] ss:$144 sps:$4 sm:$0xff]   ;;  %v6510_v55 = vld [vmem:[%s7237_s14 + $0xdac] ss:$144 sps:$4 sm:$0xff]  }
  0x55   : > { %1222 = vmatprep.subr.bf16.mxu0 %v6348_v60  ;;  %1283 = vmatprep.subr.bf16.mxu1 %v6351_v63  ;;  %v5580_v60 = vcombine.low %v938_v54, %v938_v54  ;;  %v6507_v54 = vld [vmem:[%s7237_s14 + $0xda4] ss:$144 sps:$4 sm:$0xff]  }
  0x57   : > { %797 = vmatmul.mubr.bf16.vlgmr.msra.gmra.mrb[0].mxu0 %v7302_v0  ;;  %858 = vmatmul.mubr.bf16.vlgmr.msra.gmra.mrb[0].mxu1 %v7302_v0  ;;  %v1211_v63 = vsel %vm751_vm1, %v5580_v60, 0 }
  0x58   : > { %1223 = vmatpush1.bf16.msra.mxu0 %v6346_v2  ;;  %1284 = vmatpush1.bf16.msra.mxu1 %v6349_v3  ;;  %v1217_v2 = vsel %vm751_vm1, %v5582_v61, 0  ;;  %v6438_v3 = vld [vmem:[%s7237_s14 + $0x2c] ss:$144 sps:$4 sm:$0xff]  }
  0x59   : > { %1224 = vmatprep.subr.bf16.mxu0 %v6354_v4  ;;  %1285 = vmatprep.subr.bf16.mxu1 %v6357_v5  ;;  %v6433_v4 = vld [vmem:[%s7237_s14 + $0x20] ss:$144 sps:$4 sm:$0xff]   ;;  %v6436_v5 = vld [vmem:[%s7237_s14 + $0x28] ss:$144 sps:$4 sm:$0xff]  }
  0x5a   : > { %5522 = vmatprep.mubr.msk.bf16.mxu0 %vm741_vm0, %v7311_v6  ;;  %5526 = vmatprep.mubr.msk.bf16.mxu1 %vm741_vm0, %v7311_v6 }
  0x5c   : > { %1225 = vmatpush1.bf16.msra.mxu0 %v6352_v7  ;;  %1286 = vmatpush1.bf16.msra.mxu1 %v6355_v8  ;;  %v6441_v7 = vld [vmem:[%s7237_s14 + $0x144] ss:$144 sps:$4 sm:$0xff]   ;;  %v6444_v8 = vld [vmem:[%s7237_s14 + $0x14c] ss:$144 sps:$4 sm:$0xff]  }
  0x5d   : > { %1226 = vmatprep.subr.bf16.mxu0 %v6360_v9  ;;  %1287 = vmatprep.subr.bf16.mxu1 %v6363_v10  ;;  %v6439_v9 = vld [vmem:[%s7237_s14 + $0x140] ss:$144 sps:$4 sm:$0xff]   ;;  %v6442_v10 = vld [vmem:[%s7237_s14 + $0x148] ss:$144 sps:$4 sm:$0xff]  }
  0x5f   : > { %807 = vmatmul.mubr.bf16.gmra.mrb[4].mxu0 %v7324_v11  ;;  %868 = vmatmul.mubr.bf16.gmra.mrb[4].mxu1 %v7324_v11 }
  0x60   : > { %1227 = vmatpush1.bf16.msra.mxu0 %v6358_v13  ;;  %1288 = vmatpush1.bf16.msra.mxu1 %v6361_v14  ;;  %v6450_v13 = vld [vmem:[%s7237_s14 + $0x26c] ss:$144 sps:$4 sm:$0xff]   ;;  %v6445_v14 = vld [vmem:[%s7237_s14 + $0x260] ss:$144 sps:$4 sm:$0xff]  }
  0x61   : > { %1228 = vmatprep.subr.bf16.mxu0 %v6366_v15  ;;  %1289 = vmatprep.subr.bf16.mxu1 %v6369_v16  ;;  %v6448_v15 = vld [vmem:[%s7237_s14 + $0x268] ss:$144 sps:$4 sm:$0xff]   ;;  %v6453_v16 = vld [vmem:[%s7237_s14 + $0x384] ss:$144 sps:$4 sm:$0xff]  }
  0x62   : > { %5523 = vmatprep.mubr.msk.bf16.mxu0 %vm741_vm0, %v7335_v17  ;;  %5527 = vmatprep.mubr.msk.bf16.mxu1 %vm741_vm0, %v7335_v17 }
  0x64   : > { %1229 = vmatpush1.bf16.msra.mxu0 %v6364_v18  ;;  %1290 = vmatpush1.bf16.msra.mxu1 %v6367_v19  ;;  %v6456_v18 = vld [vmem:[%s7237_s14 + $0x38c] ss:$144 sps:$4 sm:$0xff]   ;;  %v6451_v19 = vld [vmem:[%s7237_s14 + $0x380] ss:$144 sps:$4 sm:$0xff]  }
  0x65   : > { %1230 = vmatprep.subr.bf16.mxu0 %v6372_v20  ;;  %1291 = vmatprep.subr.bf16.mxu1 %v6375_v21  ;;  %v6454_v20 = vld [vmem:[%s7237_s14 + $0x388] ss:$144 sps:$4 sm:$0xff]   ;;  %v6459_v21 = vld [vmem:[%s7237_s14 + $0x4a4] ss:$144 sps:$4 sm:$0xff]  }
  0x67   : > { %817 = vmatmul.mubr.bf16.gmra.mrb[8].mxu0 %v7349_v24  ;;  %878 = vmatmul.mubr.bf16.gmra.mrb[8].mxu1 %v7349_v24 }
  0x68   : > { %1231 = vmatpush1.bf16.msra.mxu0 %v6370_v22  ;;  %1292 = vmatpush1.bf16.msra.mxu1 %v6373_v23  ;;  %v6462_v22 = vld [vmem:[%s7237_s14 + $0x4ac] ss:$144 sps:$4 sm:$0xff]   ;;  %v6457_v23 = vld [vmem:[%s7237_s14 + $0x4a0] ss:$144 sps:$4 sm:$0xff]  }
  0x69   : > { %1232 = vmatprep.subr.bf16.mxu0 %v6378_v25  ;;  %1293 = vmatprep.subr.bf16.mxu1 %v6381_v26  ;;  %v6460_v25 = vld [vmem:[%s7237_s14 + $0x4a8] ss:$144 sps:$4 sm:$0xff]   ;;  %v6465_v26 = vld [vmem:[%s7237_s14 + $0x5c4] ss:$144 sps:$4 sm:$0xff]  }
  0x6a   : > { %5585 = vmatprep.mubr.msk.bf16.mxu0 %vm741_vm0, %v7227_v1  ;;  %5589 = vmatprep.mubr.msk.bf16.mxu1 %vm741_vm0, %v7227_v1  ;;  %v6396_v1 = vld [vmem:[%s7237_s14 + $0x914] ss:$144 sps:$4 sm:$0xff]  }
  0x6c   : > { %1233 = vmatpush1.bf16.msra.mxu0 %v6376_v27  ;;  %1294 = vmatpush1.bf16.msra.mxu1 %v6379_v28  ;;  %v6468_v27 = vld [vmem:[%s7237_s14 + $0x5cc] ss:$144 sps:$4 sm:$0xff]   ;;  %v6463_v28 = vld [vmem:[%s7237_s14 + $0x5c0] ss:$144 sps:$4 sm:$0xff]  }
  0x6d   : > { %1234 = vmatprep.subr.bf16.mxu0 %v6384_v29  ;;  %1295 = vmatprep.subr.bf16.mxu1 %v6387_v30  ;;  %v6466_v29 = vld [vmem:[%s7237_s14 + $0x5c8] ss:$144 sps:$4 sm:$0xff]   ;;  %v6471_v30 = vld [vmem:[%s7237_s14 + $0x6e4] ss:$144 sps:$4 sm:$0xff]  }
  0x70   : > { %1235 = vmatpush1.bf16.msra.mxu0 %v6382_v31  ;;  %1296 = vmatpush1.bf16.msra.mxu1 %v6385_v32  ;;  %v6474_v31 = vld [vmem:[%s7237_s14 + $0x6ec] ss:$144 sps:$4 sm:$0xff]  }
  0x71   : > { %1236 = vmatprep.subr.bf16.mxu0 %v6390_v33  ;;  %1297 = vmatprep.subr.bf16.mxu1 %v6393_v34  ;;  %v7438_v32 = vld [vmem:[%s9017_s1 + $0x4] ss:$8 sps:$4 sm:$0xff]   ;;  %v6469_v33 = vld [vmem:[%s7237_s14 + $0x6e0] ss:$144 sps:$4 sm:$0xff]   ;;  %v6472_v34 = vld [vmem:[%s7237_s14 + $0x6e8] ss:$144 sps:$4 sm:$0xff]  }
  0x74   : > { %1237 = vmatpush1.bf16.msra.mxu0 %v6388_v35  ;;  %1298 = vmatpush1.bf16.msra.mxu1 %v6391_v36  ;;  %v6477_v35 = vld [vmem:[%s7237_s14 + $0x804] ss:$144 sps:$4 sm:$0xff]   ;;  %v6480_v36 = vld [vmem:[%s7237_s14 + $0x80c] ss:$144 sps:$4 sm:$0xff]  }
  0x75   : > { %1238 = vmatprep.subr.bf16.mxu0 %v6396_v1  ;;  %1299 = vmatprep.subr.bf16.mxu1 %v6399_v37  ;;  %v6475_v1 = vld [vmem:[%s7237_s14 + $0x800] ss:$144 sps:$4 sm:$0xff]   ;;  %v6478_v37 = vld [vmem:[%s7237_s14 + $0x808] ss:$144 sps:$4 sm:$0xff]  }
  0x78   : > { %1239 = vmatpush1.bf16.msra.mxu0 %v6394_v38  ;;  %1300 = vmatpush1.bf16.msra.mxu1 %v6397_v39  ;;  %v6483_v38 = vld [vmem:[%s7237_s14 + $0x924] ss:$144 sps:$4 sm:$0xff]   ;;  %v6486_v39 = vld [vmem:[%s7237_s14 + $0x92c] ss:$144 sps:$4 sm:$0xff]  }
  0x79   : > { %1240 = vmatprep.subr.bf16.mxu0 %v6402_v40  ;;  %1301 = vmatprep.subr.bf16.mxu1 %v6405_v41  ;;  %v6481_v40 = vld [vmem:[%s7237_s14 + $0x920] ss:$144 sps:$4 sm:$0xff]   ;;  %v6484_v41 = vld [vmem:[%s7237_s14 + $0x928] ss:$144 sps:$4 sm:$0xff]  }
  0x7c   : > { %1241 = vmatpush1.bf16.msra.mxu0 %v6400_v42  ;;  %1302 = vmatpush1.bf16.msra.mxu1 %v6403_v43  ;;  %v6489_v42 = vld [vmem:[%s7237_s14 + $0xa44] ss:$144 sps:$4 sm:$0xff]   ;;  %v6492_v43 = vld [vmem:[%s7237_s14 + $0xa4c] ss:$144 sps:$4 sm:$0xff]  }
  0x7d   : > { %1242 = vmatprep.subr.bf16.mxu0 %v6411_v44  ;;  %1303 = vmatprep.subr.bf16.mxu1 %v6414_v45  ;;  %v6487_v44 = vld [vmem:[%s7237_s14 + $0xa40] ss:$144 sps:$4 sm:$0xff]   ;;  %v6490_v45 = vld [vmem:[%s7237_s14 + $0xa48] ss:$144 sps:$4 sm:$0xff]  }
  0x80   : > { %1243 = vmatpush1.bf16.msra.mxu0 %v6409_v46  ;;  %1304 = vmatpush1.bf16.msra.mxu1 %v6412_v47  ;;  %v6495_v46 = vld [vmem:[%s7237_s14 + $0xb64] ss:$144 sps:$4 sm:$0xff]   ;;  %v6498_v47 = vld [vmem:[%s7237_s14 + $0xb6c] ss:$144 sps:$4 sm:$0xff]  }
  0x81   : > { %1244 = vmatprep.subr.bf16.mxu0 %v6417_v48  ;;  %1305 = vmatprep.subr.bf16.mxu1 %v6420_v49  ;;  %v6493_v48 = vld [vmem:[%s7237_s14 + $0xb60] ss:$144 sps:$4 sm:$0xff]   ;;  %v6496_v49 = vld [vmem:[%s7237_s14 + $0xb68] ss:$144 sps:$4 sm:$0xff]  }
  0x84   : > { %1245 = vmatpush1.bf16.msra.mxu0 %v6415_v50  ;;  %1306 = vmatpush1.bf16.msra.mxu1 %v6418_v51  ;;  %v6501_v50 = vld [vmem:[%s7237_s14 + $0xc84] ss:$144 sps:$4 sm:$0xff]   ;;  %v6504_v51 = vld [vmem:[%s7237_s14 + $0xc8c] ss:$144 sps:$4 sm:$0xff]  }
  0x85   : > { %1246 = vmatprep.subr.bf16.mxu0 %v6425_v52  ;;  %1307 = vmatprep.subr.bf16.mxu1 %v6428_v53  ;;  %v6499_v52 = vld [vmem:[%s7237_s14 + $0xc80] ss:$144 sps:$4 sm:$0xff]   ;;  %v6502_v53 = vld [vmem:[%s7237_s14 + $0xc88] ss:$144 sps:$4 sm:$0xff]  }
  0x88   : > { %1247 = vmatpush1.bf16.msra.mxu0 %v6423_v56  ;;  %1308 = vmatpush1.bf16.msra.mxu1 %v6426_v57  ;;  %v1416_v56 = vld [vmem:[%s7237_s14 + $0xec0] sm:$0xff]  ;;  %v1417_v57 = vld [vmem:[%s7237_s14 + $0xec8] sm:$0xff] }
  0x89   : > { %5584 = vmatprep.subr.msk.bf16.mxu0 %vm751_vm1, %v5581_v58  ;;  %5588 = vmatprep.subr.msk.bf16.mxu1 %vm751_vm1, %v5583_v59  ;;  %v6505_v58 = vld [vmem:[%s7237_s14 + $0xda0] ss:$144 sps:$4 sm:$0xff]   ;;  %v6508_v59 = vld [vmem:[%s7237_s14 + $0xda8] ss:$144 sps:$4 sm:$0xff]   ;;  %v5645_v60 = vcombine.high %v1416_v56, %v1416_v56  ;;  %v5647_v61 = vcombine.high %v1417_v57, %v1417_v57 }
  0x8c   : > { %1249 = vmatpush1.bf16.msra.mxu0 %v1211_v63  ;;  %1310 = vmatpush1.bf16.msra.mxu1 %v1217_v2  ;;  %v5646_v63 = vcombine.low %v1417_v57, %v1417_v57  ;;  %v6517_v2 = vld [vmem:[%s7237_s14 + $0x34] ss:$144 sps:$4 sm:$0xff]   ;;  %v6587_v57 = vld [vmem:[%s7237_s14 + $0xdb0] ss:$144 sps:$4 sm:$0xff]  }
  0x8d   : > { %1700 = vmatprep.subr.bf16.mxu0 %v6435_v62  ;;  %1761 = vmatprep.subr.bf16.mxu1 %v6438_v3  ;;  %v5644_v62 = vcombine.low %v1416_v56, %v1416_v56  ;;  %v1895_v56 = vld [vmem:[%s7237_s14 + $0xed8] sm:$0xff] }
  0x8f   : > { %1255 = vmatmul.mubr.bf16.vlgmr.msra.gmra.mrb[12].mxu0 %v7302_v0  ;;  %1316 = vmatmul.mubr.bf16.vlgmr.msra.gmra.mrb[12].mxu1 %v7302_v0  ;;  %v1689_v3 = vsel %vm751_vm1, %v5644_v62, 0  ;;  %v5710_v62 = vcombine.low %v1895_v56, %v1895_v56 }
  0x90   : > { %1701 = vmatpush1.bf16.msra.mxu0 %v6433_v4  ;;  %1762 = vmatpush1.bf16.msra.mxu1 %v6436_v5  ;;  %v1695_v4 = vsel %vm751_vm1, %v5646_v63, 0  ;;  %v6520_v5 = vld [vmem:[%s7237_s14 + $0x3c] ss:$144 sps:$4 sm:$0xff]   ;;  %v6599_v63 = vld [vmem:[%s7237_s14 + $0x44] ss:$144 sps:$4 sm:$0xff]  }
  0x91   : > { %1702 = vmatprep.subr.bf16.mxu0 %v6441_v7  ;;  %1763 = vmatprep.subr.bf16.mxu1 %v6444_v8  ;;  %v6515_v7 = vld [vmem:[%s7237_s14 + $0x30] ss:$144 sps:$4 sm:$0xff]   ;;  %v6518_v8 = vld [vmem:[%s7237_s14 + $0x38] ss:$144 sps:$4 sm:$0xff]  }
  0x92   : > { %5586 = vmatprep.mubr.msk.bf16.mxu0 %vm741_vm0, %v7311_v6  ;;  %5590 = vmatprep.mubr.msk.bf16.mxu1 %vm741_vm0, %v7311_v6 }
  0x94   : > { %1703 = vmatpush1.bf16.msra.mxu0 %v6439_v9  ;;  %1764 = vmatpush1.bf16.msra.mxu1 %v6442_v10  ;;  %v6523_v9 = vld [vmem:[%s7237_s14 + $0x154] ss:$144 sps:$4 sm:$0xff]   ;;  %v6526_v10 = vld [vmem:[%s7237_s14 + $0x15c] ss:$144 sps:$4 sm:$0xff]  }
  0x95   : > { %1704 = vmatprep.subr.bf16.mxu0 %v6447_v12  ;;  %1765 = vmatprep.subr.bf16.mxu1 %v6450_v13  ;;  %v6521_v12 = vld [vmem:[%s7237_s14 + $0x150] ss:$144 sps:$4 sm:$0xff]   ;;  %v6524_v13 = vld [vmem:[%s7237_s14 + $0x158] ss:$144 sps:$4 sm:$0xff]  }
  0x97   : > { %1265 = vmatmul.mubr.bf16.gmra.mrb[16].mxu0 %v7324_v11  ;;  %1326 = vmatmul.mubr.bf16.gmra.mrb[16].mxu1 %v7324_v11 }
  0x98   : > { %1705 = vmatpush1.bf16.msra.mxu0 %v6445_v14  ;;  %1766 = vmatpush1.bf16.msra.mxu1 %v6448_v15  ;;  %v6529_v14 = vld [vmem:[%s7237_s14 + $0x274] ss:$144 sps:$4 sm:$0xff]   ;;  %v6532_v15 = vld [vmem:[%s7237_s14 + $0x27c] ss:$144 sps:$4 sm:$0xff]  }
  0x99   : > { %1706 = vmatprep.subr.bf16.mxu0 %v6453_v16  ;;  %1767 = vmatprep.subr.bf16.mxu1 %v6456_v18  ;;  %v6530_v16 = vld [vmem:[%s7237_s14 + $0x278] ss:$144 sps:$4 sm:$0xff]   ;;  %v6535_v18 = vld [vmem:[%s7237_s14 + $0x394] ss:$144 sps:$4 sm:$0xff]  }
  0x9a   : > { %5587 = vmatprep.mubr.msk.bf16.mxu0 %vm741_vm0, %v7335_v17  ;;  %5591 = vmatprep.mubr.msk.bf16.mxu1 %vm741_vm0, %v7335_v17 }
  0x9c   : > { %1707 = vmatpush1.bf16.msra.mxu0 %v6451_v19  ;;  %1768 = vmatpush1.bf16.msra.mxu1 %v6454_v20  ;;  %v6538_v19 = vld [vmem:[%s7237_s14 + $0x39c] ss:$144 sps:$4 sm:$0xff]   ;;  %v6533_v20 = vld [vmem:[%s7237_s14 + $0x390] ss:$144 sps:$4 sm:$0xff]  }
  0x9d   : > { %1708 = vmatprep.subr.bf16.mxu0 %v6459_v21  ;;  %1769 = vmatprep.subr.bf16.mxu1 %v6462_v22  ;;  %v6541_v21 = vld [vmem:[%s7237_s14 + $0x4b4] ss:$144 sps:$4 sm:$0xff]   ;;  %v6544_v22 = vld [vmem:[%s7237_s14 + $0x4bc] ss:$144 sps:$4 sm:$0xff]  }
  0x9f   : > { %1275 = vmatmul.mubr.bf16.gmra.mrb[20].mxu0 %v7349_v24  ;;  %1336 = vmatmul.mubr.bf16.gmra.mrb[20].mxu1 %v7349_v24 }
  0xa0   : > { %1709 = vmatpush1.bf16.msra.mxu0 %v6457_v23  ;;  %1770 = vmatpush1.bf16.msra.mxu1 %v6460_v25  ;;  %v6539_v23 = vld [vmem:[%s7237_s14 + $0x4b0] ss:$144 sps:$4 sm:$0xff]   ;;  %v6547_v25 = vld [vmem:[%s7237_s14 + $0x5d4] ss:$144 sps:$4 sm:$0xff]  }
  0xa1   : > { %1710 = vmatprep.subr.bf16.mxu0 %v6465_v26  ;;  %1771 = vmatprep.subr.bf16.mxu1 %v6468_v27  ;;  %v6550_v26 = vld [vmem:[%s7237_s14 + $0x5dc] ss:$144 sps:$4 sm:$0xff]   ;;  %v6545_v27 = vld [vmem:[%s7237_s14 + $0x5d0] ss:$144 sps:$4 sm:$0xff]  }
  0xa2   : > { %5649 = vmatprep.mubr.msk.bf16.mxu0 %vm741_vm0, %v7438_v32  ;;  %5653 = vmatprep.mubr.msk.bf16.mxu1 %vm741_vm0, %v7438_v32 }
  0xa4   : > { %1711 = vmatpush1.bf16.msra.mxu0 %v6463_v28  ;;  %1772 = vmatpush1.bf16.msra.mxu1 %v6466_v29  ;;  %v6548_v28 = vld [vmem:[%s7237_s14 + $0x5d8] ss:$144 sps:$4 sm:$0xff]   ;;  %v6553_v29 = vld [vmem:[%s7237_s14 + $0x6f4] ss:$144 sps:$4 sm:$0xff]  }
  0xa5   : > { %1712 = vmatprep.subr.bf16.mxu0 %v6471_v30  ;;  %1773 = vmatprep.subr.bf16.mxu1 %v6474_v31  ;;  %v6556_v30 = vld [vmem:[%s7237_s14 + $0x6fc] ss:$144 sps:$4 sm:$0xff]   ;;  %v6551_v31 = vld [vmem:[%s7237_s14 + $0x6f0] ss:$144 sps:$4 sm:$0xff]  }
  0xa8   : > { %1713 = vmatpush1.bf16.msra.mxu0 %v6469_v33  ;;  %1774 = vmatpush1.bf16.msra.mxu1 %v6472_v34  ;;  %v6554_v33 = vld [vmem:[%s7237_s14 + $0x6f8] ss:$144 sps:$4 sm:$0xff]   ;;  %v6559_v34 = vld [vmem:[%s7237_s14 + $0x814] ss:$144 sps:$4 sm:$0xff]  }
  0xa9   : > { %1714 = vmatprep.subr.bf16.mxu0 %v6477_v35  ;;  %1775 = vmatprep.subr.bf16.mxu1 %v6480_v36  ;;  %v6562_v35 = vld [vmem:[%s7237_s14 + $0x81c] ss:$144 sps:$4 sm:$0xff]   ;;  %v6557_v36 = vld [vmem:[%s7237_s14 + $0x810] ss:$144 sps:$4 sm:$0xff]  }
  0xac   : > { %1715 = vmatpush1.bf16.msra.mxu0 %v6475_v1  ;;  %1776 = vmatpush1.bf16.msra.mxu1 %v6478_v37  ;;  %v6560_v1 = vld [vmem:[%s7237_s14 + $0x818] ss:$144 sps:$4 sm:$0xff]   ;;  %v6565_v37 = vld [vmem:[%s7237_s14 + $0x934] ss:$144 sps:$4 sm:$0xff]  }
  0xad   : > { %1716 = vmatprep.subr.bf16.mxu0 %v6483_v38  ;;  %1777 = vmatprep.subr.bf16.mxu1 %v6486_v39  ;;  %v6568_v38 = vld [vmem:[%s7237_s14 + $0x93c] ss:$144 sps:$4 sm:$0xff]   ;;  %v6563_v39 = vld [vmem:[%s7237_s14 + $0x930] ss:$144 sps:$4 sm:$0xff]  }
  0xb0   : > { %1717 = vmatpush1.bf16.msra.mxu0 %v6481_v40  ;;  %1778 = vmatpush1.bf16.msra.mxu1 %v6484_v41  ;;  %v6566_v40 = vld [vmem:[%s7237_s14 + $0x938] ss:$144 sps:$4 sm:$0xff]   ;;  %v6571_v41 = vld [vmem:[%s7237_s14 + $0xa54] ss:$144 sps:$4 sm:$0xff]  }
  0xb1   : > { %1718 = vmatprep.subr.bf16.mxu0 %v6489_v42  ;;  %1779 = vmatprep.subr.bf16.mxu1 %v6492_v43  ;;  %v6574_v42 = vld [vmem:[%s7237_s14 + $0xa5c] ss:$144 sps:$4 sm:$0xff]   ;;  %v6569_v43 = vld [vmem:[%s7237_s14 + $0xa50] ss:$144 sps:$4 sm:$0xff]  }
  0xb4   : > { %1719 = vmatpush1.bf16.msra.mxu0 %v6487_v44  ;;  %1780 = vmatpush1.bf16.msra.mxu1 %v6490_v45  ;;  %v6572_v44 = vld [vmem:[%s7237_s14 + $0xa58] ss:$144 sps:$4 sm:$0xff]   ;;  %v6577_v45 = vld [vmem:[%s7237_s14 + $0xb74] ss:$144 sps:$4 sm:$0xff]  }
  0xb5   : > { %1720 = vmatprep.subr.bf16.mxu0 %v6495_v46  ;;  %1781 = vmatprep.subr.bf16.mxu1 %v6498_v47  ;;  %v6580_v46 = vld [vmem:[%s7237_s14 + $0xb7c] ss:$144 sps:$4 sm:$0xff]   ;;  %v6575_v47 = vld [vmem:[%s7237_s14 + $0xb70] ss:$144 sps:$4 sm:$0xff]  }
  0xb8   : > { %1721 = vmatpush1.bf16.msra.mxu0 %v6493_v48  ;;  %1782 = vmatpush1.bf16.msra.mxu1 %v6496_v49  ;;  %v6578_v48 = vld [vmem:[%s7237_s14 + $0xb78] ss:$144 sps:$4 sm:$0xff]   ;;  %v6583_v49 = vld [vmem:[%s7237_s14 + $0xc94] ss:$144 sps:$4 sm:$0xff]  }
  0xb9   : > { %1722 = vmatprep.subr.bf16.mxu0 %v6501_v50  ;;  %1783 = vmatprep.subr.bf16.mxu1 %v6504_v51  ;;  %v6586_v50 = vld [vmem:[%s7237_s14 + $0xc9c] ss:$144 sps:$4 sm:$0xff]   ;;  %v6581_v51 = vld [vmem:[%s7237_s14 + $0xc90] ss:$144 sps:$4 sm:$0xff]  }
  0xbc   : > { %1723 = vmatpush1.bf16.msra.mxu0 %v6499_v52  ;;  %1784 = vmatpush1.bf16.msra.mxu1 %v6502_v53  ;;  %v6584_v52 = vld [vmem:[%s7237_s14 + $0xc98] ss:$144 sps:$4 sm:$0xff]   ;;  %v6589_v53 = vld [vmem:[%s7237_s14 + $0xdb4] ss:$144 sps:$4 sm:$0xff]  }
  0xbd   : > { %1724 = vmatprep.subr.bf16.mxu0 %v6507_v54  ;;  %1785 = vmatprep.subr.bf16.mxu1 %v6510_v55  ;;  %v6592_v54 = vld [vmem:[%s7237_s14 + $0xdbc] ss:$144 sps:$4 sm:$0xff]   ;;  %v1894_v55 = vld [vmem:[%s7237_s14 + $0xed0] sm:$0xff] }
  0xc0   : > { %1725 = vmatpush1.bf16.msra.mxu0 %v6505_v58  ;;  %1786 = vmatpush1.bf16.msra.mxu1 %v6508_v59  ;;  %v6590_v58 = vld [vmem:[%s7237_s14 + $0xdb8] ss:$144 sps:$4 sm:$0xff]   ;;  %v5709_v59 = vcombine.high %v1894_v55, %v1894_v55 }
  0xc1   : > { %5648 = vmatprep.subr.msk.bf16.mxu0 %vm751_vm1, %v5645_v60  ;;  %5652 = vmatprep.subr.msk.bf16.mxu1 %vm751_vm1, %v5647_v61  ;;  %v5711_v60 = vcombine.high %v1895_v56, %v1895_v56  ;;  %v5708_v61 = vcombine.low %v1894_v55, %v1894_v55  ;;  %v6674_v55 = vld [vmem:[%s7237_s14 + $0xdcc] ss:$144 sps:$4 sm:$0xff]   ;;  %v2372_v56 = vld [vmem:[%s7237_s14 + $0xee0] sm:$0xff] }
  0xc4   : > { %1727 = vmatpush1.bf16.msra.mxu0 %v1689_v3  ;;  %1788 = vmatpush1.bf16.msra.mxu1 %v1695_v4  ;;  %v2173_v3 = vsel %vm751_vm1, %v5710_v62, 0  ;;  %v6602_v4 = vld [vmem:[%s7237_s14 + $0x4c] ss:$144 sps:$4 sm:$0xff]  }
  0xc5   : > { %2178 = vmatprep.subr.bf16.mxu0 %v6517_v2  ;;  %2239 = vmatprep.subr.bf16.mxu1 %v6520_v5  ;;  %v2167_v2 = vsel %vm751_vm1, %v5708_v61, 0  ;;  %v6597_v5 = vld [vmem:[%s7237_s14 + $0x40] ss:$144 sps:$4 sm:$0xff]   ;;  %v2373_v61 = vld [vmem:[%s7237_s14 + $0xee8] sm:$0xff] }
  0xc7   : > { %1733 = vmatmul.mubr.bf16.vlgmr.msra.gmra.mrb[24].mxu0 %v7302_v0  ;;  %1794 = vmatmul.mubr.bf16.vlgmr.msra.gmra.mrb[24].mxu1 %v7302_v0  ;;  %v6527_v0 = vld [vmem:[%s7237_s14 + $0x270] ss:$144 sps:$4 sm:$0xff]  }
  0xc8   : > { %2179 = vmatpush1.bf16.msra.mxu0 %v6515_v7  ;;  %2240 = vmatpush1.bf16.msra.mxu1 %v6518_v8  ;;  %v6600_v7 = vld [vmem:[%s7237_s14 + $0x48] ss:$144 sps:$4 sm:$0xff]   ;;  %v6605_v8 = vld [vmem:[%s7237_s14 + $0x164] ss:$144 sps:$4 sm:$0xff]  }
  0xc9   : > { %2180 = vmatprep.subr.bf16.mxu0 %v6523_v9  ;;  %2241 = vmatprep.subr.bf16.mxu1 %v6526_v10  ;;  %v6608_v9 = vld [vmem:[%s7237_s14 + $0x16c] ss:$144 sps:$4 sm:$0xff]   ;;  %v7561_v10 = vld [vmem:[%s9017_s1] ss:$8 sps:$4 sm:$0xff]  }
  0xca   : > { %5650 = vmatprep.mubr.msk.bf16.mxu0 %vm741_vm0, %v7311_v6  ;;  %5654 = vmatprep.mubr.msk.bf16.mxu1 %vm741_vm0, %v7311_v6  ;;  %v6536_v6 = vld [vmem:[%s7237_s14 + $0x398] ss:$144 sps:$4 sm:$0xff]  }
  0xcc   : > { %2181 = vmatpush1.bf16.msra.mxu0 %v6521_v12  ;;  %2242 = vmatpush1.bf16.msra.mxu1 %v6524_v13  ;;  %v6603_v12 = vld [vmem:[%s7237_s14 + $0x160] ss:$144 sps:$4 sm:$0xff]   ;;  %v6606_v13 = vld [vmem:[%s7237_s14 + $0x168] ss:$144 sps:$4 sm:$0xff]  }
  0xcd   : > { %2182 = vmatprep.subr.bf16.mxu0 %v6529_v14  ;;  %2243 = vmatprep.subr.bf16.mxu1 %v6532_v15  ;;  %v6611_v14 = vld [vmem:[%s7237_s14 + $0x284] ss:$144 sps:$4 sm:$0xff]   ;;  %v6614_v15 = vld [vmem:[%s7237_s14 + $0x28c] ss:$144 sps:$4 sm:$0xff]  }
  0xcf   : > { %1743 = vmatmul.mubr.bf16.gmra.mrb[28].mxu0 %v7324_v11  ;;  %1804 = vmatmul.mubr.bf16.gmra.mrb[28].mxu1 %v7324_v11  ;;  %v6542_v11 = vld [vmem:[%s7237_s14 + $0x4b8] ss:$144 sps:$4 sm:$0xff]  }
  0xd0   : > { %2183 = vmatpush1.bf16.msra.mxu0 %v6527_v0  ;;  %2244 = vmatpush1.bf16.msra.mxu1 %v6530_v16  ;;  %v7572_v0 = vld [vmem:[%s9017_s1 + $0x14] ss:$8 sps:$4 sm:$0xff]   ;;  %v6609_v16 = vld [vmem:[%s7237_s14 + $0x280] ss:$144 sps:$4 sm:$0xff]  }
  0xd1   : > { %2184 = vmatprep.subr.bf16.mxu0 %v6535_v18  ;;  %2245 = vmatprep.subr.bf16.mxu1 %v6538_v19  ;;  %v6612_v18 = vld [vmem:[%s7237_s14 + $0x288] ss:$144 sps:$4 sm:$0xff]   ;;  %v6617_v19 = vld [vmem:[%s7237_s14 + $0x3a4] ss:$144 sps:$4 sm:$0xff]  }
  0xd2   : > { %5651 = vmatprep.mubr.msk.bf16.mxu0 %vm741_vm0, %v7335_v17  ;;  %5655 = vmatprep.mubr.msk.bf16.mxu1 %vm741_vm0, %v7335_v17 }
  0xd4   : > { %2185 = vmatpush1.bf16.msra.mxu0 %v6533_v20  ;;  %2246 = vmatpush1.bf16.msra.mxu1 %v6536_v6  ;;  %v6620_v20 = vld [vmem:[%s7237_s14 + $0x3ac] ss:$144 sps:$4 sm:$0xff]   ;;  %v7585_v6 = vld [vmem:[%s9017_s1 + $0x10] ss:$8 sps:$4 sm:$0xff]  }
  0xd5   : > { %2186 = vmatprep.subr.bf16.mxu0 %v6541_v21  ;;  %2247 = vmatprep.subr.bf16.mxu1 %v6544_v22  ;;  %v6615_v21 = vld [vmem:[%s7237_s14 + $0x3a0] ss:$144 sps:$4 sm:$0xff]   ;;  %v6618_v22 = vld [vmem:[%s7237_s14 + $0x3a8] ss:$144 sps:$4 sm:$0xff]  }
  0xd7   : > { %1753 = vmatmul.mubr.bf16.gmra.mrb[32].mxu0 %v7349_v24  ;;  %1814 = vmatmul.mubr.bf16.gmra.mrb[32].mxu1 %v7349_v24 }
  0xd8   : > { %2187 = vmatpush1.bf16.msra.mxu0 %v6539_v23  ;;  %2248 = vmatpush1.bf16.msra.mxu1 %v6542_v11  ;;  %v6623_v23 = vld [vmem:[%s7237_s14 + $0x4c4] ss:$144 sps:$4 sm:$0xff]   ;;  %v6626_v11 = vld [vmem:[%s7237_s14 + $0x4cc] ss:$144 sps:$4 sm:$0xff]  }
  0xd9   : > { %2188 = vmatprep.subr.bf16.mxu0 %v6547_v25  ;;  %2249 = vmatprep.subr.bf16.mxu1 %v6550_v26  ;;  %v6621_v25 = vld [vmem:[%s7237_s14 + $0x4c0] ss:$144 sps:$4 sm:$0xff]   ;;  %v6624_v26 = vld [vmem:[%s7237_s14 + $0x4c8] ss:$144 sps:$4 sm:$0xff]  }
  0xda   : > { %5713 = vmatprep.mubr.msk.bf16.mxu0 %vm741_vm0, %v7438_v32  ;;  %5717 = vmatprep.mubr.msk.bf16.mxu1 %vm741_vm0, %v7438_v32 }
  0xdc   : > { %2189 = vmatpush1.bf16.msra.mxu0 %v6545_v27  ;;  %2250 = vmatpush1.bf16.msra.mxu1 %v6548_v28  ;;  %v6629_v27 = vld [vmem:[%s7237_s14 + $0x5e4] ss:$144 sps:$4 sm:$0xff]   ;;  %v6632_v28 = vld [vmem:[%s7237_s14 + $0x5ec] ss:$144 sps:$4 sm:$0xff]  }
  0xdd   : > { %2190 = vmatprep.subr.bf16.mxu0 %v6553_v29  ;;  %2251 = vmatprep.subr.bf16.mxu1 %v6556_v30  ;;  %v6627_v29 = vld [vmem:[%s7237_s14 + $0x5e0] ss:$144 sps:$4 sm:$0xff]   ;;  %v6630_v30 = vld [vmem:[%s7237_s14 + $0x5e8] ss:$144 sps:$4 sm:$0xff]  }
  0xe0   : > { %2191 = vmatpush1.bf16.msra.mxu0 %v6551_v31  ;;  %2252 = vmatpush1.bf16.msra.mxu1 %v6554_v33  ;;  %v6635_v31 = vld [vmem:[%s7237_s14 + $0x704] ss:$144 sps:$4 sm:$0xff]   ;;  %v6638_v33 = vld [vmem:[%s7237_s14 + $0x70c] ss:$144 sps:$4 sm:$0xff]  }
  0xe1   : > { %2192 = vmatprep.subr.bf16.mxu0 %v6559_v34  ;;  %2253 = vmatprep.subr.bf16.mxu1 %v6562_v35  ;;  %v6633_v34 = vld [vmem:[%s7237_s14 + $0x700] ss:$144 sps:$4 sm:$0xff]   ;;  %v6636_v35 = vld [vmem:[%s7237_s14 + $0x708] ss:$144 sps:$4 sm:$0xff]  }
  0xe4   : > { %2193 = vmatpush1.bf16.msra.mxu0 %v6557_v36  ;;  %2254 = vmatpush1.bf16.msra.mxu1 %v6560_v1  ;;  %v6641_v36 = vld [vmem:[%s7237_s14 + $0x824] ss:$144 sps:$4 sm:$0xff]   ;;  %v6644_v1 = vld [vmem:[%s7237_s14 + $0x82c] ss:$144 sps:$4 sm:$0xff]  }
  0xe5   : > { %2194 = vmatprep.subr.bf16.mxu0 %v6565_v37  ;;  %2255 = vmatprep.subr.bf16.mxu1 %v6568_v38  ;;  %v6639_v37 = vld [vmem:[%s7237_s14 + $0x820] ss:$144 sps:$4 sm:$0xff]   ;;  %v6642_v38 = vld [vmem:[%s7237_s14 + $0x828] ss:$144 sps:$4 sm:$0xff]  }
  0xe8   : > { %2195 = vmatpush1.bf16.msra.mxu0 %v6563_v39  ;;  %2256 = vmatpush1.bf16.msra.mxu1 %v6566_v40  ;;  %v6650_v39 = vld [vmem:[%s7237_s14 + $0x94c] ss:$144 sps:$4 sm:$0xff]   ;;  %v6645_v40 = vld [vmem:[%s7237_s14 + $0x940] ss:$144 sps:$4 sm:$0xff]  }
  0xe9   : > { %2196 = vmatprep.subr.bf16.mxu0 %v6571_v41  ;;  %2257 = vmatprep.subr.bf16.mxu1 %v6574_v42  ;;  %v6648_v41 = vld [vmem:[%s7237_s14 + $0x948] ss:$144 sps:$4 sm:$0xff]   ;;  %v6653_v42 = vld [vmem:[%s7237_s14 + $0xa64] ss:$144 sps:$4 sm:$0xff]  }
  0xec   : > { %2197 = vmatpush1.bf16.msra.mxu0 %v6569_v43  ;;  %2258 = vmatpush1.bf16.msra.mxu1 %v6572_v44  ;;  %v6656_v43 = vld [vmem:[%s7237_s14 + $0xa6c] ss:$144 sps:$4 sm:$0xff]   ;;  %v6651_v44 = vld [vmem:[%s7237_s14 + $0xa60] ss:$144 sps:$4 sm:$0xff]  }
  0xed   : > { %2198 = vmatprep.subr.bf16.mxu0 %v6577_v45  ;;  %2259 = vmatprep.subr.bf16.mxu1 %v6580_v46  ;;  %v6654_v45 = vld [vmem:[%s7237_s14 + $0xa68] ss:$144 sps:$4 sm:$0xff]   ;;  %v6659_v46 = vld [vmem:[%s7237_s14 + $0xb84] ss:$144 sps:$4 sm:$0xff]  }
  0xf0   : > { %2199 = vmatpush1.bf16.msra.mxu0 %v6575_v47  ;;  %2260 = vmatpush1.bf16.msra.mxu1 %v6578_v48  ;;  %v6662_v47 = vld [vmem:[%s7237_s14 + $0xb8c] ss:$144 sps:$4 sm:$0xff]   ;;  %v6657_v48 = vld [vmem:[%s7237_s14 + $0xb80] ss:$144 sps:$4 sm:$0xff]  }
  0xf1   : > { %2200 = vmatprep.subr.bf16.mxu0 %v6583_v49  ;;  %2261 = vmatprep.subr.bf16.mxu1 %v6586_v50  ;;  %v6660_v49 = vld [vmem:[%s7237_s14 + $0xb88] ss:$144 sps:$4 sm:$0xff]   ;;  %v6665_v50 = vld [vmem:[%s7237_s14 + $0xca4] ss:$144 sps:$4 sm:$0xff]  }
  0xf4   : > { %2201 = vmatpush1.bf16.msra.mxu0 %v6581_v51  ;;  %2262 = vmatpush1.bf16.msra.mxu1 %v6584_v52  ;;  %v6668_v51 = vld [vmem:[%s7237_s14 + $0xcac] ss:$144 sps:$4 sm:$0xff]   ;;  %v6663_v52 = vld [vmem:[%s7237_s14 + $0xca0] ss:$144 sps:$4 sm:$0xff]  }
  0xf5   : > { %2202 = vmatprep.subr.bf16.mxu0 %v6589_v53  ;;  %2263 = vmatprep.subr.bf16.mxu1 %v6592_v54  ;;  %v6666_v53 = vld [vmem:[%s7237_s14 + $0xca8] ss:$144 sps:$4 sm:$0xff]   ;;  %v6671_v54 = vld [vmem:[%s7237_s14 + $0xdc4] ss:$144 sps:$4 sm:$0xff]  }
  0xf8   : > { %2203 = vmatpush1.bf16.msra.mxu0 %v6587_v57  ;;  %2264 = vmatpush1.bf16.msra.mxu1 %v6590_v58 }
  0xf9   : > { %5712 = vmatprep.subr.msk.bf16.mxu0 %vm751_vm1, %v5709_v59  ;;  %5716 = vmatprep.subr.msk.bf16.mxu1 %vm751_vm1, %v5711_v60  ;;  %v6669_v59 = vld [vmem:[%s7237_s14 + $0xdc0] ss:$144 sps:$4 sm:$0xff]   ;;  %v6672_v60 = vld [vmem:[%s7237_s14 + $0xdc8] ss:$144 sps:$4 sm:$0xff]  }
  0xfc   : > { %2205 = vmatpush1.bf16.msra.mxu0 %v2167_v2  ;;  %2266 = vmatpush1.bf16.msra.mxu1 %v2173_v3 }
  0xfd   : > { %2656 = vmatprep.subr.bf16.mxu0 %v6599_v63  ;;  %2717 = vmatprep.subr.bf16.mxu1 %v6602_v4  ;;  %v5773_v4 = vcombine.high %v2372_v56, %v2372_v56 }
  0xff   : > { %2211 = vmatmul.mubr.bf16.vlgmr.msra.gmra.mrb[36].mxu0 %v7561_v10  ;;  %2272 = vmatmul.mubr.bf16.vlgmr.msra.gmra.mrb[36].mxu1 %v7561_v10 }
 0x100   : > { %2657 = vmatpush1.bf16.msra.mxu0 %v6597_v5  ;;  %2718 = vmatpush1.bf16.msra.mxu1 %v6600_v7 }
 0x101   : > { %2658 = vmatprep.subr.bf16.mxu0 %v6605_v8  ;;  %2719 = vmatprep.subr.bf16.mxu1 %v6608_v9  ;;  %v5775_v8 = vcombine.high %v2373_v61, %v2373_v61  ;;  %v5772_v9 = vcombine.low %v2372_v56, %v2372_v56  ;;  %v6720_v56 = vld [vmem:[%s7237_s14 + $0x71c] ss:$144 sps:$4 sm:$0xff]  }
 0x102   : > { %5714 = vmatprep.mubr.msk.bf16.mxu0 %vm741_vm0, %v7572_v0  ;;  %5718 = vmatprep.mubr.msk.bf16.mxu1 %vm741_vm0, %v7572_v0 }
 0x104   : > { %2659 = vmatpush1.bf16.msra.mxu0 %v6603_v12  ;;  %2720 = vmatpush1.bf16.msra.mxu1 %v6606_v13  ;;  %v5774_v12 = vcombine.low %v2373_v61, %v2373_v61  ;;  %v6681_v13 = vld [vmem:[%s7237_s14 + $0x54] ss:$144 sps:$4 sm:$0xff]   ;;  %v6718_v61 = vld [vmem:[%s7237_s14 + $0x718] ss:$144 sps:$4 sm:$0xff]  }
 0x105   : > { %2660 = vmatprep.subr.bf16.mxu0 %v6611_v14  ;;  %2721 = vmatprep.subr.bf16.mxu1 %v6614_v15  ;;  %v2645_v14 = vsel %vm751_vm1, %v5772_v9, 0  ;;  %v6721_v9 = vld [vmem:[%s7237_s14 + $0x830] ss:$144 sps:$4 sm:$0xff]  }
 0x106   : > { %v2651_v15 = vsel %vm751_vm1, %v5774_v12, 0  ;;  %v6724_v12 = vld [vmem:[%s7237_s14 + $0x838] ss:$144 sps:$4 sm:$0xff]  }
 0x107   : > { %2221 = vmatmul.mubr.bf16.gmra.mrb[40].mxu0 %v7585_v6  ;;  %2282 = vmatmul.mubr.bf16.gmra.mrb[40].mxu1 %v7585_v6 }
 0x108   : > { %2661 = vmatpush1.bf16.msra.mxu0 %v6609_v16  ;;  %2722 = vmatpush1.bf16.msra.mxu1 %v6612_v18  ;;  %v6684_v16 = vld [vmem:[%s7237_s14 + $0x5c] ss:$144 sps:$4 sm:$0xff]   ;;  %v6679_v18 = vld [vmem:[%s7237_s14 + $0x50] ss:$144 sps:$4 sm:$0xff]  }
 0x109   : > { %2662 = vmatprep.subr.bf16.mxu0 %v6617_v19  ;;  %2723 = vmatprep.subr.bf16.mxu1 %v6620_v20  ;;  %v6682_v19 = vld [vmem:[%s7237_s14 + $0x58] ss:$144 sps:$4 sm:$0xff]  }
 0x10a   : > { %5715 = vmatprep.mubr.msk.bf16.mxu0 %vm741_vm0, %v7335_v17  ;;  %5719 = vmatprep.mubr.msk.bf16.mxu1 %vm741_vm0, %v7335_v17 }
 0x10c   : > { %2663 = vmatpush1.bf16.msra.mxu0 %v6615_v21  ;;  %2724 = vmatpush1.bf16.msra.mxu1 %v6618_v22 }
 0x10d   : > { %2664 = vmatprep.subr.bf16.mxu0 %v6623_v23  ;;  %2725 = vmatprep.subr.bf16.mxu1 %v6626_v11 }
 0x10f   : > { %2231 = vmatmul.mubr.bf16.gmra.mrb[44].mxu0 %v7349_v24  ;;  %2292 = vmatmul.mubr.bf16.gmra.mrb[44].mxu1 %v7349_v24 }
 0x110   : > { %2665 = vmatpush1.bf16.msra.mxu0 %v6621_v25  ;;  %2726 = vmatpush1.bf16.msra.mxu1 %v6624_v26  ;;  %v6687_v26 = vld [vmem:[%s7237_s14 + $0x174] ss:$144 sps:$4 sm:$0xff]  }
 0x111   : > { %2666 = vmatprep.subr.bf16.mxu0 %v6629_v27  ;;  %2727 = vmatprep.subr.bf16.mxu1 %v6632_v28  ;;  %v6690_v27 = vld [vmem:[%s7237_s14 + $0x17c] ss:$144 sps:$4 sm:$0xff]  }
 0x112   : > { %5777 = vmatprep.mubr.msk.bf16.mxu0 %vm741_vm0, %v7438_v32  ;;  %5781 = vmatprep.mubr.msk.bf16.mxu1 %vm741_vm0, %v7438_v32  ;;  %v6647_v32 = vld [vmem:[%s7237_s14 + $0x944] ss:$144 sps:$4 sm:$0xff]  }
 0x114   : > { %2667 = vmatpush1.bf16.msra.mxu0 %v6627_v29  ;;  %2728 = vmatpush1.bf16.msra.mxu1 %v6630_v30  ;;  %v6685_v30 = vld [vmem:[%s7237_s14 + $0x170] ss:$144 sps:$4 sm:$0xff]  }
 0x115   : > { %2668 = vmatprep.subr.bf16.mxu0 %v6635_v31  ;;  %2729 = vmatprep.subr.bf16.mxu1 %v6638_v33  ;;  %v6688_v31 = vld [vmem:[%s7237_s14 + $0x178] ss:$144 sps:$4 sm:$0xff]   ;;  %v6693_v33 = vld [vmem:[%s7237_s14 + $0x294] ss:$144 sps:$4 sm:$0xff]  }
 0x118   : > { %2669 = vmatpush1.bf16.msra.mxu0 %v6633_v34  ;;  %2730 = vmatpush1.bf16.msra.mxu1 %v6636_v35  ;;  %v6696_v34 = vld [vmem:[%s7237_s14 + $0x29c] ss:$144 sps:$4 sm:$0xff]  }
 0x119   : > { %2670 = vmatprep.subr.bf16.mxu0 %v6641_v36  ;;  %2731 = vmatprep.subr.bf16.mxu1 %v6644_v1 }
 0x11c   : > { %2671 = vmatpush1.bf16.msra.mxu0 %v6639_v37  ;;  %2732 = vmatpush1.bf16.msra.mxu1 %v6642_v38  ;;  %v6691_v38 = vld [vmem:[%s7237_s14 + $0x290] ss:$144 sps:$4 sm:$0xff]  }
 0x11d   : > { %2672 = vmatprep.subr.bf16.mxu0 %v6647_v32  ;;  %2733 = vmatprep.subr.bf16.mxu1 %v6650_v39  ;;  %v6694_v32 = vld [vmem:[%s7237_s14 + $0x298] ss:$144 sps:$4 sm:$0xff]  }
 0x120   : > { %2673 = vmatpush1.bf16.msra.mxu0 %v6645_v40  ;;  %2734 = vmatpush1.bf16.msra.mxu1 %v6648_v41  ;;  %v6699_v41 = vld [vmem:[%s7237_s14 + $0x3b4] ss:$144 sps:$4 sm:$0xff]  }
 0x121   : > { %2674 = vmatprep.subr.bf16.mxu0 %v6653_v42  ;;  %2735 = vmatprep.subr.bf16.mxu1 %v6656_v43  ;;  %v6702_v42 = vld [vmem:[%s7237_s14 + $0x3bc] ss:$144 sps:$4 sm:$0xff]  }
 0x124   : > { %2675 = vmatpush1.bf16.msra.mxu0 %v6651_v44  ;;  %2736 = vmatpush1.bf16.msra.mxu1 %v6654_v45  ;;  %v6697_v45 = vld [vmem:[%s7237_s14 + $0x3b0] ss:$144 sps:$4 sm:$0xff]  }
 0x125   : > { %2676 = vmatprep.subr.bf16.mxu0 %v6659_v46  ;;  %2737 = vmatprep.subr.bf16.mxu1 %v6662_v47  ;;  %v6700_v46 = vld [vmem:[%s7237_s14 + $0x3b8] ss:$144 sps:$4 sm:$0xff]   ;;  %v6705_v47 = vld [vmem:[%s7237_s14 + $0x4d4] ss:$144 sps:$4 sm:$0xff]  }
 0x128   : > { %2677 = vmatpush1.bf16.msra.mxu0 %v6657_v48  ;;  %2738 = vmatpush1.bf16.msra.mxu1 %v6660_v49  ;;  %v6708_v48 = vld [vmem:[%s7237_s14 + $0x4dc] ss:$144 sps:$4 sm:$0xff]   ;;  %v6703_v49 = vld [vmem:[%s7237_s14 + $0x4d0] ss:$144 sps:$4 sm:$0xff]  }
 0x129   : > { %2678 = vmatprep.subr.bf16.mxu0 %v6665_v50  ;;  %2739 = vmatprep.subr.bf16.mxu1 %v6668_v51  ;;  %v6706_v50 = vld [vmem:[%s7237_s14 + $0x4d8] ss:$144 sps:$4 sm:$0xff]   ;;  %v6711_v51 = vld [vmem:[%s7237_s14 + $0x5f4] ss:$144 sps:$4 sm:$0xff]  }
 0x12a   : > { %v7636_v57 = vpop.f32.mrb[0].mxu0  ;;  %v7638_v58 = vpop.f32.mrb[0].mxu1 }
 0x12b   : > { %v7643_v62 = vpop.f32.mrb[1].mxu0  ;;  %v7645_v63 = vpop.f32.mrb[1].mxu1 }
 0x12c   : > { %v7647_v2 = vpop.f32.mrb[2].mxu0  ;;  %2679 = vmatpush1.bf16.msra.mxu0 %v6663_v52  ;;  %2740 = vmatpush1.bf16.msra.mxu1 %v6666_v53  ;;  %v7649_v3 = vpop.f32.mrb[2].mxu1  ;;  %v6714_v52 = vld [vmem:[%s7237_s14 + $0x5fc] ss:$144 sps:$4 sm:$0xff]   ;;  %v6709_v53 = vld [vmem:[%s7237_s14 + $0x5f0] ss:$144 sps:$4 sm:$0xff]  }
 0x12d   : > { %v7651_v5 = vpop.f32.mrb[3].mxu0  ;;  %v7653_v7 = vpop.f32.mrb[3].mxu1  ;;  %2680 = vmatprep.subr.bf16.mxu0 %v6671_v54  ;;  %2741 = vmatprep.subr.bf16.mxu1 %v6674_v55  ;;  %v6712_v54 = vld [vmem:[%s7237_s14 + $0x5f8] ss:$144 sps:$4 sm:$0xff]   ;;  %v6717_v55 = vld [vmem:[%s7237_s14 + $0x714] ss:$144 sps:$4 sm:$0xff]  }
 0x130   : > { %2681 = vmatpush1.bf16.msra.mxu0 %v6669_v59  ;;  %2742 = vmatpush1.bf16.msra.mxu1 %v6672_v60  ;;  %v7726_v59 = vld [vmem:[%s9017_s1 + $0x4] ss:$8 sps:$4 sm:$0xff]   ;;  %v6715_v60 = vld [vmem:[%s7237_s14 + $0x710] ss:$144 sps:$4 sm:$0xff]  }
 0x131   : > { %5776 = vmatprep.subr.msk.bf16.mxu0 %vm751_vm1, %v5773_v4  ;;  %5780 = vmatprep.subr.msk.bf16.mxu1 %vm751_vm1, %v5775_v8  ;;  %v6723_v4 = vld [vmem:[%s7237_s14 + $0x834] ss:$144 sps:$4 sm:$0xff]   ;;  %v6726_v8 = vld [vmem:[%s7237_s14 + $0x83c] ss:$144 sps:$4 sm:$0xff]  }
 0x132   : > { %v7663_v20 = vpop.f32.mrb[4].mxu0  ;;  %v7665_v21 = vpop.f32.mrb[4].mxu1 }
 0x133   : > { %v7667_v22 = vpop.f32.mrb[5].mxu0  ;;  %v7669_v23 = vpop.f32.mrb[5].mxu1 }
 0x134   : > { %2683 = vmatpush1.bf16.msra.mxu0 %v2645_v14  ;;  %2744 = vmatpush1.bf16.msra.mxu1 %v2651_v15  ;;  %v7671_v11 = vpop.f32.mrb[6].mxu0  ;;  %v7673_v25 = vpop.f32.mrb[6].mxu1  ;;  %v6732_v14 = vld [vmem:[%s7237_s14 + $0x95c] ss:$144 sps:$4 sm:$0xff]   ;;  %v6727_v15 = vld [vmem:[%s7237_s14 + $0x950] ss:$144 sps:$4 sm:$0xff]  }
 0x135   : > { %3134 = vmatprep.subr.bf16.mxu0 %v6681_v13  ;;  %3195 = vmatprep.subr.bf16.mxu1 %v6684_v16  ;;  %v7677_v28 = vpop.f32.mrb[7].mxu0  ;;  %v7679_v29 = vpop.f32.mrb[7].mxu1  ;;  %v6729_v13 = vld [vmem:[%s7237_s14 + $0x954] ss:$144 sps:$4 sm:$0xff]   ;;  %v6730_v16 = vld [vmem:[%s7237_s14 + $0x958] ss:$144 sps:$4 sm:$0xff]  }
 0x137   : > { %2689 = vmatmul.mubr.bf16.vlgmr.msra.gmra.mrb[48].mxu0 %v7561_v10  ;;  %2750 = vmatmul.mubr.bf16.vlgmr.msra.gmra.mrb[48].mxu1 %v7561_v10 }
 0x138   : > { %3135 = vmatpush1.bf16.msra.mxu0 %v6679_v18  ;;  %3196 = vmatpush1.bf16.msra.mxu1 %v6682_v19  ;;  %v6735_v18 = vld [vmem:[%s7237_s14 + $0xa74] ss:$144 sps:$4 sm:$0xff]   ;;  %v6738_v19 = vld [vmem:[%s7237_s14 + $0xa7c] ss:$144 sps:$4 sm:$0xff]  }
 0x139   : > { %3136 = vmatprep.subr.bf16.mxu0 %v6687_v26  ;;  %3197 = vmatprep.subr.bf16.mxu1 %v6690_v27  ;;  %v6733_v26 = vld [vmem:[%s7237_s14 + $0xa70] ss:$144 sps:$4 sm:$0xff]   ;;  %v6736_v27 = vld [vmem:[%s7237_s14 + $0xa78] ss:$144 sps:$4 sm:$0xff]  }
 0x13a   : > { %5778 = vmatprep.mubr.msk.bf16.mxu0 %vm741_vm0, %v7572_v0  ;;  %5782 = vmatprep.mubr.msk.bf16.mxu1 %vm741_vm0, %v7572_v0  ;;  %v7691_v35 = vpop.f32.mrb[8].mxu0  ;;  %v7693_v36 = vpop.f32.mrb[8].mxu1 }
 0x13b   : > { %v7695_v1 = vpop.f32.mrb[9].mxu0  ;;  %v7697_v37 = vpop.f32.mrb[9].mxu1 }
 0x13c   : > { %3137 = vmatpush1.bf16.msra.mxu0 %v6685_v30  ;;  %3198 = vmatpush1.bf16.msra.mxu1 %v6688_v31  ;;  %v822_v39 = vpop.f32.mrb[10].mxu0  ;;  %v883_v40 = vpop.f32.mrb[10].mxu1  ;;  %v6741_v30 = vld [vmem:[%s7237_s14 + $0xb94] ss:$144 sps:$4 sm:$0xff]   ;;  %v6744_v31 = vld [vmem:[%s7237_s14 + $0xb9c] ss:$144 sps:$4 sm:$0xff]  }
 0x13d   : > { %3138 = vmatprep.subr.bf16.mxu0 %v6693_v33  ;;  %3199 = vmatprep.subr.bf16.mxu1 %v6696_v34  ;;  %v823_v43 = vpop.f32.mrb[11].mxu0  ;;  %v884_v44 = vpop.f32.mrb[11].mxu1  ;;  %v6739_v33 = vld [vmem:[%s7237_s14 + $0xb90] ss:$144 sps:$4 sm:$0xff]   ;;  %v6742_v34 = vld [vmem:[%s7237_s14 + $0xb98] ss:$144 sps:$4 sm:$0xff]  }
 0x13e   : > { %v6745_v39 = vld [vmem:[%s7237_s14 + $0xcb0] ss:$144 sps:$4 sm:$0xff]   ;;  %v6748_v40 = vld [vmem:[%s7237_s14 + $0xcb8] ss:$144 sps:$4 sm:$0xff]   ;;  %v6756_v43 = vld [vmem:[%s7237_s14 + $0xddc] ss:$144 sps:$4 sm:$0xff]  }
 0x13f   : > { %2699 = vmatmul.mubr.bf16.gmra.mrb[52].mxu0 %v7585_v6  ;;  %2760 = vmatmul.mubr.bf16.gmra.mrb[52].mxu1 %v7585_v6  ;;  %v2851_v44 = vld [vmem:[%s7237_s14 + $0xef8] sm:$0xff] }
 0x140   : > { %3139 = vmatpush1.bf16.msra.mxu0 %v6691_v38  ;;  %3200 = vmatpush1.bf16.msra.mxu1 %v6694_v32  ;;  %v6747_v38 = vld [vmem:[%s7237_s14 + $0xcb4] ss:$144 sps:$4 sm:$0xff]   ;;  %v6750_v32 = vld [vmem:[%s7237_s14 + $0xcbc] ss:$144 sps:$4 sm:$0xff]  }
 0x141   : > { %3140 = vmatprep.subr.bf16.mxu0 %v6699_v41  ;;  %3201 = vmatprep.subr.bf16.mxu1 %v6702_v42  ;;  %v2850_v41 = vld [vmem:[%s7237_s14 + $0xef0] sm:$0xff] }
 0x142   : > { %5779 = vmatprep.mubr.msk.bf16.mxu0 %vm741_vm0, %v7335_v17  ;;  %5783 = vmatprep.mubr.msk.bf16.mxu1 %vm741_vm0, %v7335_v17  ;;  %v6753_v42 = vld [vmem:[%s7237_s14 + $0xdd4] ss:$144 sps:$4 sm:$0xff]  }
 0x144   : > { %3141 = vmatpush1.bf16.msra.mxu0 %v6697_v45  ;;  %3202 = vmatpush1.bf16.msra.mxu1 %v6700_v46 }
 0x145   : > { %3142 = vmatprep.subr.bf16.mxu0 %v6705_v47  ;;  %3203 = vmatprep.subr.bf16.mxu1 %v6708_v48 }
 0x147   : > { %2709 = vmatmul.mubr.bf16.gmra.mrb[56].mxu0 %v7349_v24  ;;  %2770 = vmatmul.mubr.bf16.gmra.mrb[56].mxu1 %v7349_v24 }
 0x148   : > { %3143 = vmatpush1.bf16.msra.mxu0 %v6703_v49  ;;  %3204 = vmatpush1.bf16.msra.mxu1 %v6706_v50 }
 0x149   : > { %3144 = vmatprep.subr.bf16.mxu0 %v6711_v51  ;;  %3205 = vmatprep.subr.bf16.mxu1 %v6714_v52  ;;  %v5837_v51 = vcombine.high %v2850_v41, %v2850_v41  ;;  %v5836_v52 = vcombine.low %v2850_v41, %v2850_v41 }
 0x14a   : > { %5841 = vmatprep.mubr.msk.bf16.mxu0 %vm741_vm0, %v7726_v59  ;;  %5845 = vmatprep.mubr.msk.bf16.mxu1 %vm741_vm0, %v7726_v59 }
 0x14c   : > { %3145 = vmatpush1.bf16.msra.mxu0 %v6709_v53  ;;  %3206 = vmatpush1.bf16.msra.mxu1 %v6712_v54 }
 0x14d   : > { %3146 = vmatprep.subr.bf16.mxu0 %v6717_v55  ;;  %3207 = vmatprep.subr.bf16.mxu1 %v6720_v56 }
 0x150   : > { %3147 = vmatpush1.bf16.msra.mxu0 %v6715_v60  ;;  %3208 = vmatpush1.bf16.msra.mxu1 %v6718_v61  ;;  %v6751_v60 = vld [vmem:[%s7237_s14 + $0xdd0] ss:$144 sps:$4 sm:$0xff]   ;;  %v6754_v61 = vld [vmem:[%s7237_s14 + $0xdd8] ss:$144 sps:$4 sm:$0xff]  }
 0x151   : > { %3148 = vmatprep.subr.bf16.mxu0 %v6723_v4  ;;  %3209 = vmatprep.subr.bf16.mxu1 %v6726_v8  ;;  %v5839_v4 = vcombine.high %v2851_v44, %v2851_v44 }
 0x154   : > { %3149 = vmatpush1.bf16.msra.mxu0 %v6721_v9  ;;  %3210 = vmatpush1.bf16.msra.mxu1 %v6724_v12 }
 0x155   : > { %3150 = vmatprep.subr.bf16.mxu0 %v6729_v13  ;;  %3211 = vmatprep.subr.bf16.mxu1 %v6732_v14  ;;  %v5838_v14 = vcombine.low %v2851_v44, %v2851_v44  ;;  %v6764_v44 = vld [vmem:[%s7237_s14 + $0x68] ss:$144 sps:$4 sm:$0xff]  }
 0x158   : > { %3151 = vmatpush1.bf16.msra.mxu0 %v6727_v15  ;;  %3212 = vmatpush1.bf16.msra.mxu1 %v6730_v16 }
 0x159   : > { %3152 = vmatprep.subr.bf16.mxu0 %v6735_v18  ;;  %3213 = vmatprep.subr.bf16.mxu1 %v6738_v19  ;;  %v3123_v18 = vsel %vm751_vm1, %v5836_v52, 0  ;;  %v3129_v19 = vsel %vm751_vm1, %v5838_v14, 0  ;;  %v6772_v14 = vld [vmem:[%s7237_s14 + $0x18c] ss:$144 sps:$4 sm:$0xff]   ;;  %v6767_v52 = vld [vmem:[%s7237_s14 + $0x180] ss:$144 sps:$4 sm:$0xff]  }
 0x15c   : > { %3153 = vmatpush1.bf16.msra.mxu0 %v6733_v26  ;;  %3214 = vmatpush1.bf16.msra.mxu1 %v6736_v27  ;;  %v6763_v26 = vld [vmem:[%s7237_s14 + $0x64] ss:$144 sps:$4 sm:$0xff]   ;;  %v6766_v27 = vld [vmem:[%s7237_s14 + $0x6c] ss:$144 sps:$4 sm:$0xff]  }
 0x15d   : > { %3154 = vmatprep.subr.bf16.mxu0 %v6741_v30  ;;  %3215 = vmatprep.subr.bf16.mxu1 %v6744_v31 }
 0x160   : > { %3155 = vmatpush1.bf16.msra.mxu0 %v6739_v33  ;;  %3216 = vmatpush1.bf16.msra.mxu1 %v6742_v34  ;;  %v6784_v33 = vld [vmem:[%s7237_s14 + $0x3cc] ss:$144 sps:$4 sm:$0xff]  }
 0x161   : > { %3156 = vmatprep.subr.bf16.mxu0 %v6747_v38  ;;  %3217 = vmatprep.subr.bf16.mxu1 %v6750_v32 }
 0x162   : > { %v7758_v45 = vpop.f32.mrb[12].mxu0  ;;  %v7760_v46 = vpop.f32.mrb[12].mxu1 }
 0x163   : > { %v1344_v47 = vmax.f32 %v7636_v57, %v7758_v45  ;;  %v1346_v48 = vmax.f32 %v7638_v58, %v7760_v46  ;;  %v7766_v49 = vpop.f32.mrb[13].mxu0  ;;  %v7768_v50 = vpop.f32.mrb[13].mxu1  ;;  %v6833_v58 = vld [vmem:[%s7237_s14 + $0xde0] ss:$144 sps:$4 sm:$0xff]   ;;  %v6836_v46 = vld [vmem:[%s7237_s14 + $0xde8] ss:$144 sps:$4 sm:$0xff]  }
 0x164   : > { %v1345_v53 = vmax.f32 %v7643_v62, %v7766_v49  ;;  %v1347_v54 = vmax.f32 %v7645_v63, %v7768_v50  ;;  %v7774_v55 = vpop.f32.mrb[14].mxu0  ;;  %v7776_v56 = vpop.f32.mrb[14].mxu1  ;;  %3157 = vmatpush1.bf16.msra.mxu0 %v6745_v39  ;;  %3218 = vmatpush1.bf16.msra.mxu1 %v6748_v40  ;;  %v6776_v39 = vld [vmem:[%s7237_s14 + $0x2a8] ss:$144 sps:$4 sm:$0xff]  }
 0x165   : > { %v1348_v8 = vmax.f32 %v7647_v2, %v7774_v55  ;;  %v1350_v9 = vmax.f32 %v7649_v3, %v7776_v56  ;;  %v7784_v12 = vpop.f32.mrb[15].mxu0  ;;  %v7786_v13 = vpop.f32.mrb[15].mxu1  ;;  %3158 = vmatprep.subr.bf16.mxu0 %v6753_v42  ;;  %3219 = vmatprep.subr.bf16.mxu1 %v6756_v43  ;;  %v6761_v43 = vld [vmem:[%s7237_s14 + $0x60] ss:$144 sps:$4 sm:$0xff]  }
 0x166   : > { %v9032_v2 = vmax.f32 %v7653_v7, %v7786_v13 }
 0x168   : > { %3159 = vmatpush1.bf16.msra.mxu0 %v6751_v60  ;;  %3220 = vmatpush1.bf16.msra.mxu1 %v6754_v61 }
 0x169   : > { %5840 = vmatprep.subr.msk.bf16.mxu0 %vm751_vm1, %v5837_v51  ;;  %5844 = vmatprep.subr.msk.bf16.mxu1 %vm751_vm1, %v5839_v4  ;;  %v6769_v4 = vld [vmem:[%s7237_s14 + $0x184] ss:$144 sps:$4 sm:$0xff]   ;;  %v6770_v51 = vld [vmem:[%s7237_s14 + $0x188] ss:$144 sps:$4 sm:$0xff]  }
 0x16a   : > { %v7798_v30 = vpop.f32.mrb[16].mxu0  ;;  %v7800_v31 = vpop.f32.mrb[16].mxu1 }
 0x16b   : > { %v7806_v38 = vpop.f32.mrb[17].mxu0  ;;  %v7808_v32 = vpop.f32.mrb[17].mxu1  ;;  %v9033_v7 = vmax.f32 %v7663_v20, %v7798_v30 }
 0x16c   : > { %v7814_v41 = vpop.f32.mrb[18].mxu0  ;;  %v7816_v42 = vpop.f32.mrb[18].mxu1  ;;  %3161 = vmatpush1.bf16.msra.mxu0 %v3123_v18  ;;  %3222 = vmatpush1.bf16.msra.mxu1 %v3129_v19 }
 0x16d   : > { %v7824_v60 = vpop.f32.mrb[19].mxu0  ;;  %v7826_v61 = vpop.f32.mrb[19].mxu1  ;;  %3612 = vmatprep.subr.bf16.mxu0 %v6763_v26  ;;  %3673 = vmatprep.subr.bf16.mxu1 %v6766_v27  ;;  %v6775_v26 = vld [vmem:[%s7237_s14 + $0x2a4] ss:$144 sps:$4 sm:$0xff]   ;;  %v6778_v27 = vld [vmem:[%s7237_s14 + $0x2ac] ss:$144 sps:$4 sm:$0xff]  }
 0x16f   : > { %3167 = vmatmul.mubr.bf16.vlgmr.msra.gmra.mrb[60].mxu0 %v7561_v10  ;;  %3228 = vmatmul.mubr.bf16.vlgmr.msra.gmra.mrb[60].mxu1 %v7561_v10 }
 0x170   : > { %3613 = vmatpush1.bf16.msra.mxu0 %v6761_v43  ;;  %3674 = vmatpush1.bf16.msra.mxu1 %v6764_v44  ;;  %v6781_v43 = vld [vmem:[%s7237_s14 + $0x3c4] ss:$144 sps:$4 sm:$0xff]  }
 0x171   : > { %3614 = vmatprep.subr.bf16.mxu0 %v6769_v4  ;;  %3675 = vmatprep.subr.bf16.mxu1 %v6772_v14 }
 0x172   : > { %v7840_v40 = vpop.f32.mrb[20].mxu0  ;;  %v7842_v18 = vpop.f32.mrb[20].mxu1  ;;  %5842 = vmatprep.mubr.msk.bf16.mxu0 %vm741_vm0, %v7572_v0  ;;  %5846 = vmatprep.mubr.msk.bf16.mxu1 %vm741_vm0, %v7572_v0  ;;  %v6773_v0 = vld [vmem:[%s7237_s14 + $0x2a0] ss:$144 sps:$4 sm:$0xff]  }
 0x173   : > { %v7852_v44 = vpop.f32.mrb[21].mxu0  ;;  %v7854_v4 = vpop.f32.mrb[21].mxu1 }
 0x174   : > { %3615 = vmatpush1.bf16.msra.mxu0 %v6767_v52  ;;  %3676 = vmatpush1.bf16.msra.mxu1 %v6770_v51  ;;  %v1280_v10 = vpop.f32.mrb[22].mxu0  ;;  %v1341_v34 = vpop.f32.mrb[22].mxu1  ;;  %v6779_v51 = vld [vmem:[%s7237_s14 + $0x3c0] ss:$144 sps:$4 sm:$0xff]   ;;  %v6782_v52 = vld [vmem:[%s7237_s14 + $0x3c8] ss:$144 sps:$4 sm:$0xff]  }
 0x175   : > { %3616 = vmatprep.subr.bf16.mxu0 %v6775_v26  ;;  %3677 = vmatprep.subr.bf16.mxu1 %v6778_v27  ;;  %v1281_v16 = vpop.f32.mrb[23].mxu0  ;;  %v1342_v14 = vpop.f32.mrb[23].mxu1  ;;  %v6787_v34 = vld [vmem:[%s7237_s14 + $0x4e4] ss:$144 sps:$4 sm:$0xff]   ;;  %v6790_v26 = vld [vmem:[%s7237_s14 + $0x4ec] ss:$144 sps:$4 sm:$0xff]  }
 0x176   : > { %v6788_v16 = vld [vmem:[%s7237_s14 + $0x4e8] ss:$144 sps:$4 sm:$0xff]   ;;  %v6791_v27 = vld [vmem:[%s7237_s14 + $0x600] ss:$144 sps:$4 sm:$0xff]   ;;  %v6802_v14 = vld [vmem:[%s7237_s14 + $0x72c] ss:$144 sps:$4 sm:$0xff]  }
 0x177   : > { %3177 = vmatmul.mubr.bf16.gmra.mrb[64].mxu0 %v7585_v6  ;;  %3238 = vmatmul.mubr.bf16.gmra.mrb[64].mxu1 %v7585_v6  ;;  %v6785_v6 = vld [vmem:[%s7237_s14 + $0x4e0] ss:$144 sps:$4 sm:$0xff]   ;;  %v6794_v10 = vld [vmem:[%s7237_s14 + $0x608] ss:$144 sps:$4 sm:$0xff]  }
 0x178   : > { %3617 = vmatpush1.bf16.msra.mxu0 %v6773_v0  ;;  %3678 = vmatpush1.bf16.msra.mxu1 %v6776_v39  ;;  %v6793_v39 = vld [vmem:[%s7237_s14 + $0x604] ss:$144 sps:$4 sm:$0xff]   ;;  %v6797_v0 = vld [vmem:[%s7237_s14 + $0x720] ss:$144 sps:$4 sm:$0xff]  }
 0x179   : > { %3618 = vmatprep.subr.bf16.mxu0 %v6781_v43  ;;  %3679 = vmatprep.subr.bf16.mxu1 %v6784_v33  ;;  %v6796_v33 = vld [vmem:[%s7237_s14 + $0x60c] ss:$144 sps:$4 sm:$0xff]   ;;  %v6799_v43 = vld [vmem:[%s7237_s14 + $0x724] ss:$144 sps:$4 sm:$0xff]  }
 0x17a   : > { %5843 = vmatprep.mubr.msk.bf16.mxu0 %vm741_vm0, %v7335_v17  ;;  %5847 = vmatprep.mubr.msk.bf16.mxu1 %vm741_vm0, %v7335_v17 }
 0x17c   : > { %3619 = vmatpush1.bf16.msra.mxu0 %v6779_v51  ;;  %3680 = vmatpush1.bf16.msra.mxu1 %v6782_v52  ;;  %v6800_v51 = vld [vmem:[%s7237_s14 + $0x728] ss:$144 sps:$4 sm:$0xff]   ;;  %v6805_v52 = vld [vmem:[%s7237_s14 + $0x844] ss:$144 sps:$4 sm:$0xff]  }
 0x17d   : > { %3620 = vmatprep.subr.bf16.mxu0 %v6787_v34  ;;  %3681 = vmatprep.subr.bf16.mxu1 %v6790_v26  ;;  %v6808_v34 = vld [vmem:[%s7237_s14 + $0x84c] ss:$144 sps:$4 sm:$0xff]   ;;  %v6803_v26 = vld [vmem:[%s7237_s14 + $0x840] ss:$144 sps:$4 sm:$0xff]  }
 0x17f   : > { %3187 = vmatmul.mubr.bf16.gmra.mrb[68].mxu0 %v7349_v24  ;;  %3248 = vmatmul.mubr.bf16.gmra.mrb[68].mxu1 %v7349_v24 }
 0x180   : > { %3621 = vmatpush1.bf16.msra.mxu0 %v6785_v6  ;;  %3682 = vmatpush1.bf16.msra.mxu1 %v6788_v16  ;;  %v6806_v6 = vld [vmem:[%s7237_s14 + $0x848] ss:$144 sps:$4 sm:$0xff]   ;;  %v6811_v16 = vld [vmem:[%s7237_s14 + $0x964] ss:$144 sps:$4 sm:$0xff]  }
 0x181   : > { %3622 = vmatprep.subr.bf16.mxu0 %v6793_v39  ;;  %3683 = vmatprep.subr.bf16.mxu1 %v6796_v33  ;;  %v6814_v39 = vld [vmem:[%s7237_s14 + $0x96c] ss:$144 sps:$4 sm:$0xff]   ;;  %v6809_v33 = vld [vmem:[%s7237_s14 + $0x960] ss:$144 sps:$4 sm:$0xff]  }
 0x182   : > { %5905 = vmatprep.mubr.msk.bf16.mxu0 %vm741_vm0, %v7726_v59  ;;  %5909 = vmatprep.mubr.msk.bf16.mxu1 %vm741_vm0, %v7726_v59 }
 0x184   : > { %3623 = vmatpush1.bf16.msra.mxu0 %v6791_v27  ;;  %3684 = vmatpush1.bf16.msra.mxu1 %v6794_v10  ;;  %v6812_v27 = vld [vmem:[%s7237_s14 + $0x968] ss:$144 sps:$4 sm:$0xff]   ;;  %v6817_v10 = vld [vmem:[%s7237_s14 + $0xa84] ss:$144 sps:$4 sm:$0xff]  }
 0x185   : > { %3624 = vmatprep.subr.bf16.mxu0 %v6799_v43  ;;  %3685 = vmatprep.subr.bf16.mxu1 %v6802_v14  ;;  %v6820_v43 = vld [vmem:[%s7237_s14 + $0xa8c] ss:$144 sps:$4 sm:$0xff]   ;;  %v6815_v14 = vld [vmem:[%s7237_s14 + $0xa80] ss:$144 sps:$4 sm:$0xff]  }
 0x188   : > { %3625 = vmatpush1.bf16.msra.mxu0 %v6797_v0  ;;  %3686 = vmatpush1.bf16.msra.mxu1 %v6800_v51  ;;  %v6818_v0 = vld [vmem:[%s7237_s14 + $0xa88] ss:$144 sps:$4 sm:$0xff]   ;;  %v6823_v51 = vld [vmem:[%s7237_s14 + $0xba4] ss:$144 sps:$4 sm:$0xff]  }
 0x189   : > { %3626 = vmatprep.subr.bf16.mxu0 %v6805_v52  ;;  %3687 = vmatprep.subr.bf16.mxu1 %v6808_v34  ;;  %v6826_v52 = vld [vmem:[%s7237_s14 + $0xbac] ss:$144 sps:$4 sm:$0xff]   ;;  %v6821_v34 = vld [vmem:[%s7237_s14 + $0xba0] ss:$144 sps:$4 sm:$0xff]  }
 0x18c   : > { %3627 = vmatpush1.bf16.msra.mxu0 %v6803_v26  ;;  %3688 = vmatpush1.bf16.msra.mxu1 %v6806_v6  ;;  %v6824_v26 = vld [vmem:[%s7237_s14 + $0xba8] ss:$144 sps:$4 sm:$0xff]   ;;  %v6829_v6 = vld [vmem:[%s7237_s14 + $0xcc4] ss:$144 sps:$4 sm:$0xff]  }
 0x18d   : > { %3628 = vmatprep.subr.bf16.mxu0 %v6811_v16  ;;  %3689 = vmatprep.subr.bf16.mxu1 %v6814_v39  ;;  %v6832_v16 = vld [vmem:[%s7237_s14 + $0xccc] ss:$144 sps:$4 sm:$0xff]   ;;  %v6827_v39 = vld [vmem:[%s7237_s14 + $0xcc0] ss:$144 sps:$4 sm:$0xff]  }
 0x190   : > { %3629 = vmatpush1.bf16.msra.mxu0 %v6809_v33  ;;  %3690 = vmatpush1.bf16.msra.mxu1 %v6812_v27  ;;  %v6830_v33 = vld [vmem:[%s7237_s14 + $0xcc8] ss:$144 sps:$4 sm:$0xff]   ;;  %v3328_v27 = vld [vmem:[%s7237_s14 + $0xf00] sm:$0xff] }
 0x191   : > { %3630 = vmatprep.subr.bf16.mxu0 %v6817_v10  ;;  %3691 = vmatprep.subr.bf16.mxu1 %v6820_v43  ;;  %v3329_v10 = vld [vmem:[%s7237_s14 + $0xf08] sm:$0xff]  ;;  %v6835_v43 = vld [vmem:[%s7237_s14 + $0xde4] ss:$144 sps:$4 sm:$0xff]  }
 0x192   : > { %v5902_v50 = vcombine.low %v3329_v10, %v3329_v10 }
 0x194   : > { %3631 = vmatpush1.bf16.msra.mxu0 %v6815_v14  ;;  %3692 = vmatpush1.bf16.msra.mxu1 %v6818_v0  ;;  %v6838_v14 = vld [vmem:[%s7237_s14 + $0xdec] ss:$144 sps:$4 sm:$0xff]   ;;  %v3607_v56 = vsel %vm751_vm1, %v5902_v50, 0  ;;  %v9042_v50 = vmax.f32 %v7693_v36, %v7842_v18  ;;  %v6858_v36 = vld [vmem:[%s7237_s14 + $0x2b8] ss:$144 sps:$4 sm:$0xff]  }
 0x195   : > { %3632 = vmatprep.subr.bf16.mxu0 %v6823_v51  ;;  %3693 = vmatprep.subr.bf16.mxu1 %v6826_v52 }
 0x198   : > { %3633 = vmatpush1.bf16.msra.mxu0 %v6821_v34  ;;  %3694 = vmatpush1.bf16.msra.mxu1 %v6824_v26 }
 0x199   : > { %3634 = vmatprep.subr.bf16.mxu0 %v6829_v6  ;;  %3695 = vmatprep.subr.bf16.mxu1 %v6832_v16  ;;  %v5901_v6 = vcombine.high %v3328_v27, %v3328_v27  ;;  %v5903_v16 = vcombine.high %v3329_v10, %v3329_v10 }
 0x19a   : > { %v1734_v0 = vpop.f32.mrb[24].mxu0  ;;  %v1795_v19 = vpop.f32.mrb[24].mxu1 }
 0x19b   : > { %v7917_v51 = vmax.f32 %v1344_v47, %v1734_v0  ;;  %v7922_v52 = vmax.f32 %v1346_v48, %v1795_v19  ;;  %v1736_v34 = vpop.f32.mrb[25].mxu0  ;;  %v1797_v26 = vpop.f32.mrb[25].mxu1  ;;  %v5900_v48 = vcombine.low %v3328_v27, %v3328_v27  ;;  %v9036_v0 = vmax.f32 %v7669_v23, %v7808_v32 }
 0x19c   : > { %v7927_v15 = vmax.f32 %v1345_v53, %v1736_v34  ;;  %v7932_v57 = vmax.f32 %v1347_v54, %v1797_v26  ;;  %v1738_v45 = vpop.f32.mrb[26].mxu0  ;;  %v1799_v47 = vpop.f32.mrb[26].mxu1  ;;  %3635 = vmatpush1.bf16.msra.mxu0 %v6827_v39  ;;  %3696 = vmatpush1.bf16.msra.mxu1 %v6830_v33  ;;  %v9031_v53 = vmax.f32 %v7651_v5, %v7784_v12  ;;  %v6845_v5 = vld [vmem:[%s7237_s14 + $0x74] ss:$144 sps:$4 sm:$0xff]  }
 0x19d   : > { %v7939_v19 = vmax.f32 %v1348_v8, %v1738_v45  ;;  %v7944_v62 = vmax.f32 %v1350_v9, %v1799_v47  ;;  %v1740_v63 = vpop.f32.mrb[27].mxu0  ;;  %v1801_v49 = vpop.f32.mrb[27].mxu1  ;;  %3636 = vmatprep.subr.bf16.mxu0 %v6835_v43  ;;  %3697 = vmatprep.subr.bf16.mxu1 %v6838_v14  ;;  %v3601_v3 = vsel %vm751_vm1, %v5900_v48, 0  ;;  %v6848_v8 = vld [vmem:[%s7237_s14 + $0x7c] ss:$144 sps:$4 sm:$0xff]   ;;  %v9034_v39 = vmax.f32 %v7665_v21, %v7800_v31 }
 0x19e   : > { %v7949_v54 = vmax.f32 %v9031_v53, %v1740_v63  ;;  %v7954_v55 = vmax.f32 %v9032_v2, %v1801_v49  ;;  %v9035_v43 = vmax.f32 %v7667_v22, %v7806_v38  ;;  %v6843_v21 = vld [vmem:[%s7237_s14 + $0x70] ss:$144 sps:$4 sm:$0xff]   ;;  %v6846_v31 = vld [vmem:[%s7237_s14 + $0x78] ss:$144 sps:$4 sm:$0xff]   ;;  %v9037_v26 = vmax.f32 %v7671_v11, %v7814_v41  ;;  %v6854_v45 = vld [vmem:[%s7237_s14 + $0x19c] ss:$144 sps:$4 sm:$0xff]  }
 0x19f   : > { %v9038_v22 = vmax.f32 %v7673_v25, %v7816_v42  ;;  %v9039_v11 = vmax.f32 %v7677_v28, %v7824_v60  ;;  %v9040_v47 = vmax.f32 %v7679_v29, %v7826_v61  ;;  %v8009_v42 = vld [vmem:[%s9017_s1] ss:$8 sps:$4 sm:$0xff]   ;;  %v6857_v60 = vld [vmem:[%s7237_s14 + $0x2b4] ss:$144 sps:$4 sm:$0xff]   ;;  %v6860_v29 = vld [vmem:[%s7237_s14 + $0x2bc] ss:$144 sps:$4 sm:$0xff]   ;;  %v9041_v63 = vmax.f32 %v7691_v35, %v7840_v40 }
 0x1a0   : > { %3637 = vmatpush1.bf16.msra.mxu0 %v6833_v58  ;;  %3698 = vmatpush1.bf16.msra.mxu1 %v6836_v46  ;;  %v6849_v58 = vld [vmem:[%s7237_s14 + $0x190] ss:$144 sps:$4 sm:$0xff]   ;;  %v6852_v28 = vld [vmem:[%s7237_s14 + $0x198] ss:$144 sps:$4 sm:$0xff]   ;;  %v8020_v48 = vld [vmem:[%s9017_s1 + $0x14] ss:$8 sps:$4 sm:$0xff]  }
 0x1a1   : > { %5904 = vmatprep.subr.msk.bf16.mxu0 %vm751_vm1, %v5901_v6  ;;  %5908 = vmatprep.subr.msk.bf16.mxu1 %vm751_vm1, %v5903_v16  ;;  %v6851_v16 = vld [vmem:[%s7237_s14 + $0x194] ss:$144 sps:$4 sm:$0xff]   ;;  %v6855_v35 = vld [vmem:[%s7237_s14 + $0x2b0] ss:$144 sps:$4 sm:$0xff]  }
 0x1a2   : > { %v1744_v9 = vpop.f32.mrb[28].mxu0  ;;  %v1805_v12 = vpop.f32.mrb[28].mxu1 }
 0x1a3   : > { %v7965_v13 = vmax.f32 %v9033_v7, %v1744_v9  ;;  %v7970_v33 = vmax.f32 %v9034_v39, %v1805_v12  ;;  %v1746_v27 = vpop.f32.mrb[29].mxu0  ;;  %v1807_v10 = vpop.f32.mrb[29].mxu1  ;;  %v6864_v39 = vld [vmem:[%s7237_s14 + $0x3d8] ss:$144 sps:$4 sm:$0xff]  }
 0x1a4   : > { %v7975_v14 = vmax.f32 %v9035_v43, %v1746_v27  ;;  %v7980_v20 = vmax.f32 %v9036_v0, %v1807_v10  ;;  %v1748_v30 = vpop.f32.mrb[30].mxu0  ;;  %v1809_v34 = vpop.f32.mrb[30].mxu1  ;;  %3639 = vmatpush1.bf16.msra.mxu0 %v3601_v3  ;;  %3700 = vmatpush1.bf16.msra.mxu1 %v3607_v56  ;;  %v9043_v56 = vmax.f32 %v7695_v1, %v7852_v44  ;;  %v6863_v1 = vld [vmem:[%s7237_s14 + $0x3d4] ss:$144 sps:$4 sm:$0xff]   ;;  %v6866_v44 = vld [vmem:[%s7237_s14 + $0x3dc] ss:$144 sps:$4 sm:$0xff]  }
 0x1a5   : > { %v7987_v6 = vmax.f32 %v9037_v26, %v1748_v30  ;;  %v7992_v38 = vmax.f32 %v9038_v22, %v1809_v34  ;;  %v1750_v23 = vpop.f32.mrb[31].mxu0  ;;  %v1811_v32 = vpop.f32.mrb[31].mxu1  ;;  %4090 = vmatprep.subr.bf16.mxu0 %v6845_v5  ;;  %4151 = vmatprep.subr.bf16.mxu1 %v6848_v8  ;;  %v9044_v8 = vmax.f32 %v7697_v37, %v7854_v4  ;;  %v8053_v37 = vld [vmem:[%s9017_s1 + $0x10] ss:$8 sps:$4 sm:$0xff]   ;;  %v6869_v27 = vld [vmem:[%s7237_s14 + $0x4f4] ss:$144 sps:$4 sm:$0xff]  }
 0x1a6   : > { %v7999_v41 = vmax.f32 %v9039_v11, %v1750_v23  ;;  %v8004_v25 = vmax.f32 %v9040_v47, %v1811_v32  ;;  %v6861_v4 = vld [vmem:[%s7237_s14 + $0x3d0] ss:$144 sps:$4 sm:$0xff]   ;;  %v6872_v10 = vld [vmem:[%s7237_s14 + $0x4fc] ss:$144 sps:$4 sm:$0xff]   ;;  %v6870_v0 = vld [vmem:[%s7237_s14 + $0x4f8] ss:$144 sps:$4 sm:$0xff]  }
 0x1a7   : > { %3645 = vmatmul.mubr.bf16.vlgmr.msra.gmra.mrb[72].mxu0 %v8009_v42  ;;  %3706 = vmatmul.mubr.bf16.vlgmr.msra.gmra.mrb[72].mxu1 %v8009_v42  ;;  %v6867_v43 = vld [vmem:[%s7237_s14 + $0x4f0] ss:$144 sps:$4 sm:$0xff]   ;;  %v6875_v30 = vld [vmem:[%s7237_s14 + $0x614] ss:$144 sps:$4 sm:$0xff]   ;;  %v6878_v34 = vld [vmem:[%s7237_s14 + $0x61c] ss:$144 sps:$4 sm:$0xff]  }
 0x1a8   : > { %4091 = vmatpush1.bf16.msra.mxu0 %v6843_v21  ;;  %4152 = vmatpush1.bf16.msra.mxu1 %v6846_v31  ;;  %v6873_v21 = vld [vmem:[%s7237_s14 + $0x610] ss:$144 sps:$4 sm:$0xff]   ;;  %v6876_v31 = vld [vmem:[%s7237_s14 + $0x618] ss:$144 sps:$4 sm:$0xff]   ;;  %v6881_v26 = vld [vmem:[%s7237_s14 + $0x734] ss:$144 sps:$4 sm:$0xff]  }
 0x1a9   : > { %4092 = vmatprep.subr.bf16.mxu0 %v6851_v16  ;;  %4153 = vmatprep.subr.bf16.mxu1 %v6854_v45  ;;  %v6884_v22 = vld [vmem:[%s7237_s14 + $0x73c] ss:$144 sps:$4 sm:$0xff]   ;;  %v6879_v23 = vld [vmem:[%s7237_s14 + $0x730] ss:$144 sps:$4 sm:$0xff]   ;;  %v6882_v32 = vld [vmem:[%s7237_s14 + $0x738] ss:$144 sps:$4 sm:$0xff]  }
 0x1aa   : > { %v1754_v61 = vpop.f32.mrb[32].mxu0  ;;  %v1815_v46 = vpop.f32.mrb[32].mxu1  ;;  %5906 = vmatprep.mubr.msk.bf16.mxu0 %vm741_vm0, %v8020_v48  ;;  %5910 = vmatprep.mubr.msk.bf16.mxu1 %vm741_vm0, %v8020_v48  ;;  %v6887_v16 = vld [vmem:[%s7237_s14 + $0x854] ss:$144 sps:$4 sm:$0xff]   ;;  %v6890_v45 = vld [vmem:[%s7237_s14 + $0x85c] ss:$144 sps:$4 sm:$0xff]  }
 0x1ab   : > { %v8029_v49 = vmax.f32 %v9041_v63, %v1754_v61  ;;  %v8034_v53 = vmax.f32 %v9042_v50, %v1815_v46  ;;  %v1756_v2 = vpop.f32.mrb[33].mxu0  ;;  %v1817_v3 = vpop.f32.mrb[33].mxu1  ;;  %v6885_v11 = vld [vmem:[%s7237_s14 + $0x850] ss:$144 sps:$4 sm:$0xff]   ;;  %v6888_v47 = vld [vmem:[%s7237_s14 + $0x858] ss:$144 sps:$4 sm:$0xff]  }
 0x1ac   : > { %v8039_v5 = vmax.f32 %v9043_v56, %v1756_v2  ;;  %v8044_v9 = vmax.f32 %v9044_v8, %v1817_v3  ;;  %4093 = vmatpush1.bf16.msra.mxu0 %v6849_v58  ;;  %4154 = vmatpush1.bf16.msra.mxu1 %v6852_v28  ;;  %v1758_v40 = vpop.f32.mrb[34].mxu0  ;;  %v1819_v18 = vpop.f32.mrb[34].mxu1  ;;  %v6896_v58 = vld [vmem:[%s7237_s14 + $0x97c] ss:$144 sps:$4 sm:$0xff]   ;;  %v6891_v28 = vld [vmem:[%s7237_s14 + $0x970] ss:$144 sps:$4 sm:$0xff]  }
 0x1ad   : > { %4094 = vmatprep.subr.bf16.mxu0 %v6857_v60  ;;  %4155 = vmatprep.subr.bf16.mxu1 %v6860_v29  ;;  %v1759_v12 = vpop.f32.mrb[35].mxu0  ;;  %v1820_v7 = vpop.f32.mrb[35].mxu1  ;;  %v6894_v60 = vld [vmem:[%s7237_s14 + $0x978] ss:$144 sps:$4 sm:$0xff]   ;;  %v6899_v29 = vld [vmem:[%s7237_s14 + $0xa94] ss:$144 sps:$4 sm:$0xff]  }
 0x1ae   : > { %v6902_v61 = vld [vmem:[%s7237_s14 + $0xa9c] ss:$144 sps:$4 sm:$0xff]   ;;  %v6897_v46 = vld [vmem:[%s7237_s14 + $0xa90] ss:$144 sps:$4 sm:$0xff]   ;;  %v6900_v63 = vld [vmem:[%s7237_s14 + $0xa98] ss:$144 sps:$4 sm:$0xff]  }
 0x1af   : > { %3655 = vmatmul.mubr.bf16.gmra.mrb[76].mxu0 %v8053_v37  ;;  %3716 = vmatmul.mubr.bf16.gmra.mrb[76].mxu1 %v8053_v37  ;;  %v6905_v50 = vld [vmem:[%s7237_s14 + $0xbb4] ss:$144 sps:$4 sm:$0xff]   ;;  %v6908_v2 = vld [vmem:[%s7237_s14 + $0xbbc] ss:$144 sps:$4 sm:$0xff]   ;;  %v6903_v3 = vld [vmem:[%s7237_s14 + $0xbb0] ss:$144 sps:$4 sm:$0xff]  }
 0x1b0   : > { %4095 = vmatpush1.bf16.msra.mxu0 %v6855_v35  ;;  %4156 = vmatpush1.bf16.msra.mxu1 %v6858_v36  ;;  %v6906_v56 = vld [vmem:[%s7237_s14 + $0xbb8] ss:$144 sps:$4 sm:$0xff]   ;;  %v6911_v8 = vld [vmem:[%s7237_s14 + $0xcd4] ss:$144 sps:$4 sm:$0xff]   ;;  %v6914_v35 = vld [vmem:[%s7237_s14 + $0xcdc] ss:$144 sps:$4 sm:$0xff]  }
 0x1b1   : > { %4096 = vmatprep.subr.bf16.mxu0 %v6863_v1  ;;  %4157 = vmatprep.subr.bf16.mxu1 %v6866_v44  ;;  %v6909_v36 = vld [vmem:[%s7237_s14 + $0xcd0] ss:$144 sps:$4 sm:$0xff]   ;;  %v6912_v40 = vld [vmem:[%s7237_s14 + $0xcd8] ss:$144 sps:$4 sm:$0xff]   ;;  %v6917_v44 = vld [vmem:[%s7237_s14 + $0xdf4] ss:$144 sps:$4 sm:$0xff]  }
 0x1b2   : > { %5907 = vmatprep.mubr.msk.bf16.mxu0 %vm741_vm0, %v7335_v17  ;;  %5911 = vmatprep.mubr.msk.bf16.mxu1 %vm741_vm0, %v7335_v17  ;;  %v3806_v18 = vld [vmem:[%s7237_s14 + $0xf10] sm:$0xff]  ;;  %v3807_v1 = vld [vmem:[%s7237_s14 + $0xf18] sm:$0xff] }
 0x1b3   : > { %v6920_v12 = vld [vmem:[%s7237_s14 + $0xdfc] ss:$144 sps:$4 sm:$0xff]  }
 0x1b4   : > { %4097 = vmatpush1.bf16.msra.mxu0 %v6861_v4  ;;  %4158 = vmatpush1.bf16.msra.mxu1 %v6864_v39 }
 0x1b5   : > { %4098 = vmatprep.subr.bf16.mxu0 %v6869_v27  ;;  %4159 = vmatprep.subr.bf16.mxu1 %v6872_v10 }
 0x1b7   : > { %3665 = vmatmul.mubr.bf16.gmra.mrb[80].mxu0 %v7349_v24  ;;  %3726 = vmatmul.mubr.bf16.gmra.mrb[80].mxu1 %v7349_v24 }
 0x1b8   : > { %4099 = vmatpush1.bf16.msra.mxu0 %v6867_v43  ;;  %4160 = vmatpush1.bf16.msra.mxu1 %v6870_v0  ;;  %v6915_v0 = vld [vmem:[%s7237_s14 + $0xdf0] ss:$144 sps:$4 sm:$0xff]  }
 0x1b9   : > { %4100 = vmatprep.subr.bf16.mxu0 %v6875_v30  ;;  %4161 = vmatprep.subr.bf16.mxu1 %v6878_v34  ;;  %v6918_v30 = vld [vmem:[%s7237_s14 + $0xdf8] ss:$144 sps:$4 sm:$0xff]   ;;  %v5965_v34 = vcombine.high %v3806_v18, %v3806_v18 }
 0x1ba   : > { %5969 = vmatprep.mubr.msk.bf16.mxu0 %vm741_vm0, %v7726_v59  ;;  %5973 = vmatprep.mubr.msk.bf16.mxu1 %vm741_vm0, %v7726_v59  ;;  %v6893_v59 = vld [vmem:[%s7237_s14 + $0x974] ss:$144 sps:$4 sm:$0xff]  }
 0x1bc   : > { %4101 = vmatpush1.bf16.msra.mxu0 %v6873_v21  ;;  %4162 = vmatpush1.bf16.msra.mxu1 %v6876_v31  ;;  %v5967_v21 = vcombine.high %v3807_v1, %v3807_v1 }
 0x1bd   : > { %4102 = vmatprep.subr.bf16.mxu0 %v6881_v26  ;;  %4163 = vmatprep.subr.bf16.mxu1 %v6884_v22 }
 0x1c0   : > { %4103 = vmatpush1.bf16.msra.mxu0 %v6879_v23  ;;  %4164 = vmatpush1.bf16.msra.mxu1 %v6882_v32  ;;  %v5964_v32 = vcombine.low %v3806_v18, %v3806_v18 }
 0x1c1   : > { %4104 = vmatprep.subr.bf16.mxu0 %v6887_v16  ;;  %4165 = vmatprep.subr.bf16.mxu1 %v6890_v45  ;;  %v4822_v16 = vld [vmem:[%s9018_s2 + $0x8] sm:$0xff]  ;;  %v4821_v45 = vld [vmem:[%s9018_s2] sm:$0xff] }
 0x1c4   : > { %4105 = vmatpush1.bf16.msra.mxu0 %v6885_v11  ;;  %4166 = vmatpush1.bf16.msra.mxu1 %v6888_v47 }
 0x1c5   : > { %4106 = vmatprep.subr.bf16.mxu0 %v6893_v59  ;;  %4167 = vmatprep.subr.bf16.mxu1 %v6896_v58 }
 0x1c8   : > { %4107 = vmatpush1.bf16.msra.mxu0 %v6891_v28  ;;  %4168 = vmatpush1.bf16.msra.mxu1 %v6894_v60  ;;  %v5966_v28 = vcombine.low %v3807_v1, %v3807_v1 }
 0x1c9   : > { %4108 = vmatprep.subr.bf16.mxu0 %v6899_v29  ;;  %4169 = vmatprep.subr.bf16.mxu1 %v6902_v61  ;;  %v7108_v61 = vmov 0  }
 0x1ca   : > { %6260 = vset.pattern.permute.xlu1 %v7108_v61  ;;  %6259 = vset.pattern.permute.xlu0 %v7108_v61  ;;  %v6933_v61 = vld [vmem:[%s7237_s14 + $0x1a4] ss:$144 sps:$4 sm:$0xff]  }
 0x1cb   : > { %4833 = vperm.xlu1 %6260, %v4822_v16   ;;  %4828 = vperm.xlu0 %6259, %v4821_v45   ;;  %v6934_v16 = vld [vmem:[%s7237_s14 + $0x1a8] ss:$144 sps:$4 sm:$0xff]  }
 0x1cc   : > { %4109 = vmatpush1.bf16.msra.mxu0 %v6897_v46  ;;  %4170 = vmatpush1.bf16.msra.mxu1 %v6900_v63  ;;  %v4872_v46 = vld [vmem:[%s9019_s3 + $0x8] sm:$0xff]  ;;  %v4871_v63 = vld [vmem:[%s9019_s3] sm:$0xff] }
 0x1cd   : > { %4110 = vmatprep.subr.bf16.mxu0 %v6905_v50  ;;  %4171 = vmatprep.subr.bf16.mxu1 %v6908_v2  ;;  %v4079_v50 = vsel %vm751_vm1, %v5964_v32, 0  ;;  %v4085_v2 = vsel %vm751_vm1, %v5966_v28, 0 }
 0x1cf   : > { %4883 = vperm.xlu1 %6260, %v4872_v46   ;;  %4878 = vperm.xlu0 %6259, %v4871_v63   ;;  %v6936_v46 = vld [vmem:[%s7237_s14 + $0x1ac] ss:$144 sps:$4 sm:$0xff]   ;;  %v6939_v63 = vld [vmem:[%s7237_s14 + $0x2c4] ss:$144 sps:$4 sm:$0xff]  }
 0x1d0   : > { %4111 = vmatpush1.bf16.msra.mxu0 %v6903_v3  ;;  %4172 = vmatpush1.bf16.msra.mxu1 %v6906_v56  ;;  %v6927_v3 = vld [vmem:[%s7237_s14 + $0x84] ss:$144 sps:$4 sm:$0xff]   ;;  %v6930_v56 = vld [vmem:[%s7237_s14 + $0x8c] ss:$144 sps:$4 sm:$0xff]  }
 0x1d1   : > { %4112 = vmatprep.subr.bf16.mxu0 %v6911_v8  ;;  %4173 = vmatprep.subr.bf16.mxu1 %v6914_v35 }
 0x1d2   : > { %v8105_v7 = vpop.f32.mrb[36].mxu0  ;;  %v8107_v4 = vpop.f32.mrb[36].mxu1 }
 0x1d3   : > { %v2300_v39 = vmax.f32 %v7917_v51, %v8105_v7  ;;  %v2302_v27 = vmax.f32 %v7922_v52, %v8107_v4  ;;  %v8113_v10 = vpop.f32.mrb[37].mxu0  ;;  %v8115_v43 = vpop.f32.mrb[37].mxu1  ;;  %v6997_v52 = vld [vmem:[%s7237_s14 + $0xe00] ss:$144 sps:$4 sm:$0xff]   ;;  %v7000_v4 = vld [vmem:[%s7237_s14 + $0xe08] ss:$144 sps:$4 sm:$0xff]  }
 0x1d4   : > { %v2301_v31 = vmax.f32 %v7927_v15, %v8113_v10  ;;  %v2303_v26 = vmax.f32 %v7932_v57, %v8115_v43  ;;  %v8123_v22 = vpop.f32.mrb[38].mxu0  ;;  %v8125_v23 = vpop.f32.mrb[38].mxu1  ;;  %4113 = vmatpush1.bf16.msra.mxu0 %v6909_v36  ;;  %4174 = vmatpush1.bf16.msra.mxu1 %v6912_v40  ;;  %v6940_v36 = vld [vmem:[%s7237_s14 + $0x2c8] ss:$144 sps:$4 sm:$0xff]   ;;  %v6943_v40 = vld [vmem:[%s7237_s14 + $0x3e0] ss:$144 sps:$4 sm:$0xff]  }
 0x1d5   : > { %v8137_v59 = vpop.f32.mrb[39].mxu0  ;;  %v8139_v58 = vpop.f32.mrb[39].mxu1  ;;  %4114 = vmatprep.subr.bf16.mxu0 %v6917_v44  ;;  %4175 = vmatprep.subr.bf16.mxu1 %v6920_v12  ;;  %v9046_v15 = vmax.f32 %v7944_v62, %v8125_v23 }
 0x1d8   : > { %4115 = vmatpush1.bf16.msra.mxu0 %v6915_v0  ;;  %4176 = vmatpush1.bf16.msra.mxu1 %v6918_v30 }
 0x1d9   : > { %5968 = vmatprep.subr.msk.bf16.mxu0 %vm751_vm1, %v5965_v34  ;;  %5972 = vmatprep.subr.msk.bf16.mxu1 %vm751_vm1, %v5967_v21  ;;  %v6925_v34 = vld [vmem:[%s7237_s14 + $0x80] ss:$144 sps:$4 sm:$0xff]   ;;  %v6928_v21 = vld [vmem:[%s7237_s14 + $0x88] ss:$144 sps:$4 sm:$0xff]  }
 0x1da   : > { %v8157_v8 = vpop.f32.mrb[40].mxu0  ;;  %v8159_v35 = vpop.f32.mrb[40].mxu1 }
 0x1db   : > { %v8165_v18 = vpop.f32.mrb[41].mxu0  ;;  %v8167_v1 = vpop.f32.mrb[41].mxu1 }
 0x1dc   : > { %v8173_v0 = vpop.f32.mrb[42].mxu0  ;;  %v8175_v30 = vpop.f32.mrb[42].mxu1  ;;  %4117 = vmatpush1.bf16.msra.mxu0 %v4079_v50  ;;  %4178 = vmatpush1.bf16.msra.mxu1 %v4085_v2  ;;  %v6931_v2 = vld [vmem:[%s7237_s14 + $0x1a0] ss:$144 sps:$4 sm:$0xff]   ;;  %v6942_v50 = vld [vmem:[%s7237_s14 + $0x2cc] ss:$144 sps:$4 sm:$0xff]  }
 0x1dd   : > { %v8183_v45 = vpop.f32.mrb[43].mxu0  ;;  %v8185_v28 = vpop.f32.mrb[43].mxu1  ;;  %4568 = vmatprep.subr.bf16.mxu0 %v6927_v3  ;;  %4629 = vmatprep.subr.bf16.mxu1 %v6930_v56  ;;  %v4873_v3 = vld [vmem:[%s9019_s3 + $0x10] sm:$0xff] }
 0x1de   : > { %v4823_v56 = vld [vmem:[%s9018_s2 + $0x10] sm:$0xff]  ;;  %4888 = vperm.xlu1 %6260, %v4873_v3  }
 0x1df   : > { %4123 = vmatmul.mubr.bf16.vlgmr.msra.gmra.mrb[84].mxu0 %v8009_v42  ;;  %4184 = vmatmul.mubr.bf16.vlgmr.msra.gmra.mrb[84].mxu1 %v8009_v42  ;;  %v6945_v3 = vld [vmem:[%s7237_s14 + $0x3e4] ss:$144 sps:$4 sm:$0xff]  }
 0x1e0   : > { %4569 = vmatpush1.bf16.msra.mxu0 %v6925_v34  ;;  %4630 = vmatpush1.bf16.msra.mxu1 %v6928_v21  ;;  %v6937_v34 = vld [vmem:[%s7237_s14 + $0x2c0] ss:$144 sps:$4 sm:$0xff]  }
 0x1e1   : > { %4570 = vmatprep.subr.bf16.mxu0 %v6933_v61  ;;  %4631 = vmatprep.subr.bf16.mxu1 %v6936_v46 }
 0x1e2   : > { %v8205_v32 = vpop.f32.mrb[44].mxu0  ;;  %v8207_v12 = vpop.f32.mrb[44].mxu1  ;;  %5970 = vmatprep.mubr.msk.bf16.mxu0 %vm741_vm0, %v8020_v48  ;;  %5974 = vmatprep.mubr.msk.bf16.mxu1 %vm741_vm0, %v8020_v48 }
 0x1e3   : > { %v8217_v61 = vpop.f32.mrb[45].mxu0  ;;  %v8219_v46 = vpop.f32.mrb[45].mxu1  ;;  %4838 = vperm.xlu0 %6259, %v4823_v56   ;;  %v6948_v56 = vld [vmem:[%s7237_s14 + $0x3ec] ss:$144 sps:$4 sm:$0xff]  }
 0x1e4   : > { %4571 = vmatpush1.bf16.msra.mxu0 %v6931_v2  ;;  %4632 = vmatpush1.bf16.msra.mxu1 %v6934_v16  ;;  %v2236_v21 = vpop.f32.mrb[46].mxu0  ;;  %v2297_v29 = vpop.f32.mrb[46].mxu1  ;;  %v6946_v16 = vld [vmem:[%s7237_s14 + $0x3e8] ss:$144 sps:$4 sm:$0xff]   ;;  %v6957_v2 = vld [vmem:[%s7237_s14 + $0x624] ss:$144 sps:$4 sm:$0xff]  }
 0x1e5   : > { %4572 = vmatprep.subr.bf16.mxu0 %v6939_v63  ;;  %4633 = vmatprep.subr.bf16.mxu1 %v6942_v50  ;;  %v2237_v60 = vpop.f32.mrb[47].mxu0  ;;  %v2298_v47 = vpop.f32.mrb[47].mxu1  ;;  %v4825_v29 = vld [vmem:[%s9018_s2 + $0x20] sm:$0xff]  ;;  %v6954_v63 = vld [vmem:[%s7237_s14 + $0x50c] ss:$144 sps:$4 sm:$0xff]  }
 0x1e6   : > { %v4824_v60 = vld [vmem:[%s9018_s2 + $0x18] sm:$0xff]  ;;  %v6951_v47 = vld [vmem:[%s7237_s14 + $0x504] ss:$144 sps:$4 sm:$0xff]   ;;  %4848 = vperm.xlu1 %6260, %v4825_v29   ;;  %v6955_v21 = vld [vmem:[%s7237_s14 + $0x620] ss:$144 sps:$4 sm:$0xff]  }
 0x1e7   : > { %4133 = vmatmul.mubr.bf16.gmra.mrb[88].mxu0 %v8053_v37  ;;  %4194 = vmatmul.mubr.bf16.gmra.mrb[88].mxu1 %v8053_v37  ;;  %v6952_v50 = vld [vmem:[%s7237_s14 + $0x508] ss:$144 sps:$4 sm:$0xff]   ;;  %v6966_v29 = vld [vmem:[%s7237_s14 + $0x74c] ss:$144 sps:$4 sm:$0xff]  }
 0x1e8   : > { %4573 = vmatpush1.bf16.msra.mxu0 %v6937_v34  ;;  %4634 = vmatpush1.bf16.msra.mxu1 %v6940_v36  ;;  %v6949_v36 = vld [vmem:[%s7237_s14 + $0x500] ss:$144 sps:$4 sm:$0xff]   ;;  %v6960_v34 = vld [vmem:[%s7237_s14 + $0x62c] ss:$144 sps:$4 sm:$0xff]  }
 0x1e9   : > { %4574 = vmatprep.subr.bf16.mxu0 %v6945_v3  ;;  %4635 = vmatprep.subr.bf16.mxu1 %v6948_v56  ;;  %v6958_v3 = vld [vmem:[%s7237_s14 + $0x628] ss:$144 sps:$4 sm:$0xff]  }
 0x1ea   : > { %5971 = vmatprep.mubr.msk.bf16.mxu0 %vm741_vm0, %v7335_v17  ;;  %5975 = vmatprep.mubr.msk.bf16.mxu1 %vm741_vm0, %v7335_v17  ;;  %v4874_v56 = vld [vmem:[%s9019_s3 + $0x18] sm:$0xff] }
 0x1eb   : > { %4843 = vperm.xlu0 %6259, %v4824_v60   ;;  %v7027_v60 = vld [vmem:[%s9017_s1 + $0x4] ss:$8 sps:$4 sm:$0xff]  }
 0x1ec   : > { %4575 = vmatpush1.bf16.msra.mxu0 %v6943_v40  ;;  %4636 = vmatpush1.bf16.msra.mxu1 %v6946_v16  ;;  %v4875_v40 = vld [vmem:[%s9019_s3 + $0x20] sm:$0xff] }
 0x1ed   : > { %4576 = vmatprep.subr.bf16.mxu0 %v6951_v47  ;;  %4637 = vmatprep.subr.bf16.mxu1 %v6954_v63  ;;  %v6963_v16 = vld [vmem:[%s7237_s14 + $0x744] ss:$144 sps:$4 sm:$0xff]   ;;  %v6961_v47 = vld [vmem:[%s7237_s14 + $0x740] ss:$144 sps:$4 sm:$0xff]   ;;  %v6964_v63 = vld [vmem:[%s7237_s14 + $0x748] ss:$144 sps:$4 sm:$0xff]  }
 0x1ee   : > { %4898 = vperm.xlu1 %6260, %v4875_v40   ;;  %v6973_v40 = vld [vmem:[%s7237_s14 + $0x980] ss:$144 sps:$4 sm:$0xff]  }
 0x1ef   : > { %4143 = vmatmul.mubr.bf16.gmra.mrb[92].mxu0 %v7349_v24  ;;  %4204 = vmatmul.mubr.bf16.gmra.mrb[92].mxu1 %v7349_v24 }
 0x1f0   : > { %4577 = vmatpush1.bf16.msra.mxu0 %v6949_v36  ;;  %4638 = vmatpush1.bf16.msra.mxu1 %v6952_v50  ;;  %v6969_v36 = vld [vmem:[%s7237_s14 + $0x864] ss:$144 sps:$4 sm:$0xff]   ;;  %v6972_v50 = vld [vmem:[%s7237_s14 + $0x86c] ss:$144 sps:$4 sm:$0xff]  }
 0x1f1   : > { %4578 = vmatprep.subr.bf16.mxu0 %v6957_v2  ;;  %4639 = vmatprep.subr.bf16.mxu1 %v6960_v34  ;;  %v6967_v2 = vld [vmem:[%s7237_s14 + $0x860] ss:$144 sps:$4 sm:$0xff]   ;;  %v6970_v34 = vld [vmem:[%s7237_s14 + $0x868] ss:$144 sps:$4 sm:$0xff]  }
 0x1f2   : > { %6033 = vmatprep.mubr.msk.bf16.mxu0 %vm741_vm0, %v7027_v60  ;;  %6037 = vmatprep.mubr.msk.bf16.mxu1 %vm741_vm0, %v7027_v60  ;;  %v6979_v60 = vld [vmem:[%s7237_s14 + $0xaa0] ss:$144 sps:$4 sm:$0xff]  }
 0x1f3   : > { %4893 = vperm.xlu0 %6259, %v4874_v56   ;;  %v6976_v56 = vld [vmem:[%s7237_s14 + $0x988] ss:$144 sps:$4 sm:$0xff]  }
 0x1f4   : > { %4579 = vmatpush1.bf16.msra.mxu0 %v6955_v21  ;;  %4640 = vmatpush1.bf16.msra.mxu1 %v6958_v3  ;;  %v6975_v21 = vld [vmem:[%s7237_s14 + $0x984] ss:$144 sps:$4 sm:$0xff]   ;;  %v6978_v3 = vld [vmem:[%s7237_s14 + $0x98c] ss:$144 sps:$4 sm:$0xff]  }
 0x1f5   : > { %4580 = vmatprep.subr.bf16.mxu0 %v6963_v16  ;;  %4641 = vmatprep.subr.bf16.mxu1 %v6966_v29  ;;  %v6981_v16 = vld [vmem:[%s7237_s14 + $0xaa4] ss:$144 sps:$4 sm:$0xff]   ;;  %v6984_v29 = vld [vmem:[%s7237_s14 + $0xaac] ss:$144 sps:$4 sm:$0xff]  }
 0x1f8   : > { %4581 = vmatpush1.bf16.msra.mxu0 %v6961_v47  ;;  %4642 = vmatpush1.bf16.msra.mxu1 %v6964_v63  ;;  %v6982_v47 = vld [vmem:[%s7237_s14 + $0xaa8] ss:$144 sps:$4 sm:$0xff]   ;;  %v6987_v63 = vld [vmem:[%s7237_s14 + $0xbc4] ss:$144 sps:$4 sm:$0xff]  }
 0x1f9   : > { %4582 = vmatprep.subr.bf16.mxu0 %v6969_v36  ;;  %4643 = vmatprep.subr.bf16.mxu1 %v6972_v50  ;;  %v6990_v36 = vld [vmem:[%s7237_s14 + $0xbcc] ss:$144 sps:$4 sm:$0xff]   ;;  %v6985_v50 = vld [vmem:[%s7237_s14 + $0xbc0] ss:$144 sps:$4 sm:$0xff]  }
 0x1fc   : > { %4583 = vmatpush1.bf16.msra.mxu0 %v6967_v2  ;;  %4644 = vmatpush1.bf16.msra.mxu1 %v6970_v34  ;;  %v6988_v2 = vld [vmem:[%s7237_s14 + $0xbc8] ss:$144 sps:$4 sm:$0xff]   ;;  %v6993_v34 = vld [vmem:[%s7237_s14 + $0xce4] ss:$144 sps:$4 sm:$0xff]  }
 0x1fd   : > { %4584 = vmatprep.subr.bf16.mxu0 %v6975_v21  ;;  %4645 = vmatprep.subr.bf16.mxu1 %v6978_v3  ;;  %v6996_v21 = vld [vmem:[%s7237_s14 + $0xcec] ss:$144 sps:$4 sm:$0xff]   ;;  %v6991_v3 = vld [vmem:[%s7237_s14 + $0xce0] ss:$144 sps:$4 sm:$0xff]  }
 0x200   : > { %4585 = vmatpush1.bf16.msra.mxu0 %v6973_v40  ;;  %4646 = vmatpush1.bf16.msra.mxu1 %v6976_v56  ;;  %v6994_v40 = vld [vmem:[%s7237_s14 + $0xce8] ss:$144 sps:$4 sm:$0xff]   ;;  %v4284_v56 = vld [vmem:[%s7237_s14 + $0xf20] sm:$0xff] }
 0x201   : > { %4586 = vmatprep.subr.bf16.mxu0 %v6981_v16  ;;  %4647 = vmatprep.subr.bf16.mxu1 %v6984_v29  ;;  %v4285_v16 = vld [vmem:[%s7237_s14 + $0xf28] sm:$0xff]  ;;  %v6999_v29 = vld [vmem:[%s7237_s14 + $0xe04] ss:$144 sps:$4 sm:$0xff]  }
 0x204   : > { %4587 = vmatpush1.bf16.msra.mxu0 %v6979_v60  ;;  %4648 = vmatpush1.bf16.msra.mxu1 %v6982_v47  ;;  %v7002_v60 = vld [vmem:[%s7237_s14 + $0xe0c] ss:$144 sps:$4 sm:$0xff]   ;;  %s5383_s14 = sshll.u32 %s376_s0, 4  ;;  %s8971_s14 = int_to_ptr.vmem [resolvable:$true] %s5383_s14 }
 0x205   : > { %4588 = vmatprep.subr.bf16.mxu0 %v6987_v63  ;;  %4649 = vmatprep.subr.bf16.mxu1 %v6990_v36  ;;  %s7028_s21 = scalar_lea.vmem %s8971_s14, 16  ;;  %p7035_p1 = scmp.lt.s32.totalorder %s8971_s14, %s7033_s23 }
 0x206   : > { %p7029_p12 = scmp.ne.s32.totalorder %s8971_s14, %s7028_s21  ;;  %p7036_p2 = scmp.lt.s32.totalorder %s7034_s25, %s7028_s21 }
 0x208   : > { %4589 = vmatpush1.bf16.msra.mxu0 %v6985_v50  ;;  %4650 = vmatpush1.bf16.msra.mxu1 %v6988_v2  ;;  %p7030_p13 = pnand %p7029_p12, %p7208_p4  ;;  %p7037_p3 = por %p7036_p2, %p7035_p1 }
 0x209   : > { %4590 = vmatprep.subr.bf16.mxu0 %v6993_v34  ;;  %4651 = vmatprep.subr.bf16.mxu1 %v6996_v21  ;;  %v6029_v34 = vcombine.high %v4284_v56, %v4284_v56  ;;  %v6031_v21 = vcombine.high %v4285_v16, %v4285_v16 }
 0x20a   : > { %v2690_v47 = vpop.f32.mrb[48].mxu0  ;;  %v2751_v44 = vpop.f32.mrb[48].mxu1  ;;  %p7031_p0 = pneg %p7030_p13 }
 0x20b   : > { %v8295_v63 = vmax.f32 %v2300_v39, %v2690_v47  ;;  %v8300_v36 = vmax.f32 %v2302_v27, %v2751_v44  ;;  %v2692_v50 = vpop.f32.mrb[49].mxu0  ;;  %v2753_v2 = vpop.f32.mrb[49].mxu1  ;;  %v6028_v27 = vcombine.low %v4284_v56, %v4284_v56  ;;  %v9045_v44 = vmax.f32 %v7939_v19, %v8123_v22 }
 0x20c   : > { %v8305_v11 = vmax.f32 %v2301_v31, %v2692_v50  ;;  %v8310_v51 = vmax.f32 %v2303_v26, %v2753_v2  ;;  %v2694_v7 = vpop.f32.mrb[50].mxu0  ;;  %v2755_v39 = vpop.f32.mrb[50].mxu1  ;;  %4591 = vmatpush1.bf16.msra.mxu0 %v6991_v3  ;;  %4652 = vmatpush1.bf16.msra.mxu1 %v6994_v40  ;;  %v6030_v31 = vcombine.low %v4285_v16, %v4285_v16  ;;  %p7038_p5 = pnand %p7037_p3, %p7031_p0 }
 0x20d   : > { %v8317_v47 = vmax.f32 %v9045_v44, %v2694_v7  ;;  %v8322_v10 = vmax.f32 %v9046_v15, %v2755_v39  ;;  %v2696_v57 = vpop.f32.mrb[51].mxu0  ;;  %v2757_v43 = vpop.f32.mrb[51].mxu1  ;;  %4592 = vmatprep.subr.bf16.mxu0 %v6999_v29  ;;  %4653 = vmatprep.subr.bf16.mxu1 %v7002_v60  ;;  %v9047_v26 = vmax.f32 %v7949_v54, %v8137_v59  ;;  %v4557_v62 = vsel %vm751_vm1, %v6028_v27, 0 }
 0x20e   : > { %v9048_v19 = vmax.f32 %v7954_v55, %v8139_v58  ;;  %v4563_v23 = vsel %vm751_vm1, %v6030_v31, 0  ;;  %v9049_v54 = vmax.f32 %v7965_v13, %v8157_v8  ;;  %v9050_v55 = vmax.f32 %v7970_v33, %v8159_v35  ;;  %v5089_v31 = vld [vmem:[%s9022_s6 + $0x88] sm:$0xff] }
 0x20f   : > { %v8327_v3 = vmax.f32 %v9047_v26, %v2696_v57  ;;  %v9051_v60 = vmax.f32 %v7975_v14, %v8165_v18  ;;  %v9052_v2 = vmax.f32 %v7980_v20, %v8167_v1  ;;  %v9053_v33 = vmax.f32 %v7987_v6, %v8173_v0  ;;  %v5120_v26 = vld [vmem:[%s9022_s6 + $0x180] sm:$0xff] }
 0x210   : > { %v8332_v22 = vmax.f32 %v9048_v19, %v2757_v43  ;;  %4593 = vmatpush1.bf16.msra.mxu0 %v6997_v52  ;;  %4654 = vmatpush1.bf16.msra.mxu1 %v7000_v4  ;;  %v9055_v20 = vmax.f32 %v7999_v41, %v8183_v45  ;;  %v9056_v39 = vmax.f32 %v8004_v25, %v8185_v28  ;;  %v5088_v43 = vld [vmem:[%s9022_s6 + $0x80] sm:$0xff] }
 0x211   : > { %6032 = vmatprep.subr.msk.bf16.mxu0 %vm751_vm1, %v6029_v34  ;;  %6036 = vmatprep.subr.msk.bf16.mxu1 %vm751_vm1, %v6031_v21  ;;  %v9054_v21 = vmax.f32 %v7992_v38, %v8175_v30  ;;  %v9057_v41 = vmax.f32 %v8029_v49, %v8205_v32  ;;  %v9058_v25 = vmax.f32 %v8034_v53, %v8207_v12 }
 0x212   : > { %v2700_v40 = vpop.f32.mrb[52].mxu0  ;;  %v2761_v56 = vpop.f32.mrb[52].mxu1  ;;  %v9059_v28 = vmax.f32 %v8039_v5, %v8217_v61 }
 0x213   : > { %v8341_v59 = vmax.f32 %v9049_v54, %v2700_v40  ;;  %v8346_v58 = vmax.f32 %v9050_v55, %v2761_v56  ;;  %v2702_v16 = vpop.f32.mrb[53].mxu0  ;;  %v2763_v29 = vpop.f32.mrb[53].mxu1  ;;  %v6138_v56 = vpack.c.bf16 %v5089_v31, %v5088_v43  ;;  %v5121_v54 = vld [vmem:[%s9022_s6 + $0x188] sm:$0xff]  ;;  %v5072_v55 = vld [vmem:[%s9022_s6] sm:$0xff] }
 0x214   : > { %v8351_v50 = vmax.f32 %v9051_v60, %v2702_v16  ;;  %v8356_v34 = vmax.f32 %v9052_v2, %v2763_v29  ;;  %v2704_v13 = vpop.f32.mrb[54].mxu0  ;;  %v2765_v8 = vpop.f32.mrb[54].mxu1  ;;  %4595 = vmatpush1.bf16.msra.mxu0 %v4557_v62  ;;  %4656 = vmatpush1.bf16.msra.mxu1 %v4563_v23  ;;  %v5073_v16 = vld [vmem:[%s9022_s6 + $0x8] sm:$0xff]  ;;  %v6170_v2 = vpack.c.bf16 %v5121_v54, %v5120_v26  ;;  %v5124_v31 = vld [vmem:[%s9022_s6 + $0x1a0] sm:$0xff] }
 0x215   : > { %v8361_v35 = vmax.f32 %v9053_v33, %v2704_v13  ;;  %v8366_v14 = vmax.f32 %v9054_v21, %v2765_v8  ;;  %v2706_v18 = vpop.f32.mrb[55].mxu0  ;;  %v2767_v7 = vpop.f32.mrb[55].mxu1  ;;  %v6140_v13 = vpack.c.bf16 %v5073_v16, %v5072_v55  ;;  %v5104_v8 = vld [vmem:[%s9022_s6 + $0x100] sm:$0xff]  ;;  %v5105_v33 = vld [vmem:[%s9022_s6 + $0x108] sm:$0xff]  ;;  %v5090_v21 = vld [vmem:[%s9022_s6 + $0x90] sm:$0xff]  ;;  %6139 = vmatprep.subr.bf16.mxu0 %v6138_v56 }
 0x216   : > { %v8371_v1 = vmax.f32 %v9055_v20, %v2706_v18  ;;  %v8376_v52 = vmax.f32 %v9056_v39, %v2767_v7  ;;  %v6172_v18 = vpack.c.bf16 %v5105_v33, %v5104_v8  ;;  %v5091_v7 = vld [vmem:[%s9022_s6 + $0x98] sm:$0xff]  ;;  %v5122_v20 = vld [vmem:[%s9022_s6 + $0x190] sm:$0xff]  ;;  %6171 = vmatprep.subr.bf16.mxu1 %v6170_v2  ;;  %v5125_v26 = vld [vmem:[%s9022_s6 + $0x1a8] sm:$0xff] }
 0x217   : > { %4601 = vmatmul.mubr.bf16.vlgmr.msra.gmra.mrb[96].mxu0 %v8009_v42  ;;  %4662 = vmatmul.mubr.bf16.vlgmr.msra.gmra.mrb[96].mxu1 %v8009_v42  ;;  %v5123_v39 = vld [vmem:[%s9022_s6 + $0x198] sm:$0xff]  ;;  %v5076_v56 = vld [vmem:[%s9022_s6 + $0x20] sm:$0xff]  ;;  %v5077_v8 = vld [vmem:[%s9022_s6 + $0x28] sm:$0xff] }
 0x218   : > { %6034 = vmatprep.mubr.msk.bf16.mxu0 %vm741_vm0, %v8020_v48  ;;  %6038 = vmatprep.mubr.msk.bf16.mxu1 %vm741_vm0, %v8020_v48  ;;  %v9060_v48 = vmax.f32 %v8044_v9, %v8219_v46  ;;  %v5108_v33 = vld [vmem:[%s9022_s6 + $0x120] sm:$0xff] }
 0x219   : > { %6141 = vmatpush3.bf16.msra.mxu0 %v6140_v13  ;;  %6173 = vmatpush3.bf16.msra.mxu1 %v6172_v18  ;;  %v6178_v13 = vpack.c.bf16 %v5125_v26, %v5124_v31  ;;  %v5127_v26 = vld [vmem:[%s9022_s6 + $0x1b8] sm:$0xff]  ;;  %v5112_v18 = vld [vmem:[%s9022_s6 + $0x140] sm:$0xff] }
 0x21a   : > { %v2710_v6 = vpop.f32.mrb[56].mxu0  ;;  %v2771_v38 = vpop.f32.mrb[56].mxu1 }
 0x21b   : > { %v8387_v0 = vmax.f32 %v9057_v41, %v2710_v6  ;;  %v8392_v30 = vmax.f32 %v9058_v25, %v2771_v38  ;;  %v2712_v45 = vpop.f32.mrb[57].mxu0  ;;  %v2773_v42 = vpop.f32.mrb[57].mxu1  ;;  %v6142_v6 = vpack.c.bf16 %v5091_v7, %v5090_v21  ;;  %v6174_v38 = vpack.c.bf16 %v5123_v39, %v5122_v20  ;;  %v5074_v41 = vld [vmem:[%s9022_s6 + $0x10] sm:$0xff]  ;;  %v5075_v25 = vld [vmem:[%s9022_s6 + $0x18] sm:$0xff]  ;;  %v5109_v21 = vld [vmem:[%s9022_s6 + $0x128] sm:$0xff] }
 0x21c   : > { %v8397_v4 = vmax.f32 %v9059_v28, %v2712_v45  ;;  %v8402_v27 = vmax.f32 %v9060_v48, %v2773_v42  ;;  %v2714_v49 = vpop.f32.mrb[58].mxu0  ;;  %v2775_v32 = vpop.f32.mrb[58].mxu1  ;;  %v5106_v45 = vld [vmem:[%s9022_s6 + $0x110] sm:$0xff]  ;;  %v6144_v42 = vpack.c.bf16 %v5075_v25, %v5074_v41  ;;  %v5107_v28 = vld [vmem:[%s9022_s6 + $0x118] sm:$0xff]  ;;  %v5092_v48 = vld [vmem:[%s9022_s6 + $0xa0] sm:$0xff] }
 0x21d   : > { %v2715_v44 = vpop.f32.mrb[59].mxu0  ;;  %v2776_v15 = vpop.f32.mrb[59].mxu1  ;;  %v5093_v49 = vld [vmem:[%s9022_s6 + $0xa8] sm:$0xff]  ;;  %6143 = vmatprep.subr.bf16.mxu0 %v6142_v6  ;;  %6175 = vmatprep.subr.bf16.mxu1 %v6174_v38  ;;  %v6148_v6 = vpack.c.bf16 %v5077_v8, %v5076_v56  ;;  %v6180_v38 = vpack.c.bf16 %v5109_v21, %v5108_v33  ;;  %v5094_v41 = vld [vmem:[%s9022_s6 + $0xb0] sm:$0xff]  ;;  %v5095_v25 = vld [vmem:[%s9022_s6 + $0xb8] sm:$0xff] }
 0x21e   : > { %v6176_v15 = vpack.c.bf16 %v5107_v28, %v5106_v45  ;;  %v6146_v43 = vpack.c.bf16 %v5093_v49, %v5092_v48  ;;  %6145 = vmatpush3.bf16.msra.mxu0 %v6144_v42  ;;  %v5126_v45 = vld [vmem:[%s9022_s6 + $0x1b0] sm:$0xff]  ;;  %v6150_v31 = vpack.c.bf16 %v5095_v25, %v5094_v41  ;;  %v5079_v8 = vld [vmem:[%s9022_s6 + $0x38] sm:$0xff]  ;;  %v5096_v25 = vld [vmem:[%s9022_s6 + $0xc0] sm:$0xff] }
 0x21f   : > { %4611 = vmatmul.mubr.bf16.gmra.mrb[100].mxu0 %v8053_v37  ;;  %4672 = vmatmul.mubr.bf16.gmra.mrb[100].mxu1 %v8053_v37  ;;  %v5078_v56 = vld [vmem:[%s9022_s6 + $0x30] sm:$0xff]  ;;  %v5111_v41 = vld [vmem:[%s9022_s6 + $0x138] sm:$0xff]  ;;  %v5097_v33 = vld [vmem:[%s9022_s6 + $0xc8] sm:$0xff] }
 0x220   : > { %6035 = vmatprep.mubr.msk.bf16.mxu0 %vm741_vm0, %v7335_v17  ;;  %6039 = vmatprep.mubr.msk.bf16.mxu1 %vm741_vm0, %v7335_v17  ;;  %v5110_v21 = vld [vmem:[%s9022_s6 + $0x130] sm:$0xff]  ;;  %v6154_v42 = vpack.c.bf16 %v5097_v33, %v5096_v25  ;;  %v5080_v28 = vld [vmem:[%s9022_s6 + $0x40] sm:$0xff]  ;;  %v5081_v7 = vld [vmem:[%s9022_s6 + $0x48] sm:$0xff] }
 0x221   : > { %6177 = vmatpush3.bf16.msra.mxu1 %v6176_v15  ;;  %6147 = vmatprep.subr.bf16.mxu0 %v6146_v43  ;;  %v6182_v43 = vpack.c.bf16 %v5127_v26, %v5126_v45  ;;  %v5129_v45 = vld [vmem:[%s9022_s6 + $0x1c8] sm:$0xff]  ;;  %v6152_v26 = vpack.c.bf16 %v5079_v8, %v5078_v56  ;;  %v6184_v15 = vpack.c.bf16 %v5111_v41, %v5110_v21  ;;  %v5098_v56 = vld [vmem:[%s9022_s6 + $0xd0] sm:$0xff]  ;;  %v5099_v8 = vld [vmem:[%s9022_s6 + $0xd8] sm:$0xff] }
 0x222   : > { %6179 = vmatprep.subr.bf16.mxu1 %v6178_v13  ;;  %v5128_v13 = vld [vmem:[%s9022_s6 + $0x1c0] sm:$0xff]  ;;  %6149 = vmatpush3.bf16.msra.mxu0 %v6148_v6  ;;  %v5130_v25 = vld [vmem:[%s9022_s6 + $0x1d0] sm:$0xff]  ;;  %v6156_v60 = vpack.c.bf16 %v5081_v7, %v5080_v28  ;;  %v5133_v28 = vld [vmem:[%s9022_s6 + $0x1e8] sm:$0xff] }
 0x223   : > { %6151 = vmatprep.subr.bf16.mxu0 %v6150_v31  ;;  %v5113_v31 = vld [vmem:[%s9022_s6 + $0x148] sm:$0xff]  ;;  %v5082_v33 = vld [vmem:[%s9022_s6 + $0x50] sm:$0xff] }
 0x224   : > { %v6188_v19 = vpack.c.bf16 %v5113_v31, %v5112_v18  ;;  %v5132_v18 = vld [vmem:[%s9022_s6 + $0x1e0] sm:$0xff] }
 0x225   : > { %6181 = vmatpush3.bf16.msra.mxu1 %v6180_v38  ;;  %v6186_v38 = vpack.c.bf16 %v5129_v45, %v5128_v13  ;;  %v5131_v13 = vld [vmem:[%s9022_s6 + $0x1d8] sm:$0xff]  ;;  %v5116_v31 = vld [vmem:[%s9022_s6 + $0x160] sm:$0xff] }
 0x226   : > { %6183 = vmatprep.subr.bf16.mxu1 %v6182_v43  ;;  %6153 = vmatpush3.bf16.msra.mxu0 %v6152_v26  ;;  %v6190_v17 = vpack.c.bf16 %v5131_v13, %v5130_v25  ;;  %v6194_v26 = vpack.c.bf16 %v5133_v28, %v5132_v18  ;;  %v5134_v25 = vld [vmem:[%s9022_s6 + $0x1f0] sm:$0xff] }
 0x227   : > { %4621 = vmatmul.mubr.bf16.gmra.mrb[104].mxu0 %v7349_v24  ;;  %4682 = vmatmul.mubr.bf16.gmra.mrb[104].mxu1 %v7349_v24  ;;  %v6158_v24 = vpack.c.bf16 %v5099_v8, %v5098_v56  ;;  %v5117_v56 = vld [vmem:[%s9022_s6 + $0x168] sm:$0xff] }
 0x228   : > { %6155 = vmatprep.subr.bf16.mxu0 %v6154_v42  ;;  %v5084_v42 = vld [vmem:[%s9022_s6 + $0x60] sm:$0xff]  ;;  %v6196_v8 = vpack.c.bf16 %v5117_v56, %v5116_v31 }
 0x229   : > { %6185 = vmatpush3.bf16.msra.mxu1 %v6184_v15  ;;  %v5085_v15 = vld [vmem:[%s9022_s6 + $0x68] sm:$0xff] }
 0x22a   : > { %6187 = vmatprep.subr.bf16.mxu1 %v6186_v38  ;;  %6157 = vmatpush3.bf16.msra.mxu0 %v6156_v60  ;;  %v5115_v60 = vld [vmem:[%s9022_s6 + $0x158] sm:$0xff]  ;;  %v6164_v38 = vpack.c.bf16 %v5085_v15, %v5084_v42 }
 0x22b   : > { %6159 = vmatprep.subr.bf16.mxu0 %v6158_v24  ;;  %v5101_v24 = vld [vmem:[%s9022_s6 + $0xe8] sm:$0xff] }
 0x22d   : > { %6189 = vmatpush3.bf16.msra.mxu1 %v6188_v19 }
 0x22e   : > { %6191 = vmatprep.subr.bf16.mxu1 %v6190_v17  ;;  %v5100_v17 = vld [vmem:[%s9022_s6 + $0xe0] sm:$0xff] }
 0x22f   : > { %v6162_v7 = vpack.c.bf16 %v5101_v24, %v5100_v17  ;;  %v5118_v17 = vld [vmem:[%s9022_s6 + $0x170] sm:$0xff]  ;;  %v5119_v24 = vld [vmem:[%s9022_s6 + $0x178] sm:$0xff] }
 0x230   : > { %v6200_v18 = vpack.c.bf16 %v5119_v24, %v5118_v17 }
 0x242   : > { %v8412_v53 = vpop.f32.mrb[60].mxu0  ;;  %v8414_v5 = vpop.f32.mrb[60].mxu1 }
 0x243   : > { %v3256_v9 = vmax.f32 %v8295_v63, %v8412_v53  ;;  %v3258_v37 = vmax.f32 %v8300_v36, %v8414_v5  ;;  %v8420_v12 = vpop.f32.mrb[61].mxu0  ;;  %v8422_v61 = vpop.f32.mrb[61].mxu1 }
 0x244   : > { %v8428_v46 = vpop.f32.mrb[62].mxu0  ;;  %v8430_v57 = vpop.f32.mrb[62].mxu1  ;;  %v9061_v31 = vmax.f32 %v8305_v11, %v8420_v12 }
 0x245   : > { %v8445_v23 = vpop.f32.mrb[63].mxu0  ;;  %v8447_v40 = vpop.f32.mrb[63].mxu1  ;;  %v9064_v5 = vmax.f32 %v8322_v10, %v8430_v57 }
 0x24a   : > { %v8498_v32 = vpop.f32.mrb[64].mxu0  ;;  %v8500_v44 = vpop.f32.mrb[64].mxu1 }
 0x24b   : > { %v8515_v16 = vpop.f32.mrb[65].mxu0  ;;  %v8517_v2 = vpop.f32.mrb[65].mxu1  ;;  %v9068_v57 = vmax.f32 %v8346_v58, %v8500_v44 }
 0x24c   : > { %v8532_v20 = vpop.f32.mrb[66].mxu0  ;;  %v8534_v39 = vpop.f32.mrb[66].mxu1 }
 0x24d   : > { %v8549_v48 = vpop.f32.mrb[67].mxu0  ;;  %v8551_v49 = vpop.f32.mrb[67].mxu1  ;;  %v9072_v44 = vmax.f32 %v8366_v14, %v8534_v39 }
 0x24e   : > { %v9073_v17 = vmax.f32 %v8371_v1, %v8549_v48 }
 0x252   : > { %v8593_v55 = vpop.f32.mrb[68].mxu0  ;;  %v8595_v6 = vpop.f32.mrb[68].mxu1 }
 0x253   : > { %v8610_v43 = vpop.f32.mrb[69].mxu0  ;;  %v8612_v41 = vpop.f32.mrb[69].mxu1  ;;  %v9076_v39 = vmax.f32 %v8392_v30, %v8595_v6 }
 0x254   : > { %v3273_v45 = vmax.f32 %v8397_v4, %v8610_v43  ;;  %v3192_v54 = vpop.f32.mrb[70].mxu0  ;;  %v3253_v21 = vpop.f32.mrb[70].mxu1 }
 0x255   : > { %v3193_v29 = vpop.f32.mrb[71].mxu0  ;;  %v3254_v62 = vpop.f32.mrb[71].mxu1  ;;  %v5083_v54 = vld [vmem:[%s9022_s6 + $0x58] sm:$0xff] }
 0x256   : > { %v5114_v62 = vld [vmem:[%s9022_s6 + $0x150] sm:$0xff]  ;;  %v6160_v29 = vpack.c.bf16 %v5083_v54, %v5082_v33  ;;  %v5103_v21 = vld [vmem:[%s9022_s6 + $0xf8] sm:$0xff] }
 0x257   : > { %v6192_v19 = vpack.c.bf16 %v5115_v60, %v5114_v62  ;;  %v5102_v33 = vld [vmem:[%s9022_s6 + $0xf0] sm:$0xff]  ;;  %v5135_v54 = vld [vmem:[%s9022_s6 + $0x1f8] sm:$0xff] }
 0x258   : > { %6161 = vmatpush3.bf16.msra.mxu0 %v6160_v29  ;;  %v6166_v13 = vpack.c.bf16 %v5103_v21, %v5102_v33  ;;  %v5086_v62 = vld [vmem:[%s9022_s6 + $0x70] sm:$0xff]  ;;  %v5087_v29 = vld [vmem:[%s9022_s6 + $0x78] sm:$0xff]  ;;  %v6198_v60 = vpack.c.bf16 %v5135_v54, %v5134_v25  ;;  %v9065_v21 = vmax.f32 %v8327_v3, %v8445_v23 }
 0x259   : > { %6193 = vmatpush3.bf16.msra.mxu1 %v6192_v19  ;;  %6163 = vmatprep.subr.bf16.mxu0 %v6162_v7  ;;  %v6168_v19 = vpack.c.bf16 %v5087_v29, %v5086_v62  ;;  %v9069_v62 = vmax.f32 %v8351_v50, %v8515_v16 }
 0x25a   : > { %6195 = vmatprep.subr.bf16.mxu1 %v6194_v26 }
 0x25c   : > { %6165 = vmatpush3.bf16.msra.mxu0 %v6164_v38 }
 0x25d   : > { %6197 = vmatpush3.bf16.msra.mxu1 %v6196_v8  ;;  %6167 = vmatprep.subr.bf16.mxu0 %v6166_v13  ;;  %v9062_v8 = vmax.f32 %v8310_v51, %v8422_v61  ;;  %v9066_v61 = vmax.f32 %v8332_v22, %v8447_v40  ;;  %v9067_v13 = vmax.f32 %v8341_v59, %v8498_v32 }
 0x25e   : > { %6199 = vmatprep.subr.bf16.mxu1 %v6198_v60  ;;  %v9070_v40 = vmax.f32 %v8356_v34, %v8517_v2  ;;  %v9071_v60 = vmax.f32 %v8361_v35, %v8532_v20  ;;  %v9074_v2 = vmax.f32 %v8376_v52, %v8551_v49  ;;  %v9077_v49 = vmax.f32 %v8402_v27, %v8612_v41 }
 0x260   : > { %6169 = vmatpush3.bf16.msra.mxu0 %v6168_v19 }
 0x261   : > { %6201 = vmatpush3.bf16.msra.mxu1 %v6200_v18  ;;  %v9075_v18 = vmax.f32 %v8387_v0, %v8593_v55 }
 0x27a   : > { %v3646_v7 = vpop.f32.mrb[72].mxu0  ;;  %v3707_v28 = vpop.f32.mrb[72].mxu1 }
 0x27b   : > { %v8687_v42 = vmax.f32 %v3256_v9, %v3646_v7  ;;  %v8692_v15 = vmax.f32 %v3258_v37, %v3707_v28  ;;  %v3648_v26 = vpop.f32.mrb[73].mxu0  ;;  %v3709_v38 = vpop.f32.mrb[73].mxu1  ;;  %v9063_v9 = vmax.f32 %v8317_v47, %v8428_v46 }
 0x27c   : > { %v8697_v56 = vmax.f32 %v9061_v31, %v3648_v26  ;;  %v8702_v33 = vmax.f32 %v9062_v8, %v3709_v38  ;;  %v3650_v63 = vpop.f32.mrb[74].mxu0  ;;  %v3711_v53 = vpop.f32.mrb[74].mxu1 }
 0x27d   : > { %v8707_v36 = vmax.f32 %v9063_v9, %v3650_v63  ;;  %v8712_v37 = vmax.f32 %v9064_v5, %v3711_v53  ;;  %v3652_v11 = vpop.f32.mrb[75].mxu0  ;;  %v3713_v12 = vpop.f32.mrb[75].mxu1 }
 0x27e   : > { %v8717_v51 = vmax.f32 %v9065_v21, %v3652_v11  ;;  %v8722_v25 = vmax.f32 %v9066_v61, %v3713_v12 }
 0x282   : > { %v3656_v47 = vpop.f32.mrb[76].mxu0  ;;  %v3717_v46 = vpop.f32.mrb[76].mxu1 }
 0x283   : > { %v8727_v10 = vmax.f32 %v9067_v13, %v3656_v47  ;;  %v8732_v54 = vmax.f32 %v9068_v57, %v3717_v46  ;;  %v3658_v3 = vpop.f32.mrb[77].mxu0  ;;  %v3719_v23 = vpop.f32.mrb[77].mxu1 }
 0x284   : > { %v8737_v22 = vmax.f32 %v9069_v62, %v3658_v3  ;;  %v8742_v29 = vmax.f32 %v9070_v40, %v3719_v23  ;;  %v3660_v59 = vpop.f32.mrb[78].mxu0  ;;  %v3721_v32 = vpop.f32.mrb[78].mxu1 }
 0x285   : > { %v8747_v58 = vmax.f32 %v9071_v60, %v3660_v59  ;;  %v8752_v19 = vmax.f32 %v9072_v44, %v3721_v32  ;;  %v3662_v50 = vpop.f32.mrb[79].mxu0  ;;  %v3723_v16 = vpop.f32.mrb[79].mxu1 }
 0x286   : > { %v8757_v34 = vmax.f32 %v9073_v17, %v3662_v50  ;;  %v8762_v24 = vmax.f32 %v9074_v2, %v3723_v16 }
 0x28a   : > { %v3666_v35 = vpop.f32.mrb[80].mxu0  ;;  %v3727_v20 = vpop.f32.mrb[80].mxu1 }
 0x28b   : > { %v8767_v14 = vmax.f32 %v9075_v18, %v3666_v35  ;;  %v8772_v7 = vmax.f32 %v9076_v39, %v3727_v20  ;;  %v3668_v1 = vpop.f32.mrb[81].mxu0  ;;  %v3729_v48 = vpop.f32.mrb[81].mxu1 }
 0x28c   : > { %v8777_v52 = vmax.f32 %v3273_v45, %v3668_v1  ;;  %v8782_v28 = vmax.f32 %v9077_v49, %v3729_v48  ;;  %v3670_v0 = vpop.f32.mrb[82].mxu0  ;;  %v3731_v55 = vpop.f32.mrb[82].mxu1  ;;  %v4943_v49 = vlaneseq }
 0x28d   : > { %v3671_v26 = vpop.f32.mrb[83].mxu0  ;;  %v3732_v38 = vpop.f32.mrb[83].mxu1 }
 0x28e   : > { %v4829_v48 = vpop.permute.xlu0 %4828  ;;  %v4834_v0 = vpop.permute.xlu1 %4833  ;;  %v4944_v26 = vshrl.u32 %v4943_v49, 7 }
 0x290   : > { %v4945_v38 = vsub.s32 0, %v4944_v26 }
 0x292   : > { %v4879_v55 = vpop.permute.xlu0 %4878 }
 0x2b2   : > { %v4124_v31 = vpop.f32.mrb[84].mxu0  ;;  %v4185_v30 = vpop.f32.mrb[84].mxu1 }
 0x2b3   : > { %v4212_v6 = vmax.f32 %v8687_v42, %v4124_v31  ;;  %v4214_v8 = vmax.f32 %v8692_v15, %v4185_v30  ;;  %v4126_v63 = vpop.f32.mrb[85].mxu0  ;;  %v4187_v53 = vpop.f32.mrb[85].mxu1  ;;  %v4949_v31 = vsub.s32 1, %v4944_v26  ;;  %v4941_v30 = vld [vmem:[%s9020_s4] sm:$0xf] }
 0x2b4   : > { %v4213_v4 = vmax.f32 %v8697_v56, %v4126_v63  ;;  %v4215_v43 = vmax.f32 %v8702_v33, %v4187_v53  ;;  %v8788_v45 = vpop.f32.mrb[86].mxu0  ;;  %v8790_v27 = vpop.f32.mrb[86].mxu1  ;;  %v4953_v63 = vsub.s32 2, %v4944_v26  ;;  %v4957_v53 = vsub.s32 3, %v4944_v26 }
 0x2b5   : > { %v4216_v41 = vmax.f32 %v8707_v36, %v8788_v45  ;;  %v4218_v9 = vmax.f32 %v8712_v37, %v8790_v27  ;;  %v8796_v5 = vpop.f32.mrb[87].mxu0  ;;  %v8798_v42 = vpop.f32.mrb[87].mxu1  ;;  %v8859_v49 = vrot.slane %v4941_v30, %v4949_v31 }
 0x2b6   : > { %v4217_v15 = vmax.f32 %v8717_v51, %v8796_v5  ;;  %v4219_v56 = vmax.f32 %v8722_v25, %v8798_v42  ;;  %v4884_v45 = vpop.permute.xlu1 %4883  ;;  %v8855_v27 = vpop.permute.xlu0 %4838  ;;  %v8861_v57 = vrot.slane %v4941_v30, %v4953_v63  ;;  %v8863_v26 = vrot.slane %v4941_v30, %v4957_v53 }
 0x2ba   : > { %v8804_v33 = vpop.f32.mrb[88].mxu0  ;;  %v8806_v11 = vpop.f32.mrb[88].mxu1 }
 0x2bb   : > { %v8812_v12 = vpop.f32.mrb[89].mxu0  ;;  %v8814_v21 = vpop.f32.mrb[89].mxu1 }
 0x2bc   : > { %v8820_v46 = vpop.f32.mrb[90].mxu0  ;;  %v8822_v13 = vpop.f32.mrb[90].mxu1 }
 0x2bd   : > { %v8828_v23 = vpop.f32.mrb[91].mxu0  ;;  %v8830_v62 = vpop.f32.mrb[91].mxu1 }
 0x2c2   : > { %v8836_v32 = vpop.f32.mrb[92].mxu0  ;;  %v8838_v60 = vpop.f32.mrb[92].mxu1 }
 0x2c3   : > { %v8844_v16 = vpop.f32.mrb[93].mxu0  ;;  %v8846_v17 = vpop.f32.mrb[93].mxu1 }
 0x2c4   : > { %v4148_v20 = vpop.f32.mrb[94].mxu0  ;;  %v4209_v18 = vpop.f32.mrb[94].mxu1 }
 0x2c5   : > { %v4149_v39 = vpop.f32.mrb[95].mxu0  ;;  %v4210_v1 = vpop.f32.mrb[95].mxu1 }
 0x2c6   : > { %v8857_v1 = vrot.slane %v4941_v30, %v4945_v38 }
 0x2ea   : > { %v4602_v20 = vpop.f32.mrb[96].mxu0  ;;  %v4663_v18 = vpop.f32.mrb[96].mxu1 }
 0x2eb   : > { %v4690_v39 = vmax.f32 %v4212_v6, %v4602_v20  ;;  %v4692_v35 = vmax.f32 %v4214_v8, %v4663_v18  ;;  %v4604_v2 = vpop.f32.mrb[97].mxu0  ;;  %v4665_v50 = vpop.f32.mrb[97].mxu1 }
 0x2ec   : > { %v4691_v44 = vmax.f32 %v4213_v4, %v4604_v2  ;;  %v4693_v59 = vmax.f32 %v4215_v43, %v4665_v50  ;;  %v4606_v40 = vpop.f32.mrb[98].mxu0  ;;  %v4667_v3 = vpop.f32.mrb[98].mxu1 }
 0x2ed   : > { %v4851_v47 = vmul.f32 %v4829_v48, %v4690_v39  ;;  %v4853_v61 = vmul.f32 %v4829_v48, %v4692_v35  ;;  %v4694_v37 = vmax.f32 %v4216_v41, %v4606_v40  ;;  %v4696_v36 = vmax.f32 %v4218_v9, %v4667_v3  ;;  %v4608_v6 = vpop.f32.mrb[99].mxu0  ;;  %v4669_v38 = vpop.f32.mrb[99].mxu1 }
 0x2ee   : > { %v4852_v20 = vmul.f32 %v4829_v48, %v4691_v44  ;;  %v4854_v8 = vmul.f32 %v4829_v48, %v4693_v59  ;;  %v4695_v31 = vmax.f32 %v4217_v15, %v4608_v6  ;;  %v4697_v4 = vmax.f32 %v4219_v56, %v4669_v38  ;;  %v4889_v3 = vpop.permute.xlu1 %4888  ;;  %v4844_v59 = vpop.permute.xlu0 %4843 }
 0x2ef   : > { %v4901_v43 = vadd.f32 %v4879_v55, %v4851_v47  ;;  %v4903_v50 = vadd.f32 %v4879_v55, %v4853_v61  ;;  %v4855_v2 = vmul.f32 %v4834_v0, %v4694_v37  ;;  %v4857_v30 = vmul.f32 %v4834_v0, %v4696_v36 }
 0x2f0   : > { %v4856_v63 = vmul.f32 %v4834_v0, %v4695_v31  ;;  %v4858_v35 = vmul.f32 %v4834_v0, %v4697_v4  ;;  %v4902_v41 = vadd.f32 %v4879_v55, %v4852_v20  ;;  %v4904_v9 = vadd.f32 %v4879_v55, %v4854_v8 }
 0x2f1   : > { %v4921_v40 = vmax.f32 %v4901_v43, 0.0  ;;  %v4923_v44 = vmax.f32 %v4903_v50, 0.0  ;;  %v4905_v48 = vadd.f32 %v4884_v45, %v4855_v2  ;;  %v8871_v53 = vadd.f32 %v4884_v45, %v4857_v30 }
 0x2f2   : > { %v4612_v51 = vpop.f32.mrb[100].mxu0  ;;  %v4673_v5 = vpop.f32.mrb[100].mxu1  ;;  %v4922_v15 = vmax.f32 %v4902_v41, 0.0  ;;  %v4924_v25 = vmax.f32 %v4904_v9, 0.0  ;;  %v4906_v42 = vadd.f32 %v4884_v45, %v4856_v63  ;;  %v8873_v56 = vadd.f32 %v4884_v45, %v4858_v35 }
 0x2f3   : > { %v4963_v36 = vmul.f32 %v8857_v1, %v4921_v40  ;;  %v9078_v37 = vmax.f32 %v8727_v10, %v8804_v33  ;;  %v9079_v47 = vmax.f32 %v8732_v54, %v8806_v11  ;;  %v4614_v55 = vpop.f32.mrb[101].mxu0  ;;  %v4675_v18 = vpop.f32.mrb[101].mxu1  ;;  %v4925_v39 = vmax.f32 %v4905_v48, 0.0 }
 0x2f4   : > { %v9080_v6 = vmax.f32 %v8737_v22, %v8812_v12  ;;  %v9081_v45 = vmax.f32 %v8742_v29, %v8814_v21  ;;  %v4616_v8 = vpop.f32.mrb[102].mxu0  ;;  %v4677_v31 = vpop.f32.mrb[102].mxu1  ;;  %v4964_v10 = vmul.f32 %v8859_v49, %v4922_v15  ;;  %5200 = vmatprep.mubr.f32.mxu0 %v4922_v15  ;;  %5290 = vmatprep.mubr.f32.mxu1 %v4924_v25  ;;  %v4926_v33 = vmax.f32 %v4906_v42, 0.0 }
 0x2f5   : > { %v4698_v61 = vmax.f32 %v9078_v37, %v4612_v51  ;;  %v4700_v0 = vmax.f32 %v9079_v47, %v4673_v5  ;;  %v9082_v4 = vmax.f32 %v8747_v58, %v8820_v46  ;;  %v9083_v12 = vmax.f32 %v8752_v19, %v8822_v13  ;;  %v4618_v21 = vpop.f32.mrb[103].mxu0  ;;  %v4679_v43 = vpop.f32.mrb[103].mxu1  ;;  %5201 = vmatmul.mubr.f32.vlgmr.msra.gmra.mrb[108].mxu0 %v4921_v40 }
 0x2f6   : > { %v4699_v38 = vmax.f32 %v9080_v6, %v4614_v55  ;;  %v4701_v20 = vmax.f32 %v9081_v45, %v4675_v18  ;;  %v9084_v30 = vmax.f32 %v8757_v34, %v8828_v23  ;;  %v9085_v35 = vmax.f32 %v8762_v24, %v8830_v62  ;;  %5291 = vmatmul.mubr.f32.vlgmr.msra.gmra.mrb[108].mxu1 %v4923_v44  ;;  %v4849_v34 = vpop.permute.xlu1 %4848  ;;  %v4894_v23 = vpop.permute.xlu0 %4893 }
 0x2f7   : > { %v4859_v54 = vmul.f32 %v8855_v27, %v4698_v61  ;;  %v4861_v11 = vmul.f32 %v8855_v27, %v4700_v0  ;;  %v4702_v22 = vmax.f32 %v9082_v4, %v4616_v8  ;;  %v4704_v29 = vmax.f32 %v9083_v12, %v4677_v31  ;;  %5205 = vmatprep.mubr.f32.mxu0 %v4926_v33 }
 0x2f8   : > { %v4860_v50 = vmul.f32 %v8855_v27, %v4699_v38  ;;  %v4862_v2 = vmul.f32 %v8855_v27, %v4701_v20  ;;  %v4703_v63 = vmax.f32 %v9084_v30, %v4618_v21  ;;  %v4705_v58 = vmax.f32 %v9085_v35, %v4679_v43 }
 0x2f9   : > { %v4863_v46 = vmul.f32 %v4844_v59, %v4702_v22  ;;  %v4865_v41 = vmul.f32 %v4844_v59, %v4704_v29  ;;  %v4968_v19 = vmul.f32 %v8859_v49, %v4926_v33  ;;  %v4928_v13 = vmax.f32 %v8873_v56, 0.0  ;;  %5206 = vmatmul.mubr.f32.gmra.mrb[110].mxu0 %v4925_v39 }
 0x2fa   : > { %v4864_v9 = vmul.f32 %v4844_v59, %v4703_v63  ;;  %v4866_v40 = vmul.f32 %v4844_v59, %v4705_v58  ;;  %v4967_v27 = vmul.f32 %v8857_v1, %v4925_v39  ;;  %v4927_v48 = vmax.f32 %v8871_v53, 0.0  ;;  %v4622_v5 = vpop.f32.mrb[104].mxu0  ;;  %v4683_v15 = vpop.f32.mrb[104].mxu1 }
 0x2fb   : > { %5295 = vmatprep.mubr.f32.mxu1 %v4928_v13  ;;  %v8909_v24 = vadd.f32 %v4889_v3, %v4862_v2  ;;  %v4965_v62 = vmul.f32 %v8861_v57, %v4923_v44  ;;  %v4966_v51 = vmul.f32 %v8863_v26, %v4924_v25  ;;  %v4983_v42 = vadd.f32 %v4964_v10, %v4963_v36  ;;  %v4624_v55 = vpop.f32.mrb[105].mxu0  ;;  %v4685_v18 = vpop.f32.mrb[105].mxu1 }
 0x2fc   : > { %5296 = vmatmul.mubr.f32.gmra.mrb[110].mxu1 %v4927_v48  ;;  %v4910_v56 = vadd.f32 %v4889_v3, %v4860_v50  ;;  %v4909_v59 = vadd.f32 %v4889_v3, %v4859_v54  ;;  %v4911_v37 = vadd.f32 %v4889_v3, %v4861_v11  ;;  %v9086_v53 = vmax.f32 %v8767_v14, %v8836_v32  ;;  %v4687_v38 = vpop.f32.mrb[106].mxu1  ;;  %v4626_v32 = vpop.f32.mrb[106].mxu0 }
 0x2fd   : > { %v9087_v47 = vmax.f32 %v8772_v7, %v8838_v60  ;;  %v4932_v44 = vmax.f32 %v8909_v24, 0.0  ;;  %v4914_v25 = vadd.f32 %v4894_v23, %v4864_v9  ;;  %v9088_v39 = vmax.f32 %v8777_v52, %v8844_v16  ;;  %v4627_v7 = vpop.f32.mrb[107].mxu0  ;;  %v4688_v60 = vpop.f32.mrb[107].mxu1 }
 0x2fe   : > { %v4706_v61 = vmax.f32 %v9086_v53, %v4622_v5  ;;  %v9089_v3 = vmax.f32 %v8782_v28, %v8846_v17  ;;  %v4984_v14 = vadd.f32 %v4983_v42, %v4965_v62  ;;  %v4930_v45 = vmax.f32 %v4910_v56, 0.0  ;;  %v4899_v4 = vpop.permute.xlu1 %4898 }
 0x2ff   : > { %v4708_v0 = vmax.f32 %v9087_v47, %v4683_v15  ;;  %v4707_v36 = vmax.f32 %v9088_v39, %v4624_v55  ;;  %5300 = vmatprep.mubr.f32.mxu1 %v4932_v44  ;;  %v4929_v8 = vmax.f32 %v4909_v59, 0.0  ;;  %v4931_v31 = vmax.f32 %v4911_v37, 0.0  ;;  %v6040_v39 = vld [vmem:[#allocation3] ss:$0 sm:$0xff] }
 0x300   : > { %v4709_v6 = vmax.f32 %v9089_v3, %v4685_v18  ;;  %v4867_v20 = vmul.f32 %v4849_v34, %v4706_v61  ;;  %v4985_v11 = vadd.f32 %v4984_v14, %v4966_v51  ;;  %5210 = vmatprep.mubr.f32.mxu0 %v4930_v45  ;;  %v4972_v52 = vmul.f32 %v8859_v49, %v4930_v45 }
 0x301   : > { %v4869_v10 = vmul.f32 %v4849_v34, %v4708_v0  ;;  %v4868_v33 = vmul.f32 %v4849_v34, %v4707_v36  ;;  %v4971_v28 = vmul.f32 %v8857_v1, %v4929_v8  ;;  %5211 = vmatmul.mubr.f32.gmra.mrb[112].mxu0 %v4929_v8  ;;  %5301 = vmatmul.mubr.f32.gmra.mrb[112].mxu1 %v4931_v31  ;;  %v4934_v16 = vmax.f32 %v4914_v25, 0.0 }
 0x302   : > { %v4870_v54 = vmul.f32 %v4849_v34, %v4709_v6  ;;  %v4916_v17 = vadd.f32 %v4894_v23, %v4866_v40  ;;  %4986 = vadd.xlane.f32.xlu0 %v4985_v11  ;;  %v4969_v22 = vmul.f32 %v8861_v57, %v4927_v48  ;;  %v4988_v12 = vadd.f32 %v4968_v19, %v4967_v27 }
 0x303   : > { %v4913_v29 = vadd.f32 %v4894_v23, %v4863_v46  ;;  %v4915_v21 = vadd.f32 %v4894_v23, %v4865_v41  ;;  %v4976_v43 = vmul.f32 %v8859_v49, %v4934_v16  ;;  %5215 = vmatprep.mubr.f32.mxu0 %v4934_v16  ;;  %v4970_v2 = vmul.f32 %v8863_v26, %v4928_v13 }
 0x304   : > { %v4936_v50 = vmax.f32 %v4916_v17, 0.0  ;;  %v4920_v30 = vadd.f32 %v4899_v4, %v4870_v54  ;;  %v4989_v63 = vadd.f32 %v4988_v12, %v4969_v22  ;;  %v4973_v9 = vmul.f32 %v8861_v57, %v4931_v31 }
 0x305   : > { %v4933_v35 = vmax.f32 %v4913_v29, 0.0  ;;  %v4935_v58 = vmax.f32 %v4915_v21, 0.0  ;;  %v4993_v34 = vadd.f32 %v4972_v52, %v4971_v28  ;;  %v4918_v24 = vadd.f32 %v4899_v4, %v4868_v33 }
 0x306   : > { %5305 = vmatprep.mubr.f32.mxu1 %v4936_v50  ;;  %v4940_v40 = vmax.f32 %v4920_v30, 0.0  ;;  %v4917_v48 = vadd.f32 %v4899_v4, %v4867_v20  ;;  %v4990_v19 = vadd.f32 %v4989_v63, %v4970_v2  ;;  %v4919_v41 = vadd.f32 %v4899_v4, %v4869_v10 }
 0x307   : > { %v4975_v46 = vmul.f32 %v8857_v1, %v4933_v35  ;;  %5216 = vmatmul.mubr.f32.gmra.mrb[114].mxu0 %v4933_v35  ;;  %5306 = vmatmul.mubr.f32.gmra.mrb[114].mxu1 %v4935_v58  ;;  %v4974_v13 = vmul.f32 %v8863_v26, %v4932_v44  ;;  %v4994_v27 = vadd.f32 %v4993_v34, %v4973_v9  ;;  %v4938_v23 = vmax.f32 %v4918_v24, 0.0 }
 0x308   : > { %5310 = vmatprep.mubr.f32.mxu1 %v4940_v40  ;;  %v4937_v62 = vmax.f32 %v4917_v48, 0.0  ;;  %4991 = vadd.xlane.f32.xlu0 %v4990_v19  ;;  %v4939_v51 = vmax.f32 %v4919_v41, 0.0  ;;  %v4977_v5 = vmul.f32 %v8861_v57, %v4935_v58  ;;  %v4978_v37 = vmul.f32 %v8863_v26, %v4936_v50 }
 0x309   : > { %v4998_v15 = vadd.f32 %v4976_v43, %v4975_v46  ;;  %v4995_v42 = vadd.f32 %v4994_v27, %v4974_v13  ;;  %v4980_v56 = vmul.f32 %v8859_v49, %v4938_v23  ;;  %5220 = vmatprep.mubr.f32.mxu0 %v4938_v23  ;;  %v4982_v55 = vmul.f32 %v8863_v26, %v4940_v40 }
 0x30a   : > { %v4979_v59 = vmul.f32 %v8857_v1, %v4937_v62  ;;  %v4981_v61 = vmul.f32 %v8861_v57, %v4939_v51 }
 0x30b   : > { %5221 = vmatmul.mubr.f32.gmra.mrb[116].mxu0 %v4937_v62  ;;  %5311 = vmatmul.mubr.f32.gmra.mrb[116].mxu1 %v4939_v51  ;;  %v4999_v53 = vadd.f32 %v4998_v15, %v4977_v5 }
 0x30c   : > { %v5003_v47 = vadd.f32 %v4980_v56, %v4979_v59  ;;  %4996 = vadd.xlane.f32.xlu0 %v4995_v42 }
 0x30d   : > { %v5000_v0 = vadd.f32 %v4999_v53, %v4978_v37 }
 0x30e   : > { %v5004_v18 = vadd.f32 %v5003_v47, %v4981_v61 }
 0x310   : > { %v5005_v44 = vadd.f32 %v5004_v18, %v4982_v55 }
 0x312   : > { %5006 = vadd.xlane.f32.xlu1 %v5005_v44 }
 0x316   : > { %5001 = vadd.xlane.f32.xlu1 %v5000_v0 }
 0x38f   : > { %v4987_v49 = vpop.xlane.xlu0 %4986 }
 0x390   : > { %v5015_v1 = vadd.f32 %v6040_v39, %v4987_v49 }
 0x392   : > { %v5021_v38 = vsel %vm5020_vm2, %v5015_v1, -inf }
 0x395   : > { %v4992_v25 = vpop.xlane.xlu0 %4991 }
 0x396   : > { %v5016_v57 = vadd.f32 %v6040_v39, %v4992_v25 }
 0x398   : > { %v5022_v7 = vsel %vm5020_vm2, %v5016_v57, -inf }
 0x399   : > { %v4997_v36 = vpop.xlane.xlu0 %4996 }
 0x39a   : > { %v5017_v14 = vadd.f32 %v6040_v39, %v4997_v36 }
 0x39c   : > { %v5023_v60 = vsel %vm5020_vm2, %v5017_v14, -inf }
 0x39f   : > { %v5007_v3 = vpop.xlane.xlu1 %5006 }
 0x3a0   : > { %v5019_v6 = vadd.f32 %v6040_v39, %v5007_v3 }
 0x3a2   : > { %v5025_v32 = vsel %vm5020_vm2, %v5019_v6, -inf }
 0x3a3   : > { %v5026_v45 = vmax.f32 %v5021_v38, %v5025_v32  ;;  %v5002_v26 = vpop.xlane.xlu1 %5001 }
 0x3a4   : > { %v5018_v20 = vadd.f32 %v6040_v39, %v5002_v26 }
 0x3a5   : > { %v5027_v31 = vmax.f32 %v5026_v45, %v5022_v7 }
 0x3a6   : > { %v5024_v8 = vsel %vm5020_vm2, %v5018_v20, -inf }
 0x3a7   : > { %v5028_v10 = vmax.f32 %v5023_v60, %v5024_v8 }
 0x3a9   : > { %v5029_v33 = vmax.f32 %v5027_v31, %v5028_v10 }
 0x3ab   : > { %v5030_v54 = vrot.slane %v5029_v33, 4 }
 0x3ad   : > { %v5031_v11 = vmax.f32 %v5029_v33, %v5030_v54 }
 0x3af   : > { %v5032_v52 = vrot.slane %v5031_v11, 2 }
 0x3b1   : > { %v5033_v28 = vmax.f32 %v5031_v11, %v5032_v52 }
 0x3b3   : > { %v5034_v16 = vrot.slane %v5033_v28, 1 }
 0x3b5   : > { %v5035_v17 = vmax.f32 %v5033_v28, %v5034_v16 }
 0x3b7   : > { %v5036_v4 = vsub.f32 %v5015_v1, %v5035_v17  ;;  %v5038_v22 = vsub.f32 %v5017_v14, %v5035_v17  ;;  %v5037_v12 = vsub.f32 %v5016_v57, %v5035_v17  ;;  %v5039_v29 = vsub.f32 %v5018_v20, %v5035_v17 }
 0x3b8   : > { %v5040_v50 = vsub.f32 %v5019_v6, %v5035_v17 }
 0x3b9   : > { %v5041_v21 = vmul.f32 1.442695, %v5036_v4  ;;  %v5045_v43 = vmul.f32 1.442695, %v5038_v22  ;;  %v5043_v2 = vmul.f32 1.442695, %v5037_v12 }
 0x3ba   : > { %v5047_v30 = vmul.f32 1.442695, %v5039_v29  ;;  %v5049_v63 = vmul.f32 1.442695, %v5040_v50 }
 0x3bb   : > { %7007 = vpow2.f32 %v5041_v21 }
 0x3bc   : > { %7009 = vpow2.f32 %v5045_v43 }
 0x3bd   : > { %7011 = vpow2.f32 %v5043_v2 }
 0x3be   : > { %7013 = vpow2.f32 %v5047_v30 }
 0x3bf   : > { %7015 = vpow2.f32 %v5049_v63 }
 0x3c5   : > { %v7008_v35 = vpop.eup %7007 }
 0x3c6   : > { %v7010_v58 = vpop.eup %7009  ;;  %v5051_v9 = vsel %vm5020_vm2, %v7008_v35, 0.0 }
 0x3c7   : > { %v7012_v40 = vpop.eup %7011  ;;  %v5054_v13 = vsel %vm5020_vm2, %v7010_v58, 0.0 }
 0x3c8   : > { %v5052_v34 = vsel %vm5020_vm2, %v7012_v40, 0.0  ;;  %v7014_v24 = vpop.eup %7013  ;;  %v6076_v48 = vpop.f32.mrb[108].mxu0 }
 0x3c9   : > { %v5053_v19 = vadd.f32 %v5052_v34, %v5051_v9  ;;  %v6123_v46 = vpop.f32.mrb[108].mxu1  ;;  %v6077_v41 = vpop.f32.mrb[109].mxu0  ;;  %v5056_v5 = vsel %vm5020_vm2, %v7014_v24, 0.0 }
 0x3ca   : > { %v7016_v27 = vpop.eup %7015  ;;  %v6078_v23 = vadd.f32 %v6077_v41, %v6076_v48  ;;  %v6124_v62 = vpop.f32.mrb[109].mxu1 }
 0x3cb   : > { %v5055_v51 = vadd.f32 %v5054_v13, %v5053_v19  ;;  %v6125_v15 = vadd.f32 %v6124_v62, %v6123_v46  ;;  %v5058_v53 = vsel %vm5020_vm2, %v7016_v27, 0.0 }
 0x3cc   : > { %v6079_v42 = vpop.f32.mrb[110].mxu0 }
 0x3cd   : > { %v5057_v56 = vadd.f32 %v5056_v5, %v5055_v51  ;;  %v6080_v37 = vpop.f32.mrb[111].mxu0  ;;  %v5293_v61 = vadd.f32 %v6125_v15, %v6078_v23 }
 0x3ce   : > { %v6081_v47 = vadd.f32 %v6080_v37, %v6079_v42 }
 0x3cf   : > { %v6126_v59 = vpop.f32.mrb[110].mxu1  ;;  %v5059_v55 = vadd.f32 %v5058_v53, %v5057_v56  ;;  %v5362_v53 = vld [vmem:[%s9023_s7] sm:$0x1] }
 0x3d0   : > { %v6127_v0 = vpop.f32.mrb[111].mxu1 }
 0x3d1   : > { %v6128_v18 = vadd.f32 %v6127_v0, %v6126_v59  ;;  %v5060_v44 = vrot.slane %v5059_v55, 4 }
 0x3d3   : > { %v5298_v49 = vadd.f32 %v6128_v18, %v6081_v47  ;;  %v5061_v1 = vadd.f32 %v5060_v44, %v5059_v55  ;;  %v5364_v47 = vld [vmem:[%s9024_s8] sm:$0x1] }
 0x3d4   : > { %v6082_v25 = vpop.f32.mrb[112].mxu0  ;;  %v6129_v39 = vpop.f32.mrb[112].mxu1  ;;  %v5366_v55 = vld [vmem:[%s9025_s9] sm:$0x1] }
 0x3d5   : > { %v6083_v36 = vpop.f32.mrb[113].mxu0  ;;  %v6130_v3 = vpop.f32.mrb[113].mxu1  ;;  %v5062_v57 = vrot.slane %v5061_v1, 2 }
 0x3d6   : > { %v6084_v6 = vadd.f32 %v6083_v36, %v6082_v25  ;;  %v6131_v38 = vadd.f32 %v6130_v3, %v6129_v39 }
 0x3d7   : > { %v5063_v14 = vadd.f32 %v5062_v57, %v5061_v1 }
 0x3d8   : > { %v5303_v32 = vadd.f32 %v6131_v38, %v6084_v6 }
 0x3d9   : > { %v5064_v60 = vrot.slane %v5063_v14, 1 }
 0x3da   : > { %v6085_v45 = vpop.f32.mrb[114].mxu0  ;;  %v6132_v26 = vpop.f32.mrb[114].mxu1 }
 0x3db   : > { %v6086_v20 = vpop.f32.mrb[115].mxu0  ;;  %v6133_v7 = vpop.f32.mrb[115].mxu1  ;;  %v5065_v10 = vadd.f32 %v5064_v60, %v5063_v14 }
 0x3dc   : > { %v6087_v8 = vadd.f32 %v6086_v20, %v6085_v45  ;;  %v6134_v31 = vadd.f32 %v6133_v7, %v6132_v26 }
 0x3dd   : > { %7017 = vrcp.f32 %v5065_v10 }
 0x3de   : > { %v6088_v33 = vpop.f32.mrb[116].mxu0  ;;  %v6135_v54 = vpop.f32.mrb[116].mxu1  ;;  %v5308_v11 = vadd.f32 %v6134_v31, %v6087_v8 }
 0x3df   : > { %v6089_v52 = vpop.f32.mrb[117].mxu0  ;;  %v6136_v28 = vpop.f32.mrb[117].mxu1 }
 0x3e0   : > { %v6090_v16 = vadd.f32 %v6089_v52, %v6088_v33  ;;  %v6137_v17 = vadd.f32 %v6136_v28, %v6135_v54 }
 0x3e2   : > { %v5313_v4 = vadd.f32 %v6137_v17, %v6090_v16 }
 0x3e7   : > { %v7018_v22 = vpop.eup %7017 }
 0x3e8   : > { %v5068_v12 = vmul.f32 %v7018_v22, %v7012_v40  ;;  %v5067_v29 = vmul.f32 %v7018_v22, %v7008_v35  ;;  %v5069_v21 = vmul.f32 %v7018_v22, %v7010_v58  ;;  %v5070_v43 = vmul.f32 %v7018_v22, %v7014_v24 }
 0x3e9   : > { %v5071_v50 = vmul.f32 %v7018_v22, %v7016_v27 }
 0x3ea   : > { %5323 = vperm.xlu1 %6260, %v5068_v12   ;;  %5318 = vperm.xlu0 %6259, %v5067_v29  }
 0x3ee   : > { %5328 = vperm.xlu1 %6260, %v5069_v21   ;;  %5333 = vperm.xlu0 %6259, %v5070_v43  }
 0x3f2   : > { %5338 = vperm.xlu1 %6260, %v5071_v50  }
 0x469   : > { %v5324_v2 = vpop.permute.xlu1 %5323  ;;  %v5319_v30 = vpop.permute.xlu0 %5318 }
 0x46a   : > { %v5342_v63 = vmul.f32 %v5324_v2, %v5298_v49  ;;  %v5341_v9 = vmul.f32 %v5319_v30, %v5293_v61 }
 0x46c   : > { %v5348_v34 = vsel %vm5346_vm3, %v5342_v63, 0.0  ;;  %v5347_v48 = vsel %vm5346_vm3, %v5341_v9, 0.0 }
 0x46d   : > { %v5349_v19 = vadd.f32 %v5348_v34, %v5347_v48  ;;  %v5329_v40 = vpop.permute.xlu1 %5328  ;;  %v5334_v35 = vpop.permute.xlu0 %5333 }
 0x46e   : > { %v5343_v46 = vmul.f32 %v5329_v40, %v5303_v32  ;;  %v5344_v58 = vmul.f32 %v5334_v35, %v5308_v11 }
 0x470   : > { %v5350_v24 = vsel %vm5346_vm3, %v5343_v46, 0.0  ;;  %v5352_v27 = vsel %vm5346_vm3, %v5344_v58, 0.0 }
 0x471   : > { %v5351_v41 = vadd.f32 %v5350_v24, %v5349_v19  ;;  %v5339_v13 = vpop.permute.xlu1 %5338 }
 0x472   : > { %v5345_v23 = vmul.f32 %v5339_v13, %v5313_v4 }
 0x473   : > { %v5353_v62 = vadd.f32 %v5352_v27, %v5351_v41 }
 0x474   : > { %v5354_v51 = vsel %vm5346_vm3, %v5345_v23, 0.0 }
 0x475   : > { %v5355_v5 = vadd.f32 %v5354_v51, %v5353_v62 }
 0x477   : > { %v5356_v15 = vrot.slane %v5355_v5, 4 }
 0x479   : > { %v5357_v42 = vadd.f32 %v5356_v15, %v5355_v5 }
 0x47b   : > { %v5358_v56 = vrot.slane %v5357_v42, 2 }
 0x47d   : > { %v5359_v59 = vadd.f32 %v5358_v56, %v5357_v42 }
 0x47f   : > { %v5360_v37 = vrot.slane %v5359_v59, 1 }
 0x481   : > { %v5361_v61 = vadd.f32 %v5360_v37, %v5359_v59 }
 0x483   : > { %v5363_v0 = vadd.f32 %v5362_v53, %v5361_v61 }
 0x485   : > { %v5365_v18 = vmul.f32 %v5364_v47, %v5363_v0 }
 0x487   : > { %v5367_v44 = vadd.f32 %v5366_v55, %v5365_v18 }
 0x489   : > { %5369 = vst.msk [vmem:[%s376_s0] sm:$0x1] %vm5368_vm4, %v5367_v44 }
 0x48a   : > { %7041 = shalt.err (!%p7038_p5)
}
 0x48b   : > { %s7042_s12 = scalar_lea.hbm %s8969_s13, 16  ;;  %s7046_s0 = scalar_lea.hbm %s9026_s10, 32 }
 0x48c   : > { %p7043_p6 = scmp.ne.s32.totalorder %s8969_s13, %s7042_s12  ;;  %p7047_p10 = scmp.lt.u32.totalorder %s8969_s13, %s9026_s10 }
 0x48d   : > { %p7048_p11 = scmp.lt.u32.totalorder %s7046_s0, %s7042_s12  ;;  %p7050_p13 = scmp.lt.u32.totalorder %s7042_s12, %s8969_s13 }
 0x48e   : > { %p7044_p7 = pnand %p7043_p6, %p7208_p4 }
 0x48f   : > { %p7049_p12 = por %p7048_p11, %p7047_p10 }
 0x490   : > { %p7045_p9 = pneg %p7044_p7 }
 0x491   : > { %p7051_p0 = por %p7050_p13, %p7049_p12 }
 0x493   : > { %p7052_p1 = pnand %p7051_p0, %p7045_p9 }
 0x495   : > { %7055 = shalt.err (!%p7052_p1)
}
 0x496   : > { %6203 = dma.vmem_to_hbm [thread:$0]  (%p7208_p4), %s8971_s14, 16, %s8969_s13, %s5371_s5  }
 0x497 PF: > { %p6209_p2 = scmp.ge.s32.totalorder %s7106_s20, 2  ;;  %s5395_s21 = sand.u32 1, %s7086_s15  }
 0x498   : > { %s5396_s18 = scalar_lea.sflag [#allocation5], %s5395_s21 }
 0x499   : > { %p6206_p3 = pnand %p6209_p2, %p7215_p8 }
 0x49b   : > { %7081 = dma.done.wait (!%p6206_p3), %s5396_s18, 16  }
 0x49c   : > { %7083 = vsyncadd (!%p6206_p3), %s5396_s18, 4294967280  ;;  %s25_s20 = sadd.s32 1, %s7106_s20   ;;  %s9090_s15 = smov %s7090_s16 }
 0x49d   : > { %p22_p5 = scmp.ge.s32.totalorder %s25_s20, 4   ;;  %s9091_s16 = smov %s7094_s17 }
 0x49e   : > { %s9092_s17 = smov %s7221_s27  ;;  %s9093_s18 = smov %s7102_s19 }
 0x49f   : > { %s9094_s19 = smov %s9096_s22  ;;  %24 = sbr.rel (!%p22_p5) target bundleno = 7 (0x7), region = 107 }
 0x4a6   :  { %5400 = vsyncpa [#allocation5], 1 }
 0x4a7   :  { %5402 = vsyncpa [#allocation5 + $0x1], 1 }

</bundles_post_ra>
